<compile_context>
chip_gen: v5e
topology: v5e:2x2
jax: 0.10.0
libtpu: 0.0.40
codegen_flags: <defaults>
</compile_context>

<pallas_src>
import functools
import math

import jax
import jax.numpy as jnp
from jax.experimental import pallas as pl
from jax.experimental.pallas import tpu as pltpu


def _layer_norm(x, gamma, beta, eps=1e-5):
    mu = jnp.mean(x, axis=-1, keepdims=True)
    var = jnp.mean(jnp.square(x - mu), axis=-1, keepdims=True)
    return (x - mu) * jax.lax.rsqrt(var + eps) * gamma + beta


def text_encoder_kernel(xlen_ref, x0_ref,
                        wqkv_ref, bqkv_ref, wo_ref, bo_ref, relk_ref, relv_ref,
                        ln1g_ref, ln1b_ref, ln2g_ref, ln2b_ref,
                        w1_ref, b1_ref, w2_ref, b2_ref, wp_ref, bp_ref,
                        out_ref, *, n_layers, n_heads, window_size, kernel_size):
    f32, bf16 = jnp.float32, jnp.bfloat16
    T, H = x0_ref.shape
    dk = H // n_heads
    K = kernel_size
    w = window_size
    nrel = 2 * w + 1
    pad_l = (K - 1) // 2
    inv_sqrt_dk = f32(1.0 / math.sqrt(dk))

    # ---- per-grid-step constants, hoisted out of the layer/head loops --------
    seq_len = xlen_ref[pl.program_id(0)]
    row_pos = jax.lax.broadcasted_iota(jnp.int32, (T, 1), 0)
    col_pos = jax.lax.broadcasted_iota(jnp.int32, (1, T), 1)
    mcol = (row_pos < seq_len).astype(f32)                     # [T, 1]
    mrow = (col_pos < seq_len).astype(f32)                     # [1, T]
    attn_bias = (mcol * mrow - 1.0) * f32(1e4)                 # 0 valid / -1e4 pad
    rel = (jax.lax.broadcasted_iota(jnp.int32, (T, T), 1)
           - jax.lax.broadcasted_iota(jnp.int32, (T, T), 0))   # rel[i, j] = j - i
    sel = [(rel == (r - w)).astype(f32) for r in range(nrel)]  # |j-i|<=w diagonals

    x = x0_ref[...] * mcol                                     # [T, H] residual stream

    def conv1d_same(inp, w_ref, b_ref, layer):
        # "same" conv1d as im2col: K time-shifted taps concatenated lane-wise,
        # then ONE [T, K*Cin] @ [K*Cin, Cout] MXU matmul (no VMEM scratch round
        # trip, no per-tap accumulate adds, deep K*Cin contraction).
        cin = inp.shape[1]
        pieces = []
        if pad_l > 0:
            pieces.append(jnp.zeros((pad_l, cin), f32))
        pieces.append(inp)
        if K - 1 - pad_l > 0:
            pieces.append(jnp.zeros((K - 1 - pad_l, cin), f32))
        xp = jnp.concatenate(pieces, axis=0) if len(pieces) > 1 else inp
        if K > 1:
            cols = jnp.concatenate([xp[ki:ki + T, :] for ki in range(K)], axis=1)
        else:
            cols = xp
        return jnp.dot(cols.astype(bf16), w_ref[layer],
                       preferred_element_type=f32) + b_ref[layer]

    for l in range(n_layers):
        # ---- windowed relative-position multi-head self-attention ------------
        xb = x.astype(bf16)
        # fused QKV projection: one lane-dense [T,H] @ [H,3H] matmul.
        qkv = jnp.dot(xb, wqkv_ref[l], preferred_element_type=f32) + bqkv_ref[l]
        relk_l = relk_ref[l]        # [nrel, dk] bf16 (lane-dense: contract over dk)
        relv_l = relv_ref[l]        # [nrel, dk] bf16

        head_outs = []
        for h in range(n_heads):
            q = qkv[:, h * dk:(h + 1) * dk] * inv_sqrt_dk
            k = qkv[:, H + h * dk:H + (h + 1) * dk]
            v = qkv[:, 2 * H + h * dk:2 * H + (h + 1) * dk]
            qb, kb, vb = q.astype(bf16), k.astype(bf16), v.astype(bf16)

            scores = jax.lax.dot_general(qb, kb, (((1,), (1,)), ((), ())),
                                         preferred_element_type=f32)   # [T, T]
            scores = scores + attn_bias
            # relative-key bias: scores[i,j] += q_i . emb_rel_k[j-i+w], |j-i|<=w
            qr = jax.lax.dot_general(qb, relk_l, (((1,), (1,)), ((), ())),
                                     preferred_element_type=f32)        # [T, nrel]
            for r in range(nrel):
                scores = scores + qr[:, r:r + 1] * sel[r]

            scores = scores - jnp.max(scores, axis=-1, keepdims=True)
            p = jnp.exp(scores)
            p = p * (1.0 / jnp.sum(p, axis=-1, keepdims=True))   # exact softmax

            # relative-value term: band of p -> [T, nrel], then ONE matmul.
            pband = jnp.concatenate(
                [jnp.sum(p * sel[r], axis=-1, keepdims=True) for r in range(nrel)],
                axis=1)
            out_h = (jnp.dot(p.astype(bf16), vb, preferred_element_type=f32)
                     + jnp.dot(pband.astype(bf16), relv_l,
                               preferred_element_type=f32))
            head_outs.append(out_h)

        # concat heads -> ONE dense [T,H] @ [H,H] output projection.
        out_all = head_outs[0] if n_heads == 1 else jnp.concatenate(head_outs, axis=1)
        y = jnp.dot(out_all.astype(bf16), wo_ref[l],
                    preferred_element_type=f32) + bo_ref[l]
        x = _layer_norm(x + y, ln1g_ref[l], ln1b_ref[l])

        # ---- FFN: conv1d(K) -> relu -> conv1d(K), "same" padding -------------
        h1 = conv1d_same(x * mcol, w1_ref, b1_ref, l)
        h1 = jnp.maximum(h1, 0.0) * mcol
        h2 = conv1d_same(h1, w2_ref, b2_ref, l)
        x = _layer_norm(x + h2 * mcol, ln2g_ref[l], ln2b_ref[l])

    x = x * mcol                                   # final Encoder mask
    stats = (jnp.dot(x.astype(bf16), wp_ref[...], preferred_element_type=f32)
             + bp_ref[...]) * mcol
    # one lane-dense [T, H + 2*out_ch] output slab: [x | m | logs]
    out_ref[:, :H] = x
    out_ref[:, H:] = stats


def init_params(key, *, n_vocab, out_channels, hidden, filter_ch, n_layers,
                n_heads, kernel_size, window_size):
    H, F, L, K = hidden, filter_ch, n_layers, kernel_size
    dk = H // n_heads
    nrel = 2 * window_size + 1
    ks = jax.random.split(key, 20)
    nrm = lambda k, s, sc: jax.random.normal(k, s, jnp.float32) * sc
    return dict(
        emb=nrm(ks[0], (n_vocab, H), H ** -0.5),
        # fused QKV projection (PyTorch conv_q/k/v are full [H,H] 1x1 convs)
        wqkv=nrm(ks[1], (L, H, 3 * H), H ** -0.5),
        bqkv=nrm(ks[2], (L, 1, 3 * H), 0.1),
        wo=nrm(ks[3], (L, H, H), H ** -0.5),
        bo=nrm(ks[4], (L, 1, H), 0.1),
        # relative-position tables (shared across heads, VITS default), [nrel, dk]
        relk=nrm(ks[5], (L, nrel, dk), dk ** -0.5),
        relv=nrm(ks[6], (L, nrel, dk), dk ** -0.5),
        ln1g=1.0 + nrm(ks[7], (L, 1, H), 0.05),
        ln1b=nrm(ks[8], (L, 1, H), 0.05),
        ln2g=1.0 + nrm(ks[9], (L, 1, H), 0.05),
        ln2b=nrm(ks[10], (L, 1, H), 0.05),
        # FFN conv weights as [L, K, Cin, Cout] (per-tap, pre-transposed)
        w1=nrm(ks[11], (L, K, H, F), (H * K) ** -0.5),
        b1=nrm(ks[12], (L, 1, F), 0.1),
        w2=nrm(ks[13], (L, K, F, H), (F * K) ** -0.5),
        b2=nrm(ks[14], (L, 1, H), 0.1),
        wp=nrm(ks[15], (H, 2 * out_channels), H ** -0.5),
        bp=nrm(ks[16], (1, 2 * out_channels), 0.1),
    )


def text_encoder_forward(tokens, x_lengths, params, *, out_channels, n_heads,
                         n_layers, kernel_size, window_size=4):
    B, T = tokens.shape
    H = params['emb'].shape[1]
    F = params['b1'].shape[-1]
    K = kernel_size
    L = n_layers
    oc2 = 2 * out_channels
    bf16 = jnp.bfloat16

    # Embedding lookup + sqrt(H) scale stays in XLA (no in-kernel one-hot matmul).
    # NOTE: out-of-range ids clamp (jnp.take default) rather than error like
    # nn.Embedding; harmless for in-range tokens.
    x0 = jnp.take(params['emb'], tokens.astype(jnp.int32), axis=0)
    x0 = x0 * jnp.float32(math.sqrt(H))                                 # [B, T, H]

    weight_args = [
        params['wqkv'].astype(bf16), params['bqkv'],
        params['wo'].astype(bf16), params['bo'],
        params['relk'].astype(bf16), params['relv'].astype(bf16),
        params['ln1g'], params['ln1b'], params['ln2g'], params['ln2b'],
        params['w1'].reshape(L, K * H, F).astype(bf16), params['b1'],
        params['w2'].reshape(L, K * F, H).astype(bf16), params['b2'],
        params['wp'].astype(bf16), params['bp'],
    ]

    kernel = functools.partial(
        text_encoder_kernel, n_layers=n_layers, n_heads=n_heads,
        window_size=window_size, kernel_size=kernel_size)

    def per_batch_spec(shape):
        nz = len(shape)
        return pl.BlockSpec((None,) + tuple(shape),
                            lambda b, xl, _n=nz: (b,) + (0,) * _n)

    def shared_spec(a, single_buffer):
        nd = a.ndim
        idx = lambda b, xl, _n=nd: (0,) * _n
        if single_buffer:
            # grid-invariant weights: one resident VMEM buffer (v7x headroom)
            return pl.BlockSpec(tuple(a.shape), idx, pipeline_mode=pl.Buffered(1))
        return pl.BlockSpec(tuple(a.shape), idx)

    # VMEM limit: ~3/4 of physical VMEM, capped at 100 MiB.  -> ~48 MiB on v7x
    # (64 MiB parts), ~96-100 MiB on v5e/v6e (128 MiB parts).
    try:
        vmem_cap = int(getattr(pltpu.get_tpu_info(), 'vmem_capacity_bytes',
                               128 << 20))
    except Exception:
        vmem_cap = 128 << 20
    vmem_limit = int(max(32 << 20, min(vmem_cap * 3 // 4, 100 << 20)))

    out_shape = jax.ShapeDtypeStruct((B, T, H + oc2), jnp.float32)

    def run(single_buffer):
        grid_spec = pltpu.PrefetchScalarGridSpec(
            num_scalar_prefetch=1,
            grid=(B,),
            in_specs=[per_batch_spec((T, H))]
                     + [shared_spec(a, single_buffer) for a in weight_args],
            out_specs=per_batch_spec((T, H + oc2)),
        )
        return pl.pallas_call(
            kernel,
            out_shape=out_shape,
            grid_spec=grid_spec,
            compiler_params=pltpu.CompilerParams(
                dimension_semantics=("parallel",),   # batch items independent
                vmem_limit_bytes=vmem_limit),
        )(x_lengths.astype(jnp.int32), x0, *weight_args)

    try:
        out = run(True)
    except Exception:
        # pl.Buffered(1) unsupported on this version -> default double buffering
        out = run(False)

    x = out[..., :H]
    m = out[..., H:H + out_channels]
    logs = out[..., H + out_channels:]
    t_idx = jnp.arange(T, dtype=jnp.int32)
    x_mask = (t_idx[None, None, :] < x_lengths[:, None, None]).astype(jnp.float32)
    return x, m, logs, x_mask                        # x_mask: [B, 1, T]


def text_encoder_reference(tokens, x_lengths, params, *, out_channels, n_heads,
                           n_layers, kernel_size, window_size=4):
    """Pure-JAX reference (same bf16-rounded weights / dot inputs as the kernel)."""
    f32 = jnp.float32
    c = lambda a: a.astype(jnp.bfloat16).astype(f32)
    B, T = tokens.shape
    H = params['emb'].shape[1]
    dk = H // n_heads
    K = kernel_size
    w = window_size
    nrel = 2 * w + 1
    pad_l = (K - 1) // 2
    inv_sqrt_dk = 1.0 / math.sqrt(dk)

    t_idx = jnp.arange(T)
    mask = (t_idx[None, :] < x_lengths[:, None]).astype(f32)
    mcol = mask[:, :, None]
    mrow = mask[:, None, :]
    attn_bias = (mcol * mrow - 1.0) * 1e4                  # [B, T, T]
    rel = t_idx[None, :] - t_idx[:, None]                  # [T, T]
    sel = [(rel == (r - w)).astype(f32) for r in range(nrel)]

    x = jnp.take(params['emb'], tokens.astype(jnp.int32), axis=0)
    x = x * math.sqrt(H) * mcol

    for l in range(n_layers):
        qkv = jnp.einsum('bti,io->bto', c(x), c(params['wqkv'][l])) + params['bqkv'][l]
        head_outs = []
        for h in range(n_heads):
            q = qkv[..., h * dk:(h + 1) * dk] * inv_sqrt_dk
            k = qkv[..., H + h * dk:H + (h + 1) * dk]
            v = qkv[..., 2 * H + h * dk:2 * H + (h + 1) * dk]
            qb, kb, vb = c(q), c(k), c(v)
            scores = jnp.einsum('btd,bsd->bts', qb, kb) + attn_bias
            qr = jnp.einsum('btd,rd->btr', qb, c(params['relk'][l]))
            for r in range(nrel):
                scores = scores + qr[..., r:r + 1] * sel[r][None]
            scores = scores - jnp.max(scores, axis=-1, keepdims=True)
            p = jnp.exp(scores)
            p = p * (1.0 / jnp.sum(p, axis=-1, keepdims=True))
            pband = jnp.stack(
                [jnp.sum(p * sel[r][None], axis=-1) for r in range(nrel)], axis=-1)
            out_h = (jnp.einsum('bts,bsd->btd', c(p), vb)
                     + jnp.einsum('btr,rd->btd', c(pband), c(params['relv'][l])))
            head_outs.append(out_h)
        out_all = jnp.concatenate(head_outs, axis=-1)
        y = jnp.einsum('bti,io->bto', c(out_all), c(params['wo'][l])) + params['bo'][l]
        x = _layer_norm(x + y, params['ln1g'][l], params['ln1b'][l])

        def conv(inp, W, b):
            xp = jnp.pad(c(inp), ((0, 0), (pad_l, K - 1 - pad_l), (0, 0)))
            acc = 0.0
            for ki in range(K):
                acc = acc + jnp.einsum('bti,io->bto', xp[:, ki:ki + T, :], c(W[ki]))
            return acc + b

        h1 = jnp.maximum(conv(x * mcol, params['w1'][l], params['b1'][l]), 0.0) * mcol
        h2 = conv(h1, params['w2'][l], params['b2'][l])
        x = _layer_norm(x + h2 * mcol, params['ln2g'][l], params['ln2b'][l])

    x = x * mcol
    stats = (jnp.einsum('bti,io->bto', c(x), c(params['wp'])) + params['bp']) * mcol
    return x, stats[..., :out_channels], stats[..., out_channels:], mrow


if __name__ == "__main__":
    # Small config consistent with the module's constructor.
    n_vocab, out_channels, hidden, filter_ch = 40, 8, 32, 64
    n_heads, n_layers, kernel_size, window_size = 2, 2, 3, 4
    B, T = 2, 16

    key = jax.random.PRNGKey(0)
    kp, kt = jax.random.split(key)
    params = init_params(kp, n_vocab=n_vocab, out_channels=out_channels,
                         hidden=hidden, filter_ch=filter_ch, n_layers=n_layers,
                         n_heads=n_heads, kernel_size=kernel_size,
                         window_size=window_size)
    tokens = jax.random.randint(kt, (B, T), 0, n_vocab, dtype=jnp.int32)
    x_lengths = jnp.array([T, 11], dtype=jnp.int32)

    x, m, logs, x_mask = text_encoder_forward(
        tokens, x_lengths, params, out_channels=out_channels, n_heads=n_heads,
        n_layers=n_layers, kernel_size=kernel_size, window_size=window_size)
    jax.block_until_ready((x, m, logs, x_mask))

    assert x.shape == (B, T, hidden)
    assert m.shape == (B, T, out_channels)
    assert logs.shape == (B, T, out_channels)
    assert x_mask.shape == (B, 1, T)
    assert bool(jnp.all(jnp.isfinite(x)))
    assert bool(jnp.all(jnp.isfinite(m))) and bool(jnp.all(jnp.isfinite(logs)))

    # Correctness check against a pure-JAX reference of the same module math.
    xr, mr, lr, _ = text_encoder_reference(
        tokens, x_lengths, params, out_channels=out_channels, n_heads=n_heads,
        n_layers=n_layers, kernel_size=kernel_size, window_size=window_size)
    for got, ref in ((x, xr), (m, mr), (logs, lr)):
        err = float(jnp.max(jnp.abs(got - ref)))
        assert err < 5e-2, f"max abs err {err}"

    print("KERNEL_OK")
</pallas_src>

<mosaic_0001>
module attributes {stable_mosaic.version = 11 : i64} {
  func.func @text_encoder_kernel(%arg0: i32, %arg1: memref<2xi32, #tpu.memory_space<smem>>, %arg2: memref<1x16x32xf32, #tpu.memory_space<vmem>>, %arg3: memref<2x32x96xbf16, #tpu.memory_space<vmem>>, %arg4: memref<2x1x96xf32, #tpu.memory_space<vmem>>, %arg5: memref<2x32x32xbf16, #tpu.memory_space<vmem>>, %arg6: memref<2x1x32xf32, #tpu.memory_space<vmem>>, %arg7: memref<2x9x16xbf16, #tpu.memory_space<vmem>>, %arg8: memref<2x9x16xbf16, #tpu.memory_space<vmem>>, %arg9: memref<2x1x32xf32, #tpu.memory_space<vmem>>, %arg10: memref<2x1x32xf32, #tpu.memory_space<vmem>>, %arg11: memref<2x1x32xf32, #tpu.memory_space<vmem>>, %arg12: memref<2x1x32xf32, #tpu.memory_space<vmem>>, %arg13: memref<2x96x64xbf16, #tpu.memory_space<vmem>>, %arg14: memref<2x1x64xf32, #tpu.memory_space<vmem>>, %arg15: memref<2x192x32xbf16, #tpu.memory_space<vmem>>, %arg16: memref<2x1x32xf32, #tpu.memory_space<vmem>>, %arg17: memref<32x16xbf16, #tpu.memory_space<vmem>>, %arg18: memref<1x16xf32, #tpu.memory_space<vmem>>, %arg19: memref<1x16x48xf32, #tpu.memory_space<vmem>>) attributes {dimension_semantics = [#tpu.dimension_semantics<parallel>], iteration_bounds = array<i64: 2>, scalar_prefetch = 1 : i64, scratch_operands = 0 : i64, tpu.core_type = #tpu.core_type<tc>, window_params = [{transform_indices = @transform_0, window_bounds = array<i64: 1, 16, 32>}, {pipeline_mode = #tpu.pipeline_mode<synchronous>, transform_indices = @transform_1, window_bounds = array<i64: 2, 32, 96>}, {pipeline_mode = #tpu.pipeline_mode<synchronous>, transform_indices = @transform_2, window_bounds = array<i64: 2, 1, 96>}, {pipeline_mode = #tpu.pipeline_mode<synchronous>, transform_indices = @transform_3, window_bounds = array<i64: 2, 32, 32>}, {pipeline_mode = #tpu.pipeline_mode<synchronous>, transform_indices = @transform_4, window_bounds = array<i64: 2, 1, 32>}, {pipeline_mode = #tpu.pipeline_mode<synchronous>, transform_indices = @transform_5, window_bounds = array<i64: 2, 9, 16>}, {pipeline_mode = #tpu.pipeline_mode<synchronous>, transform_indices = @transform_6, window_bounds = array<i64: 2, 9, 16>}, {pipeline_mode = #tpu.pipeline_mode<synchronous>, transform_indices = @transform_7, window_bounds = array<i64: 2, 1, 32>}, {pipeline_mode = #tpu.pipeline_mode<synchronous>, transform_indices = @transform_8, window_bounds = array<i64: 2, 1, 32>}, {pipeline_mode = #tpu.pipeline_mode<synchronous>, transform_indices = @transform_9, window_bounds = array<i64: 2, 1, 32>}, {pipeline_mode = #tpu.pipeline_mode<synchronous>, transform_indices = @transform_10, window_bounds = array<i64: 2, 1, 32>}, {pipeline_mode = #tpu.pipeline_mode<synchronous>, transform_indices = @transform_11, window_bounds = array<i64: 2, 96, 64>}, {pipeline_mode = #tpu.pipeline_mode<synchronous>, transform_indices = @transform_12, window_bounds = array<i64: 2, 1, 64>}, {pipeline_mode = #tpu.pipeline_mode<synchronous>, transform_indices = @transform_13, window_bounds = array<i64: 2, 192, 32>}, {pipeline_mode = #tpu.pipeline_mode<synchronous>, transform_indices = @transform_14, window_bounds = array<i64: 2, 1, 32>}, {pipeline_mode = #tpu.pipeline_mode<synchronous>, transform_indices = @transform_15, window_bounds = array<i64: 32, 16>}, {pipeline_mode = #tpu.pipeline_mode<synchronous>, transform_indices = @transform_16, window_bounds = array<i64: 1, 16>}, {transform_indices = @transform_17, window_bounds = array<i64: 1, 16, 48>}]} {
    %0 = arith.index_cast %arg0 : i32 to index
    %1 = memref.load %arg1[%0] : memref<2xi32, #tpu.memory_space<smem>>
    %2 = tpu.iota {dimensions = array<i32: 0>} : vector<16x1xi32>
    %3 = tpu.iota {dimensions = array<i32: 1>} : vector<1x16xi32>
    %4 = vector.broadcast %1 : i32 to vector<16x1xi32>
    %5 = arith.cmpi slt, %2, %4 : vector<16x1xi32>
    %6 = arith.extui %5 : vector<16x1xi1> to vector<16x1xi32>
    %7 = arith.sitofp %6 : vector<16x1xi32> to vector<16x1xf32>
    %8 = vector.broadcast %1 : i32 to vector<1x16xi32>
    %9 = arith.cmpi slt, %3, %8 : vector<1x16xi32>
    %10 = arith.extui %9 : vector<1x16xi1> to vector<1x16xi32>
    %11 = arith.sitofp %10 : vector<1x16xi32> to vector<1x16xf32>
    %12 = vector.broadcast %7 : vector<16x1xf32> to vector<16x16xf32>
    %13 = vector.broadcast %11 : vector<1x16xf32> to vector<16x16xf32>
    %14 = arith.mulf %12, %13 : vector<16x16xf32>
    %cst = arith.constant 1.000000e+00 : f32
    %15 = vector.broadcast %cst : f32 to vector<16x16xf32>
    %16 = arith.subf %14, %15 : vector<16x16xf32>
    %cst_0 = arith.constant 1.000000e+04 : f32
    %17 = vector.broadcast %cst_0 : f32 to vector<16x16xf32>
    %18 = arith.mulf %16, %17 : vector<16x16xf32>
    %19 = tpu.iota {dimensions = array<i32: 1>} : vector<16x16xi32>
    %20 = tpu.iota {dimensions = array<i32: 0>} : vector<16x16xi32>
    %21 = arith.subi %19, %20 : vector<16x16xi32>
    %c-4_i32 = arith.constant -4 : i32
    %22 = vector.broadcast %c-4_i32 : i32 to vector<16x16xi32>
    %23 = arith.cmpi eq, %21, %22 : vector<16x16xi32>
    %24 = arith.extui %23 : vector<16x16xi1> to vector<16x16xi32>
    %25 = arith.sitofp %24 : vector<16x16xi32> to vector<16x16xf32>
    %c-3_i32 = arith.constant -3 : i32
    %26 = vector.broadcast %c-3_i32 : i32 to vector<16x16xi32>
    %27 = arith.cmpi eq, %21, %26 : vector<16x16xi32>
    %28 = arith.extui %27 : vector<16x16xi1> to vector<16x16xi32>
    %29 = arith.sitofp %28 : vector<16x16xi32> to vector<16x16xf32>
    %c-2_i32 = arith.constant -2 : i32
    %30 = vector.broadcast %c-2_i32 : i32 to vector<16x16xi32>
    %31 = arith.cmpi eq, %21, %30 : vector<16x16xi32>
    %32 = arith.extui %31 : vector<16x16xi1> to vector<16x16xi32>
    %33 = arith.sitofp %32 : vector<16x16xi32> to vector<16x16xf32>
    %c-1_i32 = arith.constant -1 : i32
    %34 = vector.broadcast %c-1_i32 : i32 to vector<16x16xi32>
    %35 = arith.cmpi eq, %21, %34 : vector<16x16xi32>
    %36 = arith.extui %35 : vector<16x16xi1> to vector<16x16xi32>
    %37 = arith.sitofp %36 : vector<16x16xi32> to vector<16x16xf32>
    %c0_i32 = arith.constant 0 : i32
    %38 = vector.broadcast %c0_i32 : i32 to vector<16x16xi32>
    %39 = arith.cmpi eq, %21, %38 : vector<16x16xi32>
    %40 = arith.extui %39 : vector<16x16xi1> to vector<16x16xi32>
    %41 = arith.sitofp %40 : vector<16x16xi32> to vector<16x16xf32>
    %c1_i32 = arith.constant 1 : i32
    %42 = vector.broadcast %c1_i32 : i32 to vector<16x16xi32>
    %43 = arith.cmpi eq, %21, %42 : vector<16x16xi32>
    %44 = arith.extui %43 : vector<16x16xi1> to vector<16x16xi32>
    %45 = arith.sitofp %44 : vector<16x16xi32> to vector<16x16xf32>
    %c2_i32 = arith.constant 2 : i32
    %46 = vector.broadcast %c2_i32 : i32 to vector<16x16xi32>
    %47 = arith.cmpi eq, %21, %46 : vector<16x16xi32>
    %48 = arith.extui %47 : vector<16x16xi1> to vector<16x16xi32>
    %49 = arith.sitofp %48 : vector<16x16xi32> to vector<16x16xf32>
    %c3_i32 = arith.constant 3 : i32
    %50 = vector.broadcast %c3_i32 : i32 to vector<16x16xi32>
    %51 = arith.cmpi eq, %21, %50 : vector<16x16xi32>
    %52 = arith.extui %51 : vector<16x16xi1> to vector<16x16xi32>
    %53 = arith.sitofp %52 : vector<16x16xi32> to vector<16x16xf32>
    %c4_i32 = arith.constant 4 : i32
    %54 = vector.broadcast %c4_i32 : i32 to vector<16x16xi32>
    %55 = arith.cmpi eq, %21, %54 : vector<16x16xi32>
    %56 = arith.extui %55 : vector<16x16xi1> to vector<16x16xi32>
    %57 = arith.sitofp %56 : vector<16x16xi32> to vector<16x16xf32>
    %c0 = arith.constant 0 : index
    %c0_1 = arith.constant 0 : index
    %c0_2 = arith.constant 0 : index
    %58 = vector.load %arg2[%c0, %c0_1, %c0_2] : memref<1x16x32xf32, #tpu.memory_space<vmem>>, vector<1x16x32xf32>
    %59 = vector.shape_cast %58 : vector<1x16x32xf32> to vector<16x32xf32>
    %60 = vector.broadcast %7 : vector<16x1xf32> to vector<16x32xf32>
    %61 = arith.mulf %59, %60 : vector<16x32xf32>
    %62 = arith.truncf %61 : vector<16x32xf32> to vector<16x32xbf16>
    %c0_3 = arith.constant 0 : index
    %c0_4 = arith.constant 0 : index
    %c0_5 = arith.constant 0 : index
    %63 = vector.load %arg3[%c0_3, %c0_4, %c0_5] : memref<2x32x96xbf16, #tpu.memory_space<vmem>>, vector<1x32x96xbf16>
    %64 = vector.shape_cast %63 : vector<1x32x96xbf16> to vector<32x96xbf16>
    %cst_6 = arith.constant dense<0.000000e+00> : vector<16x96xf32>
    %65 = tpu.matmul %62, %64, %cst_6 {dimension_numbers = #tpu.dot_dimension_numbers<[1], [0], [0], [1], [0, 0, 1, 1], [], []>} : vector<16x32xbf16>, vector<32x96xbf16>, vector<16x96xf32> -> vector<16x96xf32>
    %c0_7 = arith.constant 0 : index
    %c0_8 = arith.constant 0 : index
    %c0_9 = arith.constant 0 : index
    %66 = vector.load %arg4[%c0_7, %c0_8, %c0_9] : memref<2x1x96xf32, #tpu.memory_space<vmem>>, vector<1x1x96xf32>
    %67 = vector.shape_cast %66 : vector<1x1x96xf32> to vector<1x96xf32>
    %68 = vector.broadcast %67 : vector<1x96xf32> to vector<16x96xf32>
    %69 = arith.addf %65, %68 : vector<16x96xf32>
    %c0_10 = arith.constant 0 : index
    %c0_11 = arith.constant 0 : index
    %c0_12 = arith.constant 0 : index
    %70 = vector.load %arg7[%c0_10, %c0_11, %c0_12] : memref<2x9x16xbf16, #tpu.memory_space<vmem>>, vector<1x9x16xbf16>
    %71 = vector.shape_cast %70 : vector<1x9x16xbf16> to vector<9x16xbf16>
    %c0_13 = arith.constant 0 : index
    %c0_14 = arith.constant 0 : index
    %c0_15 = arith.constant 0 : index
    %72 = vector.load %arg8[%c0_13, %c0_14, %c0_15] : memref<2x9x16xbf16, #tpu.memory_space<vmem>>, vector<1x9x16xbf16>
    %73 = vector.shape_cast %72 : vector<1x9x16xbf16> to vector<9x16xbf16>
    %74 = vector.extract_strided_slice %69 {offsets = [0, 0], sizes = [16, 16], strides = [1, 1]} : vector<16x96xf32> to vector<16x16xf32>
    %cst_16 = arith.constant 2.500000e-01 : f32
    %75 = vector.broadcast %cst_16 : f32 to vector<16x16xf32>
    %76 = arith.mulf %74, %75 : vector<16x16xf32>
    %77 = vector.extract_strided_slice %69 {offsets = [0, 32], sizes = [16, 16], strides = [1, 1]} : vector<16x96xf32> to vector<16x16xf32>
    %78 = vector.extract_strided_slice %69 {offsets = [0, 64], sizes = [16, 16], strides = [1, 1]} : vector<16x96xf32> to vector<16x16xf32>
    %79 = arith.truncf %76 : vector<16x16xf32> to vector<16x16xbf16>
    %80 = arith.truncf %77 : vector<16x16xf32> to vector<16x16xbf16>
    %81 = arith.truncf %78 : vector<16x16xf32> to vector<16x16xbf16>
    %cst_17 = arith.constant dense<0.000000e+00> : vector<16x16xf32>
    %82 = tpu.matmul %79, %80, %cst_17 {dimension_numbers = #tpu.dot_dimension_numbers<[1], [1], [0], [0], [0, 0, 1, 0], [], []>} : vector<16x16xbf16>, vector<16x16xbf16>, vector<16x16xf32> -> vector<16x16xf32>
    %83 = arith.addf %82, %18 : vector<16x16xf32>
    %cst_18 = arith.constant dense<0.000000e+00> : vector<16x9xf32>
    %84 = tpu.matmul %79, %71, %cst_18 {dimension_numbers = #tpu.dot_dimension_numbers<[1], [1], [0], [0], [0, 0, 1, 0], [], []>} : vector<16x16xbf16>, vector<9x16xbf16>, vector<16x9xf32> -> vector<16x9xf32>
    %85 = vector.extract_strided_slice %84 {offsets = [0, 0], sizes = [16, 1], strides = [1, 1]} : vector<16x9xf32> to vector<16x1xf32>
    %86 = vector.broadcast %85 : vector<16x1xf32> to vector<16x16xf32>
    %87 = arith.mulf %86, %25 : vector<16x16xf32>
    %88 = arith.addf %83, %87 : vector<16x16xf32>
    %89 = vector.extract_strided_slice %84 {offsets = [0, 1], sizes = [16, 1], strides = [1, 1]} : vector<16x9xf32> to vector<16x1xf32>
    %90 = vector.broadcast %89 : vector<16x1xf32> to vector<16x16xf32>
    %91 = arith.mulf %90, %29 : vector<16x16xf32>
    %92 = arith.addf %88, %91 : vector<16x16xf32>
    %93 = vector.extract_strided_slice %84 {offsets = [0, 2], sizes = [16, 1], strides = [1, 1]} : vector<16x9xf32> to vector<16x1xf32>
    %94 = vector.broadcast %93 : vector<16x1xf32> to vector<16x16xf32>
    %95 = arith.mulf %94, %33 : vector<16x16xf32>
    %96 = arith.addf %92, %95 : vector<16x16xf32>
    %97 = vector.extract_strided_slice %84 {offsets = [0, 3], sizes = [16, 1], strides = [1, 1]} : vector<16x9xf32> to vector<16x1xf32>
    %98 = vector.broadcast %97 : vector<16x1xf32> to vector<16x16xf32>
    %99 = arith.mulf %98, %37 : vector<16x16xf32>
    %100 = arith.addf %96, %99 : vector<16x16xf32>
    %101 = vector.extract_strided_slice %84 {offsets = [0, 4], sizes = [16, 1], strides = [1, 1]} : vector<16x9xf32> to vector<16x1xf32>
    %102 = vector.broadcast %101 : vector<16x1xf32> to vector<16x16xf32>
    %103 = arith.mulf %102, %41 : vector<16x16xf32>
    %104 = arith.addf %100, %103 : vector<16x16xf32>
    %105 = vector.extract_strided_slice %84 {offsets = [0, 5], sizes = [16, 1], strides = [1, 1]} : vector<16x9xf32> to vector<16x1xf32>
    %106 = vector.broadcast %105 : vector<16x1xf32> to vector<16x16xf32>
    %107 = arith.mulf %106, %45 : vector<16x16xf32>
    %108 = arith.addf %104, %107 : vector<16x16xf32>
    %109 = vector.extract_strided_slice %84 {offsets = [0, 6], sizes = [16, 1], strides = [1, 1]} : vector<16x9xf32> to vector<16x1xf32>
    %110 = vector.broadcast %109 : vector<16x1xf32> to vector<16x16xf32>
    %111 = arith.mulf %110, %49 : vector<16x16xf32>
    %112 = arith.addf %108, %111 : vector<16x16xf32>
    %113 = vector.extract_strided_slice %84 {offsets = [0, 7], sizes = [16, 1], strides = [1, 1]} : vector<16x9xf32> to vector<16x1xf32>
    %114 = vector.broadcast %113 : vector<16x1xf32> to vector<16x16xf32>
    %115 = arith.mulf %114, %53 : vector<16x16xf32>
    %116 = arith.addf %112, %115 : vector<16x16xf32>
    %117 = vector.extract_strided_slice %84 {offsets = [0, 8], sizes = [16, 1], strides = [1, 1]} : vector<16x9xf32> to vector<16x1xf32>
    %118 = vector.broadcast %117 : vector<16x1xf32> to vector<16x16xf32>
    %119 = arith.mulf %118, %57 : vector<16x16xf32>
    %120 = arith.addf %116, %119 : vector<16x16xf32>
    %cst_19 = arith.constant dense<0xFF800000> : vector<16xf32>
    %121 = vector.multi_reduction <maximumf>, %120, %cst_19 [1] : vector<16x16xf32> to vector<16xf32>
    %122 = vector.shape_cast %121 : vector<16xf32> to vector<16x1xf32>
    %123 = vector.broadcast %122 : vector<16x1xf32> to vector<16x16xf32>
    %124 = arith.subf %120, %123 : vector<16x16xf32>
    %125 = math.exp %124 : vector<16x16xf32>
    %cst_20 = arith.constant dense<0.000000e+00> : vector<16xf32>
    %126 = vector.multi_reduction <add>, %125, %cst_20 [1] : vector<16x16xf32> to vector<16xf32>
    %127 = vector.shape_cast %126 : vector<16xf32> to vector<16x1xf32>
    %cst_21 = arith.constant 1.000000e+00 : f32
    %128 = vector.broadcast %cst_21 : f32 to vector<16x1xf32>
    %129 = arith.divf %128, %127 : vector<16x1xf32>
    %130 = vector.broadcast %129 : vector<16x1xf32> to vector<16x16xf32>
    %131 = arith.mulf %125, %130 : vector<16x16xf32>
    %132 = arith.mulf %131, %25 : vector<16x16xf32>
    %cst_22 = arith.constant dense<0.000000e+00> : vector<16xf32>
    %133 = vector.multi_reduction <add>, %132, %cst_22 [1] : vector<16x16xf32> to vector<16xf32>
    %134 = vector.shape_cast %133 : vector<16xf32> to vector<16x1xf32>
    %135 = arith.mulf %131, %29 : vector<16x16xf32>
    %cst_23 = arith.constant dense<0.000000e+00> : vector<16xf32>
    %136 = vector.multi_reduction <add>, %135, %cst_23 [1] : vector<16x16xf32> to vector<16xf32>
    %137 = vector.shape_cast %136 : vector<16xf32> to vector<16x1xf32>
    %138 = arith.mulf %131, %33 : vector<16x16xf32>
    %cst_24 = arith.constant dense<0.000000e+00> : vector<16xf32>
    %139 = vector.multi_reduction <add>, %138, %cst_24 [1] : vector<16x16xf32> to vector<16xf32>
    %140 = vector.shape_cast %139 : vector<16xf32> to vector<16x1xf32>
    %141 = arith.mulf %131, %37 : vector<16x16xf32>
    %cst_25 = arith.constant dense<0.000000e+00> : vector<16xf32>
    %142 = vector.multi_reduction <add>, %141, %cst_25 [1] : vector<16x16xf32> to vector<16xf32>
    %143 = vector.shape_cast %142 : vector<16xf32> to vector<16x1xf32>
    %144 = arith.mulf %131, %41 : vector<16x16xf32>
    %cst_26 = arith.constant dense<0.000000e+00> : vector<16xf32>
    %145 = vector.multi_reduction <add>, %144, %cst_26 [1] : vector<16x16xf32> to vector<16xf32>
    %146 = vector.shape_cast %145 : vector<16xf32> to vector<16x1xf32>
    %147 = arith.mulf %131, %45 : vector<16x16xf32>
    %cst_27 = arith.constant dense<0.000000e+00> : vector<16xf32>
    %148 = vector.multi_reduction <add>, %147, %cst_27 [1] : vector<16x16xf32> to vector<16xf32>
    %149 = vector.shape_cast %148 : vector<16xf32> to vector<16x1xf32>
    %150 = arith.mulf %131, %49 : vector<16x16xf32>
    %cst_28 = arith.constant dense<0.000000e+00> : vector<16xf32>
    %151 = vector.multi_reduction <add>, %150, %cst_28 [1] : vector<16x16xf32> to vector<16xf32>
    %152 = vector.shape_cast %151 : vector<16xf32> to vector<16x1xf32>
    %153 = arith.mulf %131, %53 : vector<16x16xf32>
    %cst_29 = arith.constant dense<0.000000e+00> : vector<16xf32>
    %154 = vector.multi_reduction <add>, %153, %cst_29 [1] : vector<16x16xf32> to vector<16xf32>
    %155 = vector.shape_cast %154 : vector<16xf32> to vector<16x1xf32>
    %156 = arith.mulf %131, %57 : vector<16x16xf32>
    %cst_30 = arith.constant dense<0.000000e+00> : vector<16xf32>
    %157 = vector.multi_reduction <add>, %156, %cst_30 [1] : vector<16x16xf32> to vector<16xf32>
    %158 = vector.shape_cast %157 : vector<16xf32> to vector<16x1xf32>
    %159 = tpu.concatenate %134, %137, %140, %143, %146, %149, %152, %155, %158 in 1 : vector<16x1xf32>, vector<16x1xf32>, vector<16x1xf32>, vector<16x1xf32>, vector<16x1xf32>, vector<16x1xf32>, vector<16x1xf32>, vector<16x1xf32>, vector<16x1xf32> -> vector<16x9xf32>
    %160 = arith.truncf %131 : vector<16x16xf32> to vector<16x16xbf16>
    %cst_31 = arith.constant dense<0.000000e+00> : vector<16x16xf32>
    %161 = tpu.matmul %160, %81, %cst_31 {dimension_numbers = #tpu.dot_dimension_numbers<[1], [0], [0], [1], [0, 0, 1, 1], [], []>} : vector<16x16xbf16>, vector<16x16xbf16>, vector<16x16xf32> -> vector<16x16xf32>
    %162 = arith.truncf %159 : vector<16x9xf32> to vector<16x9xbf16>
    %cst_32 = arith.constant dense<0.000000e+00> : vector<16x16xf32>
    %163 = tpu.matmul %162, %73, %cst_32 {dimension_numbers = #tpu.dot_dimension_numbers<[1], [0], [0], [1], [0, 0, 1, 1], [], []>} : vector<16x9xbf16>, vector<9x16xbf16>, vector<16x16xf32> -> vector<16x16xf32>
    %164 = arith.addf %161, %163 : vector<16x16xf32>
    %165 = vector.extract_strided_slice %69 {offsets = [0, 16], sizes = [16, 16], strides = [1, 1]} : vector<16x96xf32> to vector<16x16xf32>
    %cst_33 = arith.constant 2.500000e-01 : f32
    %166 = vector.broadcast %cst_33 : f32 to vector<16x16xf32>
    %167 = arith.mulf %165, %166 : vector<16x16xf32>
    %168 = vector.extract_strided_slice %69 {offsets = [0, 48], sizes = [16, 16], strides = [1, 1]} : vector<16x96xf32> to vector<16x16xf32>
    %169 = vector.extract_strided_slice %69 {offsets = [0, 80], sizes = [16, 16], strides = [1, 1]} : vector<16x96xf32> to vector<16x16xf32>
    %170 = arith.truncf %167 : vector<16x16xf32> to vector<16x16xbf16>
    %171 = arith.truncf %168 : vector<16x16xf32> to vector<16x16xbf16>
    %172 = arith.truncf %169 : vector<16x16xf32> to vector<16x16xbf16>
    %cst_34 = arith.constant dense<0.000000e+00> : vector<16x16xf32>
    %173 = tpu.matmul %170, %171, %cst_34 {dimension_numbers = #tpu.dot_dimension_numbers<[1], [1], [0], [0], [0, 0, 1, 0], [], []>} : vector<16x16xbf16>, vector<16x16xbf16>, vector<16x16xf32> -> vector<16x16xf32>
    %174 = arith.addf %173, %18 : vector<16x16xf32>
    %cst_35 = arith.constant dense<0.000000e+00> : vector<16x9xf32>
    %175 = tpu.matmul %170, %71, %cst_35 {dimension_numbers = #tpu.dot_dimension_numbers<[1], [1], [0], [0], [0, 0, 1, 0], [], []>} : vector<16x16xbf16>, vector<9x16xbf16>, vector<16x9xf32> -> vector<16x9xf32>
    %176 = vector.extract_strided_slice %175 {offsets = [0, 0], sizes = [16, 1], strides = [1, 1]} : vector<16x9xf32> to vector<16x1xf32>
    %177 = vector.broadcast %176 : vector<16x1xf32> to vector<16x16xf32>
    %178 = arith.mulf %177, %25 : vector<16x16xf32>
    %179 = arith.addf %174, %178 : vector<16x16xf32>
    %180 = vector.extract_strided_slice %175 {offsets = [0, 1], sizes = [16, 1], strides = [1, 1]} : vector<16x9xf32> to vector<16x1xf32>
    %181 = vector.broadcast %180 : vector<16x1xf32> to vector<16x16xf32>
    %182 = arith.mulf %181, %29 : vector<16x16xf32>
    %183 = arith.addf %179, %182 : vector<16x16xf32>
    %184 = vector.extract_strided_slice %175 {offsets = [0, 2], sizes = [16, 1], strides = [1, 1]} : vector<16x9xf32> to vector<16x1xf32>
    %185 = vector.broadcast %184 : vector<16x1xf32> to vector<16x16xf32>
    %186 = arith.mulf %185, %33 : vector<16x16xf32>
    %187 = arith.addf %183, %186 : vector<16x16xf32>
    %188 = vector.extract_strided_slice %175 {offsets = [0, 3], sizes = [16, 1], strides = [1, 1]} : vector<16x9xf32> to vector<16x1xf32>
    %189 = vector.broadcast %188 : vector<16x1xf32> to vector<16x16xf32>
    %190 = arith.mulf %189, %37 : vector<16x16xf32>
    %191 = arith.addf %187, %190 : vector<16x16xf32>
    %192 = vector.extract_strided_slice %175 {offsets = [0, 4], sizes = [16, 1], strides = [1, 1]} : vector<16x9xf32> to vector<16x1xf32>
    %193 = vector.broadcast %192 : vector<16x1xf32> to vector<16x16xf32>
    %194 = arith.mulf %193, %41 : vector<16x16xf32>
    %195 = arith.addf %191, %194 : vector<16x16xf32>
    %196 = vector.extract_strided_slice %175 {offsets = [0, 5], sizes = [16, 1], strides = [1, 1]} : vector<16x9xf32> to vector<16x1xf32>
    %197 = vector.broadcast %196 : vector<16x1xf32> to vector<16x16xf32>
    %198 = arith.mulf %197, %45 : vector<16x16xf32>
    %199 = arith.addf %195, %198 : vector<16x16xf32>
    %200 = vector.extract_strided_slice %175 {offsets = [0, 6], sizes = [16, 1], strides = [1, 1]} : vector<16x9xf32> to vector<16x1xf32>
    %201 = vector.broadcast %200 : vector<16x1xf32> to vector<16x16xf32>
    %202 = arith.mulf %201, %49 : vector<16x16xf32>
    %203 = arith.addf %199, %202 : vector<16x16xf32>
    %204 = vector.extract_strided_slice %175 {offsets = [0, 7], sizes = [16, 1], strides = [1, 1]} : vector<16x9xf32> to vector<16x1xf32>
    %205 = vector.broadcast %204 : vector<16x1xf32> to vector<16x16xf32>
    %206 = arith.mulf %205, %53 : vector<16x16xf32>
    %207 = arith.addf %203, %206 : vector<16x16xf32>
    %208 = vector.extract_strided_slice %175 {offsets = [0, 8], sizes = [16, 1], strides = [1, 1]} : vector<16x9xf32> to vector<16x1xf32>
    %209 = vector.broadcast %208 : vector<16x1xf32> to vector<16x16xf32>
    %210 = arith.mulf %209, %57 : vector<16x16xf32>
    %211 = arith.addf %207, %210 : vector<16x16xf32>
    %cst_36 = arith.constant dense<0xFF800000> : vector<16xf32>
    %212 = vector.multi_reduction <maximumf>, %211, %cst_36 [1] : vector<16x16xf32> to vector<16xf32>
    %213 = vector.shape_cast %212 : vector<16xf32> to vector<16x1xf32>
    %214 = vector.broadcast %213 : vector<16x1xf32> to vector<16x16xf32>
    %215 = arith.subf %211, %214 : vector<16x16xf32>
    %216 = math.exp %215 : vector<16x16xf32>
    %cst_37 = arith.constant dense<0.000000e+00> : vector<16xf32>
    %217 = vector.multi_reduction <add>, %216, %cst_37 [1] : vector<16x16xf32> to vector<16xf32>
    %218 = vector.shape_cast %217 : vector<16xf32> to vector<16x1xf32>
    %cst_38 = arith.constant 1.000000e+00 : f32
    %219 = vector.broadcast %cst_38 : f32 to vector<16x1xf32>
    %220 = arith.divf %219, %218 : vector<16x1xf32>
    %221 = vector.broadcast %220 : vector<16x1xf32> to vector<16x16xf32>
    %222 = arith.mulf %216, %221 : vector<16x16xf32>
    %223 = arith.mulf %222, %25 : vector<16x16xf32>
    %cst_39 = arith.constant dense<0.000000e+00> : vector<16xf32>
    %224 = vector.multi_reduction <add>, %223, %cst_39 [1] : vector<16x16xf32> to vector<16xf32>
    %225 = vector.shape_cast %224 : vector<16xf32> to vector<16x1xf32>
    %226 = arith.mulf %222, %29 : vector<16x16xf32>
    %cst_40 = arith.constant dense<0.000000e+00> : vector<16xf32>
    %227 = vector.multi_reduction <add>, %226, %cst_40 [1] : vector<16x16xf32> to vector<16xf32>
    %228 = vector.shape_cast %227 : vector<16xf32> to vector<16x1xf32>
    %229 = arith.mulf %222, %33 : vector<16x16xf32>
    %cst_41 = arith.constant dense<0.000000e+00> : vector<16xf32>
    %230 = vector.multi_reduction <add>, %229, %cst_41 [1] : vector<16x16xf32> to vector<16xf32>
    %231 = vector.shape_cast %230 : vector<16xf32> to vector<16x1xf32>
    %232 = arith.mulf %222, %37 : vector<16x16xf32>
    %cst_42 = arith.constant dense<0.000000e+00> : vector<16xf32>
    %233 = vector.multi_reduction <add>, %232, %cst_42 [1] : vector<16x16xf32> to vector<16xf32>
    %234 = vector.shape_cast %233 : vector<16xf32> to vector<16x1xf32>
    %235 = arith.mulf %222, %41 : vector<16x16xf32>
    %cst_43 = arith.constant dense<0.000000e+00> : vector<16xf32>
    %236 = vector.multi_reduction <add>, %235, %cst_43 [1] : vector<16x16xf32> to vector<16xf32>
    %237 = vector.shape_cast %236 : vector<16xf32> to vector<16x1xf32>
    %238 = arith.mulf %222, %45 : vector<16x16xf32>
    %cst_44 = arith.constant dense<0.000000e+00> : vector<16xf32>
    %239 = vector.multi_reduction <add>, %238, %cst_44 [1] : vector<16x16xf32> to vector<16xf32>
    %240 = vector.shape_cast %239 : vector<16xf32> to vector<16x1xf32>
    %241 = arith.mulf %222, %49 : vector<16x16xf32>
    %cst_45 = arith.constant dense<0.000000e+00> : vector<16xf32>
    %242 = vector.multi_reduction <add>, %241, %cst_45 [1] : vector<16x16xf32> to vector<16xf32>
    %243 = vector.shape_cast %242 : vector<16xf32> to vector<16x1xf32>
    %244 = arith.mulf %222, %53 : vector<16x16xf32>
    %cst_46 = arith.constant dense<0.000000e+00> : vector<16xf32>
    %245 = vector.multi_reduction <add>, %244, %cst_46 [1] : vector<16x16xf32> to vector<16xf32>
    %246 = vector.shape_cast %245 : vector<16xf32> to vector<16x1xf32>
    %247 = arith.mulf %222, %57 : vector<16x16xf32>
    %cst_47 = arith.constant dense<0.000000e+00> : vector<16xf32>
    %248 = vector.multi_reduction <add>, %247, %cst_47 [1] : vector<16x16xf32> to vector<16xf32>
    %249 = vector.shape_cast %248 : vector<16xf32> to vector<16x1xf32>
    %250 = tpu.concatenate %225, %228, %231, %234, %237, %240, %243, %246, %249 in 1 : vector<16x1xf32>, vector<16x1xf32>, vector<16x1xf32>, vector<16x1xf32>, vector<16x1xf32>, vector<16x1xf32>, vector<16x1xf32>, vector<16x1xf32>, vector<16x1xf32> -> vector<16x9xf32>
    %251 = arith.truncf %222 : vector<16x16xf32> to vector<16x16xbf16>
    %cst_48 = arith.constant dense<0.000000e+00> : vector<16x16xf32>
    %252 = tpu.matmul %251, %172, %cst_48 {dimension_numbers = #tpu.dot_dimension_numbers<[1], [0], [0], [1], [0, 0, 1, 1], [], []>} : vector<16x16xbf16>, vector<16x16xbf16>, vector<16x16xf32> -> vector<16x16xf32>
    %253 = arith.truncf %250 : vector<16x9xf32> to vector<16x9xbf16>
    %cst_49 = arith.constant dense<0.000000e+00> : vector<16x16xf32>
    %254 = tpu.matmul %253, %73, %cst_49 {dimension_numbers = #tpu.dot_dimension_numbers<[1], [0], [0], [1], [0, 0, 1, 1], [], []>} : vector<16x9xbf16>, vector<9x16xbf16>, vector<16x16xf32> -> vector<16x16xf32>
    %255 = arith.addf %252, %254 : vector<16x16xf32>
    %256 = tpu.concatenate %164, %255 in 1 : vector<16x16xf32>, vector<16x16xf32> -> vector<16x32xf32>
    %257 = arith.truncf %256 : vector<16x32xf32> to vector<16x32xbf16>
    %c0_50 = arith.constant 0 : index
    %c0_51 = arith.constant 0 : index
    %c0_52 = arith.constant 0 : index
    %258 = vector.load %arg5[%c0_50, %c0_51, %c0_52] : memref<2x32x32xbf16, #tpu.memory_space<vmem>>, vector<1x32x32xbf16>
    %259 = vector.shape_cast %258 : vector<1x32x32xbf16> to vector<32x32xbf16>
    %cst_53 = arith.constant dense<0.000000e+00> : vector<16x32xf32>
    %260 = tpu.matmul %257, %259, %cst_53 {dimension_numbers = #tpu.dot_dimension_numbers<[1], [0], [0], [1], [0, 0, 1, 1], [], []>} : vector<16x32xbf16>, vector<32x32xbf16>, vector<16x32xf32> -> vector<16x32xf32>
    %c0_54 = arith.constant 0 : index
    %c0_55 = arith.constant 0 : index
    %c0_56 = arith.constant 0 : index
    %261 = vector.load %arg6[%c0_54, %c0_55, %c0_56] : memref<2x1x32xf32, #tpu.memory_space<vmem>>, vector<1x1x32xf32>
    %262 = vector.shape_cast %261 : vector<1x1x32xf32> to vector<1x32xf32>
    %263 = vector.broadcast %262 : vector<1x32xf32> to vector<16x32xf32>
    %264 = arith.addf %260, %263 : vector<16x32xf32>
    %265 = arith.addf %61, %264 : vector<16x32xf32>
    %c0_57 = arith.constant 0 : index
    %c0_58 = arith.constant 0 : index
    %c0_59 = arith.constant 0 : index
    %266 = vector.load %arg9[%c0_57, %c0_58, %c0_59] : memref<2x1x32xf32, #tpu.memory_space<vmem>>, vector<1x1x32xf32>
    %267 = vector.shape_cast %266 : vector<1x1x32xf32> to vector<1x32xf32>
    %c0_60 = arith.constant 0 : index
    %c0_61 = arith.constant 0 : index
    %c0_62 = arith.constant 0 : index
    %268 = vector.load %arg10[%c0_60, %c0_61, %c0_62] : memref<2x1x32xf32, #tpu.memory_space<vmem>>, vector<1x1x32xf32>
    %269 = vector.shape_cast %268 : vector<1x1x32xf32> to vector<1x32xf32>
    %cst_63 = arith.constant dense<0.000000e+00> : vector<16xf32>
    %270 = vector.multi_reduction <add>, %265, %cst_63 [1] : vector<16x32xf32> to vector<16xf32>
    %271 = vector.shape_cast %270 : vector<16xf32> to vector<16x1xf32>
    %cst_64 = arith.constant 3.200000e+01 : f32
    %272 = vector.broadcast %cst_64 : f32 to vector<16x1xf32>
    %273 = arith.divf %271, %272 : vector<16x1xf32>
    %274 = vector.broadcast %273 : vector<16x1xf32> to vector<16x32xf32>
    %275 = arith.subf %265, %274 : vector<16x32xf32>
    %276 = arith.mulf %275, %275 : vector<16x32xf32>
    %cst_65 = arith.constant dense<0.000000e+00> : vector<16xf32>
    %277 = vector.multi_reduction <add>, %276, %cst_65 [1] : vector<16x32xf32> to vector<16xf32>
    %278 = vector.shape_cast %277 : vector<16xf32> to vector<16x1xf32>
    %cst_66 = arith.constant 3.200000e+01 : f32
    %279 = vector.broadcast %cst_66 : f32 to vector<16x1xf32>
    %280 = arith.divf %278, %279 : vector<16x1xf32>
    %281 = vector.broadcast %273 : vector<16x1xf32> to vector<16x32xf32>
    %282 = arith.subf %265, %281 : vector<16x32xf32>
    %cst_67 = arith.constant 9.99999974E-6 : f32
    %283 = vector.broadcast %cst_67 : f32 to vector<16x1xf32>
    %284 = arith.addf %280, %283 : vector<16x1xf32>
    %285 = math.rsqrt %284 : vector<16x1xf32>
    %286 = vector.broadcast %285 : vector<16x1xf32> to vector<16x32xf32>
    %287 = arith.mulf %282, %286 : vector<16x32xf32>
    %288 = vector.broadcast %267 : vector<1x32xf32> to vector<16x32xf32>
    %289 = arith.mulf %287, %288 : vector<16x32xf32>
    %290 = vector.broadcast %269 : vector<1x32xf32> to vector<16x32xf32>
    %291 = arith.addf %289, %290 : vector<16x32xf32>
    %292 = vector.broadcast %7 : vector<16x1xf32> to vector<16x32xf32>
    %293 = arith.mulf %291, %292 : vector<16x32xf32>
    %cst_68 = arith.constant 0.000000e+00 : f32
    %294 = vector.broadcast %cst_68 : f32 to vector<1x32xf32>
    %cst_69 = arith.constant 0.000000e+00 : f32
    %295 = vector.broadcast %cst_69 : f32 to vector<1x32xf32>
    %296 = tpu.concatenate %294, %293, %295 in 0 : vector<1x32xf32>, vector<16x32xf32>, vector<1x32xf32> -> vector<18x32xf32>
    %297 = vector.extract_strided_slice %296 {offsets = [0, 0], sizes = [16, 32], strides = [1, 1]} : vector<18x32xf32> to vector<16x32xf32>
    %298 = vector.extract_strided_slice %296 {offsets = [1, 0], sizes = [16, 32], strides = [1, 1]} : vector<18x32xf32> to vector<16x32xf32>
    %299 = vector.extract_strided_slice %296 {offsets = [2, 0], sizes = [16, 32], strides = [1, 1]} : vector<18x32xf32> to vector<16x32xf32>
    %300 = tpu.concatenate %297, %298, %299 in 1 : vector<16x32xf32>, vector<16x32xf32>, vector<16x32xf32> -> vector<16x96xf32>
    %301 = arith.truncf %300 : vector<16x96xf32> to vector<16x96xbf16>
    %c0_70 = arith.constant 0 : index
    %c0_71 = arith.constant 0 : index
    %c0_72 = arith.constant 0 : index
    %302 = vector.load %arg13[%c0_70, %c0_71, %c0_72] : memref<2x96x64xbf16, #tpu.memory_space<vmem>>, vector<1x96x64xbf16>
    %303 = vector.shape_cast %302 : vector<1x96x64xbf16> to vector<96x64xbf16>
    %cst_73 = arith.constant dense<0.000000e+00> : vector<16x64xf32>
    %304 = tpu.matmul %301, %303, %cst_73 {dimension_numbers = #tpu.dot_dimension_numbers<[1], [0], [0], [1], [0, 0, 1, 1], [], []>} : vector<16x96xbf16>, vector<96x64xbf16>, vector<16x64xf32> -> vector<16x64xf32>
    %c0_74 = arith.constant 0 : index
    %c0_75 = arith.constant 0 : index
    %c0_76 = arith.constant 0 : index
    %305 = vector.load %arg14[%c0_74, %c0_75, %c0_76] : memref<2x1x64xf32, #tpu.memory_space<vmem>>, vector<1x1x64xf32>
    %306 = vector.shape_cast %305 : vector<1x1x64xf32> to vector<1x64xf32>
    %307 = vector.broadcast %306 : vector<1x64xf32> to vector<16x64xf32>
    %308 = arith.addf %304, %307 : vector<16x64xf32>
    %cst_77 = arith.constant 0.000000e+00 : f32
    %309 = vector.broadcast %cst_77 : f32 to vector<16x64xf32>
    %310 = arith.maximumf %308, %309 : vector<16x64xf32>
    %311 = vector.broadcast %7 : vector<16x1xf32> to vector<16x64xf32>
    %312 = arith.mulf %310, %311 : vector<16x64xf32>
    %cst_78 = arith.constant 0.000000e+00 : f32
    %313 = vector.broadcast %cst_78 : f32 to vector<1x64xf32>
    %cst_79 = arith.constant 0.000000e+00 : f32
    %314 = vector.broadcast %cst_79 : f32 to vector<1x64xf32>
    %315 = tpu.concatenate %313, %312, %314 in 0 : vector<1x64xf32>, vector<16x64xf32>, vector<1x64xf32> -> vector<18x64xf32>
    %316 = vector.extract_strided_slice %315 {offsets = [0, 0], sizes = [16, 64], strides = [1, 1]} : vector<18x64xf32> to vector<16x64xf32>
    %317 = vector.extract_strided_slice %315 {offsets = [1, 0], sizes = [16, 64], strides = [1, 1]} : vector<18x64xf32> to vector<16x64xf32>
    %318 = vector.extract_strided_slice %315 {offsets = [2, 0], sizes = [16, 64], strides = [1, 1]} : vector<18x64xf32> to vector<16x64xf32>
    %319 = tpu.concatenate %316, %317, %318 in 1 : vector<16x64xf32>, vector<16x64xf32>, vector<16x64xf32> -> vector<16x192xf32>
    %320 = arith.truncf %319 : vector<16x192xf32> to vector<16x192xbf16>
    %c0_80 = arith.constant 0 : index
    %c0_81 = arith.constant 0 : index
    %c0_82 = arith.constant 0 : index
    %321 = vector.load %arg15[%c0_80, %c0_81, %c0_82] : memref<2x192x32xbf16, #tpu.memory_space<vmem>>, vector<1x192x32xbf16>
    %322 = vector.shape_cast %321 : vector<1x192x32xbf16> to vector<192x32xbf16>
    %cst_83 = arith.constant dense<0.000000e+00> : vector<16x32xf32>
    %323 = tpu.matmul %320, %322, %cst_83 {dimension_numbers = #tpu.dot_dimension_numbers<[1], [0], [0], [1], [0, 0, 1, 1], [], []>} : vector<16x192xbf16>, vector<192x32xbf16>, vector<16x32xf32> -> vector<16x32xf32>
    %c0_84 = arith.constant 0 : index
    %c0_85 = arith.constant 0 : index
    %c0_86 = arith.constant 0 : index
    %324 = vector.load %arg16[%c0_84, %c0_85, %c0_86] : memref<2x1x32xf32, #tpu.memory_space<vmem>>, vector<1x1x32xf32>
    %325 = vector.shape_cast %324 : vector<1x1x32xf32> to vector<1x32xf32>
    %326 = vector.broadcast %325 : vector<1x32xf32> to vector<16x32xf32>
    %327 = arith.addf %323, %326 : vector<16x32xf32>
    %328 = vector.broadcast %7 : vector<16x1xf32> to vector<16x32xf32>
    %329 = arith.mulf %327, %328 : vector<16x32xf32>
    %330 = arith.addf %291, %329 : vector<16x32xf32>
    %c0_87 = arith.constant 0 : index
    %c0_88 = arith.constant 0 : index
    %c0_89 = arith.constant 0 : index
    %331 = vector.load %arg11[%c0_87, %c0_88, %c0_89] : memref<2x1x32xf32, #tpu.memory_space<vmem>>, vector<1x1x32xf32>
    %332 = vector.shape_cast %331 : vector<1x1x32xf32> to vector<1x32xf32>
    %c0_90 = arith.constant 0 : index
    %c0_91 = arith.constant 0 : index
    %c0_92 = arith.constant 0 : index
    %333 = vector.load %arg12[%c0_90, %c0_91, %c0_92] : memref<2x1x32xf32, #tpu.memory_space<vmem>>, vector<1x1x32xf32>
    %334 = vector.shape_cast %333 : vector<1x1x32xf32> to vector<1x32xf32>
    %cst_93 = arith.constant dense<0.000000e+00> : vector<16xf32>
    %335 = vector.multi_reduction <add>, %330, %cst_93 [1] : vector<16x32xf32> to vector<16xf32>
    %336 = vector.shape_cast %335 : vector<16xf32> to vector<16x1xf32>
    %cst_94 = arith.constant 3.200000e+01 : f32
    %337 = vector.broadcast %cst_94 : f32 to vector<16x1xf32>
    %338 = arith.divf %336, %337 : vector<16x1xf32>
    %339 = vector.broadcast %338 : vector<16x1xf32> to vector<16x32xf32>
    %340 = arith.subf %330, %339 : vector<16x32xf32>
    %341 = arith.mulf %340, %340 : vector<16x32xf32>
    %cst_95 = arith.constant dense<0.000000e+00> : vector<16xf32>
    %342 = vector.multi_reduction <add>, %341, %cst_95 [1] : vector<16x32xf32> to vector<16xf32>
    %343 = vector.shape_cast %342 : vector<16xf32> to vector<16x1xf32>
    %cst_96 = arith.constant 3.200000e+01 : f32
    %344 = vector.broadcast %cst_96 : f32 to vector<16x1xf32>
    %345 = arith.divf %343, %344 : vector<16x1xf32>
    %346 = vector.broadcast %338 : vector<16x1xf32> to vector<16x32xf32>
    %347 = arith.subf %330, %346 : vector<16x32xf32>
    %cst_97 = arith.constant 9.99999974E-6 : f32
    %348 = vector.broadcast %cst_97 : f32 to vector<16x1xf32>
    %349 = arith.addf %345, %348 : vector<16x1xf32>
    %350 = math.rsqrt %349 : vector<16x1xf32>
    %351 = vector.broadcast %350 : vector<16x1xf32> to vector<16x32xf32>
    %352 = arith.mulf %347, %351 : vector<16x32xf32>
    %353 = vector.broadcast %332 : vector<1x32xf32> to vector<16x32xf32>
    %354 = arith.mulf %352, %353 : vector<16x32xf32>
    %355 = vector.broadcast %334 : vector<1x32xf32> to vector<16x32xf32>
    %356 = arith.addf %354, %355 : vector<16x32xf32>
    %357 = arith.truncf %356 : vector<16x32xf32> to vector<16x32xbf16>
    %c1 = arith.constant 1 : index
    %c0_98 = arith.constant 0 : index
    %c0_99 = arith.constant 0 : index
    %358 = vector.load %arg3[%c1, %c0_98, %c0_99] : memref<2x32x96xbf16, #tpu.memory_space<vmem>>, vector<1x32x96xbf16>
    %359 = vector.shape_cast %358 : vector<1x32x96xbf16> to vector<32x96xbf16>
    %cst_100 = arith.constant dense<0.000000e+00> : vector<16x96xf32>
    %360 = tpu.matmul %357, %359, %cst_100 {dimension_numbers = #tpu.dot_dimension_numbers<[1], [0], [0], [1], [0, 0, 1, 1], [], []>} : vector<16x32xbf16>, vector<32x96xbf16>, vector<16x96xf32> -> vector<16x96xf32>
    %c1_101 = arith.constant 1 : index
    %c0_102 = arith.constant 0 : index
    %c0_103 = arith.constant 0 : index
    %361 = vector.load %arg4[%c1_101, %c0_102, %c0_103] : memref<2x1x96xf32, #tpu.memory_space<vmem>>, vector<1x1x96xf32>
    %362 = vector.shape_cast %361 : vector<1x1x96xf32> to vector<1x96xf32>
    %363 = vector.broadcast %362 : vector<1x96xf32> to vector<16x96xf32>
    %364 = arith.addf %360, %363 : vector<16x96xf32>
    %c1_104 = arith.constant 1 : index
    %c0_105 = arith.constant 0 : index
    %c0_106 = arith.constant 0 : index
    %365 = vector.load %arg7[%c1_104, %c0_105, %c0_106] : memref<2x9x16xbf16, #tpu.memory_space<vmem>>, vector<1x9x16xbf16>
    %366 = vector.shape_cast %365 : vector<1x9x16xbf16> to vector<9x16xbf16>
    %c1_107 = arith.constant 1 : index
    %c0_108 = arith.constant 0 : index
    %c0_109 = arith.constant 0 : index
    %367 = vector.load %arg8[%c1_107, %c0_108, %c0_109] : memref<2x9x16xbf16, #tpu.memory_space<vmem>>, vector<1x9x16xbf16>
    %368 = vector.shape_cast %367 : vector<1x9x16xbf16> to vector<9x16xbf16>
    %369 = vector.extract_strided_slice %364 {offsets = [0, 0], sizes = [16, 16], strides = [1, 1]} : vector<16x96xf32> to vector<16x16xf32>
    %cst_110 = arith.constant 2.500000e-01 : f32
    %370 = vector.broadcast %cst_110 : f32 to vector<16x16xf32>
    %371 = arith.mulf %369, %370 : vector<16x16xf32>
    %372 = vector.extract_strided_slice %364 {offsets = [0, 32], sizes = [16, 16], strides = [1, 1]} : vector<16x96xf32> to vector<16x16xf32>
    %373 = vector.extract_strided_slice %364 {offsets = [0, 64], sizes = [16, 16], strides = [1, 1]} : vector<16x96xf32> to vector<16x16xf32>
    %374 = arith.truncf %371 : vector<16x16xf32> to vector<16x16xbf16>
    %375 = arith.truncf %372 : vector<16x16xf32> to vector<16x16xbf16>
    %376 = arith.truncf %373 : vector<16x16xf32> to vector<16x16xbf16>
    %cst_111 = arith.constant dense<0.000000e+00> : vector<16x16xf32>
    %377 = tpu.matmul %374, %375, %cst_111 {dimension_numbers = #tpu.dot_dimension_numbers<[1], [1], [0], [0], [0, 0, 1, 0], [], []>} : vector<16x16xbf16>, vector<16x16xbf16>, vector<16x16xf32> -> vector<16x16xf32>
    %378 = arith.addf %377, %18 : vector<16x16xf32>
    %cst_112 = arith.constant dense<0.000000e+00> : vector<16x9xf32>
    %379 = tpu.matmul %374, %366, %cst_112 {dimension_numbers = #tpu.dot_dimension_numbers<[1], [1], [0], [0], [0, 0, 1, 0], [], []>} : vector<16x16xbf16>, vector<9x16xbf16>, vector<16x9xf32> -> vector<16x9xf32>
    %380 = vector.extract_strided_slice %379 {offsets = [0, 0], sizes = [16, 1], strides = [1, 1]} : vector<16x9xf32> to vector<16x1xf32>
    %381 = vector.broadcast %380 : vector<16x1xf32> to vector<16x16xf32>
    %382 = arith.mulf %381, %25 : vector<16x16xf32>
    %383 = arith.addf %378, %382 : vector<16x16xf32>
    %384 = vector.extract_strided_slice %379 {offsets = [0, 1], sizes = [16, 1], strides = [1, 1]} : vector<16x9xf32> to vector<16x1xf32>
    %385 = vector.broadcast %384 : vector<16x1xf32> to vector<16x16xf32>
    %386 = arith.mulf %385, %29 : vector<16x16xf32>
    %387 = arith.addf %383, %386 : vector<16x16xf32>
    %388 = vector.extract_strided_slice %379 {offsets = [0, 2], sizes = [16, 1], strides = [1, 1]} : vector<16x9xf32> to vector<16x1xf32>
    %389 = vector.broadcast %388 : vector<16x1xf32> to vector<16x16xf32>
    %390 = arith.mulf %389, %33 : vector<16x16xf32>
    %391 = arith.addf %387, %390 : vector<16x16xf32>
    %392 = vector.extract_strided_slice %379 {offsets = [0, 3], sizes = [16, 1], strides = [1, 1]} : vector<16x9xf32> to vector<16x1xf32>
    %393 = vector.broadcast %392 : vector<16x1xf32> to vector<16x16xf32>
    %394 = arith.mulf %393, %37 : vector<16x16xf32>
    %395 = arith.addf %391, %394 : vector<16x16xf32>
    %396 = vector.extract_strided_slice %379 {offsets = [0, 4], sizes = [16, 1], strides = [1, 1]} : vector<16x9xf32> to vector<16x1xf32>
    %397 = vector.broadcast %396 : vector<16x1xf32> to vector<16x16xf32>
    %398 = arith.mulf %397, %41 : vector<16x16xf32>
    %399 = arith.addf %395, %398 : vector<16x16xf32>
    %400 = vector.extract_strided_slice %379 {offsets = [0, 5], sizes = [16, 1], strides = [1, 1]} : vector<16x9xf32> to vector<16x1xf32>
    %401 = vector.broadcast %400 : vector<16x1xf32> to vector<16x16xf32>
    %402 = arith.mulf %401, %45 : vector<16x16xf32>
    %403 = arith.addf %399, %402 : vector<16x16xf32>
    %404 = vector.extract_strided_slice %379 {offsets = [0, 6], sizes = [16, 1], strides = [1, 1]} : vector<16x9xf32> to vector<16x1xf32>
    %405 = vector.broadcast %404 : vector<16x1xf32> to vector<16x16xf32>
    %406 = arith.mulf %405, %49 : vector<16x16xf32>
    %407 = arith.addf %403, %406 : vector<16x16xf32>
    %408 = vector.extract_strided_slice %379 {offsets = [0, 7], sizes = [16, 1], strides = [1, 1]} : vector<16x9xf32> to vector<16x1xf32>
    %409 = vector.broadcast %408 : vector<16x1xf32> to vector<16x16xf32>
    %410 = arith.mulf %409, %53 : vector<16x16xf32>
    %411 = arith.addf %407, %410 : vector<16x16xf32>
    %412 = vector.extract_strided_slice %379 {offsets = [0, 8], sizes = [16, 1], strides = [1, 1]} : vector<16x9xf32> to vector<16x1xf32>
    %413 = vector.broadcast %412 : vector<16x1xf32> to vector<16x16xf32>
    %414 = arith.mulf %413, %57 : vector<16x16xf32>
    %415 = arith.addf %411, %414 : vector<16x16xf32>
    %cst_113 = arith.constant dense<0xFF800000> : vector<16xf32>
    %416 = vector.multi_reduction <maximumf>, %415, %cst_113 [1] : vector<16x16xf32> to vector<16xf32>
    %417 = vector.shape_cast %416 : vector<16xf32> to vector<16x1xf32>
    %418 = vector.broadcast %417 : vector<16x1xf32> to vector<16x16xf32>
    %419 = arith.subf %415, %418 : vector<16x16xf32>
    %420 = math.exp %419 : vector<16x16xf32>
    %cst_114 = arith.constant dense<0.000000e+00> : vector<16xf32>
    %421 = vector.multi_reduction <add>, %420, %cst_114 [1] : vector<16x16xf32> to vector<16xf32>
    %422 = vector.shape_cast %421 : vector<16xf32> to vector<16x1xf32>
    %cst_115 = arith.constant 1.000000e+00 : f32
    %423 = vector.broadcast %cst_115 : f32 to vector<16x1xf32>
    %424 = arith.divf %423, %422 : vector<16x1xf32>
    %425 = vector.broadcast %424 : vector<16x1xf32> to vector<16x16xf32>
    %426 = arith.mulf %420, %425 : vector<16x16xf32>
    %427 = arith.mulf %426, %25 : vector<16x16xf32>
    %cst_116 = arith.constant dense<0.000000e+00> : vector<16xf32>
    %428 = vector.multi_reduction <add>, %427, %cst_116 [1] : vector<16x16xf32> to vector<16xf32>
    %429 = vector.shape_cast %428 : vector<16xf32> to vector<16x1xf32>
    %430 = arith.mulf %426, %29 : vector<16x16xf32>
    %cst_117 = arith.constant dense<0.000000e+00> : vector<16xf32>
    %431 = vector.multi_reduction <add>, %430, %cst_117 [1] : vector<16x16xf32> to vector<16xf32>
    %432 = vector.shape_cast %431 : vector<16xf32> to vector<16x1xf32>
    %433 = arith.mulf %426, %33 : vector<16x16xf32>
    %cst_118 = arith.constant dense<0.000000e+00> : vector<16xf32>
    %434 = vector.multi_reduction <add>, %433, %cst_118 [1] : vector<16x16xf32> to vector<16xf32>
    %435 = vector.shape_cast %434 : vector<16xf32> to vector<16x1xf32>
    %436 = arith.mulf %426, %37 : vector<16x16xf32>
    %cst_119 = arith.constant dense<0.000000e+00> : vector<16xf32>
    %437 = vector.multi_reduction <add>, %436, %cst_119 [1] : vector<16x16xf32> to vector<16xf32>
    %438 = vector.shape_cast %437 : vector<16xf32> to vector<16x1xf32>
    %439 = arith.mulf %426, %41 : vector<16x16xf32>
    %cst_120 = arith.constant dense<0.000000e+00> : vector<16xf32>
    %440 = vector.multi_reduction <add>, %439, %cst_120 [1] : vector<16x16xf32> to vector<16xf32>
    %441 = vector.shape_cast %440 : vector<16xf32> to vector<16x1xf32>
    %442 = arith.mulf %426, %45 : vector<16x16xf32>
    %cst_121 = arith.constant dense<0.000000e+00> : vector<16xf32>
    %443 = vector.multi_reduction <add>, %442, %cst_121 [1] : vector<16x16xf32> to vector<16xf32>
    %444 = vector.shape_cast %443 : vector<16xf32> to vector<16x1xf32>
    %445 = arith.mulf %426, %49 : vector<16x16xf32>
    %cst_122 = arith.constant dense<0.000000e+00> : vector<16xf32>
    %446 = vector.multi_reduction <add>, %445, %cst_122 [1] : vector<16x16xf32> to vector<16xf32>
    %447 = vector.shape_cast %446 : vector<16xf32> to vector<16x1xf32>
    %448 = arith.mulf %426, %53 : vector<16x16xf32>
    %cst_123 = arith.constant dense<0.000000e+00> : vector<16xf32>
    %449 = vector.multi_reduction <add>, %448, %cst_123 [1] : vector<16x16xf32> to vector<16xf32>
    %450 = vector.shape_cast %449 : vector<16xf32> to vector<16x1xf32>
    %451 = arith.mulf %426, %57 : vector<16x16xf32>
    %cst_124 = arith.constant dense<0.000000e+00> : vector<16xf32>
    %452 = vector.multi_reduction <add>, %451, %cst_124 [1] : vector<16x16xf32> to vector<16xf32>
    %453 = vector.shape_cast %452 : vector<16xf32> to vector<16x1xf32>
    %454 = tpu.concatenate %429, %432, %435, %438, %441, %444, %447, %450, %453 in 1 : vector<16x1xf32>, vector<16x1xf32>, vector<16x1xf32>, vector<16x1xf32>, vector<16x1xf32>, vector<16x1xf32>, vector<16x1xf32>, vector<16x1xf32>, vector<16x1xf32> -> vector<16x9xf32>
    %455 = arith.truncf %426 : vector<16x16xf32> to vector<16x16xbf16>
    %cst_125 = arith.constant dense<0.000000e+00> : vector<16x16xf32>
    %456 = tpu.matmul %455, %376, %cst_125 {dimension_numbers = #tpu.dot_dimension_numbers<[1], [0], [0], [1], [0, 0, 1, 1], [], []>} : vector<16x16xbf16>, vector<16x16xbf16>, vector<16x16xf32> -> vector<16x16xf32>
    %457 = arith.truncf %454 : vector<16x9xf32> to vector<16x9xbf16>
    %cst_126 = arith.constant dense<0.000000e+00> : vector<16x16xf32>
    %458 = tpu.matmul %457, %368, %cst_126 {dimension_numbers = #tpu.dot_dimension_numbers<[1], [0], [0], [1], [0, 0, 1, 1], [], []>} : vector<16x9xbf16>, vector<9x16xbf16>, vector<16x16xf32> -> vector<16x16xf32>
    %459 = arith.addf %456, %458 : vector<16x16xf32>
    %460 = vector.extract_strided_slice %364 {offsets = [0, 16], sizes = [16, 16], strides = [1, 1]} : vector<16x96xf32> to vector<16x16xf32>
    %cst_127 = arith.constant 2.500000e-01 : f32
    %461 = vector.broadcast %cst_127 : f32 to vector<16x16xf32>
    %462 = arith.mulf %460, %461 : vector<16x16xf32>
    %463 = vector.extract_strided_slice %364 {offsets = [0, 48], sizes = [16, 16], strides = [1, 1]} : vector<16x96xf32> to vector<16x16xf32>
    %464 = vector.extract_strided_slice %364 {offsets = [0, 80], sizes = [16, 16], strides = [1, 1]} : vector<16x96xf32> to vector<16x16xf32>
    %465 = arith.truncf %462 : vector<16x16xf32> to vector<16x16xbf16>
    %466 = arith.truncf %463 : vector<16x16xf32> to vector<16x16xbf16>
    %467 = arith.truncf %464 : vector<16x16xf32> to vector<16x16xbf16>
    %cst_128 = arith.constant dense<0.000000e+00> : vector<16x16xf32>
    %468 = tpu.matmul %465, %466, %cst_128 {dimension_numbers = #tpu.dot_dimension_numbers<[1], [1], [0], [0], [0, 0, 1, 0], [], []>} : vector<16x16xbf16>, vector<16x16xbf16>, vector<16x16xf32> -> vector<16x16xf32>
    %469 = arith.addf %468, %18 : vector<16x16xf32>
    %cst_129 = arith.constant dense<0.000000e+00> : vector<16x9xf32>
    %470 = tpu.matmul %465, %366, %cst_129 {dimension_numbers = #tpu.dot_dimension_numbers<[1], [1], [0], [0], [0, 0, 1, 0], [], []>} : vector<16x16xbf16>, vector<9x16xbf16>, vector<16x9xf32> -> vector<16x9xf32>
    %471 = vector.extract_strided_slice %470 {offsets = [0, 0], sizes = [16, 1], strides = [1, 1]} : vector<16x9xf32> to vector<16x1xf32>
    %472 = vector.broadcast %471 : vector<16x1xf32> to vector<16x16xf32>
    %473 = arith.mulf %472, %25 : vector<16x16xf32>
    %474 = arith.addf %469, %473 : vector<16x16xf32>
    %475 = vector.extract_strided_slice %470 {offsets = [0, 1], sizes = [16, 1], strides = [1, 1]} : vector<16x9xf32> to vector<16x1xf32>
    %476 = vector.broadcast %475 : vector<16x1xf32> to vector<16x16xf32>
    %477 = arith.mulf %476, %29 : vector<16x16xf32>
    %478 = arith.addf %474, %477 : vector<16x16xf32>
    %479 = vector.extract_strided_slice %470 {offsets = [0, 2], sizes = [16, 1], strides = [1, 1]} : vector<16x9xf32> to vector<16x1xf32>
    %480 = vector.broadcast %479 : vector<16x1xf32> to vector<16x16xf32>
    %481 = arith.mulf %480, %33 : vector<16x16xf32>
    %482 = arith.addf %478, %481 : vector<16x16xf32>
    %483 = vector.extract_strided_slice %470 {offsets = [0, 3], sizes = [16, 1], strides = [1, 1]} : vector<16x9xf32> to vector<16x1xf32>
    %484 = vector.broadcast %483 : vector<16x1xf32> to vector<16x16xf32>
    %485 = arith.mulf %484, %37 : vector<16x16xf32>
    %486 = arith.addf %482, %485 : vector<16x16xf32>
    %487 = vector.extract_strided_slice %470 {offsets = [0, 4], sizes = [16, 1], strides = [1, 1]} : vector<16x9xf32> to vector<16x1xf32>
    %488 = vector.broadcast %487 : vector<16x1xf32> to vector<16x16xf32>
    %489 = arith.mulf %488, %41 : vector<16x16xf32>
    %490 = arith.addf %486, %489 : vector<16x16xf32>
    %491 = vector.extract_strided_slice %470 {offsets = [0, 5], sizes = [16, 1], strides = [1, 1]} : vector<16x9xf32> to vector<16x1xf32>
    %492 = vector.broadcast %491 : vector<16x1xf32> to vector<16x16xf32>
    %493 = arith.mulf %492, %45 : vector<16x16xf32>
    %494 = arith.addf %490, %493 : vector<16x16xf32>
    %495 = vector.extract_strided_slice %470 {offsets = [0, 6], sizes = [16, 1], strides = [1, 1]} : vector<16x9xf32> to vector<16x1xf32>
    %496 = vector.broadcast %495 : vector<16x1xf32> to vector<16x16xf32>
    %497 = arith.mulf %496, %49 : vector<16x16xf32>
    %498 = arith.addf %494, %497 : vector<16x16xf32>
    %499 = vector.extract_strided_slice %470 {offsets = [0, 7], sizes = [16, 1], strides = [1, 1]} : vector<16x9xf32> to vector<16x1xf32>
    %500 = vector.broadcast %499 : vector<16x1xf32> to vector<16x16xf32>
    %501 = arith.mulf %500, %53 : vector<16x16xf32>
    %502 = arith.addf %498, %501 : vector<16x16xf32>
    %503 = vector.extract_strided_slice %470 {offsets = [0, 8], sizes = [16, 1], strides = [1, 1]} : vector<16x9xf32> to vector<16x1xf32>
    %504 = vector.broadcast %503 : vector<16x1xf32> to vector<16x16xf32>
    %505 = arith.mulf %504, %57 : vector<16x16xf32>
    %506 = arith.addf %502, %505 : vector<16x16xf32>
    %cst_130 = arith.constant dense<0xFF800000> : vector<16xf32>
    %507 = vector.multi_reduction <maximumf>, %506, %cst_130 [1] : vector<16x16xf32> to vector<16xf32>
    %508 = vector.shape_cast %507 : vector<16xf32> to vector<16x1xf32>
    %509 = vector.broadcast %508 : vector<16x1xf32> to vector<16x16xf32>
    %510 = arith.subf %506, %509 : vector<16x16xf32>
    %511 = math.exp %510 : vector<16x16xf32>
    %cst_131 = arith.constant dense<0.000000e+00> : vector<16xf32>
    %512 = vector.multi_reduction <add>, %511, %cst_131 [1] : vector<16x16xf32> to vector<16xf32>
    %513 = vector.shape_cast %512 : vector<16xf32> to vector<16x1xf32>
    %cst_132 = arith.constant 1.000000e+00 : f32
    %514 = vector.broadcast %cst_132 : f32 to vector<16x1xf32>
    %515 = arith.divf %514, %513 : vector<16x1xf32>
    %516 = vector.broadcast %515 : vector<16x1xf32> to vector<16x16xf32>
    %517 = arith.mulf %511, %516 : vector<16x16xf32>
    %518 = arith.mulf %517, %25 : vector<16x16xf32>
    %cst_133 = arith.constant dense<0.000000e+00> : vector<16xf32>
    %519 = vector.multi_reduction <add>, %518, %cst_133 [1] : vector<16x16xf32> to vector<16xf32>
    %520 = vector.shape_cast %519 : vector<16xf32> to vector<16x1xf32>
    %521 = arith.mulf %517, %29 : vector<16x16xf32>
    %cst_134 = arith.constant dense<0.000000e+00> : vector<16xf32>
    %522 = vector.multi_reduction <add>, %521, %cst_134 [1] : vector<16x16xf32> to vector<16xf32>
    %523 = vector.shape_cast %522 : vector<16xf32> to vector<16x1xf32>
    %524 = arith.mulf %517, %33 : vector<16x16xf32>
    %cst_135 = arith.constant dense<0.000000e+00> : vector<16xf32>
    %525 = vector.multi_reduction <add>, %524, %cst_135 [1] : vector<16x16xf32> to vector<16xf32>
    %526 = vector.shape_cast %525 : vector<16xf32> to vector<16x1xf32>
    %527 = arith.mulf %517, %37 : vector<16x16xf32>
    %cst_136 = arith.constant dense<0.000000e+00> : vector<16xf32>
    %528 = vector.multi_reduction <add>, %527, %cst_136 [1] : vector<16x16xf32> to vector<16xf32>
    %529 = vector.shape_cast %528 : vector<16xf32> to vector<16x1xf32>
    %530 = arith.mulf %517, %41 : vector<16x16xf32>
    %cst_137 = arith.constant dense<0.000000e+00> : vector<16xf32>
    %531 = vector.multi_reduction <add>, %530, %cst_137 [1] : vector<16x16xf32> to vector<16xf32>
    %532 = vector.shape_cast %531 : vector<16xf32> to vector<16x1xf32>
    %533 = arith.mulf %517, %45 : vector<16x16xf32>
    %cst_138 = arith.constant dense<0.000000e+00> : vector<16xf32>
    %534 = vector.multi_reduction <add>, %533, %cst_138 [1] : vector<16x16xf32> to vector<16xf32>
    %535 = vector.shape_cast %534 : vector<16xf32> to vector<16x1xf32>
    %536 = arith.mulf %517, %49 : vector<16x16xf32>
    %cst_139 = arith.constant dense<0.000000e+00> : vector<16xf32>
    %537 = vector.multi_reduction <add>, %536, %cst_139 [1] : vector<16x16xf32> to vector<16xf32>
    %538 = vector.shape_cast %537 : vector<16xf32> to vector<16x1xf32>
    %539 = arith.mulf %517, %53 : vector<16x16xf32>
    %cst_140 = arith.constant dense<0.000000e+00> : vector<16xf32>
    %540 = vector.multi_reduction <add>, %539, %cst_140 [1] : vector<16x16xf32> to vector<16xf32>
    %541 = vector.shape_cast %540 : vector<16xf32> to vector<16x1xf32>
    %542 = arith.mulf %517, %57 : vector<16x16xf32>
    %cst_141 = arith.constant dense<0.000000e+00> : vector<16xf32>
    %543 = vector.multi_reduction <add>, %542, %cst_141 [1] : vector<16x16xf32> to vector<16xf32>
    %544 = vector.shape_cast %543 : vector<16xf32> to vector<16x1xf32>
    %545 = tpu.concatenate %520, %523, %526, %529, %532, %535, %538, %541, %544 in 1 : vector<16x1xf32>, vector<16x1xf32>, vector<16x1xf32>, vector<16x1xf32>, vector<16x1xf32>, vector<16x1xf32>, vector<16x1xf32>, vector<16x1xf32>, vector<16x1xf32> -> vector<16x9xf32>
    %546 = arith.truncf %517 : vector<16x16xf32> to vector<16x16xbf16>
    %cst_142 = arith.constant dense<0.000000e+00> : vector<16x16xf32>
    %547 = tpu.matmul %546, %467, %cst_142 {dimension_numbers = #tpu.dot_dimension_numbers<[1], [0], [0], [1], [0, 0, 1, 1], [], []>} : vector<16x16xbf16>, vector<16x16xbf16>, vector<16x16xf32> -> vector<16x16xf32>
    %548 = arith.truncf %545 : vector<16x9xf32> to vector<16x9xbf16>
    %cst_143 = arith.constant dense<0.000000e+00> : vector<16x16xf32>
    %549 = tpu.matmul %548, %368, %cst_143 {dimension_numbers = #tpu.dot_dimension_numbers<[1], [0], [0], [1], [0, 0, 1, 1], [], []>} : vector<16x9xbf16>, vector<9x16xbf16>, vector<16x16xf32> -> vector<16x16xf32>
    %550 = arith.addf %547, %549 : vector<16x16xf32>
    %551 = tpu.concatenate %459, %550 in 1 : vector<16x16xf32>, vector<16x16xf32> -> vector<16x32xf32>
    %552 = arith.truncf %551 : vector<16x32xf32> to vector<16x32xbf16>
    %c1_144 = arith.constant 1 : index
    %c0_145 = arith.constant 0 : index
    %c0_146 = arith.constant 0 : index
    %553 = vector.load %arg5[%c1_144, %c0_145, %c0_146] : memref<2x32x32xbf16, #tpu.memory_space<vmem>>, vector<1x32x32xbf16>
    %554 = vector.shape_cast %553 : vector<1x32x32xbf16> to vector<32x32xbf16>
    %cst_147 = arith.constant dense<0.000000e+00> : vector<16x32xf32>
    %555 = tpu.matmul %552, %554, %cst_147 {dimension_numbers = #tpu.dot_dimension_numbers<[1], [0], [0], [1], [0, 0, 1, 1], [], []>} : vector<16x32xbf16>, vector<32x32xbf16>, vector<16x32xf32> -> vector<16x32xf32>
    %c1_148 = arith.constant 1 : index
    %c0_149 = arith.constant 0 : index
    %c0_150 = arith.constant 0 : index
    %556 = vector.load %arg6[%c1_148, %c0_149, %c0_150] : memref<2x1x32xf32, #tpu.memory_space<vmem>>, vector<1x1x32xf32>
    %557 = vector.shape_cast %556 : vector<1x1x32xf32> to vector<1x32xf32>
    %558 = vector.broadcast %557 : vector<1x32xf32> to vector<16x32xf32>
    %559 = arith.addf %555, %558 : vector<16x32xf32>
    %560 = arith.addf %356, %559 : vector<16x32xf32>
    %c1_151 = arith.constant 1 : index
    %c0_152 = arith.constant 0 : index
    %c0_153 = arith.constant 0 : index
    %561 = vector.load %arg9[%c1_151, %c0_152, %c0_153] : memref<2x1x32xf32, #tpu.memory_space<vmem>>, vector<1x1x32xf32>
    %562 = vector.shape_cast %561 : vector<1x1x32xf32> to vector<1x32xf32>
    %c1_154 = arith.constant 1 : index
    %c0_155 = arith.constant 0 : index
    %c0_156 = arith.constant 0 : index
    %563 = vector.load %arg10[%c1_154, %c0_155, %c0_156] : memref<2x1x32xf32, #tpu.memory_space<vmem>>, vector<1x1x32xf32>
    %564 = vector.shape_cast %563 : vector<1x1x32xf32> to vector<1x32xf32>
    %cst_157 = arith.constant dense<0.000000e+00> : vector<16xf32>
    %565 = vector.multi_reduction <add>, %560, %cst_157 [1] : vector<16x32xf32> to vector<16xf32>
    %566 = vector.shape_cast %565 : vector<16xf32> to vector<16x1xf32>
    %cst_158 = arith.constant 3.200000e+01 : f32
    %567 = vector.broadcast %cst_158 : f32 to vector<16x1xf32>
    %568 = arith.divf %566, %567 : vector<16x1xf32>
    %569 = vector.broadcast %568 : vector<16x1xf32> to vector<16x32xf32>
    %570 = arith.subf %560, %569 : vector<16x32xf32>
    %571 = arith.mulf %570, %570 : vector<16x32xf32>
    %cst_159 = arith.constant dense<0.000000e+00> : vector<16xf32>
    %572 = vector.multi_reduction <add>, %571, %cst_159 [1] : vector<16x32xf32> to vector<16xf32>
    %573 = vector.shape_cast %572 : vector<16xf32> to vector<16x1xf32>
    %cst_160 = arith.constant 3.200000e+01 : f32
    %574 = vector.broadcast %cst_160 : f32 to vector<16x1xf32>
    %575 = arith.divf %573, %574 : vector<16x1xf32>
    %576 = vector.broadcast %568 : vector<16x1xf32> to vector<16x32xf32>
    %577 = arith.subf %560, %576 : vector<16x32xf32>
    %cst_161 = arith.constant 9.99999974E-6 : f32
    %578 = vector.broadcast %cst_161 : f32 to vector<16x1xf32>
    %579 = arith.addf %575, %578 : vector<16x1xf32>
    %580 = math.rsqrt %579 : vector<16x1xf32>
    %581 = vector.broadcast %580 : vector<16x1xf32> to vector<16x32xf32>
    %582 = arith.mulf %577, %581 : vector<16x32xf32>
    %583 = vector.broadcast %562 : vector<1x32xf32> to vector<16x32xf32>
    %584 = arith.mulf %582, %583 : vector<16x32xf32>
    %585 = vector.broadcast %564 : vector<1x32xf32> to vector<16x32xf32>
    %586 = arith.addf %584, %585 : vector<16x32xf32>
    %587 = vector.broadcast %7 : vector<16x1xf32> to vector<16x32xf32>
    %588 = arith.mulf %586, %587 : vector<16x32xf32>
    %cst_162 = arith.constant 0.000000e+00 : f32
    %589 = vector.broadcast %cst_162 : f32 to vector<1x32xf32>
    %cst_163 = arith.constant 0.000000e+00 : f32
    %590 = vector.broadcast %cst_163 : f32 to vector<1x32xf32>
    %591 = tpu.concatenate %589, %588, %590 in 0 : vector<1x32xf32>, vector<16x32xf32>, vector<1x32xf32> -> vector<18x32xf32>
    %592 = vector.extract_strided_slice %591 {offsets = [0, 0], sizes = [16, 32], strides = [1, 1]} : vector<18x32xf32> to vector<16x32xf32>
    %593 = vector.extract_strided_slice %591 {offsets = [1, 0], sizes = [16, 32], strides = [1, 1]} : vector<18x32xf32> to vector<16x32xf32>
    %594 = vector.extract_strided_slice %591 {offsets = [2, 0], sizes = [16, 32], strides = [1, 1]} : vector<18x32xf32> to vector<16x32xf32>
    %595 = tpu.concatenate %592, %593, %594 in 1 : vector<16x32xf32>, vector<16x32xf32>, vector<16x32xf32> -> vector<16x96xf32>
    %596 = arith.truncf %595 : vector<16x96xf32> to vector<16x96xbf16>
    %c1_164 = arith.constant 1 : index
    %c0_165 = arith.constant 0 : index
    %c0_166 = arith.constant 0 : index
    %597 = vector.load %arg13[%c1_164, %c0_165, %c0_166] : memref<2x96x64xbf16, #tpu.memory_space<vmem>>, vector<1x96x64xbf16>
    %598 = vector.shape_cast %597 : vector<1x96x64xbf16> to vector<96x64xbf16>
    %cst_167 = arith.constant dense<0.000000e+00> : vector<16x64xf32>
    %599 = tpu.matmul %596, %598, %cst_167 {dimension_numbers = #tpu.dot_dimension_numbers<[1], [0], [0], [1], [0, 0, 1, 1], [], []>} : vector<16x96xbf16>, vector<96x64xbf16>, vector<16x64xf32> -> vector<16x64xf32>
    %c1_168 = arith.constant 1 : index
    %c0_169 = arith.constant 0 : index
    %c0_170 = arith.constant 0 : index
    %600 = vector.load %arg14[%c1_168, %c0_169, %c0_170] : memref<2x1x64xf32, #tpu.memory_space<vmem>>, vector<1x1x64xf32>
    %601 = vector.shape_cast %600 : vector<1x1x64xf32> to vector<1x64xf32>
    %602 = vector.broadcast %601 : vector<1x64xf32> to vector<16x64xf32>
    %603 = arith.addf %599, %602 : vector<16x64xf32>
    %cst_171 = arith.constant 0.000000e+00 : f32
    %604 = vector.broadcast %cst_171 : f32 to vector<16x64xf32>
    %605 = arith.maximumf %603, %604 : vector<16x64xf32>
    %606 = vector.broadcast %7 : vector<16x1xf32> to vector<16x64xf32>
    %607 = arith.mulf %605, %606 : vector<16x64xf32>
    %cst_172 = arith.constant 0.000000e+00 : f32
    %608 = vector.broadcast %cst_172 : f32 to vector<1x64xf32>
    %cst_173 = arith.constant 0.000000e+00 : f32
    %609 = vector.broadcast %cst_173 : f32 to vector<1x64xf32>
    %610 = tpu.concatenate %608, %607, %609 in 0 : vector<1x64xf32>, vector<16x64xf32>, vector<1x64xf32> -> vector<18x64xf32>
    %611 = vector.extract_strided_slice %610 {offsets = [0, 0], sizes = [16, 64], strides = [1, 1]} : vector<18x64xf32> to vector<16x64xf32>
    %612 = vector.extract_strided_slice %610 {offsets = [1, 0], sizes = [16, 64], strides = [1, 1]} : vector<18x64xf32> to vector<16x64xf32>
    %613 = vector.extract_strided_slice %610 {offsets = [2, 0], sizes = [16, 64], strides = [1, 1]} : vector<18x64xf32> to vector<16x64xf32>
    %614 = tpu.concatenate %611, %612, %613 in 1 : vector<16x64xf32>, vector<16x64xf32>, vector<16x64xf32> -> vector<16x192xf32>
    %615 = arith.truncf %614 : vector<16x192xf32> to vector<16x192xbf16>
    %c1_174 = arith.constant 1 : index
    %c0_175 = arith.constant 0 : index
    %c0_176 = arith.constant 0 : index
    %616 = vector.load %arg15[%c1_174, %c0_175, %c0_176] : memref<2x192x32xbf16, #tpu.memory_space<vmem>>, vector<1x192x32xbf16>
    %617 = vector.shape_cast %616 : vector<1x192x32xbf16> to vector<192x32xbf16>
    %cst_177 = arith.constant dense<0.000000e+00> : vector<16x32xf32>
    %618 = tpu.matmul %615, %617, %cst_177 {dimension_numbers = #tpu.dot_dimension_numbers<[1], [0], [0], [1], [0, 0, 1, 1], [], []>} : vector<16x192xbf16>, vector<192x32xbf16>, vector<16x32xf32> -> vector<16x32xf32>
    %c1_178 = arith.constant 1 : index
    %c0_179 = arith.constant 0 : index
    %c0_180 = arith.constant 0 : index
    %619 = vector.load %arg16[%c1_178, %c0_179, %c0_180] : memref<2x1x32xf32, #tpu.memory_space<vmem>>, vector<1x1x32xf32>
    %620 = vector.shape_cast %619 : vector<1x1x32xf32> to vector<1x32xf32>
    %621 = vector.broadcast %620 : vector<1x32xf32> to vector<16x32xf32>
    %622 = arith.addf %618, %621 : vector<16x32xf32>
    %623 = vector.broadcast %7 : vector<16x1xf32> to vector<16x32xf32>
    %624 = arith.mulf %622, %623 : vector<16x32xf32>
    %625 = arith.addf %586, %624 : vector<16x32xf32>
    %c1_181 = arith.constant 1 : index
    %c0_182 = arith.constant 0 : index
    %c0_183 = arith.constant 0 : index
    %626 = vector.load %arg11[%c1_181, %c0_182, %c0_183] : memref<2x1x32xf32, #tpu.memory_space<vmem>>, vector<1x1x32xf32>
    %627 = vector.shape_cast %626 : vector<1x1x32xf32> to vector<1x32xf32>
    %c1_184 = arith.constant 1 : index
    %c0_185 = arith.constant 0 : index
    %c0_186 = arith.constant 0 : index
    %628 = vector.load %arg12[%c1_184, %c0_185, %c0_186] : memref<2x1x32xf32, #tpu.memory_space<vmem>>, vector<1x1x32xf32>
    %629 = vector.shape_cast %628 : vector<1x1x32xf32> to vector<1x32xf32>
    %cst_187 = arith.constant dense<0.000000e+00> : vector<16xf32>
    %630 = vector.multi_reduction <add>, %625, %cst_187 [1] : vector<16x32xf32> to vector<16xf32>
    %631 = vector.shape_cast %630 : vector<16xf32> to vector<16x1xf32>
    %cst_188 = arith.constant 3.200000e+01 : f32
    %632 = vector.broadcast %cst_188 : f32 to vector<16x1xf32>
    %633 = arith.divf %631, %632 : vector<16x1xf32>
    %634 = vector.broadcast %633 : vector<16x1xf32> to vector<16x32xf32>
    %635 = arith.subf %625, %634 : vector<16x32xf32>
    %636 = arith.mulf %635, %635 : vector<16x32xf32>
    %cst_189 = arith.constant dense<0.000000e+00> : vector<16xf32>
    %637 = vector.multi_reduction <add>, %636, %cst_189 [1] : vector<16x32xf32> to vector<16xf32>
    %638 = vector.shape_cast %637 : vector<16xf32> to vector<16x1xf32>
    %cst_190 = arith.constant 3.200000e+01 : f32
    %639 = vector.broadcast %cst_190 : f32 to vector<16x1xf32>
    %640 = arith.divf %638, %639 : vector<16x1xf32>
    %641 = vector.broadcast %633 : vector<16x1xf32> to vector<16x32xf32>
    %642 = arith.subf %625, %641 : vector<16x32xf32>
    %cst_191 = arith.constant 9.99999974E-6 : f32
    %643 = vector.broadcast %cst_191 : f32 to vector<16x1xf32>
    %644 = arith.addf %640, %643 : vector<16x1xf32>
    %645 = math.rsqrt %644 : vector<16x1xf32>
    %646 = vector.broadcast %645 : vector<16x1xf32> to vector<16x32xf32>
    %647 = arith.mulf %642, %646 : vector<16x32xf32>
    %648 = vector.broadcast %627 : vector<1x32xf32> to vector<16x32xf32>
    %649 = arith.mulf %647, %648 : vector<16x32xf32>
    %650 = vector.broadcast %629 : vector<1x32xf32> to vector<16x32xf32>
    %651 = arith.addf %649, %650 : vector<16x32xf32>
    %652 = vector.broadcast %7 : vector<16x1xf32> to vector<16x32xf32>
    %653 = arith.mulf %651, %652 : vector<16x32xf32>
    %654 = arith.truncf %653 : vector<16x32xf32> to vector<16x32xbf16>
    %c0_192 = arith.constant 0 : index
    %c0_193 = arith.constant 0 : index
    %655 = vector.load %arg17[%c0_192, %c0_193] : memref<32x16xbf16, #tpu.memory_space<vmem>>, vector<32x16xbf16>
    %cst_194 = arith.constant dense<0.000000e+00> : vector<16x16xf32>
    %656 = tpu.matmul %654, %655, %cst_194 {dimension_numbers = #tpu.dot_dimension_numbers<[1], [0], [0], [1], [0, 0, 1, 1], [], []>} : vector<16x32xbf16>, vector<32x16xbf16>, vector<16x16xf32> -> vector<16x16xf32>
    %c0_195 = arith.constant 0 : index
    %c0_196 = arith.constant 0 : index
    %657 = vector.load %arg18[%c0_195, %c0_196] : memref<1x16xf32, #tpu.memory_space<vmem>>, vector<1x16xf32>
    %658 = vector.broadcast %657 : vector<1x16xf32> to vector<16x16xf32>
    %659 = arith.addf %656, %658 : vector<16x16xf32>
    %660 = vector.broadcast %7 : vector<16x1xf32> to vector<16x16xf32>
    %661 = arith.mulf %659, %660 : vector<16x16xf32>
    %c0_197 = arith.constant 0 : index
    %c0_198 = arith.constant 0 : index
    %c0_199 = arith.constant 0 : index
    %662 = vector.load %arg19[%c0_197, %c0_198, %c0_199] : memref<1x16x48xf32, #tpu.memory_space<vmem>>, vector<1x16x32xf32>
    %663 = vector.shape_cast %662 : vector<1x16x32xf32> to vector<16x32xf32>
    %664 = vector.shape_cast %653 : vector<16x32xf32> to vector<1x16x32xf32>
    tpu.vector_store %arg19[%c0_197, %c0_198, %c0_199], %664 {strides = array<i32>} : memref<1x16x48xf32, #tpu.memory_space<vmem>>, vector<1x16x32xf32>,
    %c0_200 = arith.constant 0 : index
    %c0_201 = arith.constant 0 : index
    %c32 = arith.constant 32 : index
    %665 = vector.load %arg19[%c0_200, %c0_201, %c32] : memref<1x16x48xf32, #tpu.memory_space<vmem>>, vector<1x16x16xf32>
    %666 = vector.shape_cast %665 : vector<1x16x16xf32> to vector<16x16xf32>
    %667 = vector.shape_cast %661 : vector<16x16xf32> to vector<1x16x16xf32>
    tpu.vector_store %arg19[%c0_200, %c0_201, %c32], %667 {strides = array<i32>} : memref<1x16x48xf32, #tpu.memory_space<vmem>>, vector<1x16x16xf32>,
    return
  }
  func.func @transform_0(%arg0: i32, %arg1: memref<2xi32, #tpu.memory_space<smem>>) -> (i32, i32, i32) {
    %c0_i32 = arith.constant 0 : i32
    %c0_i32_0 = arith.constant 0 : i32
    %c0_i32_1 = arith.constant 0 : i32
    return %arg0, %c0_i32, %c0_i32_0 : i32, i32, i32
  }
  func.func @transform_1(%arg0: i32, %arg1: memref<2xi32, #tpu.memory_space<smem>>) -> (i32, i32, i32) {
    %c0_i32 = arith.constant 0 : i32
    %c0_i32_0 = arith.constant 0 : i32
    %c0_i32_1 = arith.constant 0 : i32
    %c0_i32_2 = arith.constant 0 : i32
    return %c0_i32, %c0_i32_0, %c0_i32_1 : i32, i32, i32
  }
  func.func @transform_2(%arg0: i32, %arg1: memref<2xi32, #tpu.memory_space<smem>>) -> (i32, i32, i32) {
    %c0_i32 = arith.constant 0 : i32
    %c0_i32_0 = arith.constant 0 : i32
    %c0_i32_1 = arith.constant 0 : i32
    %c0_i32_2 = arith.constant 0 : i32
    return %c0_i32, %c0_i32_0, %c0_i32_1 : i32, i32, i32
  }
  func.func @transform_3(%arg0: i32, %arg1: memref<2xi32, #tpu.memory_space<smem>>) -> (i32, i32, i32) {
    %c0_i32 = arith.constant 0 : i32
    %c0_i32_0 = arith.constant 0 : i32
    %c0_i32_1 = arith.constant 0 : i32
    %c0_i32_2 = arith.constant 0 : i32
    return %c0_i32, %c0_i32_0, %c0_i32_1 : i32, i32, i32
  }
  func.func @transform_4(%arg0: i32, %arg1: memref<2xi32, #tpu.memory_space<smem>>) -> (i32, i32, i32) {
    %c0_i32 = arith.constant 0 : i32
    %c0_i32_0 = arith.constant 0 : i32
    %c0_i32_1 = arith.constant 0 : i32
    %c0_i32_2 = arith.constant 0 : i32
    return %c0_i32, %c0_i32_0, %c0_i32_1 : i32, i32, i32
  }
  func.func @transform_5(%arg0: i32, %arg1: memref<2xi32, #tpu.memory_space<smem>>) -> (i32, i32, i32) {
    %c0_i32 = arith.constant 0 : i32
    %c0_i32_0 = arith.constant 0 : i32
    %c0_i32_1 = arith.constant 0 : i32
    %c0_i32_2 = arith.constant 0 : i32
    return %c0_i32, %c0_i32_0, %c0_i32_1 : i32, i32, i32
  }
  func.func @transform_6(%arg0: i32, %arg1: memref<2xi32, #tpu.memory_space<smem>>) -> (i32, i32, i32) {
    %c0_i32 = arith.constant 0 : i32
    %c0_i32_0 = arith.constant 0 : i32
    %c0_i32_1 = arith.constant 0 : i32
    %c0_i32_2 = arith.constant 0 : i32
    return %c0_i32, %c0_i32_0, %c0_i32_1 : i32, i32, i32
  }
  func.func @transform_7(%arg0: i32, %arg1: memref<2xi32, #tpu.memory_space<smem>>) -> (i32, i32, i32) {
    %c0_i32 = arith.constant 0 : i32
    %c0_i32_0 = arith.constant 0 : i32
    %c0_i32_1 = arith.constant 0 : i32
    %c0_i32_2 = arith.constant 0 : i32
    return %c0_i32, %c0_i32_0, %c0_i32_1 : i32, i32, i32
  }
  func.func @transform_8(%arg0: i32, %arg1: memref<2xi32, #tpu.memory_space<smem>>) -> (i32, i32, i32) {
    %c0_i32 = arith.constant 0 : i32
    %c0_i32_0 = arith.constant 0 : i32
    %c0_i32_1 = arith.constant 0 : i32
    %c0_i32_2 = arith.constant 0 : i32
    return %c0_i32, %c0_i32_0, %c0_i32_1 : i32, i32, i32
  }
  func.func @transform_9(%arg0: i32, %arg1: memref<2xi32, #tpu.memory_space<smem>>) -> (i32, i32, i32) {
    %c0_i32 = arith.constant 0 : i32
    %c0_i32_0 = arith.constant 0 : i32
    %c0_i32_1 = arith.constant 0 : i32
    %c0_i32_2 = arith.constant 0 : i32
    return %c0_i32, %c0_i32_0, %c0_i32_1 : i32, i32, i32
  }
  func.func @transform_10(%arg0: i32, %arg1: memref<2xi32, #tpu.memory_space<smem>>) -> (i32, i32, i32) {
    %c0_i32 = arith.constant 0 : i32
    %c0_i32_0 = arith.constant 0 : i32
    %c0_i32_1 = arith.constant 0 : i32
    %c0_i32_2 = arith.constant 0 : i32
    return %c0_i32, %c0_i32_0, %c0_i32_1 : i32, i32, i32
  }
  func.func @transform_11(%arg0: i32, %arg1: memref<2xi32, #tpu.memory_space<smem>>) -> (i32, i32, i32) {
    %c0_i32 = arith.constant 0 : i32
    %c0_i32_0 = arith.constant 0 : i32
    %c0_i32_1 = arith.constant 0 : i32
    %c0_i32_2 = arith.constant 0 : i32
    return %c0_i32, %c0_i32_0, %c0_i32_1 : i32, i32, i32
  }
  func.func @transform_12(%arg0: i32, %arg1: memref<2xi32, #tpu.memory_space<smem>>) -> (i32, i32, i32) {
    %c0_i32 = arith.constant 0 : i32
    %c0_i32_0 = arith.constant 0 : i32
    %c0_i32_1 = arith.constant 0 : i32
    %c0_i32_2 = arith.constant 0 : i32
    return %c0_i32, %c0_i32_0, %c0_i32_1 : i32, i32, i32
  }
  func.func @transform_13(%arg0: i32, %arg1: memref<2xi32, #tpu.memory_space<smem>>) -> (i32, i32, i32) {
    %c0_i32 = arith.constant 0 : i32
    %c0_i32_0 = arith.constant 0 : i32
    %c0_i32_1 = arith.constant 0 : i32
    %c0_i32_2 = arith.constant 0 : i32
    return %c0_i32, %c0_i32_0, %c0_i32_1 : i32, i32, i32
  }
  func.func @transform_14(%arg0: i32, %arg1: memref<2xi32, #tpu.memory_space<smem>>) -> (i32, i32, i32) {
    %c0_i32 = arith.constant 0 : i32
    %c0_i32_0 = arith.constant 0 : i32
    %c0_i32_1 = arith.constant 0 : i32
    %c0_i32_2 = arith.constant 0 : i32
    return %c0_i32, %c0_i32_0, %c0_i32_1 : i32, i32, i32
  }
  func.func @transform_15(%arg0: i32, %arg1: memref<2xi32, #tpu.memory_space<smem>>) -> (i32, i32) {
    %c0_i32 = arith.constant 0 : i32
    %c0_i32_0 = arith.constant 0 : i32
    %c0_i32_1 = arith.constant 0 : i32
    return %c0_i32, %c0_i32_0 : i32, i32
  }
  func.func @transform_16(%arg0: i32, %arg1: memref<2xi32, #tpu.memory_space<smem>>) -> (i32, i32) {
    %c0_i32 = arith.constant 0 : i32
    %c0_i32_0 = arith.constant 0 : i32
    %c0_i32_1 = arith.constant 0 : i32
    return %c0_i32, %c0_i32_0 : i32, i32
  }
  func.func @transform_17(%arg0: i32, %arg1: memref<2xi32, #tpu.memory_space<smem>>) -> (i32, i32, i32) {
    %c0_i32 = arith.constant 0 : i32
    %c0_i32_0 = arith.constant 0 : i32
    %c0_i32_1 = arith.constant 0 : i32
    return %arg0, %c0_i32, %c0_i32_0 : i32, i32, i32
  }
}

module attributes {stable_mosaic.version = 11 : i64} {
  func.func @text_encoder_kernel(%arg0: i32, %arg1: memref<2xi32, #tpu.memory_space<smem>>, %arg2: memref<1x16x32xf32, #tpu.memory_space<vmem>>, %arg3: memref<2x32x96xbf16, #tpu.memory_space<vmem>>, %arg4: memref<2x1x96xf32, #tpu.memory_space<vmem>>, %arg5: memref<2x32x32xbf16, #tpu.memory_space<vmem>>, %arg6: memref<2x1x32xf32, #tpu.memory_space<vmem>>, %arg7: memref<2x9x16xbf16, #tpu.memory_space<vmem>>, %arg8: memref<2x9x16xbf16, #tpu.memory_space<vmem>>, %arg9: memref<2x1x32xf32, #tpu.memory_space<vmem>>, %arg10: memref<2x1x32xf32, #tpu.memory_space<vmem>>, %arg11: memref<2x1x32xf32, #tpu.memory_space<vmem>>, %arg12: memref<2x1x32xf32, #tpu.memory_space<vmem>>, %arg13: memref<2x96x64xbf16, #tpu.memory_space<vmem>>, %arg14: memref<2x1x64xf32, #tpu.memory_space<vmem>>, %arg15: memref<2x192x32xbf16, #tpu.memory_space<vmem>>, %arg16: memref<2x1x32xf32, #tpu.memory_space<vmem>>, %arg17: memref<32x16xbf16, #tpu.memory_space<vmem>>, %arg18: memref<1x16xf32, #tpu.memory_space<vmem>>, %arg19: memref<1x16x48xf32, #tpu.memory_space<vmem>>) attributes {dimension_semantics = [#tpu.dimension_semantics<parallel>], iteration_bounds = array<i64: 2>, scalar_prefetch = 1 : i64, scratch_operands = 0 : i64, tpu.core_type = #tpu.core_type<tc>, window_params = [{transform_indices = @transform_0, window_bounds = array<i64: 1, 16, 32>}, {pipeline_mode = #tpu.pipeline_mode<synchronous>, transform_indices = @transform_1, window_bounds = array<i64: 2, 32, 96>}, {pipeline_mode = #tpu.pipeline_mode<synchronous>, transform_indices = @transform_2, window_bounds = array<i64: 2, 1, 96>}, {pipeline_mode = #tpu.pipeline_mode<synchronous>, transform_indices = @transform_3, window_bounds = array<i64: 2, 32, 32>}, {pipeline_mode = #tpu.pipeline_mode<synchronous>, transform_indices = @transform_4, window_bounds = array<i64: 2, 1, 32>}, {pipeline_mode = #tpu.pipeline_mode<synchronous>, transform_indices = @transform_5, window_bounds = array<i64: 2, 9, 16>}, {pipeline_mode = #tpu.pipeline_mode<synchronous>, transform_indices = @transform_6, window_bounds = array<i64: 2, 9, 16>}, {pipeline_mode = #tpu.pipeline_mode<synchronous>, transform_indices = @transform_7, window_bounds = array<i64: 2, 1, 32>}, {pipeline_mode = #tpu.pipeline_mode<synchronous>, transform_indices = @transform_8, window_bounds = array<i64: 2, 1, 32>}, {pipeline_mode = #tpu.pipeline_mode<synchronous>, transform_indices = @transform_9, window_bounds = array<i64: 2, 1, 32>}, {pipeline_mode = #tpu.pipeline_mode<synchronous>, transform_indices = @transform_10, window_bounds = array<i64: 2, 1, 32>}, {pipeline_mode = #tpu.pipeline_mode<synchronous>, transform_indices = @transform_11, window_bounds = array<i64: 2, 96, 64>}, {pipeline_mode = #tpu.pipeline_mode<synchronous>, transform_indices = @transform_12, window_bounds = array<i64: 2, 1, 64>}, {pipeline_mode = #tpu.pipeline_mode<synchronous>, transform_indices = @transform_13, window_bounds = array<i64: 2, 192, 32>}, {pipeline_mode = #tpu.pipeline_mode<synchronous>, transform_indices = @transform_14, window_bounds = array<i64: 2, 1, 32>}, {pipeline_mode = #tpu.pipeline_mode<synchronous>, transform_indices = @transform_15, window_bounds = array<i64: 32, 16>}, {pipeline_mode = #tpu.pipeline_mode<synchronous>, transform_indices = @transform_16, window_bounds = array<i64: 1, 16>}, {transform_indices = @transform_17, window_bounds = array<i64: 1, 16, 48>}]} {
    %0 = arith.index_cast %arg0 : i32 to index
    %1 = memref.load %arg1[%0] : memref<2xi32, #tpu.memory_space<smem>>
    %2 = tpu.iota {dimensions = array<i32: 0>} : vector<16x1xi32>
    %3 = tpu.iota {dimensions = array<i32: 1>} : vector<1x16xi32>
    %4 = vector.broadcast %1 : i32 to vector<16x1xi32>
    %5 = arith.cmpi slt, %2, %4 : vector<16x1xi32>
    %6 = arith.extui %5 : vector<16x1xi1> to vector<16x1xi32>
    %7 = arith.sitofp %6 : vector<16x1xi32> to vector<16x1xf32>
    %8 = vector.broadcast %1 : i32 to vector<1x16xi32>
    %9 = arith.cmpi slt, %3, %8 : vector<1x16xi32>
    %10 = arith.extui %9 : vector<1x16xi1> to vector<1x16xi32>
    %11 = arith.sitofp %10 : vector<1x16xi32> to vector<1x16xf32>
    %12 = vector.broadcast %7 : vector<16x1xf32> to vector<16x16xf32>
    %13 = vector.broadcast %11 : vector<1x16xf32> to vector<16x16xf32>
    %14 = arith.mulf %12, %13 : vector<16x16xf32>
    %cst = arith.constant 1.000000e+00 : f32
    %15 = vector.broadcast %cst : f32 to vector<16x16xf32>
    %16 = arith.subf %14, %15 : vector<16x16xf32>
    %cst_0 = arith.constant 1.000000e+04 : f32
    %17 = vector.broadcast %cst_0 : f32 to vector<16x16xf32>
    %18 = arith.mulf %16, %17 : vector<16x16xf32>
    %19 = tpu.iota {dimensions = array<i32: 1>} : vector<16x16xi32>
    %20 = tpu.iota {dimensions = array<i32: 0>} : vector<16x16xi32>
    %21 = arith.subi %19, %20 : vector<16x16xi32>
    %c-4_i32 = arith.constant -4 : i32
    %22 = vector.broadcast %c-4_i32 : i32 to vector<16x16xi32>
    %23 = arith.cmpi eq, %21, %22 : vector<16x16xi32>
    %24 = arith.extui %23 : vector<16x16xi1> to vector<16x16xi32>
    %25 = arith.sitofp %24 : vector<16x16xi32> to vector<16x16xf32>
    %c-3_i32 = arith.constant -3 : i32
    %26 = vector.broadcast %c-3_i32 : i32 to vector<16x16xi32>
    %27 = arith.cmpi eq, %21, %26 : vector<16x16xi32>
    %28 = arith.extui %27 : vector<16x16xi1> to vector<16x16xi32>
    %29 = arith.sitofp %28 : vector<16x16xi32> to vector<16x16xf32>
    %c-2_i32 = arith.constant -2 : i32
    %30 = vector.broadcast %c-2_i32 : i32 to vector<16x16xi32>
    %31 = arith.cmpi eq, %21, %30 : vector<16x16xi32>
    %32 = arith.extui %31 : vector<16x16xi1> to vector<16x16xi32>
    %33 = arith.sitofp %32 : vector<16x16xi32> to vector<16x16xf32>
    %c-1_i32 = arith.constant -1 : i32
    %34 = vector.broadcast %c-1_i32 : i32 to vector<16x16xi32>
    %35 = arith.cmpi eq, %21, %34 : vector<16x16xi32>
    %36 = arith.extui %35 : vector<16x16xi1> to vector<16x16xi32>
    %37 = arith.sitofp %36 : vector<16x16xi32> to vector<16x16xf32>
    %c0_i32 = arith.constant 0 : i32
    %38 = vector.broadcast %c0_i32 : i32 to vector<16x16xi32>
    %39 = arith.cmpi eq, %21, %38 : vector<16x16xi32>
    %40 = arith.extui %39 : vector<16x16xi1> to vector<16x16xi32>
    %41 = arith.sitofp %40 : vector<16x16xi32> to vector<16x16xf32>
    %c1_i32 = arith.constant 1 : i32
    %42 = vector.broadcast %c1_i32 : i32 to vector<16x16xi32>
    %43 = arith.cmpi eq, %21, %42 : vector<16x16xi32>
    %44 = arith.extui %43 : vector<16x16xi1> to vector<16x16xi32>
    %45 = arith.sitofp %44 : vector<16x16xi32> to vector<16x16xf32>
    %c2_i32 = arith.constant 2 : i32
    %46 = vector.broadcast %c2_i32 : i32 to vector<16x16xi32>
    %47 = arith.cmpi eq, %21, %46 : vector<16x16xi32>
    %48 = arith.extui %47 : vector<16x16xi1> to vector<16x16xi32>
    %49 = arith.sitofp %48 : vector<16x16xi32> to vector<16x16xf32>
    %c3_i32 = arith.constant 3 : i32
    %50 = vector.broadcast %c3_i32 : i32 to vector<16x16xi32>
    %51 = arith.cmpi eq, %21, %50 : vector<16x16xi32>
    %52 = arith.extui %51 : vector<16x16xi1> to vector<16x16xi32>
    %53 = arith.sitofp %52 : vector<16x16xi32> to vector<16x16xf32>
    %c4_i32 = arith.constant 4 : i32
    %54 = vector.broadcast %c4_i32 : i32 to vector<16x16xi32>
    %55 = arith.cmpi eq, %21, %54 : vector<16x16xi32>
    %56 = arith.extui %55 : vector<16x16xi1> to vector<16x16xi32>
    %57 = arith.sitofp %56 : vector<16x16xi32> to vector<16x16xf32>
    %c0 = arith.constant 0 : index
    %c0_1 = arith.constant 0 : index
    %c0_2 = arith.constant 0 : index
    %58 = vector.load %arg2[%c0, %c0_1, %c0_2] : memref<1x16x32xf32, #tpu.memory_space<vmem>>, vector<1x16x32xf32>
    %59 = vector.shape_cast %58 : vector<1x16x32xf32> to vector<16x32xf32>
    %60 = vector.broadcast %7 : vector<16x1xf32> to vector<16x32xf32>
    %61 = arith.mulf %59, %60 : vector<16x32xf32>
    %62 = arith.truncf %61 : vector<16x32xf32> to vector<16x32xbf16>
    %c0_3 = arith.constant 0 : index
    %c0_4 = arith.constant 0 : index
    %c0_5 = arith.constant 0 : index
    %63 = vector.load %arg3[%c0_3, %c0_4, %c0_5] : memref<2x32x96xbf16, #tpu.memory_space<vmem>>, vector<1x32x96xbf16>
    %64 = vector.shape_cast %63 : vector<1x32x96xbf16> to vector<32x96xbf16>
    %cst_6 = arith.constant dense<0.000000e+00> : vector<16x96xf32>
    %65 = tpu.matmul %62, %64, %cst_6 {dimension_numbers = #tpu.dot_dimension_numbers<[1], [0], [0], [1], [0, 0, 1, 1], [], []>} : vector<16x32xbf16>, vector<32x96xbf16>, vector<16x96xf32> -> vector<16x96xf32>
    %c0_7 = arith.constant 0 : index
    %c0_8 = arith.constant 0 : index
    %c0_9 = arith.constant 0 : index
    %66 = vector.load %arg4[%c0_7, %c0_8, %c0_9] : memref<2x1x96xf32, #tpu.memory_space<vmem>>, vector<1x1x96xf32>
    %67 = vector.shape_cast %66 : vector<1x1x96xf32> to vector<1x96xf32>
    %68 = vector.broadcast %67 : vector<1x96xf32> to vector<16x96xf32>
    %69 = arith.addf %65, %68 : vector<16x96xf32>
    %c0_10 = arith.constant 0 : index
    %c0_11 = arith.constant 0 : index
    %c0_12 = arith.constant 0 : index
    %70 = vector.load %arg7[%c0_10, %c0_11, %c0_12] : memref<2x9x16xbf16, #tpu.memory_space<vmem>>, vector<1x9x16xbf16>
    %71 = vector.shape_cast %70 : vector<1x9x16xbf16> to vector<9x16xbf16>
    %c0_13 = arith.constant 0 : index
    %c0_14 = arith.constant 0 : index
    %c0_15 = arith.constant 0 : index
    %72 = vector.load %arg8[%c0_13, %c0_14, %c0_15] : memref<2x9x16xbf16, #tpu.memory_space<vmem>>, vector<1x9x16xbf16>
    %73 = vector.shape_cast %72 : vector<1x9x16xbf16> to vector<9x16xbf16>
    %74 = vector.extract_strided_slice %69 {offsets = [0, 0], sizes = [16, 16], strides = [1, 1]} : vector<16x96xf32> to vector<16x16xf32>
    %cst_16 = arith.constant 2.500000e-01 : f32
    %75 = vector.broadcast %cst_16 : f32 to vector<16x16xf32>
    %76 = arith.mulf %74, %75 : vector<16x16xf32>
    %77 = vector.extract_strided_slice %69 {offsets = [0, 32], sizes = [16, 16], strides = [1, 1]} : vector<16x96xf32> to vector<16x16xf32>
    %78 = vector.extract_strided_slice %69 {offsets = [0, 64], sizes = [16, 16], strides = [1, 1]} : vector<16x96xf32> to vector<16x16xf32>
    %79 = arith.truncf %76 : vector<16x16xf32> to vector<16x16xbf16>
    %80 = arith.truncf %77 : vector<16x16xf32> to vector<16x16xbf16>
    %81 = arith.truncf %78 : vector<16x16xf32> to vector<16x16xbf16>
    %cst_17 = arith.constant dense<0.000000e+00> : vector<16x16xf32>
    %82 = tpu.matmul %79, %80, %cst_17 {dimension_numbers = #tpu.dot_dimension_numbers<[1], [1], [0], [0], [0, 0, 1, 0], [], []>} : vector<16x16xbf16>, vector<16x16xbf16>, vector<16x16xf32> -> vector<16x16xf32>
    %83 = arith.addf %82, %18 : vector<16x16xf32>
    %cst_18 = arith.constant dense<0.000000e+00> : vector<16x9xf32>
    %84 = tpu.matmul %79, %71, %cst_18 {dimension_numbers = #tpu.dot_dimension_numbers<[1], [1], [0], [0], [0, 0, 1, 0], [], []>} : vector<16x16xbf16>, vector<9x16xbf16>, vector<16x9xf32> -> vector<16x9xf32>
    %85 = vector.extract_strided_slice %84 {offsets = [0, 0], sizes = [16, 1], strides = [1, 1]} : vector<16x9xf32> to vector<16x1xf32>
    %86 = vector.broadcast %85 : vector<16x1xf32> to vector<16x16xf32>
    %87 = arith.mulf %86, %25 : vector<16x16xf32>
    %88 = arith.addf %83, %87 : vector<16x16xf32>
    %89 = vector.extract_strided_slice %84 {offsets = [0, 1], sizes = [16, 1], strides = [1, 1]} : vector<16x9xf32> to vector<16x1xf32>
    %90 = vector.broadcast %89 : vector<16x1xf32> to vector<16x16xf32>
    %91 = arith.mulf %90, %29 : vector<16x16xf32>
    %92 = arith.addf %88, %91 : vector<16x16xf32>
    %93 = vector.extract_strided_slice %84 {offsets = [0, 2], sizes = [16, 1], strides = [1, 1]} : vector<16x9xf32> to vector<16x1xf32>
    %94 = vector.broadcast %93 : vector<16x1xf32> to vector<16x16xf32>
    %95 = arith.mulf %94, %33 : vector<16x16xf32>
    %96 = arith.addf %92, %95 : vector<16x16xf32>
    %97 = vector.extract_strided_slice %84 {offsets = [0, 3], sizes = [16, 1], strides = [1, 1]} : vector<16x9xf32> to vector<16x1xf32>
    %98 = vector.broadcast %97 : vector<16x1xf32> to vector<16x16xf32>
    %99 = arith.mulf %98, %37 : vector<16x16xf32>
    %100 = arith.addf %96, %99 : vector<16x16xf32>
    %101 = vector.extract_strided_slice %84 {offsets = [0, 4], sizes = [16, 1], strides = [1, 1]} : vector<16x9xf32> to vector<16x1xf32>
    %102 = vector.broadcast %101 : vector<16x1xf32> to vector<16x16xf32>
    %103 = arith.mulf %102, %41 : vector<16x16xf32>
    %104 = arith.addf %100, %103 : vector<16x16xf32>
    %105 = vector.extract_strided_slice %84 {offsets = [0, 5], sizes = [16, 1], strides = [1, 1]} : vector<16x9xf32> to vector<16x1xf32>
    %106 = vector.broadcast %105 : vector<16x1xf32> to vector<16x16xf32>
    %107 = arith.mulf %106, %45 : vector<16x16xf32>
    %108 = arith.addf %104, %107 : vector<16x16xf32>
    %109 = vector.extract_strided_slice %84 {offsets = [0, 6], sizes = [16, 1], strides = [1, 1]} : vector<16x9xf32> to vector<16x1xf32>
    %110 = vector.broadcast %109 : vector<16x1xf32> to vector<16x16xf32>
    %111 = arith.mulf %110, %49 : vector<16x16xf32>
    %112 = arith.addf %108, %111 : vector<16x16xf32>
    %113 = vector.extract_strided_slice %84 {offsets = [0, 7], sizes = [16, 1], strides = [1, 1]} : vector<16x9xf32> to vector<16x1xf32>
    %114 = vector.broadcast %113 : vector<16x1xf32> to vector<16x16xf32>
    %115 = arith.mulf %114, %53 : vector<16x16xf32>
    %116 = arith.addf %112, %115 : vector<16x16xf32>
    %117 = vector.extract_strided_slice %84 {offsets = [0, 8], sizes = [16, 1], strides = [1, 1]} : vector<16x9xf32> to vector<16x1xf32>
    %118 = vector.broadcast %117 : vector<16x1xf32> to vector<16x16xf32>
    %119 = arith.mulf %118, %57 : vector<16x16xf32>
    %120 = arith.addf %116, %119 : vector<16x16xf32>
    %cst_19 = arith.constant dense<0xFF800000> : vector<16xf32>
    %121 = vector.multi_reduction <maximumf>, %120, %cst_19 [1] : vector<16x16xf32> to vector<16xf32>
    %122 = vector.shape_cast %121 : vector<16xf32> to vector<16x1xf32>
    %123 = vector.broadcast %122 : vector<16x1xf32> to vector<16x16xf32>
    %124 = arith.subf %120, %123 : vector<16x16xf32>
    %125 = math.exp %124 : vector<16x16xf32>
    %cst_20 = arith.constant dense<0.000000e+00> : vector<16xf32>
    %126 = vector.multi_reduction <add>, %125, %cst_20 [1] : vector<16x16xf32> to vector<16xf32>
    %127 = vector.shape_cast %126 : vector<16xf32> to vector<16x1xf32>
    %cst_21 = arith.constant 1.000000e+00 : f32
    %128 = vector.broadcast %cst_21 : f32 to vector<16x1xf32>
    %129 = arith.divf %128, %127 : vector<16x1xf32>
    %130 = vector.broadcast %129 : vector<16x1xf32> to vector<16x16xf32>
    %131 = arith.mulf %125, %130 : vector<16x16xf32>
    %132 = arith.mulf %131, %25 : vector<16x16xf32>
    %cst_22 = arith.constant dense<0.000000e+00> : vector<16xf32>
    %133 = vector.multi_reduction <add>, %132, %cst_22 [1] : vector<16x16xf32> to vector<16xf32>
    %134 = vector.shape_cast %133 : vector<16xf32> to vector<16x1xf32>
    %135 = arith.mulf %131, %29 : vector<16x16xf32>
    %cst_23 = arith.constant dense<0.000000e+00> : vector<16xf32>
    %136 = vector.multi_reduction <add>, %135, %cst_23 [1] : vector<16x16xf32> to vector<16xf32>
    %137 = vector.shape_cast %136 : vector<16xf32> to vector<16x1xf32>
    %138 = arith.mulf %131, %33 : vector<16x16xf32>
    %cst_24 = arith.constant dense<0.000000e+00> : vector<16xf32>
    %139 = vector.multi_reduction <add>, %138, %cst_24 [1] : vector<16x16xf32> to vector<16xf32>
    %140 = vector.shape_cast %139 : vector<16xf32> to vector<16x1xf32>
    %141 = arith.mulf %131, %37 : vector<16x16xf32>
    %cst_25 = arith.constant dense<0.000000e+00> : vector<16xf32>
    %142 = vector.multi_reduction <add>, %141, %cst_25 [1] : vector<16x16xf32> to vector<16xf32>
    %143 = vector.shape_cast %142 : vector<16xf32> to vector<16x1xf32>
    %144 = arith.mulf %131, %41 : vector<16x16xf32>
    %cst_26 = arith.constant dense<0.000000e+00> : vector<16xf32>
    %145 = vector.multi_reduction <add>, %144, %cst_26 [1] : vector<16x16xf32> to vector<16xf32>
    %146 = vector.shape_cast %145 : vector<16xf32> to vector<16x1xf32>
    %147 = arith.mulf %131, %45 : vector<16x16xf32>
    %cst_27 = arith.constant dense<0.000000e+00> : vector<16xf32>
    %148 = vector.multi_reduction <add>, %147, %cst_27 [1] : vector<16x16xf32> to vector<16xf32>
    %149 = vector.shape_cast %148 : vector<16xf32> to vector<16x1xf32>
    %150 = arith.mulf %131, %49 : vector<16x16xf32>
    %cst_28 = arith.constant dense<0.000000e+00> : vector<16xf32>
    %151 = vector.multi_reduction <add>, %150, %cst_28 [1] : vector<16x16xf32> to vector<16xf32>
    %152 = vector.shape_cast %151 : vector<16xf32> to vector<16x1xf32>
    %153 = arith.mulf %131, %53 : vector<16x16xf32>
    %cst_29 = arith.constant dense<0.000000e+00> : vector<16xf32>
    %154 = vector.multi_reduction <add>, %153, %cst_29 [1] : vector<16x16xf32> to vector<16xf32>
    %155 = vector.shape_cast %154 : vector<16xf32> to vector<16x1xf32>
    %156 = arith.mulf %131, %57 : vector<16x16xf32>
    %cst_30 = arith.constant dense<0.000000e+00> : vector<16xf32>
    %157 = vector.multi_reduction <add>, %156, %cst_30 [1] : vector<16x16xf32> to vector<16xf32>
    %158 = vector.shape_cast %157 : vector<16xf32> to vector<16x1xf32>
    %159 = tpu.concatenate %134, %137, %140, %143, %146, %149, %152, %155, %158 in 1 : vector<16x1xf32>, vector<16x1xf32>, vector<16x1xf32>, vector<16x1xf32>, vector<16x1xf32>, vector<16x1xf32>, vector<16x1xf32>, vector<16x1xf32>, vector<16x1xf32> -> vector<16x9xf32>
    %160 = arith.truncf %131 : vector<16x16xf32> to vector<16x16xbf16>
    %cst_31 = arith.constant dense<0.000000e+00> : vector<16x16xf32>
    %161 = tpu.matmul %160, %81, %cst_31 {dimension_numbers = #tpu.dot_dimension_numbers<[1], [0], [0], [1], [0, 0, 1, 1], [], []>} : vector<16x16xbf16>, vector<16x16xbf16>, vector<16x16xf32> -> vector<16x16xf32>
    %162 = arith.truncf %159 : vector<16x9xf32> to vector<16x9xbf16>
    %cst_32 = arith.constant dense<0.000000e+00> : vector<16x16xf32>
    %163 = tpu.matmul %162, %73, %cst_32 {dimension_numbers = #tpu.dot_dimension_numbers<[1], [0], [0], [1], [0, 0, 1, 1], [], []>} : vector<16x9xbf16>, vector<9x16xbf16>, vector<16x16xf32> -> vector<16x16xf32>
    %164 = arith.addf %161, %163 : vector<16x16xf32>
    %165 = vector.extract_strided_slice %69 {offsets = [0, 16], sizes = [16, 16], strides = [1, 1]} : vector<16x96xf32> to vector<16x16xf32>
    %cst_33 = arith.constant 2.500000e-01 : f32
    %166 = vector.broadcast %cst_33 : f32 to vector<16x16xf32>
    %167 = arith.mulf %165, %166 : vector<16x16xf32>
    %168 = vector.extract_strided_slice %69 {offsets = [0, 48], sizes = [16, 16], strides = [1, 1]} : vector<16x96xf32> to vector<16x16xf32>
    %169 = vector.extract_strided_slice %69 {offsets = [0, 80], sizes = [16, 16], strides = [1, 1]} : vector<16x96xf32> to vector<16x16xf32>
    %170 = arith.truncf %167 : vector<16x16xf32> to vector<16x16xbf16>
    %171 = arith.truncf %168 : vector<16x16xf32> to vector<16x16xbf16>
    %172 = arith.truncf %169 : vector<16x16xf32> to vector<16x16xbf16>
    %cst_34 = arith.constant dense<0.000000e+00> : vector<16x16xf32>
    %173 = tpu.matmul %170, %171, %cst_34 {dimension_numbers = #tpu.dot_dimension_numbers<[1], [1], [0], [0], [0, 0, 1, 0], [], []>} : vector<16x16xbf16>, vector<16x16xbf16>, vector<16x16xf32> -> vector<16x16xf32>
    %174 = arith.addf %173, %18 : vector<16x16xf32>
    %cst_35 = arith.constant dense<0.000000e+00> : vector<16x9xf32>
    %175 = tpu.matmul %170, %71, %cst_35 {dimension_numbers = #tpu.dot_dimension_numbers<[1], [1], [0], [0], [0, 0, 1, 0], [], []>} : vector<16x16xbf16>, vector<9x16xbf16>, vector<16x9xf32> -> vector<16x9xf32>
    %176 = vector.extract_strided_slice %175 {offsets = [0, 0], sizes = [16, 1], strides = [1, 1]} : vector<16x9xf32> to vector<16x1xf32>
    %177 = vector.broadcast %176 : vector<16x1xf32> to vector<16x16xf32>
    %178 = arith.mulf %177, %25 : vector<16x16xf32>
    %179 = arith.addf %174, %178 : vector<16x16xf32>
    %180 = vector.extract_strided_slice %175 {offsets = [0, 1], sizes = [16, 1], strides = [1, 1]} : vector<16x9xf32> to vector<16x1xf32>
    %181 = vector.broadcast %180 : vector<16x1xf32> to vector<16x16xf32>
    %182 = arith.mulf %181, %29 : vector<16x16xf32>
    %183 = arith.addf %179, %182 : vector<16x16xf32>
    %184 = vector.extract_strided_slice %175 {offsets = [0, 2], sizes = [16, 1], strides = [1, 1]} : vector<16x9xf32> to vector<16x1xf32>
    %185 = vector.broadcast %184 : vector<16x1xf32> to vector<16x16xf32>
    %186 = arith.mulf %185, %33 : vector<16x16xf32>
    %187 = arith.addf %183, %186 : vector<16x16xf32>
    %188 = vector.extract_strided_slice %175 {offsets = [0, 3], sizes = [16, 1], strides = [1, 1]} : vector<16x9xf32> to vector<16x1xf32>
    %189 = vector.broadcast %188 : vector<16x1xf32> to vector<16x16xf32>
    %190 = arith.mulf %189, %37 : vector<16x16xf32>
    %191 = arith.addf %187, %190 : vector<16x16xf32>
    %192 = vector.extract_strided_slice %175 {offsets = [0, 4], sizes = [16, 1], strides = [1, 1]} : vector<16x9xf32> to vector<16x1xf32>
    %193 = vector.broadcast %192 : vector<16x1xf32> to vector<16x16xf32>
    %194 = arith.mulf %193, %41 : vector<16x16xf32>
    %195 = arith.addf %191, %194 : vector<16x16xf32>
    %196 = vector.extract_strided_slice %175 {offsets = [0, 5], sizes = [16, 1], strides = [1, 1]} : vector<16x9xf32> to vector<16x1xf32>
    %197 = vector.broadcast %196 : vector<16x1xf32> to vector<16x16xf32>
    %198 = arith.mulf %197, %45 : vector<16x16xf32>
    %199 = arith.addf %195, %198 : vector<16x16xf32>
    %200 = vector.extract_strided_slice %175 {offsets = [0, 6], sizes = [16, 1], strides = [1, 1]} : vector<16x9xf32> to vector<16x1xf32>
    %201 = vector.broadcast %200 : vector<16x1xf32> to vector<16x16xf32>
    %202 = arith.mulf %201, %49 : vector<16x16xf32>
    %203 = arith.addf %199, %202 : vector<16x16xf32>
    %204 = vector.extract_strided_slice %175 {offsets = [0, 7], sizes = [16, 1], strides = [1, 1]} : vector<16x9xf32> to vector<16x1xf32>
    %205 = vector.broadcast %204 : vector<16x1xf32> to vector<16x16xf32>
    %206 = arith.mulf %205, %53 : vector<16x16xf32>
    %207 = arith.addf %203, %206 : vector<16x16xf32>
    %208 = vector.extract_strided_slice %175 {offsets = [0, 8], sizes = [16, 1], strides = [1, 1]} : vector<16x9xf32> to vector<16x1xf32>
    %209 = vector.broadcast %208 : vector<16x1xf32> to vector<16x16xf32>
    %210 = arith.mulf %209, %57 : vector<16x16xf32>
    %211 = arith.addf %207, %210 : vector<16x16xf32>
    %cst_36 = arith.constant dense<0xFF800000> : vector<16xf32>
    %212 = vector.multi_reduction <maximumf>, %211, %cst_36 [1] : vector<16x16xf32> to vector<16xf32>
    %213 = vector.shape_cast %212 : vector<16xf32> to vector<16x1xf32>
    %214 = vector.broadcast %213 : vector<16x1xf32> to vector<16x16xf32>
    %215 = arith.subf %211, %214 : vector<16x16xf32>
    %216 = math.exp %215 : vector<16x16xf32>
    %cst_37 = arith.constant dense<0.000000e+00> : vector<16xf32>
    %217 = vector.multi_reduction <add>, %216, %cst_37 [1] : vector<16x16xf32> to vector<16xf32>
    %218 = vector.shape_cast %217 : vector<16xf32> to vector<16x1xf32>
    %cst_38 = arith.constant 1.000000e+00 : f32
    %219 = vector.broadcast %cst_38 : f32 to vector<16x1xf32>
    %220 = arith.divf %219, %218 : vector<16x1xf32>
    %221 = vector.broadcast %220 : vector<16x1xf32> to vector<16x16xf32>
    %222 = arith.mulf %216, %221 : vector<16x16xf32>
    %223 = arith.mulf %222, %25 : vector<16x16xf32>
    %cst_39 = arith.constant dense<0.000000e+00> : vector<16xf32>
    %224 = vector.multi_reduction <add>, %223, %cst_39 [1] : vector<16x16xf32> to vector<16xf32>
    %225 = vector.shape_cast %224 : vector<16xf32> to vector<16x1xf32>
    %226 = arith.mulf %222, %29 : vector<16x16xf32>
    %cst_40 = arith.constant dense<0.000000e+00> : vector<16xf32>
    %227 = vector.multi_reduction <add>, %226, %cst_40 [1] : vector<16x16xf32> to vector<16xf32>
    %228 = vector.shape_cast %227 : vector<16xf32> to vector<16x1xf32>
    %229 = arith.mulf %222, %33 : vector<16x16xf32>
    %cst_41 = arith.constant dense<0.000000e+00> : vector<16xf32>
    %230 = vector.multi_reduction <add>, %229, %cst_41 [1] : vector<16x16xf32> to vector<16xf32>
    %231 = vector.shape_cast %230 : vector<16xf32> to vector<16x1xf32>
    %232 = arith.mulf %222, %37 : vector<16x16xf32>
    %cst_42 = arith.constant dense<0.000000e+00> : vector<16xf32>
    %233 = vector.multi_reduction <add>, %232, %cst_42 [1] : vector<16x16xf32> to vector<16xf32>
    %234 = vector.shape_cast %233 : vector<16xf32> to vector<16x1xf32>
    %235 = arith.mulf %222, %41 : vector<16x16xf32>
    %cst_43 = arith.constant dense<0.000000e+00> : vector<16xf32>
    %236 = vector.multi_reduction <add>, %235, %cst_43 [1] : vector<16x16xf32> to vector<16xf32>
    %237 = vector.shape_cast %236 : vector<16xf32> to vector<16x1xf32>
    %238 = arith.mulf %222, %45 : vector<16x16xf32>
    %cst_44 = arith.constant dense<0.000000e+00> : vector<16xf32>
    %239 = vector.multi_reduction <add>, %238, %cst_44 [1] : vector<16x16xf32> to vector<16xf32>
    %240 = vector.shape_cast %239 : vector<16xf32> to vector<16x1xf32>
    %241 = arith.mulf %222, %49 : vector<16x16xf32>
    %cst_45 = arith.constant dense<0.000000e+00> : vector<16xf32>
    %242 = vector.multi_reduction <add>, %241, %cst_45 [1] : vector<16x16xf32> to vector<16xf32>
    %243 = vector.shape_cast %242 : vector<16xf32> to vector<16x1xf32>
    %244 = arith.mulf %222, %53 : vector<16x16xf32>
    %cst_46 = arith.constant dense<0.000000e+00> : vector<16xf32>
    %245 = vector.multi_reduction <add>, %244, %cst_46 [1] : vector<16x16xf32> to vector<16xf32>
    %246 = vector.shape_cast %245 : vector<16xf32> to vector<16x1xf32>
    %247 = arith.mulf %222, %57 : vector<16x16xf32>
    %cst_47 = arith.constant dense<0.000000e+00> : vector<16xf32>
    %248 = vector.multi_reduction <add>, %247, %cst_47 [1] : vector<16x16xf32> to vector<16xf32>
    %249 = vector.shape_cast %248 : vector<16xf32> to vector<16x1xf32>
    %250 = tpu.concatenate %225, %228, %231, %234, %237, %240, %243, %246, %249 in 1 : vector<16x1xf32>, vector<16x1xf32>, vector<16x1xf32>, vector<16x1xf32>, vector<16x1xf32>, vector<16x1xf32>, vector<16x1xf32>, vector<16x1xf32>, vector<16x1xf32> -> vector<16x9xf32>
    %251 = arith.truncf %222 : vector<16x16xf32> to vector<16x16xbf16>
    %cst_48 = arith.constant dense<0.000000e+00> : vector<16x16xf32>
    %252 = tpu.matmul %251, %172, %cst_48 {dimension_numbers = #tpu.dot_dimension_numbers<[1], [0], [0], [1], [0, 0, 1, 1], [], []>} : vector<16x16xbf16>, vector<16x16xbf16>, vector<16x16xf32> -> vector<16x16xf32>
    %253 = arith.truncf %250 : vector<16x9xf32> to vector<16x9xbf16>
    %cst_49 = arith.constant dense<0.000000e+00> : vector<16x16xf32>
    %254 = tpu.matmul %253, %73, %cst_49 {dimension_numbers = #tpu.dot_dimension_numbers<[1], [0], [0], [1], [0, 0, 1, 1], [], []>} : vector<16x9xbf16>, vector<9x16xbf16>, vector<16x16xf32> -> vector<16x16xf32>
    %255 = arith.addf %252, %254 : vector<16x16xf32>
    %256 = tpu.concatenate %164, %255 in 1 : vector<16x16xf32>, vector<16x16xf32> -> vector<16x32xf32>
    %257 = arith.truncf %256 : vector<16x32xf32> to vector<16x32xbf16>
    %c0_50 = arith.constant 0 : index
    %c0_51 = arith.constant 0 : index
    %c0_52 = arith.constant 0 : index
    %258 = vector.load %arg5[%c0_50, %c0_51, %c0_52] : memref<2x32x32xbf16, #tpu.memory_space<vmem>>, vector<1x32x32xbf16>
    %259 = vector.shape_cast %258 : vector<1x32x32xbf16> to vector<32x32xbf16>
    %cst_53 = arith.constant dense<0.000000e+00> : vector<16x32xf32>
    %260 = tpu.matmul %257, %259, %cst_53 {dimension_numbers = #tpu.dot_dimension_numbers<[1], [0], [0], [1], [0, 0, 1, 1], [], []>} : vector<16x32xbf16>, vector<32x32xbf16>, vector<16x32xf32> -> vector<16x32xf32>
    %c0_54 = arith.constant 0 : index
    %c0_55 = arith.constant 0 : index
    %c0_56 = arith.constant 0 : index
    %261 = vector.load %arg6[%c0_54, %c0_55, %c0_56] : memref<2x1x32xf32, #tpu.memory_space<vmem>>, vector<1x1x32xf32>
    %262 = vector.shape_cast %261 : vector<1x1x32xf32> to vector<1x32xf32>
    %263 = vector.broadcast %262 : vector<1x32xf32> to vector<16x32xf32>
    %264 = arith.addf %260, %263 : vector<16x32xf32>
    %265 = arith.addf %61, %264 : vector<16x32xf32>
    %c0_57 = arith.constant 0 : index
    %c0_58 = arith.constant 0 : index
    %c0_59 = arith.constant 0 : index
    %266 = vector.load %arg9[%c0_57, %c0_58, %c0_59] : memref<2x1x32xf32, #tpu.memory_space<vmem>>, vector<1x1x32xf32>
    %267 = vector.shape_cast %266 : vector<1x1x32xf32> to vector<1x32xf32>
    %c0_60 = arith.constant 0 : index
    %c0_61 = arith.constant 0 : index
    %c0_62 = arith.constant 0 : index
    %268 = vector.load %arg10[%c0_60, %c0_61, %c0_62] : memref<2x1x32xf32, #tpu.memory_space<vmem>>, vector<1x1x32xf32>
    %269 = vector.shape_cast %268 : vector<1x1x32xf32> to vector<1x32xf32>
    %cst_63 = arith.constant dense<0.000000e+00> : vector<16xf32>
    %270 = vector.multi_reduction <add>, %265, %cst_63 [1] : vector<16x32xf32> to vector<16xf32>
    %271 = vector.shape_cast %270 : vector<16xf32> to vector<16x1xf32>
    %cst_64 = arith.constant 3.200000e+01 : f32
    %272 = vector.broadcast %cst_64 : f32 to vector<16x1xf32>
    %273 = arith.divf %271, %272 : vector<16x1xf32>
    %274 = vector.broadcast %273 : vector<16x1xf32> to vector<16x32xf32>
    %275 = arith.subf %265, %274 : vector<16x32xf32>
    %276 = arith.mulf %275, %275 : vector<16x32xf32>
    %cst_65 = arith.constant dense<0.000000e+00> : vector<16xf32>
    %277 = vector.multi_reduction <add>, %276, %cst_65 [1] : vector<16x32xf32> to vector<16xf32>
    %278 = vector.shape_cast %277 : vector<16xf32> to vector<16x1xf32>
    %cst_66 = arith.constant 3.200000e+01 : f32
    %279 = vector.broadcast %cst_66 : f32 to vector<16x1xf32>
    %280 = arith.divf %278, %279 : vector<16x1xf32>
    %281 = vector.broadcast %273 : vector<16x1xf32> to vector<16x32xf32>
    %282 = arith.subf %265, %281 : vector<16x32xf32>
    %cst_67 = arith.constant 9.99999974E-6 : f32
    %283 = vector.broadcast %cst_67 : f32 to vector<16x1xf32>
    %284 = arith.addf %280, %283 : vector<16x1xf32>
    %285 = math.rsqrt %284 : vector<16x1xf32>
    %286 = vector.broadcast %285 : vector<16x1xf32> to vector<16x32xf32>
    %287 = arith.mulf %282, %286 : vector<16x32xf32>
    %288 = vector.broadcast %267 : vector<1x32xf32> to vector<16x32xf32>
    %289 = arith.mulf %287, %288 : vector<16x32xf32>
    %290 = vector.broadcast %269 : vector<1x32xf32> to vector<16x32xf32>
    %291 = arith.addf %289, %290 : vector<16x32xf32>
    %292 = vector.broadcast %7 : vector<16x1xf32> to vector<16x32xf32>
    %293 = arith.mulf %291, %292 : vector<16x32xf32>
    %cst_68 = arith.constant 0.000000e+00 : f32
    %294 = vector.broadcast %cst_68 : f32 to vector<1x32xf32>
    %cst_69 = arith.constant 0.000000e+00 : f32
    %295 = vector.broadcast %cst_69 : f32 to vector<1x32xf32>
    %296 = tpu.concatenate %294, %293, %295 in 0 : vector<1x32xf32>, vector<16x32xf32>, vector<1x32xf32> -> vector<18x32xf32>
    %297 = vector.extract_strided_slice %296 {offsets = [0, 0], sizes = [16, 32], strides = [1, 1]} : vector<18x32xf32> to vector<16x32xf32>
    %298 = vector.extract_strided_slice %296 {offsets = [1, 0], sizes = [16, 32], strides = [1, 1]} : vector<18x32xf32> to vector<16x32xf32>
    %299 = vector.extract_strided_slice %296 {offsets = [2, 0], sizes = [16, 32], strides = [1, 1]} : vector<18x32xf32> to vector<16x32xf32>
    %300 = tpu.concatenate %297, %298, %299 in 1 : vector<16x32xf32>, vector<16x32xf32>, vector<16x32xf32> -> vector<16x96xf32>
    %301 = arith.truncf %300 : vector<16x96xf32> to vector<16x96xbf16>
    %c0_70 = arith.constant 0 : index
    %c0_71 = arith.constant 0 : index
    %c0_72 = arith.constant 0 : index
    %302 = vector.load %arg13[%c0_70, %c0_71, %c0_72] : memref<2x96x64xbf16, #tpu.memory_space<vmem>>, vector<1x96x64xbf16>
    %303 = vector.shape_cast %302 : vector<1x96x64xbf16> to vector<96x64xbf16>
    %cst_73 = arith.constant dense<0.000000e+00> : vector<16x64xf32>
    %304 = tpu.matmul %301, %303, %cst_73 {dimension_numbers = #tpu.dot_dimension_numbers<[1], [0], [0], [1], [0, 0, 1, 1], [], []>} : vector<16x96xbf16>, vector<96x64xbf16>, vector<16x64xf32> -> vector<16x64xf32>
    %c0_74 = arith.constant 0 : index
    %c0_75 = arith.constant 0 : index
    %c0_76 = arith.constant 0 : index
    %305 = vector.load %arg14[%c0_74, %c0_75, %c0_76] : memref<2x1x64xf32, #tpu.memory_space<vmem>>, vector<1x1x64xf32>
    %306 = vector.shape_cast %305 : vector<1x1x64xf32> to vector<1x64xf32>
    %307 = vector.broadcast %306 : vector<1x64xf32> to vector<16x64xf32>
    %308 = arith.addf %304, %307 : vector<16x64xf32>
    %cst_77 = arith.constant 0.000000e+00 : f32
    %309 = vector.broadcast %cst_77 : f32 to vector<16x64xf32>
    %310 = arith.maximumf %308, %309 : vector<16x64xf32>
    %311 = vector.broadcast %7 : vector<16x1xf32> to vector<16x64xf32>
    %312 = arith.mulf %310, %311 : vector<16x64xf32>
    %cst_78 = arith.constant 0.000000e+00 : f32
    %313 = vector.broadcast %cst_78 : f32 to vector<1x64xf32>
    %cst_79 = arith.constant 0.000000e+00 : f32
    %314 = vector.broadcast %cst_79 : f32 to vector<1x64xf32>
    %315 = tpu.concatenate %313, %312, %314 in 0 : vector<1x64xf32>, vector<16x64xf32>, vector<1x64xf32> -> vector<18x64xf32>
    %316 = vector.extract_strided_slice %315 {offsets = [0, 0], sizes = [16, 64], strides = [1, 1]} : vector<18x64xf32> to vector<16x64xf32>
    %317 = vector.extract_strided_slice %315 {offsets = [1, 0], sizes = [16, 64], strides = [1, 1]} : vector<18x64xf32> to vector<16x64xf32>
    %318 = vector.extract_strided_slice %315 {offsets = [2, 0], sizes = [16, 64], strides = [1, 1]} : vector<18x64xf32> to vector<16x64xf32>
    %319 = tpu.concatenate %316, %317, %318 in 1 : vector<16x64xf32>, vector<16x64xf32>, vector<16x64xf32> -> vector<16x192xf32>
    %320 = arith.truncf %319 : vector<16x192xf32> to vector<16x192xbf16>
    %c0_80 = arith.constant 0 : index
    %c0_81 = arith.constant 0 : index
    %c0_82 = arith.constant 0 : index
    %321 = vector.load %arg15[%c0_80, %c0_81, %c0_82] : memref<2x192x32xbf16, #tpu.memory_space<vmem>>, vector<1x192x32xbf16>
    %322 = vector.shape_cast %321 : vector<1x192x32xbf16> to vector<192x32xbf16>
    %cst_83 = arith.constant dense<0.000000e+00> : vector<16x32xf32>
    %323 = tpu.matmul %320, %322, %cst_83 {dimension_numbers = #tpu.dot_dimension_numbers<[1], [0], [0], [1], [0, 0, 1, 1], [], []>} : vector<16x192xbf16>, vector<192x32xbf16>, vector<16x32xf32> -> vector<16x32xf32>
    %c0_84 = arith.constant 0 : index
    %c0_85 = arith.constant 0 : index
    %c0_86 = arith.constant 0 : index
    %324 = vector.load %arg16[%c0_84, %c0_85, %c0_86] : memref<2x1x32xf32, #tpu.memory_space<vmem>>, vector<1x1x32xf32>
    %325 = vector.shape_cast %324 : vector<1x1x32xf32> to vector<1x32xf32>
    %326 = vector.broadcast %325 : vector<1x32xf32> to vector<16x32xf32>
    %327 = arith.addf %323, %326 : vector<16x32xf32>
    %328 = vector.broadcast %7 : vector<16x1xf32> to vector<16x32xf32>
    %329 = arith.mulf %327, %328 : vector<16x32xf32>
    %330 = arith.addf %291, %329 : vector<16x32xf32>
    %c0_87 = arith.constant 0 : index
    %c0_88 = arith.constant 0 : index
    %c0_89 = arith.constant 0 : index
    %331 = vector.load %arg11[%c0_87, %c0_88, %c0_89] : memref<2x1x32xf32, #tpu.memory_space<vmem>>, vector<1x1x32xf32>
    %332 = vector.shape_cast %331 : vector<1x1x32xf32> to vector<1x32xf32>
    %c0_90 = arith.constant 0 : index
    %c0_91 = arith.constant 0 : index
    %c0_92 = arith.constant 0 : index
    %333 = vector.load %arg12[%c0_90, %c0_91, %c0_92] : memref<2x1x32xf32, #tpu.memory_space<vmem>>, vector<1x1x32xf32>
    %334 = vector.shape_cast %333 : vector<1x1x32xf32> to vector<1x32xf32>
    %cst_93 = arith.constant dense<0.000000e+00> : vector<16xf32>
    %335 = vector.multi_reduction <add>, %330, %cst_93 [1] : vector<16x32xf32> to vector<16xf32>
    %336 = vector.shape_cast %335 : vector<16xf32> to vector<16x1xf32>
    %cst_94 = arith.constant 3.200000e+01 : f32
    %337 = vector.broadcast %cst_94 : f32 to vector<16x1xf32>
    %338 = arith.divf %336, %337 : vector<16x1xf32>
    %339 = vector.broadcast %338 : vector<16x1xf32> to vector<16x32xf32>
    %340 = arith.subf %330, %339 : vector<16x32xf32>
    %341 = arith.mulf %340, %340 : vector<16x32xf32>
    %cst_95 = arith.constant dense<0.000000e+00> : vector<16xf32>
    %342 = vector.multi_reduction <add>, %341, %cst_95 [1] : vector<16x32xf32> to vector<16xf32>
    %343 = vector.shape_cast %342 : vector<16xf32> to vector<16x1xf32>
    %cst_96 = arith.constant 3.200000e+01 : f32
    %344 = vector.broadcast %cst_96 : f32 to vector<16x1xf32>
    %345 = arith.divf %343, %344 : vector<16x1xf32>
    %346 = vector.broadcast %338 : vector<16x1xf32> to vector<16x32xf32>
    %347 = arith.subf %330, %346 : vector<16x32xf32>
    %cst_97 = arith.constant 9.99999974E-6 : f32
    %348 = vector.broadcast %cst_97 : f32 to vector<16x1xf32>
    %349 = arith.addf %345, %348 : vector<16x1xf32>
    %350 = math.rsqrt %349 : vector<16x1xf32>
    %351 = vector.broadcast %350 : vector<16x1xf32> to vector<16x32xf32>
    %352 = arith.mulf %347, %351 : vector<16x32xf32>
    %353 = vector.broadcast %332 : vector<1x32xf32> to vector<16x32xf32>
    %354 = arith.mulf %352, %353 : vector<16x32xf32>
    %355 = vector.broadcast %334 : vector<1x32xf32> to vector<16x32xf32>
    %356 = arith.addf %354, %355 : vector<16x32xf32>
    %357 = arith.truncf %356 : vector<16x32xf32> to vector<16x32xbf16>
    %c1 = arith.constant 1 : index
    %c0_98 = arith.constant 0 : index
    %c0_99 = arith.constant 0 : index
    %358 = vector.load %arg3[%c1, %c0_98, %c0_99] : memref<2x32x96xbf16, #tpu.memory_space<vmem>>, vector<1x32x96xbf16>
    %359 = vector.shape_cast %358 : vector<1x32x96xbf16> to vector<32x96xbf16>
    %cst_100 = arith.constant dense<0.000000e+00> : vector<16x96xf32>
    %360 = tpu.matmul %357, %359, %cst_100 {dimension_numbers = #tpu.dot_dimension_numbers<[1], [0], [0], [1], [0, 0, 1, 1], [], []>} : vector<16x32xbf16>, vector<32x96xbf16>, vector<16x96xf32> -> vector<16x96xf32>
    %c1_101 = arith.constant 1 : index
    %c0_102 = arith.constant 0 : index
    %c0_103 = arith.constant 0 : index
    %361 = vector.load %arg4[%c1_101, %c0_102, %c0_103] : memref<2x1x96xf32, #tpu.memory_space<vmem>>, vector<1x1x96xf32>
    %362 = vector.shape_cast %361 : vector<1x1x96xf32> to vector<1x96xf32>
    %363 = vector.broadcast %362 : vector<1x96xf32> to vector<16x96xf32>
    %364 = arith.addf %360, %363 : vector<16x96xf32>
    %c1_104 = arith.constant 1 : index
    %c0_105 = arith.constant 0 : index
    %c0_106 = arith.constant 0 : index
    %365 = vector.load %arg7[%c1_104, %c0_105, %c0_106] : memref<2x9x16xbf16, #tpu.memory_space<vmem>>, vector<1x9x16xbf16>
    %366 = vector.shape_cast %365 : vector<1x9x16xbf16> to vector<9x16xbf16>
    %c1_107 = arith.constant 1 : index
    %c0_108 = arith.constant 0 : index
    %c0_109 = arith.constant 0 : index
    %367 = vector.load %arg8[%c1_107, %c0_108, %c0_109] : memref<2x9x16xbf16, #tpu.memory_space<vmem>>, vector<1x9x16xbf16>
    %368 = vector.shape_cast %367 : vector<1x9x16xbf16> to vector<9x16xbf16>
    %369 = vector.extract_strided_slice %364 {offsets = [0, 0], sizes = [16, 16], strides = [1, 1]} : vector<16x96xf32> to vector<16x16xf32>
    %cst_110 = arith.constant 2.500000e-01 : f32
    %370 = vector.broadcast %cst_110 : f32 to vector<16x16xf32>
    %371 = arith.mulf %369, %370 : vector<16x16xf32>
    %372 = vector.extract_strided_slice %364 {offsets = [0, 32], sizes = [16, 16], strides = [1, 1]} : vector<16x96xf32> to vector<16x16xf32>
    %373 = vector.extract_strided_slice %364 {offsets = [0, 64], sizes = [16, 16], strides = [1, 1]} : vector<16x96xf32> to vector<16x16xf32>
    %374 = arith.truncf %371 : vector<16x16xf32> to vector<16x16xbf16>
    %375 = arith.truncf %372 : vector<16x16xf32> to vector<16x16xbf16>
    %376 = arith.truncf %373 : vector<16x16xf32> to vector<16x16xbf16>
    %cst_111 = arith.constant dense<0.000000e+00> : vector<16x16xf32>
    %377 = tpu.matmul %374, %375, %cst_111 {dimension_numbers = #tpu.dot_dimension_numbers<[1], [1], [0], [0], [0, 0, 1, 0], [], []>} : vector<16x16xbf16>, vector<16x16xbf16>, vector<16x16xf32> -> vector<16x16xf32>
    %378 = arith.addf %377, %18 : vector<16x16xf32>
    %cst_112 = arith.constant dense<0.000000e+00> : vector<16x9xf32>
    %379 = tpu.matmul %374, %366, %cst_112 {dimension_numbers = #tpu.dot_dimension_numbers<[1], [1], [0], [0], [0, 0, 1, 0], [], []>} : vector<16x16xbf16>, vector<9x16xbf16>, vector<16x9xf32> -> vector<16x9xf32>
    %380 = vector.extract_strided_slice %379 {offsets = [0, 0], sizes = [16, 1], strides = [1, 1]} : vector<16x9xf32> to vector<16x1xf32>
    %381 = vector.broadcast %380 : vector<16x1xf32> to vector<16x16xf32>
    %382 = arith.mulf %381, %25 : vector<16x16xf32>
    %383 = arith.addf %378, %382 : vector<16x16xf32>
    %384 = vector.extract_strided_slice %379 {offsets = [0, 1], sizes = [16, 1], strides = [1, 1]} : vector<16x9xf32> to vector<16x1xf32>
    %385 = vector.broadcast %384 : vector<16x1xf32> to vector<16x16xf32>
    %386 = arith.mulf %385, %29 : vector<16x16xf32>
    %387 = arith.addf %383, %386 : vector<16x16xf32>
    %388 = vector.extract_strided_slice %379 {offsets = [0, 2], sizes = [16, 1], strides = [1, 1]} : vector<16x9xf32> to vector<16x1xf32>
    %389 = vector.broadcast %388 : vector<16x1xf32> to vector<16x16xf32>
    %390 = arith.mulf %389, %33 : vector<16x16xf32>
    %391 = arith.addf %387, %390 : vector<16x16xf32>
    %392 = vector.extract_strided_slice %379 {offsets = [0, 3], sizes = [16, 1], strides = [1, 1]} : vector<16x9xf32> to vector<16x1xf32>
    %393 = vector.broadcast %392 : vector<16x1xf32> to vector<16x16xf32>
    %394 = arith.mulf %393, %37 : vector<16x16xf32>
    %395 = arith.addf %391, %394 : vector<16x16xf32>
    %396 = vector.extract_strided_slice %379 {offsets = [0, 4], sizes = [16, 1], strides = [1, 1]} : vector<16x9xf32> to vector<16x1xf32>
    %397 = vector.broadcast %396 : vector<16x1xf32> to vector<16x16xf32>
    %398 = arith.mulf %397, %41 : vector<16x16xf32>
    %399 = arith.addf %395, %398 : vector<16x16xf32>
    %400 = vector.extract_strided_slice %379 {offsets = [0, 5], sizes = [16, 1], strides = [1, 1]} : vector<16x9xf32> to vector<16x1xf32>
    %401 = vector.broadcast %400 : vector<16x1xf32> to vector<16x16xf32>
    %402 = arith.mulf %401, %45 : vector<16x16xf32>
    %403 = arith.addf %399, %402 : vector<16x16xf32>
    %404 = vector.extract_strided_slice %379 {offsets = [0, 6], sizes = [16, 1], strides = [1, 1]} : vector<16x9xf32> to vector<16x1xf32>
    %405 = vector.broadcast %404 : vector<16x1xf32> to vector<16x16xf32>
    %406 = arith.mulf %405, %49 : vector<16x16xf32>
    %407 = arith.addf %403, %406 : vector<16x16xf32>
    %408 = vector.extract_strided_slice %379 {offsets = [0, 7], sizes = [16, 1], strides = [1, 1]} : vector<16x9xf32> to vector<16x1xf32>
    %409 = vector.broadcast %408 : vector<16x1xf32> to vector<16x16xf32>
    %410 = arith.mulf %409, %53 : vector<16x16xf32>
    %411 = arith.addf %407, %410 : vector<16x16xf32>
    %412 = vector.extract_strided_slice %379 {offsets = [0, 8], sizes = [16, 1], strides = [1, 1]} : vector<16x9xf32> to vector<16x1xf32>
    %413 = vector.broadcast %412 : vector<16x1xf32> to vector<16x16xf32>
    %414 = arith.mulf %413, %57 : vector<16x16xf32>
    %415 = arith.addf %411, %414 : vector<16x16xf32>
    %cst_113 = arith.constant dense<0xFF800000> : vector<16xf32>
    %416 = vector.multi_reduction <maximumf>, %415, %cst_113 [1] : vector<16x16xf32> to vector<16xf32>
    %417 = vector.shape_cast %416 : vector<16xf32> to vector<16x1xf32>
    %418 = vector.broadcast %417 : vector<16x1xf32> to vector<16x16xf32>
    %419 = arith.subf %415, %418 : vector<16x16xf32>
    %420 = math.exp %419 : vector<16x16xf32>
    %cst_114 = arith.constant dense<0.000000e+00> : vector<16xf32>
    %421 = vector.multi_reduction <add>, %420, %cst_114 [1] : vector<16x16xf32> to vector<16xf32>
    %422 = vector.shape_cast %421 : vector<16xf32> to vector<16x1xf32>
    %cst_115 = arith.constant 1.000000e+00 : f32
    %423 = vector.broadcast %cst_115 : f32 to vector<16x1xf32>
    %424 = arith.divf %423, %422 : vector<16x1xf32>
    %425 = vector.broadcast %424 : vector<16x1xf32> to vector<16x16xf32>
    %426 = arith.mulf %420, %425 : vector<16x16xf32>
    %427 = arith.mulf %426, %25 : vector<16x16xf32>
    %cst_116 = arith.constant dense<0.000000e+00> : vector<16xf32>
    %428 = vector.multi_reduction <add>, %427, %cst_116 [1] : vector<16x16xf32> to vector<16xf32>
    %429 = vector.shape_cast %428 : vector<16xf32> to vector<16x1xf32>
    %430 = arith.mulf %426, %29 : vector<16x16xf32>
    %cst_117 = arith.constant dense<0.000000e+00> : vector<16xf32>
    %431 = vector.multi_reduction <add>, %430, %cst_117 [1] : vector<16x16xf32> to vector<16xf32>
    %432 = vector.shape_cast %431 : vector<16xf32> to vector<16x1xf32>
    %433 = arith.mulf %426, %33 : vector<16x16xf32>
    %cst_118 = arith.constant dense<0.000000e+00> : vector<16xf32>
    %434 = vector.multi_reduction <add>, %433, %cst_118 [1] : vector<16x16xf32> to vector<16xf32>
    %435 = vector.shape_cast %434 : vector<16xf32> to vector<16x1xf32>
    %436 = arith.mulf %426, %37 : vector<16x16xf32>
    %cst_119 = arith.constant dense<0.000000e+00> : vector<16xf32>
    %437 = vector.multi_reduction <add>, %436, %cst_119 [1] : vector<16x16xf32> to vector<16xf32>
    %438 = vector.shape_cast %437 : vector<16xf32> to vector<16x1xf32>
    %439 = arith.mulf %426, %41 : vector<16x16xf32>
    %cst_120 = arith.constant dense<0.000000e+00> : vector<16xf32>
    %440 = vector.multi_reduction <add>, %439, %cst_120 [1] : vector<16x16xf32> to vector<16xf32>
    %441 = vector.shape_cast %440 : vector<16xf32> to vector<16x1xf32>
    %442 = arith.mulf %426, %45 : vector<16x16xf32>
    %cst_121 = arith.constant dense<0.000000e+00> : vector<16xf32>
    %443 = vector.multi_reduction <add>, %442, %cst_121 [1] : vector<16x16xf32> to vector<16xf32>
    %444 = vector.shape_cast %443 : vector<16xf32> to vector<16x1xf32>
    %445 = arith.mulf %426, %49 : vector<16x16xf32>
    %cst_122 = arith.constant dense<0.000000e+00> : vector<16xf32>
    %446 = vector.multi_reduction <add>, %445, %cst_122 [1] : vector<16x16xf32> to vector<16xf32>
    %447 = vector.shape_cast %446 : vector<16xf32> to vector<16x1xf32>
    %448 = arith.mulf %426, %53 : vector<16x16xf32>
    %cst_123 = arith.constant dense<0.000000e+00> : vector<16xf32>
    %449 = vector.multi_reduction <add>, %448, %cst_123 [1] : vector<16x16xf32> to vector<16xf32>
    %450 = vector.shape_cast %449 : vector<16xf32> to vector<16x1xf32>
    %451 = arith.mulf %426, %57 : vector<16x16xf32>
    %cst_124 = arith.constant dense<0.000000e+00> : vector<16xf32>
    %452 = vector.multi_reduction <add>, %451, %cst_124 [1] : vector<16x16xf32> to vector<16xf32>
    %453 = vector.shape_cast %452 : vector<16xf32> to vector<16x1xf32>
    %454 = tpu.concatenate %429, %432, %435, %438, %441, %444, %447, %450, %453 in 1 : vector<16x1xf32>, vector<16x1xf32>, vector<16x1xf32>, vector<16x1xf32>, vector<16x1xf32>, vector<16x1xf32>, vector<16x1xf32>, vector<16x1xf32>, vector<16x1xf32> -> vector<16x9xf32>
    %455 = arith.truncf %426 : vector<16x16xf32> to vector<16x16xbf16>
    %cst_125 = arith.constant dense<0.000000e+00> : vector<16x16xf32>
    %456 = tpu.matmul %455, %376, %cst_125 {dimension_numbers = #tpu.dot_dimension_numbers<[1], [0], [0], [1], [0, 0, 1, 1], [], []>} : vector<16x16xbf16>, vector<16x16xbf16>, vector<16x16xf32> -> vector<16x16xf32>
    %457 = arith.truncf %454 : vector<16x9xf32> to vector<16x9xbf16>
    %cst_126 = arith.constant dense<0.000000e+00> : vector<16x16xf32>
    %458 = tpu.matmul %457, %368, %cst_126 {dimension_numbers = #tpu.dot_dimension_numbers<[1], [0], [0], [1], [0, 0, 1, 1], [], []>} : vector<16x9xbf16>, vector<9x16xbf16>, vector<16x16xf32> -> vector<16x16xf32>
    %459 = arith.addf %456, %458 : vector<16x16xf32>
    %460 = vector.extract_strided_slice %364 {offsets = [0, 16], sizes = [16, 16], strides = [1, 1]} : vector<16x96xf32> to vector<16x16xf32>
    %cst_127 = arith.constant 2.500000e-01 : f32
    %461 = vector.broadcast %cst_127 : f32 to vector<16x16xf32>
    %462 = arith.mulf %460, %461 : vector<16x16xf32>
    %463 = vector.extract_strided_slice %364 {offsets = [0, 48], sizes = [16, 16], strides = [1, 1]} : vector<16x96xf32> to vector<16x16xf32>
    %464 = vector.extract_strided_slice %364 {offsets = [0, 80], sizes = [16, 16], strides = [1, 1]} : vector<16x96xf32> to vector<16x16xf32>
    %465 = arith.truncf %462 : vector<16x16xf32> to vector<16x16xbf16>
    %466 = arith.truncf %463 : vector<16x16xf32> to vector<16x16xbf16>
    %467 = arith.truncf %464 : vector<16x16xf32> to vector<16x16xbf16>
    %cst_128 = arith.constant dense<0.000000e+00> : vector<16x16xf32>
    %468 = tpu.matmul %465, %466, %cst_128 {dimension_numbers = #tpu.dot_dimension_numbers<[1], [1], [0], [0], [0, 0, 1, 0], [], []>} : vector<16x16xbf16>, vector<16x16xbf16>, vector<16x16xf32> -> vector<16x16xf32>
    %469 = arith.addf %468, %18 : vector<16x16xf32>
    %cst_129 = arith.constant dense<0.000000e+00> : vector<16x9xf32>
    %470 = tpu.matmul %465, %366, %cst_129 {dimension_numbers = #tpu.dot_dimension_numbers<[1], [1], [0], [0], [0, 0, 1, 0], [], []>} : vector<16x16xbf16>, vector<9x16xbf16>, vector<16x9xf32> -> vector<16x9xf32>
    %471 = vector.extract_strided_slice %470 {offsets = [0, 0], sizes = [16, 1], strides = [1, 1]} : vector<16x9xf32> to vector<16x1xf32>
    %472 = vector.broadcast %471 : vector<16x1xf32> to vector<16x16xf32>
    %473 = arith.mulf %472, %25 : vector<16x16xf32>
    %474 = arith.addf %469, %473 : vector<16x16xf32>
    %475 = vector.extract_strided_slice %470 {offsets = [0, 1], sizes = [16, 1], strides = [1, 1]} : vector<16x9xf32> to vector<16x1xf32>
    %476 = vector.broadcast %475 : vector<16x1xf32> to vector<16x16xf32>
    %477 = arith.mulf %476, %29 : vector<16x16xf32>
    %478 = arith.addf %474, %477 : vector<16x16xf32>
    %479 = vector.extract_strided_slice %470 {offsets = [0, 2], sizes = [16, 1], strides = [1, 1]} : vector<16x9xf32> to vector<16x1xf32>
    %480 = vector.broadcast %479 : vector<16x1xf32> to vector<16x16xf32>
    %481 = arith.mulf %480, %33 : vector<16x16xf32>
    %482 = arith.addf %478, %481 : vector<16x16xf32>
    %483 = vector.extract_strided_slice %470 {offsets = [0, 3], sizes = [16, 1], strides = [1, 1]} : vector<16x9xf32> to vector<16x1xf32>
    %484 = vector.broadcast %483 : vector<16x1xf32> to vector<16x16xf32>
    %485 = arith.mulf %484, %37 : vector<16x16xf32>
    %486 = arith.addf %482, %485 : vector<16x16xf32>
    %487 = vector.extract_strided_slice %470 {offsets = [0, 4], sizes = [16, 1], strides = [1, 1]} : vector<16x9xf32> to vector<16x1xf32>
    %488 = vector.broadcast %487 : vector<16x1xf32> to vector<16x16xf32>
    %489 = arith.mulf %488, %41 : vector<16x16xf32>
    %490 = arith.addf %486, %489 : vector<16x16xf32>
    %491 = vector.extract_strided_slice %470 {offsets = [0, 5], sizes = [16, 1], strides = [1, 1]} : vector<16x9xf32> to vector<16x1xf32>
    %492 = vector.broadcast %491 : vector<16x1xf32> to vector<16x16xf32>
    %493 = arith.mulf %492, %45 : vector<16x16xf32>
    %494 = arith.addf %490, %493 : vector<16x16xf32>
    %495 = vector.extract_strided_slice %470 {offsets = [0, 6], sizes = [16, 1], strides = [1, 1]} : vector<16x9xf32> to vector<16x1xf32>
    %496 = vector.broadcast %495 : vector<16x1xf32> to vector<16x16xf32>
    %497 = arith.mulf %496, %49 : vector<16x16xf32>
    %498 = arith.addf %494, %497 : vector<16x16xf32>
    %499 = vector.extract_strided_slice %470 {offsets = [0, 7], sizes = [16, 1], strides = [1, 1]} : vector<16x9xf32> to vector<16x1xf32>
    %500 = vector.broadcast %499 : vector<16x1xf32> to vector<16x16xf32>
    %501 = arith.mulf %500, %53 : vector<16x16xf32>
    %502 = arith.addf %498, %501 : vector<16x16xf32>
    %503 = vector.extract_strided_slice %470 {offsets = [0, 8], sizes = [16, 1], strides = [1, 1]} : vector<16x9xf32> to vector<16x1xf32>
    %504 = vector.broadcast %503 : vector<16x1xf32> to vector<16x16xf32>
    %505 = arith.mulf %504, %57 : vector<16x16xf32>
    %506 = arith.addf %502, %505 : vector<16x16xf32>
    %cst_130 = arith.constant dense<0xFF800000> : vector<16xf32>
    %507 = vector.multi_reduction <maximumf>, %506, %cst_130 [1] : vector<16x16xf32> to vector<16xf32>
    %508 = vector.shape_cast %507 : vector<16xf32> to vector<16x1xf32>
    %509 = vector.broadcast %508 : vector<16x1xf32> to vector<16x16xf32>
    %510 = arith.subf %506, %509 : vector<16x16xf32>
    %511 = math.exp %510 : vector<16x16xf32>
    %cst_131 = arith.constant dense<0.000000e+00> : vector<16xf32>
    %512 = vector.multi_reduction <add>, %511, %cst_131 [1] : vector<16x16xf32> to vector<16xf32>
    %513 = vector.shape_cast %512 : vector<16xf32> to vector<16x1xf32>
    %cst_132 = arith.constant 1.000000e+00 : f32
    %514 = vector.broadcast %cst_132 : f32 to vector<16x1xf32>
    %515 = arith.divf %514, %513 : vector<16x1xf32>
    %516 = vector.broadcast %515 : vector<16x1xf32> to vector<16x16xf32>
    %517 = arith.mulf %511, %516 : vector<16x16xf32>
    %518 = arith.mulf %517, %25 : vector<16x16xf32>
    %cst_133 = arith.constant dense<0.000000e+00> : vector<16xf32>
    %519 = vector.multi_reduction <add>, %518, %cst_133 [1] : vector<16x16xf32> to vector<16xf32>
    %520 = vector.shape_cast %519 : vector<16xf32> to vector<16x1xf32>
    %521 = arith.mulf %517, %29 : vector<16x16xf32>
    %cst_134 = arith.constant dense<0.000000e+00> : vector<16xf32>
    %522 = vector.multi_reduction <add>, %521, %cst_134 [1] : vector<16x16xf32> to vector<16xf32>
    %523 = vector.shape_cast %522 : vector<16xf32> to vector<16x1xf32>
    %524 = arith.mulf %517, %33 : vector<16x16xf32>
    %cst_135 = arith.constant dense<0.000000e+00> : vector<16xf32>
    %525 = vector.multi_reduction <add>, %524, %cst_135 [1] : vector<16x16xf32> to vector<16xf32>
    %526 = vector.shape_cast %525 : vector<16xf32> to vector<16x1xf32>
    %527 = arith.mulf %517, %37 : vector<16x16xf32>
    %cst_136 = arith.constant dense<0.000000e+00> : vector<16xf32>
    %528 = vector.multi_reduction <add>, %527, %cst_136 [1] : vector<16x16xf32> to vector<16xf32>
    %529 = vector.shape_cast %528 : vector<16xf32> to vector<16x1xf32>
    %530 = arith.mulf %517, %41 : vector<16x16xf32>
    %cst_137 = arith.constant dense<0.000000e+00> : vector<16xf32>
    %531 = vector.multi_reduction <add>, %530, %cst_137 [1] : vector<16x16xf32> to vector<16xf32>
    %532 = vector.shape_cast %531 : vector<16xf32> to vector<16x1xf32>
    %533 = arith.mulf %517, %45 : vector<16x16xf32>
    %cst_138 = arith.constant dense<0.000000e+00> : vector<16xf32>
    %534 = vector.multi_reduction <add>, %533, %cst_138 [1] : vector<16x16xf32> to vector<16xf32>
    %535 = vector.shape_cast %534 : vector<16xf32> to vector<16x1xf32>
    %536 = arith.mulf %517, %49 : vector<16x16xf32>
    %cst_139 = arith.constant dense<0.000000e+00> : vector<16xf32>
    %537 = vector.multi_reduction <add>, %536, %cst_139 [1] : vector<16x16xf32> to vector<16xf32>
    %538 = vector.shape_cast %537 : vector<16xf32> to vector<16x1xf32>
    %539 = arith.mulf %517, %53 : vector<16x16xf32>
    %cst_140 = arith.constant dense<0.000000e+00> : vector<16xf32>
    %540 = vector.multi_reduction <add>, %539, %cst_140 [1] : vector<16x16xf32> to vector<16xf32>
    %541 = vector.shape_cast %540 : vector<16xf32> to vector<16x1xf32>
    %542 = arith.mulf %517, %57 : vector<16x16xf32>
    %cst_141 = arith.constant dense<0.000000e+00> : vector<16xf32>
    %543 = vector.multi_reduction <add>, %542, %cst_141 [1] : vector<16x16xf32> to vector<16xf32>
    %544 = vector.shape_cast %543 : vector<16xf32> to vector<16x1xf32>
    %545 = tpu.concatenate %520, %523, %526, %529, %532, %535, %538, %541, %544 in 1 : vector<16x1xf32>, vector<16x1xf32>, vector<16x1xf32>, vector<16x1xf32>, vector<16x1xf32>, vector<16x1xf32>, vector<16x1xf32>, vector<16x1xf32>, vector<16x1xf32> -> vector<16x9xf32>
    %546 = arith.truncf %517 : vector<16x16xf32> to vector<16x16xbf16>
    %cst_142 = arith.constant dense<0.000000e+00> : vector<16x16xf32>
    %547 = tpu.matmul %546, %467, %cst_142 {dimension_numbers = #tpu.dot_dimension_numbers<[1], [0], [0], [1], [0, 0, 1, 1], [], []>} : vector<16x16xbf16>, vector<16x16xbf16>, vector<16x16xf32> -> vector<16x16xf32>
    %548 = arith.truncf %545 : vector<16x9xf32> to vector<16x9xbf16>
    %cst_143 = arith.constant dense<0.000000e+00> : vector<16x16xf32>
    %549 = tpu.matmul %548, %368, %cst_143 {dimension_numbers = #tpu.dot_dimension_numbers<[1], [0], [0], [1], [0, 0, 1, 1], [], []>} : vector<16x9xbf16>, vector<9x16xbf16>, vector<16x16xf32> -> vector<16x16xf32>
    %550 = arith.addf %547, %549 : vector<16x16xf32>
    %551 = tpu.concatenate %459, %550 in 1 : vector<16x16xf32>, vector<16x16xf32> -> vector<16x32xf32>
    %552 = arith.truncf %551 : vector<16x32xf32> to vector<16x32xbf16>
    %c1_144 = arith.constant 1 : index
    %c0_145 = arith.constant 0 : index
    %c0_146 = arith.constant 0 : index
    %553 = vector.load %arg5[%c1_144, %c0_145, %c0_146] : memref<2x32x32xbf16, #tpu.memory_space<vmem>>, vector<1x32x32xbf16>
    %554 = vector.shape_cast %553 : vector<1x32x32xbf16> to vector<32x32xbf16>
    %cst_147 = arith.constant dense<0.000000e+00> : vector<16x32xf32>
    %555 = tpu.matmul %552, %554, %cst_147 {dimension_numbers = #tpu.dot_dimension_numbers<[1], [0], [0], [1], [0, 0, 1, 1], [], []>} : vector<16x32xbf16>, vector<32x32xbf16>, vector<16x32xf32> -> vector<16x32xf32>
    %c1_148 = arith.constant 1 : index
    %c0_149 = arith.constant 0 : index
    %c0_150 = arith.constant 0 : index
    %556 = vector.load %arg6[%c1_148, %c0_149, %c0_150] : memref<2x1x32xf32, #tpu.memory_space<vmem>>, vector<1x1x32xf32>
    %557 = vector.shape_cast %556 : vector<1x1x32xf32> to vector<1x32xf32>
    %558 = vector.broadcast %557 : vector<1x32xf32> to vector<16x32xf32>
    %559 = arith.addf %555, %558 : vector<16x32xf32>
    %560 = arith.addf %356, %559 : vector<16x32xf32>
    %c1_151 = arith.constant 1 : index
    %c0_152 = arith.constant 0 : index
    %c0_153 = arith.constant 0 : index
    %561 = vector.load %arg9[%c1_151, %c0_152, %c0_153] : memref<2x1x32xf32, #tpu.memory_space<vmem>>, vector<1x1x32xf32>
    %562 = vector.shape_cast %561 : vector<1x1x32xf32> to vector<1x32xf32>
    %c1_154 = arith.constant 1 : index
    %c0_155 = arith.constant 0 : index
    %c0_156 = arith.constant 0 : index
    %563 = vector.load %arg10[%c1_154, %c0_155, %c0_156] : memref<2x1x32xf32, #tpu.memory_space<vmem>>, vector<1x1x32xf32>
    %564 = vector.shape_cast %563 : vector<1x1x32xf32> to vector<1x32xf32>
    %cst_157 = arith.constant dense<0.000000e+00> : vector<16xf32>
    %565 = vector.multi_reduction <add>, %560, %cst_157 [1] : vector<16x32xf32> to vector<16xf32>
    %566 = vector.shape_cast %565 : vector<16xf32> to vector<16x1xf32>
    %cst_158 = arith.constant 3.200000e+01 : f32
    %567 = vector.broadcast %cst_158 : f32 to vector<16x1xf32>
    %568 = arith.divf %566, %567 : vector<16x1xf32>
    %569 = vector.broadcast %568 : vector<16x1xf32> to vector<16x32xf32>
    %570 = arith.subf %560, %569 : vector<16x32xf32>
    %571 = arith.mulf %570, %570 : vector<16x32xf32>
    %cst_159 = arith.constant dense<0.000000e+00> : vector<16xf32>
    %572 = vector.multi_reduction <add>, %571, %cst_159 [1] : vector<16x32xf32> to vector<16xf32>
    %573 = vector.shape_cast %572 : vector<16xf32> to vector<16x1xf32>
    %cst_160 = arith.constant 3.200000e+01 : f32
    %574 = vector.broadcast %cst_160 : f32 to vector<16x1xf32>
    %575 = arith.divf %573, %574 : vector<16x1xf32>
    %576 = vector.broadcast %568 : vector<16x1xf32> to vector<16x32xf32>
    %577 = arith.subf %560, %576 : vector<16x32xf32>
    %cst_161 = arith.constant 9.99999974E-6 : f32
    %578 = vector.broadcast %cst_161 : f32 to vector<16x1xf32>
    %579 = arith.addf %575, %578 : vector<16x1xf32>
    %580 = math.rsqrt %579 : vector<16x1xf32>
    %581 = vector.broadcast %580 : vector<16x1xf32> to vector<16x32xf32>
    %582 = arith.mulf %577, %581 : vector<16x32xf32>
    %583 = vector.broadcast %562 : vector<1x32xf32> to vector<16x32xf32>
    %584 = arith.mulf %582, %583 : vector<16x32xf32>
    %585 = vector.broadcast %564 : vector<1x32xf32> to vector<16x32xf32>
    %586 = arith.addf %584, %585 : vector<16x32xf32>
    %587 = vector.broadcast %7 : vector<16x1xf32> to vector<16x32xf32>
    %588 = arith.mulf %586, %587 : vector<16x32xf32>
    %cst_162 = arith.constant 0.000000e+00 : f32
    %589 = vector.broadcast %cst_162 : f32 to vector<1x32xf32>
    %cst_163 = arith.constant 0.000000e+00 : f32
    %590 = vector.broadcast %cst_163 : f32 to vector<1x32xf32>
    %591 = tpu.concatenate %589, %588, %590 in 0 : vector<1x32xf32>, vector<16x32xf32>, vector<1x32xf32> -> vector<18x32xf32>
    %592 = vector.extract_strided_slice %591 {offsets = [0, 0], sizes = [16, 32], strides = [1, 1]} : vector<18x32xf32> to vector<16x32xf32>
    %593 = vector.extract_strided_slice %591 {offsets = [1, 0], sizes = [16, 32], strides = [1, 1]} : vector<18x32xf32> to vector<16x32xf32>
    %594 = vector.extract_strided_slice %591 {offsets = [2, 0], sizes = [16, 32], strides = [1, 1]} : vector<18x32xf32> to vector<16x32xf32>
    %595 = tpu.concatenate %592, %593, %594 in 1 : vector<16x32xf32>, vector<16x32xf32>, vector<16x32xf32> -> vector<16x96xf32>
    %596 = arith.truncf %595 : vector<16x96xf32> to vector<16x96xbf16>
    %c1_164 = arith.constant 1 : index
    %c0_165 = arith.constant 0 : index
    %c0_166 = arith.constant 0 : index
    %597 = vector.load %arg13[%c1_164, %c0_165, %c0_166] : memref<2x96x64xbf16, #tpu.memory_space<vmem>>, vector<1x96x64xbf16>
    %598 = vector.shape_cast %597 : vector<1x96x64xbf16> to vector<96x64xbf16>
    %cst_167 = arith.constant dense<0.000000e+00> : vector<16x64xf32>
    %599 = tpu.matmul %596, %598, %cst_167 {dimension_numbers = #tpu.dot_dimension_numbers<[1], [0], [0], [1], [0, 0, 1, 1], [], []>} : vector<16x96xbf16>, vector<96x64xbf16>, vector<16x64xf32> -> vector<16x64xf32>
    %c1_168 = arith.constant 1 : index
    %c0_169 = arith.constant 0 : index
    %c0_170 = arith.constant 0 : index
    %600 = vector.load %arg14[%c1_168, %c0_169, %c0_170] : memref<2x1x64xf32, #tpu.memory_space<vmem>>, vector<1x1x64xf32>
    %601 = vector.shape_cast %600 : vector<1x1x64xf32> to vector<1x64xf32>
    %602 = vector.broadcast %601 : vector<1x64xf32> to vector<16x64xf32>
    %603 = arith.addf %599, %602 : vector<16x64xf32>
    %cst_171 = arith.constant 0.000000e+00 : f32
    %604 = vector.broadcast %cst_171 : f32 to vector<16x64xf32>
    %605 = arith.maximumf %603, %604 : vector<16x64xf32>
    %606 = vector.broadcast %7 : vector<16x1xf32> to vector<16x64xf32>
    %607 = arith.mulf %605, %606 : vector<16x64xf32>
    %cst_172 = arith.constant 0.000000e+00 : f32
    %608 = vector.broadcast %cst_172 : f32 to vector<1x64xf32>
    %cst_173 = arith.constant 0.000000e+00 : f32
    %609 = vector.broadcast %cst_173 : f32 to vector<1x64xf32>
    %610 = tpu.concatenate %608, %607, %609 in 0 : vector<1x64xf32>, vector<16x64xf32>, vector<1x64xf32> -> vector<18x64xf32>
    %611 = vector.extract_strided_slice %610 {offsets = [0, 0], sizes = [16, 64], strides = [1, 1]} : vector<18x64xf32> to vector<16x64xf32>
    %612 = vector.extract_strided_slice %610 {offsets = [1, 0], sizes = [16, 64], strides = [1, 1]} : vector<18x64xf32> to vector<16x64xf32>
    %613 = vector.extract_strided_slice %610 {offsets = [2, 0], sizes = [16, 64], strides = [1, 1]} : vector<18x64xf32> to vector<16x64xf32>
    %614 = tpu.concatenate %611, %612, %613 in 1 : vector<16x64xf32>, vector<16x64xf32>, vector<16x64xf32> -> vector<16x192xf32>
    %615 = arith.truncf %614 : vector<16x192xf32> to vector<16x192xbf16>
    %c1_174 = arith.constant 1 : index
    %c0_175 = arith.constant 0 : index
    %c0_176 = arith.constant 0 : index
    %616 = vector.load %arg15[%c1_174, %c0_175, %c0_176] : memref<2x192x32xbf16, #tpu.memory_space<vmem>>, vector<1x192x32xbf16>
    %617 = vector.shape_cast %616 : vector<1x192x32xbf16> to vector<192x32xbf16>
    %cst_177 = arith.constant dense<0.000000e+00> : vector<16x32xf32>
    %618 = tpu.matmul %615, %617, %cst_177 {dimension_numbers = #tpu.dot_dimension_numbers<[1], [0], [0], [1], [0, 0, 1, 1], [], []>} : vector<16x192xbf16>, vector<192x32xbf16>, vector<16x32xf32> -> vector<16x32xf32>
    %c1_178 = arith.constant 1 : index
    %c0_179 = arith.constant 0 : index
    %c0_180 = arith.constant 0 : index
    %619 = vector.load %arg16[%c1_178, %c0_179, %c0_180] : memref<2x1x32xf32, #tpu.memory_space<vmem>>, vector<1x1x32xf32>
    %620 = vector.shape_cast %619 : vector<1x1x32xf32> to vector<1x32xf32>
    %621 = vector.broadcast %620 : vector<1x32xf32> to vector<16x32xf32>
    %622 = arith.addf %618, %621 : vector<16x32xf32>
    %623 = vector.broadcast %7 : vector<16x1xf32> to vector<16x32xf32>
    %624 = arith.mulf %622, %623 : vector<16x32xf32>
    %625 = arith.addf %586, %624 : vector<16x32xf32>
    %c1_181 = arith.constant 1 : index
    %c0_182 = arith.constant 0 : index
    %c0_183 = arith.constant 0 : index
    %626 = vector.load %arg11[%c1_181, %c0_182, %c0_183] : memref<2x1x32xf32, #tpu.memory_space<vmem>>, vector<1x1x32xf32>
    %627 = vector.shape_cast %626 : vector<1x1x32xf32> to vector<1x32xf32>
    %c1_184 = arith.constant 1 : index
    %c0_185 = arith.constant 0 : index
    %c0_186 = arith.constant 0 : index
    %628 = vector.load %arg12[%c1_184, %c0_185, %c0_186] : memref<2x1x32xf32, #tpu.memory_space<vmem>>, vector<1x1x32xf32>
    %629 = vector.shape_cast %628 : vector<1x1x32xf32> to vector<1x32xf32>
    %cst_187 = arith.constant dense<0.000000e+00> : vector<16xf32>
    %630 = vector.multi_reduction <add>, %625, %cst_187 [1] : vector<16x32xf32> to vector<16xf32>
    %631 = vector.shape_cast %630 : vector<16xf32> to vector<16x1xf32>
    %cst_188 = arith.constant 3.200000e+01 : f32
    %632 = vector.broadcast %cst_188 : f32 to vector<16x1xf32>
    %633 = arith.divf %631, %632 : vector<16x1xf32>
    %634 = vector.broadcast %633 : vector<16x1xf32> to vector<16x32xf32>
    %635 = arith.subf %625, %634 : vector<16x32xf32>
    %636 = arith.mulf %635, %635 : vector<16x32xf32>
    %cst_189 = arith.constant dense<0.000000e+00> : vector<16xf32>
    %637 = vector.multi_reduction <add>, %636, %cst_189 [1] : vector<16x32xf32> to vector<16xf32>
    %638 = vector.shape_cast %637 : vector<16xf32> to vector<16x1xf32>
    %cst_190 = arith.constant 3.200000e+01 : f32
    %639 = vector.broadcast %cst_190 : f32 to vector<16x1xf32>
    %640 = arith.divf %638, %639 : vector<16x1xf32>
    %641 = vector.broadcast %633 : vector<16x1xf32> to vector<16x32xf32>
    %642 = arith.subf %625, %641 : vector<16x32xf32>
    %cst_191 = arith.constant 9.99999974E-6 : f32
    %643 = vector.broadcast %cst_191 : f32 to vector<16x1xf32>
    %644 = arith.addf %640, %643 : vector<16x1xf32>
    %645 = math.rsqrt %644 : vector<16x1xf32>
    %646 = vector.broadcast %645 : vector<16x1xf32> to vector<16x32xf32>
    %647 = arith.mulf %642, %646 : vector<16x32xf32>
    %648 = vector.broadcast %627 : vector<1x32xf32> to vector<16x32xf32>
    %649 = arith.mulf %647, %648 : vector<16x32xf32>
    %650 = vector.broadcast %629 : vector<1x32xf32> to vector<16x32xf32>
    %651 = arith.addf %649, %650 : vector<16x32xf32>
    %652 = vector.broadcast %7 : vector<16x1xf32> to vector<16x32xf32>
    %653 = arith.mulf %651, %652 : vector<16x32xf32>
    %654 = arith.truncf %653 : vector<16x32xf32> to vector<16x32xbf16>
    %c0_192 = arith.constant 0 : index
    %c0_193 = arith.constant 0 : index
    %655 = vector.load %arg17[%c0_192, %c0_193] : memref<32x16xbf16, #tpu.memory_space<vmem>>, vector<32x16xbf16>
    %cst_194 = arith.constant dense<0.000000e+00> : vector<16x16xf32>
    %656 = tpu.matmul %654, %655, %cst_194 {dimension_numbers = #tpu.dot_dimension_numbers<[1], [0], [0], [1], [0, 0, 1, 1], [], []>} : vector<16x32xbf16>, vector<32x16xbf16>, vector<16x16xf32> -> vector<16x16xf32>
    %c0_195 = arith.constant 0 : index
    %c0_196 = arith.constant 0 : index
    %657 = vector.load %arg18[%c0_195, %c0_196] : memref<1x16xf32, #tpu.memory_space<vmem>>, vector<1x16xf32>
    %658 = vector.broadcast %657 : vector<1x16xf32> to vector<16x16xf32>
    %659 = arith.addf %656, %658 : vector<16x16xf32>
    %660 = vector.broadcast %7 : vector<16x1xf32> to vector<16x16xf32>
    %661 = arith.mulf %659, %660 : vector<16x16xf32>
    %c0_197 = arith.constant 0 : index
    %c0_198 = arith.constant 0 : index
    %c0_199 = arith.constant 0 : index
    %662 = vector.load %arg19[%c0_197, %c0_198, %c0_199] : memref<1x16x48xf32, #tpu.memory_space<vmem>>, vector<1x16x32xf32>
    %663 = vector.shape_cast %662 : vector<1x16x32xf32> to vector<16x32xf32>
    %664 = vector.shape_cast %653 : vector<16x32xf32> to vector<1x16x32xf32>
    tpu.vector_store %arg19[%c0_197, %c0_198, %c0_199], %664 {strides = array<i32>} : memref<1x16x48xf32, #tpu.memory_space<vmem>>, vector<1x16x32xf32>,
    %c0_200 = arith.constant 0 : index
    %c0_201 = arith.constant 0 : index
    %c32 = arith.constant 32 : index
    %665 = vector.load %arg19[%c0_200, %c0_201, %c32] : memref<1x16x48xf32, #tpu.memory_space<vmem>>, vector<1x16x16xf32>
    %666 = vector.shape_cast %665 : vector<1x16x16xf32> to vector<16x16xf32>
    %667 = vector.shape_cast %661 : vector<16x16xf32> to vector<1x16x16xf32>
    tpu.vector_store %arg19[%c0_200, %c0_201, %c32], %667 {strides = array<i32>} : memref<1x16x48xf32, #tpu.memory_space<vmem>>, vector<1x16x16xf32>,
    return
  }
  func.func @transform_0(%arg0: i32, %arg1: memref<2xi32, #tpu.memory_space<smem>>) -> (i32, i32, i32) {
    %c0_i32 = arith.constant 0 : i32
    %c0_i32_0 = arith.constant 0 : i32
    %c0_i32_1 = arith.constant 0 : i32
    return %arg0, %c0_i32, %c0_i32_0 : i32, i32, i32
  }
  func.func @transform_1(%arg0: i32, %arg1: memref<2xi32, #tpu.memory_space<smem>>) -> (i32, i32, i32) {
    %c0_i32 = arith.constant 0 : i32
    %c0_i32_0 = arith.constant 0 : i32
    %c0_i32_1 = arith.constant 0 : i32
    %c0_i32_2 = arith.constant 0 : i32
    return %c0_i32, %c0_i32_0, %c0_i32_1 : i32, i32, i32
  }
  func.func @transform_2(%arg0: i32, %arg1: memref<2xi32, #tpu.memory_space<smem>>) -> (i32, i32, i32) {
    %c0_i32 = arith.constant 0 : i32
    %c0_i32_0 = arith.constant 0 : i32
    %c0_i32_1 = arith.constant 0 : i32
    %c0_i32_2 = arith.constant 0 : i32
    return %c0_i32, %c0_i32_0, %c0_i32_1 : i32, i32, i32
  }
  func.func @transform_3(%arg0: i32, %arg1: memref<2xi32, #tpu.memory_space<smem>>) -> (i32, i32, i32) {
    %c0_i32 = arith.constant 0 : i32
    %c0_i32_0 = arith.constant 0 : i32
    %c0_i32_1 = arith.constant 0 : i32
    %c0_i32_2 = arith.constant 0 : i32
    return %c0_i32, %c0_i32_0, %c0_i32_1 : i32, i32, i32
  }
  func.func @transform_4(%arg0: i32, %arg1: memref<2xi32, #tpu.memory_space<smem>>) -> (i32, i32, i32) {
    %c0_i32 = arith.constant 0 : i32
    %c0_i32_0 = arith.constant 0 : i32
    %c0_i32_1 = arith.constant 0 : i32
    %c0_i32_2 = arith.constant 0 : i32
    return %c0_i32, %c0_i32_0, %c0_i32_1 : i32, i32, i32
  }
  func.func @transform_5(%arg0: i32, %arg1: memref<2xi32, #tpu.memory_space<smem>>) -> (i32, i32, i32) {
    %c0_i32 = arith.constant 0 : i32
    %c0_i32_0 = arith.constant 0 : i32
    %c0_i32_1 = arith.constant 0 : i32
    %c0_i32_2 = arith.constant 0 : i32
    return %c0_i32, %c0_i32_0, %c0_i32_1 : i32, i32, i32
  }
  func.func @transform_6(%arg0: i32, %arg1: memref<2xi32, #tpu.memory_space<smem>>) -> (i32, i32, i32) {
    %c0_i32 = arith.constant 0 : i32
    %c0_i32_0 = arith.constant 0 : i32
    %c0_i32_1 = arith.constant 0 : i32
    %c0_i32_2 = arith.constant 0 : i32
    return %c0_i32, %c0_i32_0, %c0_i32_1 : i32, i32, i32
  }
  func.func @transform_7(%arg0: i32, %arg1: memref<2xi32, #tpu.memory_space<smem>>) -> (i32, i32, i32) {
    %c0_i32 = arith.constant 0 : i32
    %c0_i32_0 = arith.constant 0 : i32
    %c0_i32_1 = arith.constant 0 : i32
    %c0_i32_2 = arith.constant 0 : i32
    return %c0_i32, %c0_i32_0, %c0_i32_1 : i32, i32, i32
  }
  func.func @transform_8(%arg0: i32, %arg1: memref<2xi32, #tpu.memory_space<smem>>) -> (i32, i32, i32) {
    %c0_i32 = arith.constant 0 : i32
    %c0_i32_0 = arith.constant 0 : i32
    %c0_i32_1 = arith.constant 0 : i32
    %c0_i32_2 = arith.constant 0 : i32
    return %c0_i32, %c0_i32_0, %c0_i32_1 : i32, i32, i32
  }
  func.func @transform_9(%arg0: i32, %arg1: memref<2xi32, #tpu.memory_space<smem>>) -> (i32, i32, i32) {
    %c0_i32 = arith.constant 0 : i32
    %c0_i32_0 = arith.constant 0 : i32
    %c0_i32_1 = arith.constant 0 : i32
    %c0_i32_2 = arith.constant 0 : i32
    return %c0_i32, %c0_i32_0, %c0_i32_1 : i32, i32, i32
  }
  func.func @transform_10(%arg0: i32, %arg1: memref<2xi32, #tpu.memory_space<smem>>) -> (i32, i32, i32) {
    %c0_i32 = arith.constant 0 : i32
    %c0_i32_0 = arith.constant 0 : i32
    %c0_i32_1 = arith.constant 0 : i32
    %c0_i32_2 = arith.constant 0 : i32
    return %c0_i32, %c0_i32_0, %c0_i32_1 : i32, i32, i32
  }
  func.func @transform_11(%arg0: i32, %arg1: memref<2xi32, #tpu.memory_space<smem>>) -> (i32, i32, i32) {
    %c0_i32 = arith.constant 0 : i32
    %c0_i32_0 = arith.constant 0 : i32
    %c0_i32_1 = arith.constant 0 : i32
    %c0_i32_2 = arith.constant 0 : i32
    return %c0_i32, %c0_i32_0, %c0_i32_1 : i32, i32, i32
  }
  func.func @transform_12(%arg0: i32, %arg1: memref<2xi32, #tpu.memory_space<smem>>) -> (i32, i32, i32) {
    %c0_i32 = arith.constant 0 : i32
    %c0_i32_0 = arith.constant 0 : i32
    %c0_i32_1 = arith.constant 0 : i32
    %c0_i32_2 = arith.constant 0 : i32
    return %c0_i32, %c0_i32_0, %c0_i32_1 : i32, i32, i32
  }
  func.func @transform_13(%arg0: i32, %arg1: memref<2xi32, #tpu.memory_space<smem>>) -> (i32, i32, i32) {
    %c0_i32 = arith.constant 0 : i32
    %c0_i32_0 = arith.constant 0 : i32
    %c0_i32_1 = arith.constant 0 : i32
    %c0_i32_2 = arith.constant 0 : i32
    return %c0_i32, %c0_i32_0, %c0_i32_1 : i32, i32, i32
  }
  func.func @transform_14(%arg0: i32, %arg1: memref<2xi32, #tpu.memory_space<smem>>) -> (i32, i32, i32) {
    %c0_i32 = arith.constant 0 : i32
    %c0_i32_0 = arith.constant 0 : i32
    %c0_i32_1 = arith.constant 0 : i32
    %c0_i32_2 = arith.constant 0 : i32
    return %c0_i32, %c0_i32_0, %c0_i32_1 : i32, i32, i32
  }
  func.func @transform_15(%arg0: i32, %arg1: memref<2xi32, #tpu.memory_space<smem>>) -> (i32, i32) {
    %c0_i32 = arith.constant 0 : i32
    %c0_i32_0 = arith.constant 0 : i32
    %c0_i32_1 = arith.constant 0 : i32
    return %c0_i32, %c0_i32_0 : i32, i32
  }
  func.func @transform_16(%arg0: i32, %arg1: memref<2xi32, #tpu.memory_space<smem>>) -> (i32, i32) {
    %c0_i32 = arith.constant 0 : i32
    %c0_i32_0 = arith.constant 0 : i32
    %c0_i32_1 = arith.constant 0 : i32
    return %c0_i32, %c0_i32_0 : i32, i32
  }
  func.func @transform_17(%arg0: i32, %arg1: memref<2xi32, #tpu.memory_space<smem>>) -> (i32, i32, i32) {
    %c0_i32 = arith.constant 0 : i32
    %c0_i32_0 = arith.constant 0 : i32
    %c0_i32_1 = arith.constant 0 : i32
    return %arg0, %c0_i32, %c0_i32_0 : i32, i32, i32
  }
}

</mosaic_0001>

<bundles_post_ra>
// kernel: tpu_custom_call.1
= control target key start
LH: loop header
LB: loop body
LE: loop exit
PB: predicated region body
PF: predicated region fallthrough
CT: control target
= control target key end

     0   :  { %s3814_s30 = smov [#allocation3]   ;;  %s5050_s0 = inlined_call_operand.vmem [shape: s32[2], index: 0, kind: input, shape index: {}]   ;;  %s5051_s1 = inlined_call_operand.vmem [shape: f32[2,16,32], index: 1, kind: input, shape index: {}]   ;;  %s5052_s2 = inlined_call_operand.vmem [shape: bf16[2,32,96], index: 2, kind: input, shape index: {}]   ;;  %s5053_s3 = inlined_call_operand.vmem [shape: f32[2,1,96], index: 3, kind: input, shape index: {}]   ;;  %s5054_s4 = inlined_call_operand.vmem [shape: bf16[2,32,32], index: 4, kind: input, shape index: {}]   ;;  %s5055_s5 = inlined_call_operand.vmem [shape: f32[2,1,32], index: 5, kind: input, shape index: {}]   ;;  %s5056_s6 = inlined_call_operand.vmem [shape: bf16[2,9,16], index: 6, kind: input, shape index: {}]   ;;  %s5057_s7 = inlined_call_operand.vmem [shape: bf16[2,9,16], index: 7, kind: input, shape index: {}]   ;;  %s5058_s8 = inlined_call_operand.vmem [shape: f32[2,1,32], index: 8, kind: input, shape index: {}]   ;;  %s5059_s9 = inlined_call_operand.vmem [shape: f32[2,1,32], index: 9, kind: input, shape index: {}]   ;;  %s5060_s10 = inlined_call_operand.vmem [shape: f32[2,1,32], index: 10, kind: input, shape index: {}]   ;;  %s5061_s11 = inlined_call_operand.vmem [shape: f32[2,1,32], index: 11, kind: input, shape index: {}]   ;;  %s5062_s12 = inlined_call_operand.vmem [shape: bf16[2,96,64], index: 12, kind: input, shape index: {}]   ;;  %s5063_s13 = inlined_call_operand.vmem [shape: f32[2,1,64], index: 13, kind: input, shape index: {}]   ;;  %s5064_s14 = inlined_call_operand.vmem [shape: bf16[2,192,32], index: 14, kind: input, shape index: {}]   ;;  %s5065_s15 = inlined_call_operand.vmem [shape: f32[2,1,32], index: 15, kind: input, shape index: {}]   ;;  %s5066_s16 = inlined_call_operand.vmem [shape: bf16[32,16], index: 16, kind: input, shape index: {}]   ;;  %s5067_s17 = inlined_call_operand.vmem [shape: f32[1,16], index: 17, kind: input, shape index: {}]   ;;  %s5068_s18 = inlined_call_operand.hbm [shape: f32[2,16,48], index: 18, kind: output, shape index: {}]  }
   0x1   :  { %5092 = sst [smem:[#allocation12_spill]] %s5050_s0 }
   0x2   :  { %5093 = sst [smem:[#allocation13_spill]] %s5051_s1 }
   0x3   :  { %5094 = sst [smem:[#allocation14_spill]] %s5052_s2 }
   0x4   :  { %5095 = sst [smem:[#allocation15_spill]] %s5053_s3 }
   0x5   :  { %5096 = sst [smem:[#allocation16_spill]] %s5054_s4 }
   0x6   :  { %5097 = sst [smem:[#allocation17_spill]] %s5055_s5 }
   0x7   :  { %5098 = sst [smem:[#allocation18_spill]] %s5061_s11 }
   0x8   :  { %s5099_s29 = sld [smem:[#allocation12_spill]] }
   0xe   :  { %s24_s11 = sshll.u32 %s5099_s29, 4  ;;  %s25_s11 = int_to_ptr.vmem [resolvable:$true] %s24_s11 }
   0xf   :  { %27 = dma.vmem_to_smem %s25_s11, 16, %s3814_s30, [#allocation2] }
  0x10   :  { %3792 = dma.done.wait [#allocation2], 16 }
  0x11   :  { %3793 = vsyncadd [#allocation2], 4294967280 }
  0x12   :  { %30 = sfence }
  0x13   :  { %31 = vsyncpa [#allocation5], 0 }
  0x14   :  { %33 = vsyncpa [#allocation5 + $0x1], 0  ;;  %s3934_s0 = smov 0   ;;  %s3936_s19 = smov 0  }
  0x15   :  { %s3938_s1 = smov 0   ;;  %s3940_s20 = smov 0  }
  0x16 LB: > { %5100 = sst [smem:[#allocation8_spill]] %s3808_s1  ;;  %s3955_s11 = sadd.s32 4294967295, %s3812_s20   ;;  %s3812_s20 = sphi %s3940_s20, %s5143_s20   ;;  %s3808_s1 = sphi %s3938_s1, %s5145_s1   ;;  %s3804_s19 = sphi %s3936_s19, %s5147_s19   ;;  %s3800_s0 = sphi %s3934_s0, %s5146_s0  }
  0x17   : > { %s3127_s21 = sadd.s32 4294967294, %s3812_s20   ;;  %s3959_s22 = sadd.s32 1, %s3812_s20  }
  0x18   : > { %5101 = sst [smem:[#allocation9_spill]] %s3959_s22  ;;  %s408_s2 = sadd.s32 1, %s3808_s1 }
  0x19   : > { %s405_s23 = ssub.s32 %s3812_s20, %s3959_s22  ;;  %p418_p0 = scmp.ne.s32.totalorder %s3808_s1, %s3804_s19 }
  0x1a   : > { %p406_p1 = scmp.eq.s32.totalorder %s405_s23, 0  ;;  %p419_p2 = scmp.eq.s32.totalorder %s3955_s11, 1 }
  0x1b   : > { %p424_p3 = scmp.ne.s32.totalorder %s3804_s19, %s3800_s0  ;;  %p425_p4 = scmp.eq.s32.totalorder %s3127_s21, 1 }
  0x1c   : > { %s3970_s24 = scalar_select %p406_p1, %s3808_s1, %s408_s2  }
  0x1d   : > { %p3972_p5 = por %p419_p2, %p418_p0  ;;  %p3976_p6 = por %p425_p4, %p424_p3 }
  0x1e   : > { %5102 = sst [smem:[#allocation10_spill]] %s3970_s24  ;;  %p3130_p7 = scmp.ge.s32.totalorder %s3812_s20, 1 }
  0x1f   : > { %s5104_s26 = scalar_select %p3976_p6, 1, 0 }
  0x20   : > { %p499_p8 = scmp.lt.s32.totalorder %s3812_s20, 3 }
  0x21   : > { %5105 = sst [smem:[#allocation11_spill]] %s5104_s26 }
  0x22   : > { %p500_p9 = pnand %p3130_p7, %p499_p8 }
  0x23   : > { %s5106_s29 = sld [smem:[#allocation14_spill]] (!%p500_p9)  ;;  %p551_p10 = scmp.lt.s32.totalorder (!%p500_p9), %s3955_s11, 1 }
  0x24   : > { %503 = sbr.rel (%p500_p9) target bundleno = 5262 (0x148e), region = 88  ;;  %s557_s30 = sld [smem:[#allocation3 + %s3955_s11]] (!%p500_p9) }
  0x25   : > { %s5107_s1 = sld [smem:[#allocation13_spill]] (!%p500_p9)  ;;  %s5079_s27 = smov (!%p500_p9), 96  }
  0x26   : > { %s5108_s3 = sld [smem:[#allocation15_spill]] (!%p500_p9)  ;;  %s5078_s28 = smov (!%p500_p9), 112  }
  0x27   : > { %s5076_s2 = smov (!%p500_p9), 48   ;;  %s5109_s4 = sld [smem:[#allocation16_spill]] (!%p500_p9) }
  0x28   : > { %s5110_s5 = sld [smem:[#allocation17_spill]] (!%p500_p9)  ;;  %s5113_s21 = smov (!%p500_p9), 80  }
  0x29   : > { %v3445_v0 = vld [vmem:[%s5106_s29 + $0x8] sm:$0xff]  ;;  %v558_v1 = vlaneseq  ;;  %v3444_v2 = vld [vmem:[%s5106_s29] sm:$0xff]  ;;  %s552_s23 = scalar_select %p551_p10, %s3955_s11, 1  ;;  %v3815_v8 = vmov 0.0   ;;  %vm660_vm2 = vcmask 261120   ;;  %vm689_vm3 = vcmask 130048  }
  0x2a   : > { %670 = vmatpush.bf16.msra.mxu0 %v3445_v0  ;;  %v4000_v5 = vstv %s557_s30  ;;  %v3169_v14 = vld [vmem:[%s5056_s6] sm:$0xf]  ;;  %v3446_v15 = vld [vmem:[%s5056_s6] sm:$0x10]  ;;  %v5074_v27 = vmov 4   ;;  %v3820_v28 = vmov 1  }
  0x2b   : > { %v3992_v3 = vshrl.u32 %v558_v1, 7  ;;  %s3443_s24 = sshll.u32 %s552_s23, 4  ;;  %v3170_v16 = vor.u32 %v3446_v15, %v3169_v14  ;;  %s5080_s23 = smov 80   ;;  %3560 = vset.pattern.permute.xlu0 %v5074_v27  ;;  %3557 = vset.pattern.permute.xlu2 %v3820_v28  ;;  %v3821_v29 = vmov 0   ;;  %v3822_v37 = vmov 5  }
  0x2c   : > { %s555_s22 = scalar_lea.vmem %s5107_s1, %s3443_s24  ;;  %v3669_v19 = vld [vmem:[%s5108_s3] ss:$0 sm:$0xff]  ;;  %3556 = vset.pattern.permute.xlu1 %v3821_v29  ;;  %v3823_v38 = vmov 2   ;;  %v3824_v39 = vmov 6   ;;  %v3825_v40 = vmov 3   ;;  %v3826_v41 = vmov 7  }
  0x2d   : > { %v3995_v4 = vadd.s32 8, %v3992_v3  ;;  %v635_v6 = vld [vmem:[%s555_s22] sm:$0xff]  ;;  %v636_v7 = vld [vmem:[%s555_s22 + $0x8] sm:$0xff]  ;;  %vm564_vm0 = vcmp.lt.s32.totalorder %v3992_v3, %v4000_v5  ;;  %v716_v17 = vsel %vm689_vm3, %v3170_v16, 0  ;;  %v3827_v42 = vmov 8   ;;  %s5083_s1 = smov 64  }
  0x2e   : > { %671 = vmatpush.bf16.msra.mxu0 %v3444_v2  ;;  %v4007_v9 = vsel %vm564_vm0, 1.0, %v3815_v8  ;;  %725 = vmatpush.bf16.xpose.msra.mxu2 %v716_v17  ;;  %v4068_v46 = vand.u32 127, %v558_v1  ;;  %s5077_s30 = smov 16   ;;  %s5112_s24 = sld [smem:[#allocation18_spill]] }
  0x2f   : > { %vm565_vm1 = vcmp.lt.s32.totalorder %v3995_v4, %v4000_v5  ;;  %v4013_v11 = vmul.f32 %v4007_v9, %v635_v6  ;;  %s5114_s22 = smov 96  }
  0x30   : > { %v4010_v10 = vsel %vm565_vm1, 1.0, %v3815_v8  ;;  %vm570_vm4 = vcmp.lt.s32.totalorder %v4068_v46, %v4000_v5  ;;  %v579_v51 = vsub.s32 %v4068_v46, %v3992_v3 }
  0x31   : > { %v4016_v12 = vmul.f32 %v4010_v10, %v636_v7  ;;  %v3136_v48 = vsel %vm570_vm4, 1.0, %v3815_v8 }
  0x32   : > { %v573_v49 = vmul.f32 %v3136_v48, %v4007_v9  ;;  %vm581_vm5 = vcmp.eq.s32.totalorder %v579_v51, 4294967292  ;;  %vm587_vm6 = vcmp.eq.s32.totalorder %v579_v51, 4294967293  ;;  %vm593_vm7 = vcmp.eq.s32.totalorder %v579_v51, 4294967294 }
  0x33   : > { %v639_v13 = vpack.c.bf16 %v4016_v12, %v4013_v11  ;;  %v4088_v56 = vsel %vm581_vm5, 1.0, %v3815_v8  ;;  %vm599_vm8 = vcmp.eq.s32.totalorder %v579_v51, 4294967295  ;;  %v4096_v60 = vsel %vm587_vm6, 1.0, %v3815_v8 }
  0x34   : > { %v3137_v52 = vadd.f32 -1.0, %v573_v49  ;;  %v4099_v61 = vsel %vm593_vm7, 1.0, %v3815_v8  ;;  %v4103_v0 = vsel %vm599_vm8, 1.0, %v3815_v8  ;;  %vm605_vm9 = vcmp.eq.s32.totalorder %v579_v51, 0 }
  0x35   : > { %3165 = vmatmul.msk.bf16.vlgmr.msra.gmra.mxu0 %vm660_vm2, %v639_v13  ;;  %v4110_v13 = vsel %vm605_vm9, 1.0, %v3815_v8  ;;  %vm611_vm10 = vcmp.eq.s32.totalorder %v579_v51, 1  ;;  %vm617_vm11 = vcmp.eq.s32.totalorder %v579_v51, 2  ;;  %vm623_vm12 = vcmp.eq.s32.totalorder %v579_v51, 3 }
  0x36   : > { %v4085_v55 = vmul.f32 10000.0, %v3137_v52  ;;  %vm629_vm13 = vcmp.eq.s32.totalorder %v579_v51, 4 }
  0xb2   : > { %v673_v18 = vpop.f32.mrf.mxu0 }
  0xb3   : > { %v674_v20 = vadd.f32 %v3669_v19, %v673_v18  ;;  %v4116_v18 = vsel %vm611_vm10, 1.0, %v3815_v8 }
  0xb5   : > { %v682_v23 = vmul.f32 0.25, %v674_v20 }
  0xba   : > { %v675_v21 = vpop.f32.mrf.mxu0 }
  0xbb   : > { %v676_v22 = vadd.f32 %v3669_v19, %v675_v21  ;;  %v4120_v21 = vsel %vm617_vm11, 1.0, %v3815_v8 }
  0xbd   : > { %v683_v24 = vmul.f32 0.25, %v676_v22  ;;  %v4031_v25 = vpack.c.bf16 %v676_v22, %v674_v20 }
  0xbf   : > { %1043 = vrot.lane.b32.xlu1 %v4031_v25, %s5080_s23  ;;  %687 = vrot.lane.b32.xlu0 %v4031_v25, %s5079_s27  ;;  %v684_v26 = vpack.c.bf16 %v683_v24, %v682_v23  ;;  %v4125_v24 = vsel %vm623_vm12, 1.0, %v3815_v8  ;;  %s5081_s23 = smov 32   ;;  %s5117_s27 = smov 48  }
  0xc1   : > { %3171 = vmatmul.msk.bf16.vlgmr.msra.gmra.mxu2 %vm689_vm3, %v684_v26 }
  0xc7   : > { %1041 = vrot.lane.b32.xlu0 %v684_v26, %s5078_s28  ;;  %s5115_s28 = smov 112  }
 0x131   : > { %v1044_v30 = vpop.permute.xlu1 %1043  ;;  %v688_v31 = vpop.permute.xlu0 %687 }
 0x132   : > { %v694_v32 = vsel %vm689_vm3, %v688_v31, 0  ;;  %v1049_v33 = vsel %vm689_vm3, %v1044_v30, 0  ;;  %v574_v30 = vmul.f32 %v3136_v48, %v4010_v10  ;;  %v4130_v31 = vsel %vm629_vm13, 1.0, %v3815_v8 }
 0x133   : > { %703 = vmatpush.bf16.xpose.msra.mxu1 %v694_v32  ;;  %1058 = vmatpush.bf16.xpose.msrb.mxu0 %v1049_v33 }
 0x139   : > { %v1042_v34 = vpop.permute.xlu0 %1041 }
 0x13a   : > { %3166 = vmatmul.msk.bf16.vlgmr.msra.gmra.mxu1 %vm689_vm3, %v684_v26  ;;  %3178 = vmatmul.msk.bf16.vlgmr.msrb.gmra.mxu0 %vm689_vm3, %v1042_v34 }
 0x13b   : > { %1072 = vmatpush.bf16.xpose.msrb.mxu1 %v716_v17 }
 0x144   : > { %v727_v35 = vpop.f32.mrf.mxu2 }
 0x145   : > { %783 = vperm.xlu0 %3560, %v727_v35   ;;  %747 = vperm.xlu2 %3557, %v727_v35  }
 0x146   : > { %734 = vperm.xlu1 %3556, %v727_v35  }
 0x14a   : > { %3179 = vmatmul.msk.bf16.vlgmr.msrb.gmra.mxu1 %vm689_vm3, %v1042_v34 }
 0x14c   : > { %v729_v36 = vpop.f32.mrf.mxu2 }
 0x14d   : > { %3566 = vset.pattern.permute.xlu0 %v3820_v28  ;;  %3561 = vset.pattern.permute.xlu2 %v3822_v37 }
 0x14e   : > { %3558 = vset.pattern.permute.xlu1 %v3823_v38  ;;  %795 = vperm.xlu2 %3561, %v727_v35  }
 0x14f   : > { %759 = vperm.xlu1 %3558, %v727_v35   ;;  %751 = vperm.xlu0 %3566, %v729_v36  }
 0x156   : > { %3562 = vset.pattern.permute.xlu2 %v3824_v39 }
 0x157   : > { %3559 = vset.pattern.permute.xlu1 %v3825_v40  ;;  %3571 = vset.pattern.permute.xlu0 %v3824_v39 }
 0x158   : > { %807 = vperm.xlu2 %3562, %v727_v35   ;;  %771 = vperm.xlu1 %3559, %v727_v35  }
 0x159   : > { %811 = vperm.xlu0 %3571, %v729_v36  }
 0x160   : > { %3565 = vset.pattern.permute.xlu2 %v3821_v29  ;;  %3563 = vset.pattern.permute.xlu1 %v3826_v41 }
 0x161   : > { %819 = vperm.xlu1 %3563, %v727_v35   ;;  %739 = vperm.xlu2 %3565, %v729_v36  }
 0x162   : > { %3574 = vset.pattern.permute.xlu0 %v3821_v29 }
 0x169   : > { %3564 = vset.pattern.permute.xlu1 %v3827_v42  ;;  %3567 = vset.pattern.permute.xlu2 %v3823_v38 }
 0x16a   : > { %831 = vperm.xlu1 %3564, %v727_v35   ;;  %763 = vperm.xlu2 %3567, %v729_v36  }
 0x172   : > { %3569 = vset.pattern.permute.xlu1 %v5074_v27  ;;  %3568 = vset.pattern.permute.xlu2 %v3825_v40 }
 0x173   : > { %787 = vperm.xlu1 %3569, %v729_v36   ;;  %775 = vperm.xlu2 %3568, %v729_v36  }
 0x17b   : > { %3570 = vset.pattern.permute.xlu1 %v3822_v37  ;;  %3572 = vset.pattern.permute.xlu2 %v3826_v41 }
 0x17c   : > { %799 = vperm.xlu1 %3570, %v729_v36   ;;  %823 = vperm.xlu2 %3572, %v729_v36  }
 0x184   : > { %3573 = vset.pattern.permute.xlu2 %v3827_v42  ;;  %3577 = vset.pattern.permute.xlu1 %v3825_v40 }
 0x185   : > { %835 = vperm.xlu2 %3573, %v729_v36   ;;  %v580_v36 = vsub.s32 %v4068_v46, %v3995_v4 }
 0x187   : > { %vm582_vm14 = vcmp.eq.s32.totalorder %v580_v36, 4294967292  ;;  %vm588_vm15 = vcmp.eq.s32.totalorder %v580_v36, 4294967293  ;;  %vm594_vm0 = vcmp.eq.s32.totalorder %v580_v36, 4294967294  ;;  %vm600_vm1 = vcmp.eq.s32.totalorder %v580_v36, 4294967295 }
 0x188   : > { %v4150_v46 = vsel %vm588_vm15, 1.0, %v3815_v8  ;;  %vm606_vm4 = vcmp.eq.s32.totalorder %v580_v36, 0  ;;  %vm612_vm5 = vcmp.eq.s32.totalorder %v580_v36, 1  ;;  %vm618_vm6 = vcmp.eq.s32.totalorder %v580_v36, 2 }
 0x189   : > { %vm624_vm7 = vcmp.eq.s32.totalorder %v580_v36, 3  ;;  %vm630_vm8 = vcmp.eq.s32.totalorder %v580_v36, 4 }
 0x18d   : > { %3575 = vset.pattern.permute.xlu2 %v3820_v28 }
 0x19f   : > { %v748_v50 = vpop.permute.xlu2 %747 }
 0x1a0   : > { %v754_v1 = vmul.f32 %v4096_v60, %v748_v50  ;;  %v4143_v50 = vsel %vm582_vm14, 1.0, %v3815_v8 }
 0x1a8   : > { %v796_v57 = vpop.permute.xlu2 %795 }
 0x1a9   : > { %v802_v20 = vmul.f32 %v4116_v18, %v796_v57 }
 0x1b2   : > { %v808_v6 = vpop.permute.xlu2 %807 }
 0x1b3   : > { %v814_v26 = vmul.f32 %v4120_v21, %v808_v6  ;;  %v4167_v6 = vsel %vm612_vm5, 1.0, %v3815_v8 }
 0x1b7   : > { %v705_v43 = vpop.f32.mrf.mxu1  ;;  %v784_v14 = vpop.permute.xlu0 %783 }
 0x1b8   : > { %v735_v47 = vpop.permute.xlu1 %734  ;;  %v706_v59 = vadd.f32 %v705_v43, %v4085_v55  ;;  %v790_v17 = vmul.f32 %v4110_v13, %v784_v14  ;;  %v3138_v43 = vadd.f32 -1.0, %v574_v30 }
 0x1b9   : > { %v742_v58 = vmul.f32 %v4088_v56, %v735_v47 }
 0x1ba   : > { %v4140_v49 = vmul.f32 10000.0, %v3138_v43 }
 0x1bb   : > { %v744_v63 = vadd.f32 %v742_v58, %v706_v59  ;;  %v740_v22 = vpop.permute.xlu2 %739 }
 0x1bc   : > { %v743_v57 = vmul.f32 %v4143_v50, %v740_v22  ;;  %v4172_v22 = vsel %vm618_vm6, 1.0, %v3815_v8 }
 0x1bd   : > { %v756_v3 = vadd.f32 %v754_v1, %v744_v63 }
 0x1bf   : > { %v4065_v44 = vpop.f32.mrf.mxu1 }
 0x1c0   : > { %v708_v4 = vadd.f32 %v4065_v44, %v4140_v49  ;;  %v4159_v44 = vsel %vm600_vm1, 1.0, %v3815_v8 }
 0x1c1   : > { %v760_v53 = vpop.permute.xlu1 %759  ;;  %v752_v52 = vpop.permute.xlu0 %751 }
 0x1c2   : > { %v766_v2 = vmul.f32 %v4099_v61, %v760_v53  ;;  %v745_v58 = vadd.f32 %v743_v57, %v708_v4  ;;  %v755_v59 = vmul.f32 %v4150_v46, %v752_v52  ;;  %v1060_v52 = vpop.f32.mrf.mxu0 }
 0x1c4   : > { %v768_v7 = vadd.f32 %v766_v2, %v756_v3  ;;  %v764_v47 = vpop.permute.xlu2 %763  ;;  %v757_v1 = vadd.f32 %v755_v59, %v745_v58  ;;  %v4163_v3 = vsel %vm606_vm4, 1.0, %v3815_v8  ;;  %v1061_v58 = vadd.f32 %v1060_v52, %v4085_v55 }
 0x1c7   : > { %v1074_v45 = vpop.f32.mrf.mxu1 }
 0x1c8   : > { %1118 = vperm.xlu1 %3577, %v1074_v45   ;;  %1094 = vperm.xlu2 %3575, %v1074_v45  }
 0x1c9   : > { %1081 = vperm.xlu0 %3574, %v1074_v45  }
 0x1ca   : > { %v772_v62 = vpop.permute.xlu1 %771 }
 0x1cb   : > { %v778_v5 = vmul.f32 %v4103_v0, %v772_v62  ;;  %v4156_v62 = vsel %vm594_vm0, 1.0, %v3815_v8 }
 0x1cc   : > { %v767_v2 = vmul.f32 %v4156_v62, %v764_v47 }
 0x1cd   : > { %v780_v15 = vadd.f32 %v778_v5, %v768_v7  ;;  %v776_v63 = vpop.permute.xlu2 %775 }
 0x1ce   : > { %v779_v5 = vmul.f32 %v4159_v44, %v776_v63  ;;  %v769_v14 = vadd.f32 %v767_v2, %v757_v1 }
 0x1cf   : > { %v4082_v54 = vpop.f32.mrf.mxu1  ;;  %v792_v19 = vadd.f32 %v790_v17, %v780_v15 }
 0x1d0   : > { %3578 = vset.pattern.permute.xlu1 %v5074_v27  ;;  %3576 = vset.pattern.permute.xlu2 %v3823_v38 }
 0x1d1   : > { %3579 = vset.pattern.permute.xlu0 %v3822_v37  ;;  %1130 = vperm.xlu1 %3578, %v1074_v45   ;;  %v804_v23 = vadd.f32 %v802_v20, %v792_v19 }
 0x1d2   : > { %1106 = vperm.xlu2 %3576, %v1074_v45   ;;  %1142 = vperm.xlu0 %3579, %v1074_v45  }
 0x1d3   : > { %v820_v16 = vpop.permute.xlu1 %819  ;;  %v816_v33 = vadd.f32 %v814_v26, %v804_v23  ;;  %v812_v23 = vpop.permute.xlu0 %811 }
 0x1d4   : > { %v826_v34 = vmul.f32 %v4125_v24, %v820_v16  ;;  %v781_v16 = vadd.f32 %v779_v5, %v769_v14  ;;  %v815_v30 = vmul.f32 %v4172_v22, %v812_v23 }
 0x1d6   : > { %v824_v19 = vpop.permute.xlu2 %823 }
 0x1d9   : > { %3582 = vset.pattern.permute.xlu1 %v3827_v42 }
 0x1da   : > { %3580 = vset.pattern.permute.xlu2 %v3824_v39  ;;  %3585 = vset.pattern.permute.xlu0 %v3823_v38 }
 0x1db   : > { %1178 = vperm.xlu1 %3582, %v1074_v45   ;;  %1154 = vperm.xlu2 %3580, %v1074_v45  }
 0x1dc   : > { %1110 = vperm.xlu0 %3585, %v4082_v54   ;;  %v832_v32 = vpop.permute.xlu1 %831 }
 0x1dd   : > { %v838_v35 = vmul.f32 %v4130_v31, %v832_v32  ;;  %v4176_v32 = vsel %vm624_vm7, 1.0, %v3815_v8  ;;  %vm999_vm7 = vcmask 1043456  }
 0x1df   : > { %v836_v43 = vpop.permute.xlu2 %835 }
 0x1e3   : > { %3581 = vset.pattern.permute.xlu2 %v3826_v41  ;;  %3583 = vset.pattern.permute.xlu1 %v3821_v29 }
 0x1e4   : > { %3590 = vset.pattern.permute.xlu0 %v3826_v41  ;;  %1166 = vperm.xlu2 %3581, %v1074_v45   ;;  %v828_v45 = vadd.f32 %v826_v34, %v816_v33  ;;  %v827_v34 = vmul.f32 %v4176_v32, %v824_v19 }
 0x1e5   : > { %1170 = vperm.xlu0 %3590, %v4082_v54   ;;  %v788_v53 = vpop.permute.xlu1 %787 }
 0x1e6   : > { %v4138_v48 = vadd.f32 %v838_v35, %v828_v45  ;;  %v791_v15 = vmul.f32 %v4163_v3, %v788_v53  ;;  %v4180_v35 = vsel %vm630_vm8, 1.0, %v3815_v8  ;;  %vm1000_vm8 = vcmask 1044480  }
 0x1e7   : > { %v839_v47 = vmul.f32 %v4180_v35, %v836_v43 }
 0x1e8   : > { %v842_v51 = vsel %vm689_vm3, %v4138_v48, -inf  ;;  %v793_v20 = vadd.f32 %v791_v15, %v781_v16 }
 0x1ec   : > { %3586 = vset.pattern.permute.xlu2 %v3825_v40 }
 0x1ed   : > { %1122 = vperm.xlu2 %3586, %v4082_v54   ;;  %3616 = vset.pattern.permute.xlu0 %v5074_v27 }
 0x1ee   : > { %v800_v7 = vpop.permute.xlu1 %799 }
 0x1ef   : > { %v803_v17 = vmul.f32 %v4167_v6, %v800_v7 }
 0x1f1   : > { %v805_v26 = vadd.f32 %v803_v17, %v793_v20 }
 0x1f3   : > { %v817_v33 = vadd.f32 %v815_v30, %v805_v26 }
 0x1f5   : > { %3587 = vset.pattern.permute.xlu2 %v5074_v27  ;;  %v829_v45 = vadd.f32 %v827_v34, %v817_v33 }
 0x1f6   : > { %1134 = vperm.xlu2 %3587, %v4082_v54  }
 0x1fe   : > { %3591 = vset.pattern.permute.xlu2 %v3827_v42 }
 0x1ff   : > { %1182 = vperm.xlu2 %3591, %v4082_v54  }
 0x205   : > { %843 = vmax.xlane.f32.xlu1 %v842_v51  ;;  %v4184_v51 = vadd.f32 %v839_v47, %v829_v45 }
 0x207   : > { %3612 = vset.pattern.permute.xlu2 %v3821_v29  ;;  %v845_v36 = vsel %vm689_vm3, %v4184_v51, -inf }
 0x21e   : > { %1086 = vperm.xlu1 %3583, %v4082_v54  }
 0x222   : > { %v1095_v4 = vpop.permute.xlu2 %1094 }
 0x223   : > { %v1101_v1 = vmul.f32 %v4096_v60, %v1095_v4 }
 0x226   : > { %3584 = vset.pattern.permute.xlu1 %v3820_v28 }
 0x227   : > { %1098 = vperm.xlu1 %3584, %v4082_v54  }
 0x228   : > { %846 = vmax.xlane.f32.xlu2 %v845_v36 }
 0x22c   : > { %v1107_v8 = vpop.permute.xlu2 %1106 }
 0x22d   : > { %v1113_v5 = vmul.f32 %v4099_v61, %v1107_v8 }
 0x22f   : > { %3588 = vset.pattern.permute.xlu1 %v3822_v37 }
 0x230   : > { %1146 = vperm.xlu1 %3588, %v4082_v54  }
 0x235   : > { %v1155_v63 = vpop.permute.xlu2 %1154 }
 0x236   : > { %v1161_v30 = vmul.f32 %v4120_v21, %v1155_v63 }
 0x238   : > { %3589 = vset.pattern.permute.xlu1 %v3824_v39 }
 0x239   : > { %1158 = vperm.xlu1 %3589, %v4082_v54  }
 0x23a   : > { %v1119_v53 = vpop.permute.xlu1 %1118 }
 0x23b   : > { %v1082_v57 = vpop.permute.xlu0 %1081  ;;  %v1125_v14 = vmul.f32 %v4103_v0, %v1119_v53 }
 0x23c   : > { %v1089_v59 = vmul.f32 %v4088_v56, %v1082_v57 }
 0x23e   : > { %v1091_v2 = vadd.f32 %v1089_v59, %v1061_v58  ;;  %v1167_v26 = vpop.permute.xlu2 %1166 }
 0x23f   : > { %v1173_v34 = vmul.f32 %v4125_v24, %v1167_v26 }
 0x240   : > { %v1103_v7 = vadd.f32 %v1101_v1, %v1091_v2  ;;  %v1062_v2 = vpop.f32.mrf.mxu0 }
 0x241   : > { %3614 = vset.pattern.permute.xlu1 %v3823_v38 }
 0x242   : > { %v1115_v15 = vadd.f32 %v1113_v5, %v1103_v7 }
 0x243   : > { %v1131_v16 = vpop.permute.xlu1 %1130 }
 0x244   : > { %v1127_v54 = vadd.f32 %v1125_v14, %v1115_v15  ;;  %v1137_v17 = vmul.f32 %v4110_v13, %v1131_v16  ;;  %v1143_v19 = vpop.permute.xlu0 %1142  ;;  %v1063_v14 = vadd.f32 %v1062_v2, %v4140_v49 }
 0x245   : > { %v1149_v23 = vmul.f32 %v4116_v18, %v1143_v19 }
 0x246   : > { %v1139_v20 = vadd.f32 %v1137_v17, %v1127_v54 }
 0x247   : > { %v1123_v63 = vpop.permute.xlu2 %1122 }
 0x248   : > { %v1151_v33 = vadd.f32 %v1149_v23, %v1139_v20  ;;  %v1126_v26 = vmul.f32 %v4159_v44, %v1123_v63 }
 0x24a   : > { %v1163_v43 = vadd.f32 %v1161_v30, %v1151_v33 }
 0x24c   : > { %v1175_v45 = vadd.f32 %v1173_v34, %v1163_v43 }
 0x24d   : > { %v1179_v47 = vpop.permute.xlu1 %1178 }
 0x24e   : > { %v1185_v36 = vmul.f32 %v4130_v31, %v1179_v47  ;;  %v1111_v54 = vpop.permute.xlu0 %1110 }
 0x24f   : > { %v1114_v19 = vmul.f32 %v4156_v62, %v1111_v54 }
 0x250   : > { %v1187_v4 = vadd.f32 %v1185_v36, %v1175_v45  ;;  %v1135_v5 = vpop.permute.xlu2 %1134 }
 0x251   : > { %v1138_v34 = vmul.f32 %v4163_v3, %v1135_v5 }
 0x252   : > { %v1189_v8 = vsel %vm689_vm3, %v1187_v4, -inf }
 0x253   : > { %1190 = vmax.xlane.f32.xlu0 %v1189_v8 }
 0x257   : > { %v1171_v36 = vpop.permute.xlu0 %1170 }
 0x259   : > { %v1183_v20 = vpop.permute.xlu2 %1182 }
 0x25a   : > { %v1186_v63 = vmul.f32 %v4180_v35, %v1183_v20 }
 0x278   : > { %v844_v52 = vpop.xlane.xlu1 %843 }
 0x279   : > { %v848_v53 = vsub.f32 %v4138_v48, %v844_v52 }
 0x27b   : > { %v850_v57 = vmul.f32 1.442695, %v848_v53 }
 0x27d   : > { %3686 = vpow2.f32 %v850_v57 }
 0x283   : > { %v4207_v58 = vpop.eup %3686 }
 0x284   : > { %v854_v59 = vsel %vm689_vm3, %v4207_v58, 0.0 }
 0x285   : > { %855 = vadd.xlane.f32.xlu1 %v854_v59  ;;  %v1174_v59 = vmul.f32 %v4176_v32, %v1171_v36 }
 0x290   : > { %v1087_v1 = vpop.permute.xlu1 %1086 }
 0x291   : > { %v1090_v7 = vmul.f32 %v4143_v50, %v1087_v1 }
 0x293   : > { %v1092_v16 = vadd.f32 %v1090_v7, %v1063_v14 }
 0x299   : > { %v1099_v15 = vpop.permute.xlu1 %1098 }
 0x29a   : > { %v1102_v48 = vmul.f32 %v4150_v46, %v1099_v15 }
 0x29b   : > { %v847_v43 = vpop.xlane.xlu2 %846 }
 0x29c   : > { %v1104_v17 = vadd.f32 %v1102_v48, %v1092_v16  ;;  %v849_v8 = vsub.f32 %v4184_v51, %v847_v43 }
 0x29e   : > { %v1116_v23 = vadd.f32 %v1114_v19, %v1104_v17  ;;  %v852_v2 = vmul.f32 1.442695, %v849_v8 }
 0x2a0   : > { %v1128_v33 = vadd.f32 %v1126_v26, %v1116_v23  ;;  %3688 = vpow2.f32 %v852_v2 }
 0x2a2   : > { %v1147_v30 = vpop.permute.xlu1 %1146  ;;  %v1140_v45 = vadd.f32 %v1138_v34, %v1128_v33 }
 0x2a3   : > { %v1150_v47 = vmul.f32 %v4167_v6, %v1147_v30 }
 0x2a5   : > { %v1152_v53 = vadd.f32 %v1150_v47, %v1140_v45 }
 0x2a6   : > { %v4223_v15 = vpop.eup %3688 }
 0x2a7   : > { %v857_v51 = vsel %vm689_vm3, %v4223_v15, 0.0 }
 0x2ab   : > { %v1159_v52 = vpop.permute.xlu1 %1158 }
 0x2ac   : > { %v1162_v57 = vmul.f32 %v4172_v22, %v1159_v52 }
 0x2ae   : > { %v1164_v1 = vadd.f32 %v1162_v57, %v1152_v53 }
 0x2b0   : > { %v1176_v7 = vadd.f32 %v1174_v59, %v1164_v1 }
 0x2b2   : > { %v1188_v14 = vadd.f32 %v1186_v63, %v1176_v7 }
 0x2b4   : > { %v1192_v5 = vsel %vm689_vm3, %v1188_v14, -inf }
 0x2b5   : > { %1193 = vmax.xlane.f32.xlu2 %v1192_v5 }
 0x2bd   : > { %858 = vadd.xlane.f32.xlu2 %v857_v51 }
 0x2c6   : > { %v1191_v16 = vpop.xlane.xlu0 %1190 }
 0x2c7   : > { %v1195_v48 = vsub.f32 %v1187_v4, %v1191_v16 }
 0x2c9   : > { %v1197_v54 = vmul.f32 1.442695, %v1195_v48 }
 0x2cb   : > { %3690 = vpow2.f32 %v1197_v54 }
 0x2d1   : > { %v4227_v17 = vpop.eup %3690 }
 0x2d2   : > { %v1201_v19 = vsel %vm689_vm3, %v4227_v17, 0.0 }
 0x2d3   : > { %1202 = vadd.xlane.f32.xlu0 %v1201_v19 }
 0x2f8   : > { %v856_v20 = vpop.xlane.xlu1 %855 }
 0x2f9   : > { %3692 = vrcp.f32 %v856_v20  ;;  %v871_v33 = vand.u32 2147483648, %v856_v20  ;;  %v869_v43 = vand.u32 2147483647, %v856_v20  ;;  %vm865_vm10 = vweird.f32 %v856_v20 }
 0x2fb   : > { %v872_v4 = vor.u32 1.1754944e-38, %v871_v33  ;;  %vm870_vm12 = vcmp.eq.f32.partialorder %v869_v43, 8.507059e+37 }
 0x2ff   : > { %v3693_v23 = vpop.eup %3692 }
 0x300   : > { %v861_v26 = vmul.f32 %v3693_v23, %v856_v20  ;;  %vm866_vm9 = vweird.f32 %v3693_v23 }
 0x301   : > { %vm867_vm11 = vmor %vm865_vm10, %vm866_vm9 }
 0x302   : > { %v862_v30 = vsub.f32 1.0, %v861_v26 }
 0x304   : > { %v863_v34 = vmul.f32 %v3693_v23, %v862_v30 }
 0x306   : > { %v864_v45 = vadd.f32 %v3693_v23, %v863_v34 }
 0x308   : > { %v868_v47 = vsel %vm867_vm11, %v3693_v23, %v864_v45 }
 0x309   : > { %v873_v36 = vsel %vm870_vm12, %v872_v4, %v868_v47 }
 0x30a   : > { %v4232_v8 = vmul.f32 %v4207_v58, %v873_v36 }
 0x30c   : > { %v908_v52 = vmul.f32 %v4099_v61, %v4232_v8  ;;  %v900_v53 = vmul.f32 %v4096_v60, %v4232_v8  ;;  %v892_v57 = vmul.f32 %v4088_v56, %v4232_v8  ;;  %v932_v58 = vmul.f32 %v4116_v18, %v4232_v8 }
 0x30d   : > { %v924_v63 = vmul.f32 %v4110_v13, %v4232_v8  ;;  %v916_v7 = vmul.f32 %v4103_v0, %v4232_v8  ;;  %v956_v48 = vmul.f32 %v4130_v31, %v4232_v8  ;;  %v948_v54 = vmul.f32 %v4125_v24, %v4232_v8 }
 0x30e   : > { %v910_v59 = vsel %vm689_vm3, %v908_v52, 0.0  ;;  %v902_v1 = vsel %vm689_vm3, %v900_v53, 0.0  ;;  %v894_v2 = vsel %vm689_vm3, %v892_v57, 0.0  ;;  %v934_v5 = vsel %vm689_vm3, %v932_v58, 0.0 }
 0x30f   : > { %911 = vadd.xlane.f32.xlu0 %v910_v59  ;;  %903 = vadd.xlane.f32.xlu1 %v902_v1  ;;  %v926_v51 = vsel %vm689_vm3, %v924_v63, 0.0  ;;  %v918_v16 = vsel %vm689_vm3, %v916_v7, 0.0  ;;  %v940_v19 = vmul.f32 %v4120_v21, %v4232_v8  ;;  %v958_v20 = vsel %vm689_vm3, %v956_v48, 0.0 }
 0x310   : > { %895 = vadd.xlane.f32.xlu2 %v894_v2  ;;  %v950_v23 = vsel %vm689_vm3, %v948_v54, 0.0 }
 0x311   : > { %v942_v26 = vsel %vm689_vm3, %v940_v19, 0.0 }
 0x317   : > { %935 = vadd.xlane.f32.xlu0 %v934_v5  ;;  %927 = vadd.xlane.f32.xlu1 %v926_v51 }
 0x318   : > { %919 = vadd.xlane.f32.xlu2 %v918_v16 }
 0x31f   : > { %959 = vadd.xlane.f32.xlu0 %v958_v20  ;;  %951 = vadd.xlane.f32.xlu1 %v950_v23 }
 0x320   : > { %943 = vadd.xlane.f32.xlu2 %v942_v26 }
 0x328   : > { %v1194_v30 = vpop.xlane.xlu2 %1193 }
 0x329   : > { %v1196_v33 = vsub.f32 %v1188_v14, %v1194_v30 }
 0x32b   : > { %v1199_v34 = vmul.f32 1.442695, %v1196_v33 }
 0x32d   : > { %3694 = vpow2.f32 %v1199_v34 }
 0x330   : > { %v859_v43 = vpop.xlane.xlu2 %858 }
 0x331   : > { %3696 = vrcp.f32 %v859_v43  ;;  %v886_v53 = vand.u32 2147483648, %v859_v43  ;;  %v884_v59 = vand.u32 2147483647, %v859_v43  ;;  %vm880_vm14 = vweird.f32 %v859_v43 }
 0x333   : > { %v4261_v45 = vpop.eup %3694  ;;  %v887_v14 = vor.u32 1.1754944e-38, %v886_v53  ;;  %vm885_vm0 = vcmp.eq.f32.partialorder %v884_v59, 8.507059e+37 }
 0x334   : > { %v1204_v4 = vsel %vm689_vm3, %v4261_v45, 0.0 }
 0x335   : > { %1205 = vadd.xlane.f32.xlu1 %v1204_v4 }
 0x337   : > { %v3697_v47 = vpop.eup %3696 }
 0x338   : > { %v876_v36 = vmul.f32 %v3697_v47, %v859_v43  ;;  %vm881_vm13 = vweird.f32 %v3697_v47 }
 0x339   : > { %vm882_vm15 = vmor %vm880_vm14, %vm881_vm13  ;;  %vm964_vm13 = vcmask 7168   ;;  %vm967_vm14 = vcmask 15360  }
 0x33a   : > { %v877_v52 = vsub.f32 1.0, %v876_v36 }
 0x33c   : > { %v878_v57 = vmul.f32 %v3697_v47, %v877_v52 }
 0x33e   : > { %v879_v1 = vadd.f32 %v3697_v47, %v878_v57 }
 0x340   : > { %v883_v2 = vsel %vm882_vm15, %v3697_v47, %v879_v1  ;;  %vm970_vm15 = vcmask 23552  }
 0x341   : > { %v888_v58 = vsel %vm885_vm0, %v887_v14, %v883_v2  ;;  %vm973_vm0 = vcmask 31744  }
 0x342   : > { %v4266_v63 = vmul.f32 %v4223_v15, %v888_v58 }
 0x344   : > { %v893_v7 = vmul.f32 %v4143_v50, %v4266_v63  ;;  %v909_v5 = vmul.f32 %v4156_v62, %v4266_v63  ;;  %v901_v51 = vmul.f32 %v4150_v46, %v4266_v63  ;;  %v988_v15 = vpack.c.bf16 %v4266_v63, %v4232_v8 }
 0x345   : > { %v917_v20 = vmul.f32 %v4159_v44, %v4266_v63  ;;  %v933_v23 = vmul.f32 %v4167_v6, %v4266_v63  ;;  %v925_v26 = vmul.f32 %v4163_v3, %v4266_v63  ;;  %v941_v52 = vmul.f32 %v4172_v22, %v4266_v63 }
 0x346   : > { %v1203_v16 = vpop.xlane.xlu0 %1202  ;;  %v897_v48 = vsel %vm689_vm3, %v893_v7, 0.0  ;;  %v913_v54 = vsel %vm689_vm3, %v909_v5, 0.0  ;;  %v905_v19 = vsel %vm689_vm3, %v901_v51, 0.0  ;;  %v957_v59 = vmul.f32 %v4180_v35, %v4266_v63 }
 0x347   : > { %3698 = vrcp.f32 %v1203_v16  ;;  %898 = vadd.xlane.f32.xlu0 %v897_v48  ;;  %914 = vadd.xlane.f32.xlu1 %v913_v54  ;;  %v921_v34 = vsel %vm689_vm3, %v917_v20, 0.0  ;;  %v937_v43 = vsel %vm689_vm3, %v933_v23, 0.0  ;;  %v929_v4 = vsel %vm689_vm3, %v925_v26, 0.0 }
 0x348   : > { %906 = vadd.xlane.f32.xlu2 %v905_v19  ;;  %v1218_v36 = vand.u32 2147483648, %v1203_v16  ;;  %v1216_v57 = vand.u32 2147483647, %v1203_v16  ;;  %v949_v1 = vmul.f32 %v4176_v32, %v4266_v63  ;;  %vm1212_vm4 = vweird.f32 %v1203_v16 }
 0x349   : > { %v945_v7 = vsel %vm689_vm3, %v941_v52, 0.0  ;;  %v961_v5 = vsel %vm689_vm3, %v957_v59, 0.0 }
 0x34a   : > { %v1219_v2 = vor.u32 1.1754944e-38, %v1218_v36  ;;  %vm1217_vm6 = vcmp.eq.f32.partialorder %v1216_v57, 8.507059e+37  ;;  %v953_v48 = vsel %vm689_vm3, %v949_v1, 0.0 }
 0x34d   : > { %v3699_v30 = vpop.eup %3698 }
 0x34e   : > { %v1208_v33 = vmul.f32 %v3699_v30, %v1203_v16  ;;  %vm1213_vm1 = vweird.f32 %v3699_v30 }
 0x34f   : > { %922 = vadd.xlane.f32.xlu0 %v921_v34  ;;  %938 = vadd.xlane.f32.xlu1 %v937_v43  ;;  %vm1214_vm5 = vmor %vm1212_vm4, %vm1213_vm1  ;;  %vm976_vm1 = vcmask 39936   ;;  %vm979_vm4 = vcmask 48128  }
 0x350   : > { %v1209_v47 = vsub.f32 1.0, %v1208_v33  ;;  %930 = vadd.xlane.f32.xlu2 %v929_v4 }
 0x352   : > { %v1210_v53 = vmul.f32 %v3699_v30, %v1209_v47 }
 0x354   : > { %v1211_v14 = vadd.f32 %v3699_v30, %v1210_v53 }
 0x356   : > { %v1215_v58 = vsel %vm1214_vm5, %v3699_v30, %v1211_v14  ;;  %vm982_vm5 = vcmask 56320  }
 0x357   : > { %v1220_v51 = vsel %vm1217_vm6, %v1219_v2, %v1215_v58  ;;  %946 = vadd.xlane.f32.xlu0 %v945_v7  ;;  %962 = vadd.xlane.f32.xlu1 %v961_v5  ;;  %vm985_vm6 = vcmask 64512  }
 0x358   : > { %v4298_v54 = vmul.f32 %v4227_v17, %v1220_v51  ;;  %954 = vadd.xlane.f32.xlu2 %v953_v48 }
 0x35a   : > { %v1239_v16 = vmul.f32 %v4088_v56, %v4298_v54  ;;  %v1271_v19 = vmul.f32 %v4110_v13, %v4298_v54  ;;  %v1247_v26 = vmul.f32 %v4096_v60, %v4298_v54  ;;  %v1279_v17 = vmul.f32 %v4116_v18, %v4298_v54 }
 0x35b   : > { %v1255_v34 = vmul.f32 %v4099_v61, %v4298_v54  ;;  %v1287_v43 = vmul.f32 %v4120_v21, %v4298_v54  ;;  %v1295_v36 = vmul.f32 %v4125_v24, %v4298_v54  ;;  %v1303_v53 = vmul.f32 %v4130_v31, %v4298_v54 }
 0x35c   : > { %v1241_v20 = vsel %vm689_vm3, %v1239_v16, 0.0  ;;  %v1273_v23 = vsel %vm689_vm3, %v1271_v19, 0.0  ;;  %v1249_v30 = vsel %vm689_vm3, %v1247_v26, 0.0  ;;  %v1281_v33 = vsel %vm689_vm3, %v1279_v17, 0.0  ;;  %v3174_v19 = vld [vmem:[%s5057_s7] sm:$0xf] }
 0x35d   : > { %v1257_v4 = vsel %vm689_vm3, %v1255_v34, 0.0  ;;  %v1289_v47 = vsel %vm689_vm3, %v1287_v43, 0.0  ;;  %v1297_v52 = vsel %vm689_vm3, %v1295_v36, 0.0  ;;  %v1305_v57 = vsel %vm689_vm3, %v1303_v53, 0.0 }
 0x35e   : > { %v1263_v1 = vmul.f32 %v4103_v0, %v4298_v54  ;;  %v3829_v17 = vmov 65535  }
 0x35f   : > { %1242 = vadd.xlane.f32.xlu0 %v1241_v20  ;;  %1274 = vadd.xlane.f32.xlu1 %v1273_v23  ;;  %v3447_v20 = vld [vmem:[%s5057_s7] sm:$0x10] }
 0x360   : > { %v1265_v2 = vsel %vm689_vm3, %v1263_v1, 0.0  ;;  %v3175_v23 = vor.u32 %v3447_v20, %v3174_v19 }
 0x367   : > { %1250 = vadd.xlane.f32.xlu0 %v1249_v30  ;;  %1282 = vadd.xlane.f32.xlu1 %v1281_v33  ;;  %v1001_v30 = vsel %vm999_vm7, 4294967295, %v3829_v17  ;;  %vm5091_vm7 = vcmask 72704  }
 0x368   : > { %v4337_v34 = vsel %vm1000_vm8, %v1001_v30, 0 }
 0x369   : > { %v1004_v43 = vand.u32 %v3175_v23, %v4337_v34 }
 0x36b   : > { %1013 = vmatpush.bf16.msra.mxu3 %v1004_v43  ;;  %1339 = vmatpush.bf16.msrb.mxu2 %v1004_v43 }
 0x36f   : > { %1258 = vadd.xlane.f32.xlu0 %v1257_v4  ;;  %1290 = vadd.xlane.f32.xlu1 %v1289_v47 }
 0x370   : > { %1020 = vrot.lane.b32.xlu2 %v4031_v25, %s5083_s1 }
 0x377   : > { %1298 = vadd.xlane.f32.xlu1 %v1297_v52 }
 0x37f   : > { %1306 = vadd.xlane.f32.xlu1 %v1305_v57 }
 0x382   : > { %v904_v59 = vpop.xlane.xlu1 %903  ;;  %v912_v58 = vpop.xlane.xlu0 %911 }
 0x383   : > { %v896_v7 = vpop.xlane.xlu2 %895 }
 0x384   : > { %v965_v27 = vsel %vm964_vm13, %v896_v7, %v904_v59 }
 0x38a   : > { %v928_v14 = vpop.xlane.xlu1 %927  ;;  %v936_v51 = vpop.xlane.xlu0 %935 }
 0x38b   : > { %v920_v16 = vpop.xlane.xlu2 %919 }
 0x392   : > { %v4329_v5 = vpop.xlane.xlu1 %951  ;;  %v4340_v4 = vpop.xlane.xlu0 %959 }
 0x393   : > { %v944_v36 = vpop.xlane.xlu2 %943 }
 0x399   : > { %1266 = vadd.xlane.f32.xlu2 %v1265_v2 }
 0x3a8   : > { %v1206_v48 = vpop.xlane.xlu1 %1205 }
 0x3a9   : > { %3700 = vrcp.f32 %v1206_v48  ;;  %v1233_v52 = vand.u32 2147483648, %v1206_v48  ;;  %v1231_v57 = vand.u32 2147483647, %v1206_v48  ;;  %vm1227_vm10 = vweird.f32 %v1206_v48 }
 0x3ab   : > { %v1234_v2 = vor.u32 1.1754944e-38, %v1233_v52  ;;  %vm1232_vm12 = vcmp.eq.f32.partialorder %v1231_v57, 8.507059e+37 }
 0x3af   : > { %v3701_v26 = vpop.eup %3700 }
 0x3b0   : > { %v1223_v33 = vmul.f32 %v3701_v26, %v1206_v48  ;;  %vm1228_vm9 = vweird.f32 %v3701_v26 }
 0x3b1   : > { %vm1229_vm11 = vmor %vm1227_vm10, %vm1228_vm9 }
 0x3b2   : > { %v1224_v47 = vsub.f32 1.0, %v1223_v33 }
 0x3b4   : > { %v1225_v53 = vmul.f32 %v3701_v26, %v1224_v47 }
 0x3b6   : > { %v1226_v1 = vadd.f32 %v3701_v26, %v1225_v53 }
 0x3b8   : > { %v1230_v19 = vsel %vm1229_vm11, %v3701_v26, %v1226_v1 }
 0x3b9   : > { %v1235_v20 = vsel %vm1232_vm12, %v1234_v2, %v1230_v19 }
 0x3ba   : > { %v4343_v23 = vmul.f32 %v4261_v45, %v1235_v20  ;;  %v899_v17 = vpop.xlane.xlu0 %898  ;;  %v915_v30 = vpop.xlane.xlu1 %914  ;;  %v968_v45 = vsel %vm967_vm14, %v965_v27, %v912_v58 }
 0x3bb   : > { %v907_v33 = vpop.xlane.xlu2 %906  ;;  %v971_v52 = vsel %vm970_vm15, %v968_v45, %v920_v16 }
 0x3bc   : > { %v1264_v43 = vmul.f32 %v4159_v44, %v4343_v23  ;;  %v1240_v48 = vmul.f32 %v4143_v50, %v4343_v23  ;;  %v966_v59 = vsel %vm964_vm13, %v899_v17, %v907_v33  ;;  %v1272_v57 = vmul.f32 %v4163_v3, %v4343_v23 }
 0x3bd   : > { %v1248_v1 = vmul.f32 %v4150_v46, %v4343_v23  ;;  %v974_v2 = vsel %vm973_vm0, %v971_v52, %v928_v14  ;;  %v969_v27 = vsel %vm967_vm14, %v966_v59, %v915_v30 }
 0x3be   : > { %v1268_v26 = vsel %vm689_vm3, %v1264_v43, 0.0  ;;  %v1244_v47 = vsel %vm689_vm3, %v1240_v48, 0.0  ;;  %v977_v16 = vsel %vm976_vm1, %v974_v2, %v936_v51  ;;  %v1276_v20 = vsel %vm689_vm3, %v1272_v57, 0.0 }
 0x3bf   : > { %1269 = vadd.xlane.f32.xlu0 %v1268_v26  ;;  %1245 = vadd.xlane.f32.xlu1 %v1244_v47  ;;  %v1252_v17 = vsel %vm689_vm3, %v1248_v1, 0.0  ;;  %v980_v33 = vsel %vm979_vm4, %v977_v16, %v944_v36  ;;  %v1280_v51 = vmul.f32 %v4167_v6, %v4343_v23  ;;  %v1256_v26 = vmul.f32 %v4156_v62, %v4343_v23 }
 0x3c0   : > { %v983_v14 = vsel %vm982_vm5, %v980_v33, %v4329_v5  ;;  %v1288_v1 = vmul.f32 %v4172_v22, %v4343_v23 }
 0x3c1   : > { %v986_v5 = vsel %vm985_vm6, %v983_v14, %v4340_v4  ;;  %v1296_v4 = vmul.f32 %v4176_v32, %v4343_v23 }
 0x3c2   : > { %v923_v7 = vpop.xlane.xlu0 %922  ;;  %v939_v53 = vpop.xlane.xlu1 %938 }
 0x3c3   : > { %v931_v58 = vpop.xlane.xlu2 %930  ;;  %v972_v19 = vsel %vm970_vm15, %v969_v27, %v923_v7  ;;  %v1284_v7 = vsel %vm689_vm3, %v1280_v51, 0.0  ;;  %v1292_v27 = vsel %vm689_vm3, %v1288_v1, 0.0 }
 0x3c4   : > { %v975_v43 = vsel %vm973_vm0, %v972_v19, %v931_v58  ;;  %v1300_v58 = vsel %vm689_vm3, %v1296_v4, 0.0  ;;  %v1304_v19 = vmul.f32 %v4180_v35, %v4343_v23 }
 0x3c5   : > { %v978_v48 = vsel %vm976_vm1, %v975_v43, %v939_v53  ;;  %v1260_v53 = vsel %vm689_vm3, %v1256_v26, 0.0 }
 0x3c6   : > { %v1308_v16 = vsel %vm689_vm3, %v1304_v19, 0.0 }
 0x3c7   : > { %1277 = vadd.xlane.f32.xlu0 %v1276_v20  ;;  %1253 = vadd.xlane.f32.xlu1 %v1252_v17 }
 0x3ca   : > { %v947_v30 = vpop.xlane.xlu0 %946  ;;  %v963_v45 = vpop.xlane.xlu1 %962 }
 0x3cb   : > { %v981_v47 = vsel %vm979_vm4, %v978_v48, %v947_v30  ;;  %v955_v36 = vpop.xlane.xlu2 %954 }
 0x3cc   : > { %v984_v52 = vsel %vm982_vm5, %v981_v47, %v955_v36 }
 0x3cd   : > { %v987_v59 = vsel %vm985_vm6, %v984_v52, %v963_v45 }
 0x3ce   : > { %v989_v57 = vpack.c.bf16 %v987_v59, %v986_v5 }
 0x3cf   : > { %1285 = vadd.xlane.f32.xlu0 %v1284_v7  ;;  %1261 = vadd.xlane.f32.xlu1 %v1260_v53 }
 0x3d0   : > { %3176 = vmatmul.msk.bf16.vlgmr.msra.gmra.mxu3 %vm5091_vm7, %v989_v57 }
 0x3d2   : > { %v1275_v20 = vpop.xlane.xlu1 %1274  ;;  %v1243_v33 = vpop.xlane.xlu0 %1242 }
 0x3d3   : > { %v1021_v2 = vpop.permute.xlu2 %1020 }
 0x3d4   : > { %1033 = vmatpush.bf16.msrb.mxu3 %v1021_v2 }
 0x3d7   : > { %1293 = vadd.xlane.f32.xlu0 %v1292_v27 }
 0x3da   : > { %v1283_v17 = vpop.xlane.xlu1 %1282  ;;  %v1251_v14 = vpop.xlane.xlu0 %1250 }
 0x3db   : > { %v1311_v45 = vsel %vm964_vm13, %v1243_v33, %v1251_v14 }
 0x3df   : > { %1301 = vadd.xlane.f32.xlu0 %v1300_v58 }
 0x3e0   : > { %3177 = vmatmul.msk.bf16.vlgmr.msrb.gmra.mxu3 %vm689_vm3, %v988_v15 }
 0x3e2   : > { %v1291_v43 = vpop.xlane.xlu1 %1290  ;;  %v1259_v48 = vpop.xlane.xlu0 %1258 }
 0x3e3   : > { %v1313_v59 = vsel %vm967_vm14, %v1311_v45, %v1259_v48 }
 0x3e7   : > { %1309 = vadd.xlane.f32.xlu0 %v1308_v16 }
 0x3e8   : > { %1346 = vrot.lane.b32.xlu1 %v4031_v25, %s5076_s2  ;;  %s5128_s2 = smov 32  }
 0x3ea   : > { %v1299_v30 = vpop.xlane.xlu1 %1298 }
 0x3f2   : > { %v1307_v8 = vpop.xlane.xlu1 %1306 }
 0x40c   : > { %v1267_v36 = vpop.xlane.xlu2 %1266 }
 0x40d   : > { %v1315_v25 = vsel %vm970_vm15, %v1313_v59, %v1267_v36 }
 0x40e   : > { %v1317_v53 = vsel %vm973_vm0, %v1315_v25, %v1275_v20 }
 0x40f   : > { %v1319_v1 = vsel %vm976_vm1, %v1317_v53, %v1283_v17 }
 0x410   : > { %v1321_v19 = vsel %vm979_vm4, %v1319_v1, %v1291_v43  ;;  %v1327_v43 = vpack.c.bf16 %v4343_v23, %v4298_v54  ;;  %v3448_v54 = vld [vmem:[%s5109_s4] sm:$0xff] }
 0x411   : > { %v1323_v33 = vsel %vm982_vm5, %v1321_v19, %v1299_v30  ;;  %v3670_v19 = vld [vmem:[%s5110_s5] ss:$0 sm:$0xff] }
 0x412   : > { %v1325_v17 = vsel %vm985_vm6, %v1323_v33, %v1307_v8 }
 0x432   : > { %v1270_v63 = vpop.xlane.xlu0 %1269  ;;  %v1246_v15 = vpop.xlane.xlu1 %1245 }
 0x43a   : > { %v1278_v51 = vpop.xlane.xlu0 %1277  ;;  %v1254_v26 = vpop.xlane.xlu1 %1253 }
 0x43b   : > { %v1312_v7 = vsel %vm964_vm13, %v1246_v15, %v1254_v26 }
 0x442   : > { %v1286_v47 = vpop.xlane.xlu0 %1285  ;;  %v1262_v5 = vpop.xlane.xlu1 %1261 }
 0x443   : > { %v1314_v57 = vsel %vm967_vm14, %v1312_v7, %v1262_v5 }
 0x444   : > { %v1316_v2 = vsel %vm970_vm15, %v1314_v57, %v1270_v63 }
 0x445   : > { %v1318_v58 = vsel %vm973_vm0, %v1316_v2, %v1278_v51 }
 0x446   : > { %v1320_v16 = vsel %vm976_vm1, %v1318_v58, %v1286_v47  ;;  %v3449_v47 = vld [vmem:[%s5109_s4 + $0x8] sm:$0xff] }
 0x447   : > { %1406 = vmatpush.bf16.msra.mxu0 %v3449_v47 }
 0x44a   : > { %v1294_v52 = vpop.xlane.xlu0 %1293 }
 0x44b   : > { %v1322_v14 = vsel %vm979_vm4, %v1320_v16, %v1294_v52  ;;  %1407 = vmatpush.bf16.msra.mxu0 %v3448_v54 }
 0x452   : > { %v1302_v27 = vpop.xlane.xlu0 %1301 }
 0x453   : > { %v1015_v4 = vpop.f32.mrf.mxu3  ;;  %v1324_v20 = vsel %vm982_vm5, %v1322_v14, %v1302_v27 }
 0x45a   : > { %v1310_v48 = vpop.xlane.xlu0 %1309  ;;  %v1347_v15 = vpop.permute.xlu1 %1346 }
 0x45b   : > { %v1326_v63 = vsel %vm985_vm6, %v1324_v20, %v1310_v48  ;;  %v1017_v26 = vpop.f32.mrf.mxu3  ;;  %1359 = vmatpush.bf16.msra.mxu3 %v1347_v15 }
 0x45c   : > { %v1328_v36 = vpack.c.bf16 %v1326_v63, %v1325_v17 }
 0x45e   : > { %3180 = vmatmul.msk.bf16.vlgmr.msrb.gmra.mxu2 %vm5091_vm7, %v1328_v36  ;;  %3181 = vmatmul.msk.bf16.vlgmr.msra.gmra.mxu3 %vm689_vm3, %v1327_v43 }
 0x463   : > { %v1035_v30 = vpop.f32.mrf.mxu3 }
 0x464   : > { %v1036_v51 = vadd.f32 %v1035_v30, %v1015_v4 }
 0x46b   : > { %v1037_v8 = vpop.f32.mrf.mxu3 }
 0x46c   : > { %v1038_v57 = vadd.f32 %v1037_v8, %v1017_v26  ;;  %v3832_v26 = vmov 32.0  }
 0x46d   : > { %3702 = vrcp.f32 %v3832_v26  ;;  %v3671_v26 = vld [vmem:[%s5058_s8] ss:$0 sm:$0xff] }
 0x473   : > { %v3703_v36 = vpop.eup %3702 }
 0x474   : > { %v1425_v43 = vmul.f32 32.0, %v3703_v36  ;;  %vm1429_vm8 = vweird.f32 %v3703_v36 }
 0x476   : > { %v1426_v30 = vsub.f32 1.0, %v1425_v43 }
 0x4e1   : > { %v1341_v45 = vpop.f32.mrf.mxu2  ;;  %v1361_v52 = vpop.f32.mrf.mxu3 }
 0x4e2   : > { %v1362_v5 = vadd.f32 %v1361_v52, %v1341_v45 }
 0x4e9   : > { %v1343_v59 = vpop.f32.mrf.mxu2  ;;  %v1363_v25 = vpop.f32.mrf.mxu3 }
 0x4ea   : > { %v1364_v7 = vadd.f32 %v1363_v25, %v1343_v59 }
 0x4ec   : > { %v3592_v53 = vpack.i.bf16 %v1364_v7, %v1362_v5 }
 0x4ee   : > { %3593 = vrot.lane.b32.xlu2 %v3592_v53, %s5077_s30  ;;  %s5111_s30 = smov 64  }
 0x548   : > { %v3594_v23 = vpop.permute.xlu2 %3593 }
 0x549   : > { %v3596_v1 = vunpack.i.h.bf16 %v3594_v23  ;;  %v3595_v2 = vunpack.i.l.bf16 %v3594_v23 }
 0x54b   : > { %v1375_v27 = vsel %vm689_vm3, %v1038_v57, %v3596_v1  ;;  %v1374_v4 = vsel %vm689_vm3, %v1036_v51, %v3595_v2  ;;  %v1427_v51 = vmul.f32 %v3703_v36, %v1426_v30 }
 0x54c   : > { %v1376_v58 = vpack.c.bf16 %v1375_v27, %v1374_v4 }
 0x54d   : > { %v1428_v47 = vadd.f32 %v3703_v36, %v1427_v51  ;;  %v3672_v51 = vld [vmem:[%s5059_s9] ss:$0 sm:$0xff] }
 0x54e   : > { %3190 = vmatmul.msk.bf16.vlgmr.msra.gmra.mxu0 %vm660_vm2, %v1376_v58 }
 0x54f   : > { %v4434_v8 = vsel %vm1429_vm8, %v3703_v36, %v1428_v47  ;;  %v3453_v36 = vld [vmem:[%s5062_s12 + $0x18] sm:$0xff] }
 0x5cb   : > { %v1409_v16 = vpop.f32.mrf.mxu0 }
 0x5cc   : > { %v1410_v33 = vadd.f32 %v3670_v19, %v1409_v16 }
 0x5ce   : > { %v1414_v14 = vadd.f32 %v1410_v33, %v4013_v11  ;;  %v3455_v33 = vld [vmem:[%s5062_s12 + $0x28] sm:$0xff] }
 0x5cf   : > { %1582 = vmatpush.bf16.msra.mxu1 %v3455_v33 }
 0x5d0   : > { %v1418_v20 = vsel %vm660_vm2, %v1414_v14, 0.0 }
 0x5d1   : > { %1419 = vadd.xlane.f32.xlu0 %v1418_v20  ;;  %v3454_v20 = vld [vmem:[%s5062_s12 + $0x20] sm:$0xff] }
 0x5d3   : > { %v1411_v48 = vpop.f32.mrf.mxu0  ;;  %1583 = vmatpush.bf16.msra.mxu1 %v3454_v20 }
 0x5d4   : > { %v1412_v15 = vadd.f32 %v3670_v19, %v1411_v48 }
 0x5d6   : > { %v1415_v17 = vadd.f32 %v1412_v15, %v4016_v12 }
 0x5d7   : > { %1584 = vmatpush.bf16.msra.mxu1 %v3453_v36 }
 0x5d8   : > { %v1421_v63 = vsel %vm660_vm2, %v1415_v17, 0.0 }
 0x5d9   : > { %1422 = vadd.xlane.f32.xlu0 %v1421_v63 }
 0x644   : > { %v1420_v11 = vpop.xlane.xlu0 %1419 }
 0x645   : > { %v1431_v45 = vmul.f32 %v4434_v8, %v1420_v11 }
 0x647   : > { %v1433_v52 = vsub.f32 %v1414_v14, %v1431_v45 }
 0x649   : > { %v1435_v59 = vmul.f32 %v1433_v52, %v1433_v52 }
 0x64b   : > { %v1437_v12 = vsel %vm660_vm2, %v1435_v59, 0.0  ;;  %v3452_v59 = vld [vmem:[%s5062_s12 + $0x10] sm:$0xff] }
 0x64c   : > { %1438 = vadd.xlane.f32.xlu0 %v1437_v12  ;;  %v1423_v25 = vpop.xlane.xlu0 %1422  ;;  %1585 = vmatpush.bf16.msra.mxu1 %v3452_v59 }
 0x64d   : > { %v1432_v5 = vmul.f32 %v4434_v8, %v1423_v25 }
 0x64f   : > { %v1434_v7 = vsub.f32 %v1415_v17, %v1432_v5 }
 0x651   : > { %v1436_v53 = vmul.f32 %v1434_v7, %v1434_v7 }
 0x653   : > { %v1440_v54 = vsel %vm660_vm2, %v1436_v53, 0.0  ;;  %v3451_v53 = vld [vmem:[%s5062_s12 + $0x8] sm:$0xff] }
 0x654   : > { %1441 = vadd.xlane.f32.xlu2 %v1440_v54  ;;  %1586 = vmatpush.bf16.msra.mxu1 %v3451_v53 }
 0x6bf   : > { %v1439_v23 = vpop.xlane.xlu0 %1438 }
 0x6c0   : > { %v1443_v57 = vmul.f32 %v1439_v23, %v4434_v8 }
 0x6c2   : > { %v1445_v1 = vadd.f32 1e-05, %v1443_v57 }
 0x6c4   : > { %3704 = vrsqrt.f32 %v1445_v1  ;;  %vm1453_vm10 = vweird.f32 %v1445_v1 }
 0x6c7   : > { %v1442_v2 = vpop.xlane.xlu2 %1441 }
 0x6c8   : > { %v1444_v27 = vmul.f32 %v1442_v2, %v4434_v8 }
 0x6ca   : > { %v3705_v4 = vpop.eup %3704  ;;  %v1446_v58 = vadd.f32 1e-05, %v1444_v27 }
 0x6cb   : > { %v1448_v19 = vmul.f32 %v3705_v4, %v1445_v1  ;;  %vm1454_vm9 = vweird.f32 %v3705_v4 }
 0x6cc   : > { %3706 = vrsqrt.f32 %v1446_v58  ;;  %vm1455_vm11 = vmor %vm1453_vm10, %vm1454_vm9  ;;  %vm1463_vm8 = vweird.f32 %v1446_v58  ;;  %vm5090_vm10 = vcmask 1040384  }
 0x6cd   : > { %v1449_v16 = vmul.f32 %v3705_v4, %v1448_v19 }
 0x6cf   : > { %v1450_v14 = vmul.f32 0.5, %v1449_v16 }
 0x6d1   : > { %v1451_v48 = vsub.f32 1.5, %v1450_v14 }
 0x6d2   : > { %v3707_v15 = vpop.eup %3706 }
 0x6d3   : > { %v1452_v17 = vmul.f32 %v3705_v4, %v1451_v48  ;;  %v1458_v63 = vmul.f32 %v3707_v15, %v1446_v58  ;;  %vm1464_vm12 = vweird.f32 %v3707_v15 }
 0x6d4   : > { %vm1465_vm9 = vmor %vm1463_vm8, %vm1464_vm12  ;;  %vm5088_vm12 = vcmask 1046528   ;;  %vm5087_vm8 = vcmask 523264  }
 0x6d5   : > { %v1456_v43 = vsel %vm1455_vm11, %v3705_v4, %v1452_v17  ;;  %v1459_v30 = vmul.f32 %v3707_v15, %v1458_v63  ;;  %vm5089_vm11 = vcmask 1045504  }
 0x6d6   : > { %v1467_v47 = vmul.f32 %v1456_v43, %v1433_v52 }
 0x6d7   : > { %v1460_v11 = vmul.f32 0.5, %v1459_v30 }
 0x6d8   : > { %v1472_v45 = vmul.f32 %v3671_v26, %v1467_v47 }
 0x6d9   : > { %v1461_v12 = vsub.f32 1.5, %v1460_v11 }
 0x6da   : > { %v4460_v25 = vadd.f32 %v3672_v51, %v1472_v45 }
 0x6db   : > { %v1462_v5 = vmul.f32 %v3707_v15, %v1461_v12 }
 0x6dc   : > { %v1479_v54 = vmul.f32 %v4007_v9, %v4460_v25 }
 0x6dd   : > { %v1466_v52 = vsel %vm1465_vm9, %v3707_v15, %v1462_v5  ;;  %vm5086_vm9 = vcmask 785408  }
 0x6de   : > { %v1468_v23 = vmul.f32 %v1466_v52, %v1434_v7  ;;  %v1484_v1 = vrot.slane %v1479_v54, 7 }
 0x6e0   : > { %v1473_v57 = vmul.f32 %v3671_v26, %v1468_v23  ;;  %v1490_v4 = vsel %vm5090_vm10, 0.0, %v1484_v1 }
 0x6e1   : > { %v1507_v33 = vrot.slane %v1490_v4, 2  ;;  %v1495_v7 = vrot.slane %v1490_v4, 1 }
 0x6e2   : > { %v4467_v2 = vadd.f32 %v3672_v51, %v1473_v57  ;;  %v3450_v51 = vld [vmem:[%s5062_s12] sm:$0xff] }
 0x6e3   : > { %1587 = vmatpush.bf16.msra.mxu1 %v3450_v51 }
 0x6e4   : > { %v1480_v27 = vmul.f32 %v4010_v10, %v4467_v2 }
 0x6e6   : > { %v1485_v58 = vrot.slane %v1480_v27, 7  ;;  %v3466_v27 = vld [vmem:[%s5064_s14 + $0x50] sm:$0xff] }
 0x6e8   : > { %v1486_v19 = vsel %vm5090_vm10, %v1484_v1, %v1485_v58  ;;  %v1491_v16 = vsel %vm5090_vm10, %v1485_v58, 0.0  ;;  %v3467_v1 = vld [vmem:[%s5064_s14 + $0x58] sm:$0xff]  ;;  %v3464_v58 = vld [vmem:[%s5064_s14 + $0x40] sm:$0xff] }
 0x6e9   : > { %v1508_v14 = vrot.slane %v1486_v19, 2  ;;  %v1510_v20 = vrot.slane %v1491_v16, 2  ;;  %v1496_v48 = vrot.slane %v1486_v19, 1  ;;  %v1498_v15 = vrot.slane %v1491_v16, 1  ;;  %1753 = vmatpush.bf16.msrb.mxu3 %v3467_v1  ;;  %v3462_v16 = vld [vmem:[%s5064_s14 + $0x30] sm:$0xff] }
 0x6eb   : > { %v1509_v17 = vsel %vm5089_vm11, %v1507_v33, %v1508_v14  ;;  %v1511_v63 = vsel %vm5089_vm11, %v1508_v14, %v1510_v20  ;;  %v1497_v26 = vsel %vm5088_vm12, %v1495_v7, %v1496_v48  ;;  %v1499_v36 = vsel %vm5088_vm12, %v1496_v48, %v1498_v15  ;;  %v3673_v33 = vld [vmem:[%s5063_s13] ss:$0 sm:$0xff]  ;;  %v3461_v7 = vld [vmem:[%s5064_s14 + $0x28] sm:$0xff] }
 0x6ec   : > { %v3602_v43 = vpack.i.bf16 %v1511_v63, %v1509_v17  ;;  %v3597_v30 = vpack.i.bf16 %v1499_v36, %v1497_v26  ;;  %v3460_v48 = vld [vmem:[%s5064_s14 + $0x20] sm:$0xff]  ;;  %v3459_v17 = vld [vmem:[%s5064_s14 + $0x18] sm:$0xff] }
 0x6ed   : > { %1754 = vmatpush.bf16.msrb.mxu3 %v3466_v27 }
 0x6ee   : > { %3603 = vrot.lane.b32.xlu0 %v3602_v43, %s5083_s1  ;;  %3598 = vrot.lane.b32.xlu1 %v3597_v30, %s5081_s23  ;;  %v3458_v43 = vld [vmem:[%s5064_s14 + $0x10] sm:$0xff]  ;;  %s5120_s23 = smov 16  }
 0x760   : > { %v3604_v47 = vpop.permute.xlu0 %3603  ;;  %v3599_v11 = vpop.permute.xlu1 %3598 }
 0x761   : > { %v3606_v45 = vunpack.i.h.bf16 %v3604_v47  ;;  %v3605_v59 = vunpack.i.l.bf16 %v3604_v47  ;;  %v3601_v12 = vunpack.i.h.bf16 %v3599_v11  ;;  %v3600_v5 = vunpack.i.l.bf16 %v3599_v11  ;;  %v3457_v11 = vld [vmem:[%s5064_s14 + $0x8] sm:$0xff] }
 0x763   : > { %v1519_v53 = vsel %vm660_vm2, %v1486_v19, %v3601_v12  ;;  %v1518_v52 = vsel %vm660_vm2, %v1490_v4, %v3600_v5  ;;  %v3465_v4 = vld [vmem:[%s5064_s14 + $0x48] sm:$0xff]  ;;  %v3463_v19 = vld [vmem:[%s5064_s14 + $0x38] sm:$0xff] }
 0x764   : > { %v1522_v54 = vsel %vm5087_vm8, %v1519_v53, %v3606_v45  ;;  %v1521_v23 = vsel %vm5087_vm8, %v1518_v52, %v3605_v59  ;;  %1755 = vmatpush.bf16.msrb.mxu3 %v3465_v4  ;;  %1735 = vmatpush.bf16.msra.mxu2 %v3463_v19 }
 0x765   : > { %v1523_v57 = vpack.c.bf16 %v1522_v54, %v1521_v23 }
 0x767   : > { %3215 = vmatmul.msk.bf16.vlgmr.msra.gmra.mxu1 %vm5086_vm9, %v1523_v57 }
 0x768   : > { %1756 = vmatpush.bf16.msrb.mxu3 %v3464_v58  ;;  %1736 = vmatpush.bf16.msra.mxu2 %v3462_v16 }
 0x76c   : > { %1737 = vmatpush.bf16.msra.mxu2 %v3461_v7  ;;  %v3456_v7 = vld [vmem:[%s5064_s14] sm:$0xff] }
 0x770   : > { %1738 = vmatpush.bf16.msra.mxu2 %v3460_v48 }
 0x774   : > { %1739 = vmatpush.bf16.msra.mxu2 %v3459_v17 }
 0x778   : > { %1740 = vmatpush.bf16.msra.mxu2 %v3458_v43 }
 0x77c   : > { %1741 = vmatpush.bf16.msra.mxu2 %v3457_v11 }
 0x780   : > { %1742 = vmatpush.bf16.msra.mxu2 %v3456_v7 }
 0x7e4   : > { %v1589_v14 = vpop.f32.mrf.mxu1 }
 0x7e5   : > { %v1590_v20 = vadd.f32 %v3673_v33, %v1589_v14 }
 0x7e7   : > { %v1594_v15 = vmax.f32 %v1590_v20, 0.0 }
 0x7e9   : > { %v1596_v63 = vmul.f32 %v4007_v9, %v1594_v15 }
 0x7eb   : > { %v1600_v30 = vrot.slane %v1596_v63, 7 }
 0x7ec   : > { %v1591_v26 = vpop.f32.mrf.mxu1 }
 0x7ed   : > { %v1592_v36 = vadd.f32 %v3673_v33, %v1591_v26  ;;  %v1606_v45 = vsel %vm5090_vm10, 0.0, %v1600_v30  ;;  %v3674_v26 = vld [vmem:[%s5065_s15] ss:$0 sm:$0xff] }
 0x7ee   : > { %v1610_v12 = vrot.slane %v1606_v45, 1  ;;  %v1621_v5 = vrot.slane %v1606_v45, 2 }
 0x7ef   : > { %v1595_v51 = vmax.f32 %v1592_v36, 0.0 }
 0x7f1   : > { %v1597_v47 = vmul.f32 %v4010_v10, %v1595_v51 }
 0x7f3   : > { %v1601_v59 = vrot.slane %v1597_v47, 7 }
 0x7f5   : > { %v1602_v53 = vsel %vm5090_vm10, %v1600_v30, %v1601_v59  ;;  %v1607_v52 = vsel %vm5090_vm10, %v1601_v59, 0.0 }
 0x7f6   : > { %v1613_v54 = vrot.slane %v1607_v52, 1  ;;  %v1622_v23 = vrot.slane %v1602_v53, 2  ;;  %v1624_v57 = vrot.slane %v1607_v52, 2  ;;  %v1611_v1 = vrot.slane %v1602_v53, 1 }
 0x7f8   : > { %v1625_v27 = vsel %vm5089_vm11, %v1622_v23, %v1624_v57  ;;  %v1623_v4 = vsel %vm5089_vm11, %v1621_v5, %v1622_v23  ;;  %v1612_v58 = vsel %vm5088_vm12, %v1610_v12, %v1611_v1  ;;  %v1614_v19 = vsel %vm5088_vm12, %v1611_v1, %v1613_v54 }
 0x7f9   : > { %v1631_v16 = vpack.c.bf16 %v1625_v27, %v1623_v4  ;;  %v3607_v33 = vpack.i.bf16 %v1614_v19, %v1612_v58 }
 0x7fb   : > { %3264 = vmatmul.msk.bf16.vlgmr.msrb.gmra.mxu3 %vm5087_vm8, %v1631_v16  ;;  %3608 = vrot.lane.b32.xlu1 %v3607_v33, %s5111_s30 }
 0x86d   : > { %v3609_v14 = vpop.permute.xlu1 %3608 }
 0x86e   : > { %v3611_v20 = vunpack.i.h.bf16 %v3609_v14  ;;  %v3610_v48 = vunpack.i.l.bf16 %v3609_v14  ;;  %v3471_v14 = vld [vmem:[%s5057_s7 + $0x8] sm:$0x10] }
 0x870   : > { %v1629_v15 = vsel %vm5087_vm8, %v1602_v53, %v3611_v20  ;;  %v1628_v17 = vsel %vm5087_vm8, %v1606_v45, %v3610_v48 }
 0x871   : > { %v1630_v63 = vpack.c.bf16 %v1629_v15, %v1628_v17 }
 0x873   : > { %1743 = vmatmul.bf16.vlgmr.msra.gmra.mxu2 %v1630_v63  ;;  %v3469_v63 = vld [vmem:[%s5106_s29 + $0x18] sm:$0xff] }
 0x874   : > { %1855 = vmatpush.bf16.msrb.mxu0 %v3469_v63 }
 0x87e   : > { %v1758_v36 = vpop.f32.mrf.mxu3 }
 0x886   : > { %v1760_v53 = vpop.f32.mrf.mxu3 }
 0x8f6   : > { %v1744_v43 = vpop.f32.mrf.mxu2 }
 0x8f7   : > { %v1745_v30 = vadd.f32 %v3674_v26, %v1744_v43 }
 0x8f9   : > { %v1759_v51 = vadd.f32 %v1758_v36, %v1745_v30 }
 0x8fb   : > { %v1763_v47 = vmul.f32 %v4007_v9, %v1759_v51 }
 0x8fd   : > { %v1765_v11 = vadd.f32 %v1763_v47, %v4460_v25 }
 0x8fe   : > { %v1746_v59 = vpop.f32.mrf.mxu2 }
 0x8ff   : > { %v1747_v12 = vadd.f32 %v3674_v26, %v1746_v59  ;;  %v1769_v5 = vsel %vm660_vm2, %v1765_v11, 0.0  ;;  %v3468_v26 = vld [vmem:[%s5106_s29 + $0x10] sm:$0xff] }
 0x900   : > { %1770 = vadd.xlane.f32.xlu1 %v1769_v5  ;;  %1856 = vmatpush.bf16.msrb.mxu0 %v3468_v26  ;;  %v3677_v26 = vld [vmem:[%s5108_s3 + $0x1] ss:$0 sm:$0xff]  ;;  %s3768_s3 = scalar_lea.hbm %s5068_s18, 32 }
 0x901   : > { %v1761_v45 = vadd.f32 %v1760_v53, %v1747_v12 }
 0x903   : > { %v1764_v52 = vmul.f32 %v4010_v10, %v1761_v45 }
 0x905   : > { %v1766_v54 = vadd.f32 %v1764_v52, %v4467_v2  ;;  %v3291_v2 = vld [vmem:[%s5057_s7 + $0x8] sm:$0xf] }
 0x906   : > { %v3292_v15 = vor.u32 %v3471_v14, %v3291_v2 }
 0x907   : > { %v1772_v23 = vsel %vm660_vm2, %v1766_v54, 0.0 }
 0x908   : > { %1773 = vadd.xlane.f32.xlu0 %v1772_v23  ;;  %v2177_v36 = vand.u32 %v3292_v15, %v4337_v34  ;;  %v3470_v15 = vld [vmem:[%s5056_s6 + $0x8] sm:$0x10] }
 0x90a   : > { %2186 = vmatpush.bf16.msra.mxu0 %v2177_v36 }
 0x973   : > { %v1771_v57 = vpop.xlane.xlu1 %1770 }
 0x974   : > { %v1775_v1 = vmul.f32 %v1771_v57, %v4434_v8 }
 0x976   : > { %v1777_v27 = vsub.f32 %v1765_v11, %v1775_v1  ;;  %v3675_v1 = vld [vmem:[%s5060_s10] ss:$0 sm:$0xff] }
 0x978   : > { %v1779_v4 = vmul.f32 %v1777_v27, %v1777_v27 }
 0x97a   : > { %v1781_v25 = vsel %vm660_vm2, %v1779_v4, 0.0 }
 0x97b   : > { %v1774_v58 = vpop.xlane.xlu0 %1773  ;;  %1782 = vadd.xlane.f32.xlu2 %v1781_v25 }
 0x97c   : > { %v1776_v19 = vmul.f32 %v1774_v58, %v4434_v8 }
 0x97e   : > { %v1778_v16 = vsub.f32 %v1766_v54, %v1776_v19  ;;  %v3676_v19 = vld [vmem:[%s5112_s24] ss:$0 sm:$0xff] }
 0x980   : > { %v1780_v33 = vmul.f32 %v1778_v16, %v1778_v16 }
 0x982   : > { %v1784_v7 = vsel %vm660_vm2, %v1780_v33, 0.0 }
 0x983   : > { %1785 = vadd.xlane.f32.xlu2 %v1784_v7 }
 0x9ee   : > { %v1783_v20 = vpop.xlane.xlu2 %1782 }
 0x9ef   : > { %v1787_v48 = vmul.f32 %v1783_v20, %v4434_v8 }
 0x9f1   : > { %v1789_v17 = vadd.f32 1e-05, %v1787_v48 }
 0x9f3   : > { %3708 = vrsqrt.f32 %v1789_v17  ;;  %vm1797_vm8 = vweird.f32 %v1789_v17 }
 0x9f6   : > { %v1786_v43 = vpop.xlane.xlu2 %1785 }
 0x9f7   : > { %v1788_v30 = vmul.f32 %v1786_v43, %v4434_v8 }
 0x9f9   : > { %v3709_v51 = vpop.eup %3708  ;;  %v1790_v47 = vadd.f32 1e-05, %v1788_v30 }
 0x9fa   : > { %v1792_v11 = vmul.f32 %v3709_v51, %v1789_v17  ;;  %vm1798_vm9 = vweird.f32 %v3709_v51 }
 0x9fb   : > { %3710 = vrsqrt.f32 %v1790_v47  ;;  %vm1799_vm12 = vmor %vm1797_vm8, %vm1798_vm9  ;;  %vm1807_vm10 = vweird.f32 %v1790_v47 }
 0x9fc   : > { %v1793_v59 = vmul.f32 %v3709_v51, %v1792_v11 }
 0x9fe   : > { %v1794_v12 = vmul.f32 0.5, %v1793_v59 }
 0xa00   : > { %v1795_v5 = vsub.f32 1.5, %v1794_v12 }
 0xa01   : > { %v3711_v53 = vpop.eup %3710 }
 0xa02   : > { %v1796_v45 = vmul.f32 %v3709_v51, %v1795_v5  ;;  %v1802_v52 = vmul.f32 %v3711_v53, %v1790_v47  ;;  %vm1808_vm11 = vweird.f32 %v3711_v53 }
 0xa03   : > { %vm1809_vm7 = vmor %vm1807_vm10, %vm1808_vm11 }
 0xa04   : > { %v1803_v54 = vmul.f32 %v3711_v53, %v1802_v52  ;;  %v1800_v34 = vsel %vm1799_vm12, %v3709_v51, %v1796_v45 }
 0xa05   : > { %v1811_v4 = vmul.f32 %v1800_v34, %v1777_v27  ;;  %v3286_v27 = vld [vmem:[%s5056_s6 + $0x8] sm:$0xf] }
 0xa06   : > { %v1804_v23 = vmul.f32 0.5, %v1803_v54 }
 0xa07   : > { %v1816_v33 = vmul.f32 %v3675_v1, %v1811_v4 }
 0xa08   : > { %v1805_v57 = vsub.f32 1.5, %v1804_v23  ;;  %v5116_v23 = vmov 4  }
 0xa09   : > { %v4574_v14 = vadd.f32 %v3676_v19, %v1816_v33 }
 0xa0a   : > { %v1806_v25 = vmul.f32 %v3711_v53, %v1805_v57 }
 0xa0c   : > { %v1810_v58 = vsel %vm1809_vm7, %v3711_v53, %v1806_v25 }
 0xa0d   : > { %v1812_v7 = vmul.f32 %v1810_v58, %v1778_v16  ;;  %v3287_v16 = vor.u32 %v3470_v15, %v3286_v27 }
 0xa0f   : > { %v1817_v2 = vmul.f32 %v3675_v1, %v1812_v7  ;;  %v1902_v17 = vsel %vm689_vm3, %v3287_v16, 0 }
 0xa10   : > { %1911 = vmatpush.bf16.xpose.msra.mxu3 %v1902_v17 }
 0xa11   : > { %v4576_v20 = vadd.f32 %v3676_v19, %v1817_v2 }
 0xa13   : > { %v1823_v48 = vpack.c.bf16 %v4576_v20, %v4574_v14 }
 0xa15   : > { %3278 = vmatmul.msk.bf16.vlgmr.msrb.gmra.mxu0 %vm660_vm2, %v1823_v48 }
 0xa16   : > { %2512 = vmatpush.bf16.msrb.mxu0 %v2177_v36 }
 0xa18   : > { %2245 = vmatpush.bf16.xpose.msrb.mxu3 %v1902_v17 }
 0xa92   : > { %v1858_v63 = vpop.f32.mrf.mxu0 }
 0xa93   : > { %v1859_v43 = vadd.f32 %v3677_v26, %v1858_v63 }
 0xa95   : > { %v1869_v51 = vmul.f32 0.25, %v1859_v43 }
 0xa9a   : > { %v1860_v36 = vpop.f32.mrf.mxu0 }
 0xa9b   : > { %v1861_v30 = vadd.f32 %v3677_v26, %v1860_v36 }
 0xa9d   : > { %v1870_v47 = vmul.f32 0.25, %v1861_v30  ;;  %v4591_v11 = vpack.c.bf16 %v1861_v30, %v1859_v43 }
 0xa9f   : > { %2216 = vrot.lane.b32.xlu0 %v4591_v11, %s5113_s21  ;;  %1874 = vrot.lane.b32.xlu1 %v4591_v11, %s5114_s22  ;;  %v1871_v59 = vpack.c.bf16 %v1870_v47, %v1869_v51  ;;  %s3494_s22 = sshll.u32 %s3955_s11, 4 }
 0xaa1   : > { %2214 = vrot.lane.b32.xlu2 %v1871_v59, %s5115_s28  ;;  %3288 = vmatmul.msk.bf16.vlgmr.msra.gmra.mxu3 %vm689_vm3, %v1871_v59  ;;  %s548_s28 = sand.u32 1, %s3804_s19  }
 0xaa2   : > { %s3131_s1 = sshll.u32 %s548_s28, 4 }
 0xafb   : > { %v2215_v12 = vpop.permute.xlu2 %2214 }
 0xafc   : > { %3296 = vmatmul.msk.bf16.vlgmr.msrb.gmra.mxu3 %vm689_vm3, %v2215_v12 }
 0xb11   : > { %v2217_v5 = vpop.permute.xlu0 %2216  ;;  %v1875_v53 = vpop.permute.xlu1 %1874 }
 0xb12   : > { %v2222_v45 = vsel %vm689_vm3, %v2217_v5, 0  ;;  %v1880_v52 = vsel %vm689_vm3, %v1875_v53, 0 }
 0xb13   : > { %1889 = vmatpush.bf16.xpose.msrb.mxu1 %v1880_v52 }
 0xb1a   : > { %3283 = vmatmul.msk.bf16.vlgmr.msrb.gmra.mxu1 %vm689_vm3, %v1871_v59 }
 0xb1b   : > { %2231 = vmatpush.bf16.xpose.msra.mxu1 %v2222_v45 }
 0xb24   : > { %v1913_v54 = vpop.f32.mrf.mxu3 }
 0xb25   : > { %1969 = vperm.xlu0 %3616, %v1913_v54   ;;  %1945 = vperm.xlu1 %3614, %v1913_v54  }
 0xb26   : > { %1920 = vperm.xlu2 %3612, %v1913_v54  }
 0xb2a   : > { %3295 = vmatmul.msk.bf16.vlgmr.msra.gmra.mxu1 %vm689_vm3, %v2215_v12 }
 0xb2c   : > { %v1915_v34 = vpop.f32.mrf.mxu3 }
 0xb2d   : > { %3622 = vset.pattern.permute.xlu0 %v3820_v28  ;;  %3615 = vset.pattern.permute.xlu1 %v3825_v40 }
 0xb2e   : > { %3613 = vset.pattern.permute.xlu2 %v3820_v28  ;;  %1957 = vperm.xlu1 %3615, %v1913_v54  }
 0xb2f   : > { %1933 = vperm.xlu2 %3613, %v1913_v54   ;;  %1937 = vperm.xlu0 %3622, %v1915_v34  }
 0xb36   : > { %3619 = vset.pattern.permute.xlu1 %v3826_v41 }
 0xb37   : > { %3617 = vset.pattern.permute.xlu2 %v3822_v37  ;;  %3627 = vset.pattern.permute.xlu0 %v3824_v39 }
 0xb38   : > { %2005 = vperm.xlu1 %3619, %v1913_v54   ;;  %1981 = vperm.xlu2 %3617, %v1913_v54  }
 0xb39   : > { %1997 = vperm.xlu0 %3627, %v1915_v34  }
 0xb40   : > { %3620 = vset.pattern.permute.xlu1 %v3827_v42  ;;  %3618 = vset.pattern.permute.xlu2 %v3824_v39 }
 0xb41   : > { %2017 = vperm.xlu1 %3620, %v1913_v54   ;;  %1993 = vperm.xlu2 %3618, %v1913_v54  }
 0xb42   : > { %3630 = vset.pattern.permute.xlu0 %v3821_v29 }
 0xb49   : > { %3621 = vset.pattern.permute.xlu1 %v3821_v29  ;;  %3623 = vset.pattern.permute.xlu2 %v3823_v38 }
 0xb4a   : > { %1949 = vperm.xlu2 %3623, %v1915_v34   ;;  %1925 = vperm.xlu1 %3621, %v1915_v34  }
 0xb52   : > { %3624 = vset.pattern.permute.xlu2 %v3825_v40  ;;  %3625 = vset.pattern.permute.xlu1 %v5116_v23 }
 0xb53   : > { %1961 = vperm.xlu2 %3624, %v1915_v34   ;;  %1973 = vperm.xlu1 %3625, %v1915_v34  }
 0xb5b   : > { %3628 = vset.pattern.permute.xlu2 %v3826_v41  ;;  %3626 = vset.pattern.permute.xlu1 %v3822_v37 }
 0xb5c   : > { %2009 = vperm.xlu2 %3628, %v1915_v34   ;;  %1985 = vperm.xlu1 %3626, %v1915_v34  }
 0xb64   : > { %3629 = vset.pattern.permute.xlu2 %v3827_v42  ;;  %3633 = vset.pattern.permute.xlu1 %v3825_v40 }
 0xb65   : > { %2021 = vperm.xlu2 %3629, %v1915_v34  }
 0xb6d   : > { %3631 = vset.pattern.permute.xlu2 %v3820_v28 }
 0xb7f   : > { %v2247_v57 = vpop.f32.mrf.mxu3 }
 0xb80   : > { %2291 = vperm.xlu1 %3633, %v2247_v57   ;;  %2267 = vperm.xlu2 %3631, %v2247_v57   ;;  %v1921_v1 = vpop.permute.xlu2 %1920 }
 0xb81   : > { %2254 = vperm.xlu0 %3630, %v2247_v57   ;;  %v1928_v17 = vmul.f32 %v4088_v56, %v1921_v1 }
 0xb87   : > { %v2249_v4 = vpop.f32.mrf.mxu3 }
 0xb88   : > { %3634 = vset.pattern.permute.xlu1 %v5116_v23  ;;  %3632 = vset.pattern.permute.xlu2 %v3823_v38 }
 0xb89   : > { %3635 = vset.pattern.permute.xlu0 %v3822_v37  ;;  %2303 = vperm.xlu1 %3634, %v2247_v57   ;;  %v1934_v58 = vpop.permute.xlu2 %1933 }
 0xb8a   : > { %2279 = vperm.xlu2 %3632, %v2247_v57   ;;  %2315 = vperm.xlu0 %3635, %v2247_v57  }
 0xb91   : > { %3638 = vset.pattern.permute.xlu1 %v3827_v42 }
 0xb92   : > { %3636 = vset.pattern.permute.xlu2 %v3824_v39  ;;  %3641 = vset.pattern.permute.xlu0 %v3823_v38  ;;  %v1982_v33 = vpop.permute.xlu2 %1981 }
 0xb93   : > { %2351 = vperm.xlu1 %3638, %v2247_v57   ;;  %2327 = vperm.xlu2 %3636, %v2247_v57  }
 0xb94   : > { %2283 = vperm.xlu0 %3641, %v2249_v4  }
 0xb97   : > { %v1946_v25 = vpop.permute.xlu1 %1945  ;;  %v1970_v2 = vpop.permute.xlu0 %1969 }
 0xb98   : > { %v1952_v59 = vmul.f32 %v4099_v61, %v1946_v25  ;;  %v1988_v25 = vmul.f32 %v4116_v18, %v1982_v33 }
 0xb9b   : > { %3639 = vset.pattern.permute.xlu1 %v3821_v29  ;;  %3637 = vset.pattern.permute.xlu2 %v3826_v41  ;;  %v1994_v29 = vpop.permute.xlu2 %1993 }
 0xb9c   : > { %3646 = vset.pattern.permute.xlu0 %v3826_v41  ;;  %2339 = vperm.xlu2 %3637, %v2247_v57   ;;  %v1891_v41 = vpop.f32.mrf.mxu1  ;;  %v1976_v57 = vmul.f32 %v4110_v13, %v1970_v2 }
 0xb9d   : > { %2343 = vperm.xlu0 %3646, %v2249_v4   ;;  %2259 = vperm.xlu1 %3639, %v2249_v4   ;;  %v1892_v27 = vadd.f32 %v1891_v41, %v4085_v55 }
 0xb9f   : > { %v1930_v26 = vadd.f32 %v1928_v17, %v1892_v27 }
 0xba0   : > { %v1958_v19 = vpop.permute.xlu1 %1957 }
 0xba1   : > { %v1938_v16 = vpop.permute.xlu0 %1937  ;;  %v1964_v12 = vmul.f32 %v4103_v0, %v1958_v19 }
 0xba4   : > { %3642 = vset.pattern.permute.xlu2 %v3825_v40  ;;  %v1893_v40 = vpop.f32.mrf.mxu1 }
 0xba5   : > { %3640 = vset.pattern.permute.xlu1 %v3820_v28  ;;  %2295 = vperm.xlu2 %3642, %v2249_v4   ;;  %v1950_v28 = vpop.permute.xlu2 %1949  ;;  %v1894_v15 = vadd.f32 %v1893_v40, %v4140_v49 }
 0xba6   : > { %2271 = vperm.xlu1 %3640, %v2249_v4   ;;  %3668 = vset.pattern.permute.xlu0 %v3827_v42  ;;  %v1953_v51 = vmul.f32 %v4156_v62, %v1950_v28 }
 0xbaa   : > { %v2006_v38 = vpop.permute.xlu1 %2005 }
 0xbab   : > { %v1998_v1 = vpop.permute.xlu0 %1997  ;;  %v2012_v2 = vmul.f32 %v4125_v24, %v2006_v38 }
 0xbac   : > { %v2001_v19 = vmul.f32 %v4172_v22, %v1998_v1 }
 0xbad   : > { %3643 = vset.pattern.permute.xlu2 %v5116_v23  ;;  %v1962_v43 = vpop.permute.xlu2 %1961 }
 0xbae   : > { %3644 = vset.pattern.permute.xlu1 %v3822_v37  ;;  %2307 = vperm.xlu2 %3643, %v2249_v4   ;;  %v1965_v45 = vmul.f32 %v4159_v44, %v1962_v43 }
 0xbaf   : > { %2319 = vperm.xlu1 %3644, %v2249_v4  }
 0xbb3   : > { %v2018_v7 = vpop.permute.xlu1 %2017 }
 0xbb6   : > { %3647 = vset.pattern.permute.xlu2 %v3827_v42  ;;  %v1941_v42 = vmul.f32 %v4150_v46, %v1938_v16  ;;  %v2010_v23 = vpop.permute.xlu2 %2009 }
 0xbb7   : > { %3645 = vset.pattern.permute.xlu1 %v3824_v39  ;;  %2355 = vperm.xlu2 %3647, %v2249_v4   ;;  %v1940_v39 = vmul.f32 %v4096_v60, %v1934_v58 }
 0xbb8   : > { %2331 = vperm.xlu1 %3645, %v2249_v4  }
 0xbb9   : > { %v1942_v30 = vadd.f32 %v1940_v39, %v1930_v26  ;;  %v2024_v26 = vmul.f32 %v4130_v31, %v2018_v7 }
 0xbbb   : > { %v1954_v53 = vadd.f32 %v1952_v59, %v1942_v30 }
 0xbbc   : > { %v1926_v48 = vpop.permute.xlu1 %1925 }
 0xbbd   : > { %v1929_v37 = vmul.f32 %v4143_v50, %v1926_v48  ;;  %v1966_v52 = vadd.f32 %v1964_v12, %v1954_v53 }
 0xbbf   : > { %v1931_v63 = vadd.f32 %v1929_v37, %v1894_v15  ;;  %v1978_v58 = vadd.f32 %v1976_v57, %v1966_v52  ;;  %v2000_v15 = vmul.f32 %v4120_v21, %v1994_v29  ;;  %v2013_v37 = vmul.f32 %v4176_v32, %v2010_v23  ;;  %v2022_v16 = vpop.permute.xlu2 %2021 }
 0xbc1   : > { %v1943_v36 = vadd.f32 %v1941_v42, %v1931_v63  ;;  %v1990_v48 = vadd.f32 %v1988_v25, %v1978_v58  ;;  %v2025_v42 = vmul.f32 %v4180_v35, %v2022_v16 }
 0xbc3   : > { %v1955_v5 = vadd.f32 %v1953_v51, %v1943_v36  ;;  %v2002_v17 = vadd.f32 %v2000_v15, %v1990_v48  ;;  %v2233_v51 = vpop.f32.mrf.mxu1 }
 0xbc4   : > { %v2234_v59 = vadd.f32 %v2233_v51, %v4085_v55 }
 0xbc5   : > { %v1974_v47 = vpop.permute.xlu1 %1973  ;;  %v1967_v54 = vadd.f32 %v1965_v45, %v1955_v5  ;;  %v2014_v43 = vadd.f32 %v2012_v2, %v2002_v17 }
 0xbc6   : > { %v1977_v34 = vmul.f32 %v4163_v3, %v1974_v47 }
 0xbc7   : > { %v4660_v39 = vadd.f32 %v2024_v26, %v2014_v43 }
 0xbc8   : > { %v1979_v41 = vadd.f32 %v1977_v34, %v1967_v54 }
 0xbc9   : > { %v2028_v30 = vsel %vm689_vm3, %v4660_v39, -inf }
 0xbce   : > { %v1986_v4 = vpop.permute.xlu1 %1985 }
 0xbcf   : > { %v1989_v28 = vmul.f32 %v4167_v6, %v1986_v4 }
 0xbd1   : > { %v1991_v40 = vadd.f32 %v1989_v28, %v1979_v41 }
 0xbd3   : > { %v2003_v27 = vadd.f32 %v2001_v19, %v1991_v40 }
 0xbd5   : > { %v2015_v63 = vadd.f32 %v2013_v37, %v2003_v27 }
 0xbd7   : > { %v4658_v33 = vadd.f32 %v2025_v42, %v2015_v63  ;;  %v2235_v63 = vpop.f32.mrf.mxu1 }
 0xbd8   : > { %v2236_v42 = vadd.f32 %v2235_v63, %v4140_v49 }
 0xbd9   : > { %v2031_v36 = vsel %vm689_vm3, %v4658_v33, -inf }
 0xbda   : > { %v2268_v29 = vpop.permute.xlu2 %2267 }
 0xbdb   : > { %v2274_v53 = vmul.f32 %v4096_v60, %v2268_v29 }
 0xbe0   : > { %2032 = vmax.xlane.f32.xlu2 %v2031_v36 }
 0xbe2   : > { %2029 = vmax.xlane.f32.xlu1 %v2028_v30 }
 0xbe4   : > { %v2280_v38 = vpop.permute.xlu2 %2279 }
 0xbe5   : > { %v2286_v52 = vmul.f32 %v4099_v61, %v2280_v38 }
 0xbed   : > { %v2328_v5 = vpop.permute.xlu2 %2327 }
 0xbee   : > { %v2334_v25 = vmul.f32 %v4120_v21, %v2328_v5 }
 0xbf2   : > { %v2292_v47 = vpop.permute.xlu1 %2291 }
 0xbf3   : > { %v2255_v7 = vpop.permute.xlu0 %2254  ;;  %v2298_v34 = vmul.f32 %v4103_v0, %v2292_v47 }
 0xbf4   : > { %v2262_v12 = vmul.f32 %v4088_v56, %v2255_v7 }
 0xbf6   : > { %v2264_v45 = vadd.f32 %v2262_v12, %v2234_v59  ;;  %v2340_v28 = vpop.permute.xlu2 %2339 }
 0xbf7   : > { %v2346_v40 = vmul.f32 %v4125_v24, %v2340_v28 }
 0xbf8   : > { %v2276_v54 = vadd.f32 %v2274_v53, %v2264_v45 }
 0xbfa   : > { %v2288_v23 = vadd.f32 %v2286_v52, %v2276_v54 }
 0xbfb   : > { %v2304_v57 = vpop.permute.xlu1 %2303 }
 0xbfc   : > { %v2300_v1 = vadd.f32 %v2298_v34, %v2288_v23  ;;  %v2310_v4 = vmul.f32 %v4110_v13, %v2304_v57  ;;  %v2316_v58 = vpop.permute.xlu0 %2315 }
 0xbfd   : > { %v2322_v55 = vmul.f32 %v4116_v18, %v2316_v58 }
 0xbfe   : > { %v2312_v41 = vadd.f32 %v2310_v4, %v2300_v1 }
 0xbff   : > { %v2296_v43 = vpop.permute.xlu2 %2295 }
 0xc00   : > { %v2324_v19 = vadd.f32 %v2322_v55, %v2312_v41  ;;  %v2299_v59 = vmul.f32 %v4159_v44, %v2296_v43 }
 0xc02   : > { %v2336_v48 = vadd.f32 %v2334_v25, %v2324_v19 }
 0xc04   : > { %v2348_v27 = vadd.f32 %v2346_v40, %v2336_v48 }
 0xc05   : > { %v2352_v15 = vpop.permute.xlu1 %2351 }
 0xc06   : > { %v2358_v37 = vmul.f32 %v4130_v31, %v2352_v15  ;;  %v2284_v38 = vpop.permute.xlu0 %2283 }
 0xc07   : > { %v2287_v47 = vmul.f32 %v4156_v62, %v2284_v38 }
 0xc08   : > { %v2360_v16 = vadd.f32 %v2358_v37, %v2348_v27  ;;  %v2308_v5 = vpop.permute.xlu2 %2307 }
 0xc09   : > { %v2311_v45 = vmul.f32 %v4163_v3, %v2308_v5 }
 0xc0a   : > { %v2362_v17 = vsel %vm689_vm3, %v2360_v16, -inf }
 0xc0b   : > { %2363 = vmax.xlane.f32.xlu0 %v2362_v17 }
 0xc0f   : > { %v2260_v2 = vpop.permute.xlu1 %2259  ;;  %v2344_v54 = vpop.permute.xlu0 %2343 }
 0xc10   : > { %v2263_v26 = vmul.f32 %v4143_v50, %v2260_v2  ;;  %v2347_v4 = vmul.f32 %v4176_v32, %v2344_v54 }
 0xc11   : > { %v2356_v1 = vpop.permute.xlu2 %2355 }
 0xc12   : > { %v2265_v29 = vadd.f32 %v2263_v26, %v2236_v42  ;;  %v2359_v41 = vmul.f32 %v4180_v35, %v2356_v1 }
 0xc18   : > { %v2272_v36 = vpop.permute.xlu1 %2271 }
 0xc19   : > { %v2275_v30 = vmul.f32 %v4150_v46, %v2272_v36 }
 0xc1b   : > { %v2277_v51 = vadd.f32 %v2275_v30, %v2265_v29 }
 0xc1d   : > { %v2289_v7 = vadd.f32 %v2287_v47, %v2277_v51 }
 0xc1f   : > { %v2301_v53 = vadd.f32 %v2299_v59, %v2289_v7 }
 0xc21   : > { %v2320_v12 = vpop.permute.xlu1 %2319  ;;  %v2313_v52 = vadd.f32 %v2311_v45, %v2301_v53 }
 0xc22   : > { %v2323_v49 = vmul.f32 %v4167_v6, %v2320_v12 }
 0xc24   : > { %v2325_v23 = vadd.f32 %v2323_v49, %v2313_v52 }
 0xc2a   : > { %v2332_v34 = vpop.permute.xlu1 %2331 }
 0xc2b   : > { %v2335_v57 = vmul.f32 %v4172_v22, %v2332_v34 }
 0xc2d   : > { %v2337_v58 = vadd.f32 %v2335_v57, %v2325_v23 }
 0xc2f   : > { %v2349_v55 = vadd.f32 %v2347_v4, %v2337_v58 }
 0xc31   : > { %v2361_v28 = vadd.f32 %v2359_v41, %v2349_v55 }
 0xc33   : > { %v2365_v25 = vsel %vm689_vm3, %v2361_v28, -inf }
 0xc34   : > { %2366 = vmax.xlane.f32.xlu1 %v2365_v25 }
 0xc53   : > { %v2033_v19 = vpop.xlane.xlu2 %2032 }
 0xc54   : > { %v2035_v40 = vsub.f32 %v4658_v33, %v2033_v19 }
 0xc55   : > { %v2030_v48 = vpop.xlane.xlu1 %2029 }
 0xc56   : > { %v2038_v27 = vmul.f32 1.442695, %v2035_v40  ;;  %v2034_v15 = vsub.f32 %v4660_v39, %v2030_v48 }
 0xc58   : > { %3712 = vpow2.f32 %v2038_v27  ;;  %v2036_v37 = vmul.f32 1.442695, %v2034_v15 }
 0xc5a   : > { %3714 = vpow2.f32 %v2036_v37 }
 0xc5e   : > { %v4690_v17 = vpop.eup %3712 }
 0xc5f   : > { %v2043_v2 = vsel %vm689_vm3, %v4690_v17, 0.0 }
 0xc60   : > { %v3715_v63 = vpop.eup %3714  ;;  %2044 = vadd.xlane.f32.xlu0 %v2043_v2 }
 0xc61   : > { %v2040_v26 = vsel %vm689_vm3, %v3715_v63, 0.0 }
 0xc62   : > { %2041 = vadd.xlane.f32.xlu2 %v2040_v26 }
 0xc74   : > { %2519 = vrot.lane.b32.xlu0 %v4591_v11, %s5117_s27 }
 0xc7e   : > { %v2364_v33 = vpop.xlane.xlu0 %2363 }
 0xc7f   : > { %v2368_v42 = vsub.f32 %v2360_v16, %v2364_v33 }
 0xc81   : > { %v2370_v43 = vmul.f32 1.442695, %v2368_v42 }
 0xc83   : > { %3716 = vpow2.f32 %v2370_v43 }
 0xc89   : > { %v4697_v39 = vpop.eup %3716 }
 0xc8a   : > { %v2374_v36 = vsel %vm689_vm3, %v4697_v39, 0.0 }
 0xc8b   : > { %2375 = vadd.xlane.f32.xlu1 %v2374_v36 }
 0xca7   : > { %v2367_v29 = vpop.xlane.xlu1 %2366 }
 0xca8   : > { %v2369_v30 = vsub.f32 %v2361_v28, %v2367_v29 }
 0xcaa   : > { %v2372_v38 = vmul.f32 1.442695, %v2369_v30 }
 0xcac   : > { %3718 = vpow2.f32 %v2372_v38 }
 0xcb2   : > { %v4701_v51 = vpop.eup %3718 }
 0xcb3   : > { %v2377_v47 = vsel %vm689_vm3, %v4701_v51, 0.0 }
 0xcb4   : > { %2378 = vadd.xlane.f32.xlu2 %v2377_v47 }
 0xccc   : > { %2193 = vrot.lane.b32.xlu2 %v4591_v11, %s5111_s30 }
 0xcd3   : > { %v2045_v16 = vpop.xlane.xlu0 %2044 }
 0xcd4   : > { %3720 = vrcp.f32 %v2045_v16  ;;  %v2072_v25 = vand.u32 2147483648, %v2045_v16  ;;  %vm2066_vm9 = vweird.f32 %v2045_v16  ;;  %v2070_v19 = vand.u32 2147483647, %v2045_v16 }
 0xcd5   : > { %v2042_v7 = vpop.xlane.xlu2 %2041 }
 0xcd6   : > { %3722 = vrcp.f32 %v2042_v7  ;;  %v2057_v52 = vand.u32 2147483648, %v2042_v7  ;;  %v2055_v34 = vand.u32 2147483647, %v2042_v7  ;;  %vm2051_vm10 = vweird.f32 %v2042_v7 }
 0xcd7   : > { %v2073_v15 = vor.u32 1.1754944e-38, %v2072_v25 }
 0xcd8   : > { %v2058_v57 = vor.u32 1.1754944e-38, %v2057_v52  ;;  %vm2056_vm12 = vcmp.eq.f32.partialorder %v2055_v34, 8.507059e+37 }
 0xcda   : > { %v3721_v59 = vpop.eup %3720 }
 0xcdb   : > { %v2062_v5 = vmul.f32 %v3721_v59, %v2045_v16  ;;  %vm2067_vm8 = vweird.f32 %v3721_v59 }
 0xcdc   : > { %v3723_v12 = vpop.eup %3722 }
 0xcdd   : > { %v2047_v53 = vmul.f32 %v3723_v12, %v2042_v7  ;;  %v2063_v49 = vsub.f32 1.0, %v2062_v5  ;;  %vm2052_vm7 = vweird.f32 %v3723_v12 }
 0xcde   : > { %vm2053_vm11 = vmor %vm2051_vm10, %vm2052_vm7  ;;  %vm2071_vm10 = vcmp.eq.f32.partialorder %v2070_v19, 8.507059e+37 }
 0xcdf   : > { %v2048_v45 = vsub.f32 1.0, %v2047_v53  ;;  %v2064_v1 = vmul.f32 %v3721_v59, %v2063_v49  ;;  %vm2068_vm7 = vmor %vm2066_vm9, %vm2067_vm8 }
 0xce1   : > { %v2049_v54 = vmul.f32 %v3723_v12, %v2048_v45  ;;  %v2065_v41 = vadd.f32 %v3721_v59, %v2064_v1 }
 0xce3   : > { %v2050_v23 = vadd.f32 %v3723_v12, %v2049_v54  ;;  %v2069_v27 = vsel %vm2068_vm7, %v3721_v59, %v2065_v41 }
 0xce5   : > { %v2054_v11 = vsel %vm2053_vm11, %v3723_v12, %v2050_v23 }
 0xce6   : > { %v2059_v4 = vsel %vm2056_vm12, %v2058_v57, %v2054_v11 }
 0xce7   : > { %v4707_v58 = vmul.f32 %v3715_v63, %v2059_v4  ;;  %v2074_v63 = vsel %vm2071_vm10, %v2073_v15, %v2069_v27 }
 0xce8   : > { %v4722_v33 = vmul.f32 %v4690_v17, %v2074_v63 }
 0xce9   : > { %v2094_v55 = vmul.f32 %v4099_v61, %v4707_v58  ;;  %v2078_v28 = vmul.f32 %v4088_v56, %v4707_v58  ;;  %v2142_v37 = vmul.f32 %v4130_v31, %v4707_v58  ;;  %v2102_v2 = vmul.f32 %v4103_v0, %v4707_v58 }
 0xcea   : > { %v2086_v26 = vmul.f32 %v4096_v60, %v4707_v58  ;;  %v2079_v29 = vmul.f32 %v4143_v50, %v4722_v33  ;;  %v2110_v30 = vmul.f32 %v4110_v13, %v4707_v58  ;;  %v2134_v38 = vmul.f32 %v4125_v24, %v4707_v58 }
 0xceb   : > { %v2096_v40 = vsel %vm689_vm3, %v2094_v55, 0.0  ;;  %v2080_v48 = vsel %vm689_vm3, %v2078_v28, 0.0  ;;  %v2144_v42 = vsel %vm689_vm3, %v2142_v37, 0.0  ;;  %v2104_v43 = vsel %vm689_vm3, %v2102_v2, 0.0 }
 0xcec   : > { %2097 = vadd.xlane.f32.xlu1 %v2096_v40  ;;  %2081 = vadd.xlane.f32.xlu0 %v2080_v48  ;;  %v2088_v36 = vsel %vm689_vm3, %v2086_v26, 0.0  ;;  %v2083_v17 = vsel %vm689_vm3, %v2079_v29, 0.0  ;;  %v2112_v47 = vsel %vm689_vm3, %v2110_v30, 0.0  ;;  %v2136_v16 = vsel %vm689_vm3, %v2134_v38, 0.0 }
 0xced   : > { %v2103_v59 = vmul.f32 %v4159_v44, %v4722_v33  ;;  %v2118_v12 = vmul.f32 %v4116_v18, %v4707_v58  ;;  %v2095_v5 = vmul.f32 %v4156_v62, %v4722_v33  ;;  %v2111_v34 = vmul.f32 %v4163_v3, %v4722_v33 }
 0xcee   : > { %v2126_v23 = vmul.f32 %v4120_v21, %v4707_v58  ;;  %v2119_v41 = vmul.f32 %v4167_v6, %v4722_v33  ;;  %v2087_v55 = vmul.f32 %v4150_v46, %v4722_v33  ;;  %v2127_v37 = vmul.f32 %v4172_v22, %v4722_v33 }
 0xcef   : > { %v2107_v53 = vsel %vm689_vm3, %v2103_v59, 0.0  ;;  %v2120_v45 = vsel %vm689_vm3, %v2118_v12, 0.0  ;;  %v2099_v52 = vsel %vm689_vm3, %v2095_v5, 0.0  ;;  %v2115_v1 = vsel %vm689_vm3, %v2111_v34, 0.0  ;;  %v2520_v12 = vpop.permute.xlu0 %2519 }
 0xcf0   : > { %v2128_v11 = vsel %vm689_vm3, %v2126_v23, 0.0  ;;  %v2123_v40 = vsel %vm689_vm3, %v2119_v41, 0.0  ;;  %v2091_v48 = vsel %vm689_vm3, %v2087_v55, 0.0  ;;  %v2135_v2 = vmul.f32 %v4176_v32, %v4722_v33 }
 0xcf4   : > { %2145 = vadd.xlane.f32.xlu1 %v2144_v42  ;;  %2105 = vadd.xlane.f32.xlu0 %v2104_v43  ;;  %v2131_v42 = vsel %vm689_vm3, %v2127_v37, 0.0  ;;  %v2139_v43 = vsel %vm689_vm3, %v2135_v2, 0.0 }
 0xcf5   : > { %2089 = vadd.xlane.f32.xlu2 %v2088_v36  ;;  %v2143_v36 = vmul.f32 %v4180_v35, %v4722_v33 }
 0xcf7   : > { %v2147_v30 = vsel %vm689_vm3, %v2143_v36, 0.0 }
 0xcfc   : > { %2084 = vadd.xlane.f32.xlu1 %v2083_v17  ;;  %2113 = vadd.xlane.f32.xlu0 %v2112_v47 }
 0xcfd   : > { %2137 = vadd.xlane.f32.xlu2 %v2136_v16 }
 0xcfe   : > { %v2376_v7 = vpop.xlane.xlu1 %2375 }
 0xcff   : > { %3724 = vrcp.f32 %v2376_v7  ;;  %v2391_v25 = vand.u32 2147483648, %v2376_v7  ;;  %vm2385_vm12 = vweird.f32 %v2376_v7  ;;  %v2389_v19 = vand.u32 2147483647, %v2376_v7 }
 0xd01   : > { %v2392_v15 = vor.u32 1.1754944e-38, %v2391_v25  ;;  %vm2390_vm9 = vcmp.eq.f32.partialorder %v2389_v19, 8.507059e+37 }
 0xd04   : > { %2108 = vadd.xlane.f32.xlu1 %v2107_v53  ;;  %2121 = vadd.xlane.f32.xlu0 %v2120_v45  ;;  %v2166_v53 = vpack.c.bf16 %v4722_v33, %v4707_v58 }
 0xd05   : > { %v3725_v49 = vpop.eup %3724  ;;  %2100 = vadd.xlane.f32.xlu2 %v2099_v52 }
 0xd06   : > { %v2381_v54 = vmul.f32 %v3725_v49, %v2376_v7  ;;  %vm2386_vm11 = vweird.f32 %v3725_v49 }
 0xd07   : > { %vm2387_vm8 = vmor %vm2385_vm12, %vm2386_vm11 }
 0xd08   : > { %v2382_v57 = vsub.f32 1.0, %v2381_v54 }
 0xd0a   : > { %v2383_v4 = vmul.f32 %v3725_v49, %v2382_v57 }
 0xd0c   : > { %2116 = vadd.xlane.f32.xlu1 %v2115_v1  ;;  %2129 = vadd.xlane.f32.xlu0 %v2128_v11  ;;  %v2384_v28 = vadd.f32 %v3725_v49, %v2383_v4 }
 0xd0e   : > { %v2388_v27 = vsel %vm2387_vm8, %v3725_v49, %v2384_v28  ;;  %vm5118_vm8 = vcmask 72704  }
 0xd0f   : > { %v2393_v63 = vsel %vm2390_vm9, %v2392_v15, %v2388_v27 }
 0xd10   : > { %v4762_v26 = vmul.f32 %v4697_v39, %v2393_v63 }
 0xd12   : > { %v2412_v29 = vmul.f32 %v4088_v56, %v4762_v26  ;;  %v2420_v17 = vmul.f32 %v4096_v60, %v4762_v26  ;;  %v2428_v56 = vmul.f32 %v4099_v61, %v4762_v26  ;;  %v2436_v23 = vmul.f32 %v4103_v0, %v4762_v26 }
 0xd13   : > { %v2444_v55 = vmul.f32 %v4110_v13, %v4762_v26  ;;  %v2452_v13 = vmul.f32 %v4116_v18, %v4762_v26  ;;  %v2460_v27 = vmul.f32 %v4120_v21, %v4762_v26  ;;  %v2468_v18 = vmul.f32 %v4125_v24, %v4762_v26 }
 0xd14   : > { %2124 = vadd.xlane.f32.xlu1 %v2123_v40  ;;  %2092 = vadd.xlane.f32.xlu0 %v2091_v48  ;;  %v2414_v38 = vsel %vm689_vm3, %v2412_v29, 0.0  ;;  %v2422_v47 = vsel %vm689_vm3, %v2420_v17, 0.0  ;;  %v2430_v49 = vsel %vm689_vm3, %v2428_v56, 0.0  ;;  %v2438_v33 = vsel %vm689_vm3, %v2436_v23, 0.0 }
 0xd15   : > { %v2470_v37 = vsel %vm689_vm3, %v2468_v18, 0.0  ;;  %v2476_v63 = vmul.f32 %v4130_v31, %v4762_v26 }
 0xd1c   : > { %2132 = vadd.xlane.f32.xlu1 %v2131_v42  ;;  %2140 = vadd.xlane.f32.xlu0 %v2139_v43 }
 0xd24   : > { %2148 = vadd.xlane.f32.xlu0 %v2147_v30  ;;  %2415 = vadd.xlane.f32.xlu1 %v2414_v38 }
 0xd27   : > { %v2379_v39 = vpop.xlane.xlu2 %2378 }
 0xd28   : > { %3726 = vrcp.f32 %v2379_v39  ;;  %v2406_v45 = vand.u32 2147483648, %v2379_v39  ;;  %v2404_v60 = vand.u32 2147483647, %v2379_v39  ;;  %vm2400_vm10 = vweird.f32 %v2379_v39 }
 0xd2a   : > { %v2407_v61 = vor.u32 1.1754944e-38, %v2406_v45  ;;  %vm2405_vm12 = vcmp.eq.f32.partialorder %v2404_v60, 8.507059e+37 }
 0xd2c   : > { %2423 = vadd.xlane.f32.xlu1 %v2422_v47 }
 0xd2e   : > { %v3727_v16 = vpop.eup %3726 }
 0xd2f   : > { %v2396_v7 = vmul.f32 %v3727_v16, %v2379_v39  ;;  %v2194_v59 = vpop.permute.xlu2 %2193  ;;  %vm2401_vm7 = vweird.f32 %v3727_v16 }
 0xd30   : > { %2206 = vmatpush.bf16.msrb.mxu2 %v2194_v59  ;;  %vm2402_vm11 = vmor %vm2400_vm10, %vm2401_vm7  ;;  %vm5124_vm7 = vcmask 1045504  }
 0xd31   : > { %v2397_v5 = vsub.f32 1.0, %v2396_v7  ;;  %vm5125_vm10 = vmmov %vm5124_vm7 }
 0xd33   : > { %v2398_v52 = vmul.f32 %v3727_v16, %v2397_v5  ;;  %3294 = vmatmul.msk.bf16.vlgmr.msrb.gmra.mxu2 %vm689_vm3, %v2166_v53 }
 0xd34   : > { %2532 = vmatpush.bf16.msra.mxu2 %v2520_v12  ;;  %2431 = vadd.xlane.f32.xlu1 %v2430_v49 }
 0xd35   : > { %v2399_v54 = vadd.f32 %v3727_v16, %v2398_v52 }
 0xd37   : > { %v2403_v34 = vsel %vm2402_vm11, %v3727_v16, %v2399_v54  ;;  %vm5126_vm11 = vcmask 1046528  }
 0xd38   : > { %v2408_v57 = vsel %vm2405_vm12, %v2407_v61, %v2403_v34  ;;  %vm5127_vm12 = vmmov %vm5126_vm11 }
 0xd39   : > { %v2411_v58 = vmul.f32 %v4701_v51, %v2408_v57 }
 0xd3b   : > { %v2437_v1 = vmul.f32 %v4159_v44, %v2411_v58  ;;  %v2413_v11 = vmul.f32 %v4143_v50, %v2411_v58  ;;  %v2500_v0 = vpack.c.bf16 %v2411_v58, %v4762_v26  ;;  %v2445_v51 = vmul.f32 %v4163_v3, %v2411_v58 }
 0xd3c   : > { %2439 = vadd.xlane.f32.xlu1 %v2438_v33  ;;  %v2421_v28 = vmul.f32 %v4150_v46, %v2411_v58  ;;  %v2446_v50 = vsel %vm689_vm3, %v2444_v55, 0.0  ;;  %v2453_v19 = vmul.f32 %v4167_v6, %v2411_v58  ;;  %v2429_v3 = vmul.f32 %v4156_v62, %v2411_v58 }
 0xd3d   : > { %v2441_v4 = vsel %vm689_vm3, %v2437_v1, 0.0  ;;  %v2417_v41 = vsel %vm689_vm3, %v2413_v11, 0.0  ;;  %v2449_v44 = vsel %vm689_vm3, %v2445_v51, 0.0  ;;  %v2454_v46 = vsel %vm689_vm3, %v2452_v13, 0.0 }
 0xd3e   : > { %2442 = vadd.xlane.f32.xlu2 %v2441_v4  ;;  %2418 = vadd.xlane.f32.xlu0 %v2417_v41  ;;  %v2425_v25 = vsel %vm689_vm3, %v2421_v28, 0.0  ;;  %v2457_v40 = vsel %vm689_vm3, %v2453_v19, 0.0  ;;  %v2433_v48 = vsel %vm689_vm3, %v2429_v3, 0.0  ;;  %v2461_v15 = vmul.f32 %v4172_v22, %v2411_v58 }
 0xd3f   : > { %v2462_v6 = vsel %vm689_vm3, %v2460_v27, 0.0  ;;  %v2469_v2 = vmul.f32 %v4176_v32, %v2411_v58  ;;  %v2478_v22 = vsel %vm689_vm3, %v2476_v63, 0.0  ;;  %v2477_v43 = vmul.f32 %v4180_v35, %v2411_v58 }
 0xd40   : > { %v2465_v62 = vsel %vm689_vm3, %v2461_v15, 0.0 }
 0xd41   : > { %v2473_v21 = vsel %vm689_vm3, %v2469_v2, 0.0  ;;  %v2481_v36 = vsel %vm689_vm3, %v2477_v43, 0.0 }
 0xd43   : > { %3298 = vmatmul.msk.bf16.vlgmr.msra.gmra.mxu2 %vm689_vm3, %v2500_v0 }
 0xd44   : > { %2447 = vadd.xlane.f32.xlu1 %v2446_v50 }
 0xd46   : > { %2450 = vadd.xlane.f32.xlu2 %v2449_v44  ;;  %2426 = vadd.xlane.f32.xlu0 %v2425_v25 }
 0xd4c   : > { %2455 = vadd.xlane.f32.xlu1 %v2454_v46 }
 0xd4e   : > { %2458 = vadd.xlane.f32.xlu2 %v2457_v40  ;;  %2434 = vadd.xlane.f32.xlu0 %v2433_v48 }
 0xd54   : > { %2463 = vadd.xlane.f32.xlu1 %v2462_v6 }
 0xd56   : > { %2466 = vadd.xlane.f32.xlu0 %v2465_v62  ;;  %2471 = vadd.xlane.f32.xlu2 %v2470_v37 }
 0xd5c   : > { %2474 = vadd.xlane.f32.xlu1 %v2473_v21 }
 0xd5e   : > { %2479 = vadd.xlane.f32.xlu2 %v2478_v22 }
 0xd5f   : > { %v2082_v24 = vpop.xlane.xlu0 %2081  ;;  %v2098_v42 = vpop.xlane.xlu1 %2097 }
 0xd64   : > { %2482 = vadd.xlane.f32.xlu1 %v2481_v36 }
 0xd67   : > { %v2106_v29 = vpop.xlane.xlu0 %2105  ;;  %v2146_v30 = vpop.xlane.xlu1 %2145 }
 0xd68   : > { %v2090_v39 = vpop.xlane.xlu2 %2089 }
 0xd69   : > { %v2150_v12 = vsel %vm964_vm13, %v2082_v24, %v2090_v39 }
 0xd6a   : > { %v2152_v53 = vsel %vm967_vm14, %v2150_v12, %v2098_v42 }
 0xd6b   : > { %v2154_v52 = vsel %vm970_vm15, %v2152_v53, %v2106_v29 }
 0xd6f   : > { %v2114_v38 = vpop.xlane.xlu0 %2113  ;;  %v2085_v32 = vpop.xlane.xlu1 %2084 }
 0xd70   : > { %v2138_v26 = vpop.xlane.xlu2 %2137  ;;  %v2156_v54 = vsel %vm973_vm0, %v2154_v52, %v2114_v38 }
 0xd77   : > { %v2122_v17 = vpop.xlane.xlu0 %2121  ;;  %v2109_v31 = vpop.xlane.xlu1 %2108 }
 0xd78   : > { %v2101_v35 = vpop.xlane.xlu2 %2100  ;;  %v2158_v34 = vsel %vm976_vm1, %v2156_v54, %v2122_v17  ;;  %v3472_v54 = vld [vmem:[%s5109_s4 + $0x10] sm:$0xff] }
 0xd7f   : > { %v2130_v47 = vpop.xlane.xlu0 %2129  ;;  %v2117_v16 = vpop.xlane.xlu1 %2116 }
 0xd80   : > { %v2160_v23 = vsel %vm979_vm4, %v2158_v34, %v2130_v47 }
 0xd81   : > { %v2162_v33 = vsel %vm982_vm5, %v2160_v23, %v2138_v26 }
 0xd82   : > { %v2164_v41 = vsel %vm985_vm6, %v2162_v33, %v2146_v30 }
 0xd87   : > { %v2093_v7 = vpop.xlane.xlu0 %2092  ;;  %v2125_v59 = vpop.xlane.xlu1 %2124 }
 0xd88   : > { %v2151_v56 = vsel %vm964_vm13, %v2085_v32, %v2093_v7  ;;  %v3473_v7 = vld [vmem:[%s5109_s4 + $0x18] sm:$0xff] }
 0xd89   : > { %v2153_v5 = vsel %vm967_vm14, %v2151_v56, %v2101_v35  ;;  %2581 = vmatpush.bf16.msrb.mxu1 %v3473_v7 }
 0xd8a   : > { %v2155_v45 = vsel %vm970_vm15, %v2153_v5, %v2109_v31 }
 0xd8b   : > { %v2157_v61 = vsel %vm973_vm0, %v2155_v45, %v2117_v16 }
 0xd8c   : > { %v2159_v57 = vsel %vm976_vm1, %v2157_v61, %v2125_v59 }
 0xd8d   : > { %2582 = vmatpush.bf16.msrb.mxu1 %v3472_v54 }
 0xd8f   : > { %v2141_v60 = vpop.xlane.xlu0 %2140  ;;  %v2133_v49 = vpop.xlane.xlu1 %2132 }
 0xd90   : > { %v2161_v58 = vsel %vm979_vm4, %v2159_v57, %v2133_v49 }
 0xd91   : > { %v2163_v11 = vsel %vm982_vm5, %v2161_v58, %v2141_v60 }
 0xd97   : > { %v2149_v1 = vpop.xlane.xlu0 %2148  ;;  %v2416_v4 = vpop.xlane.xlu1 %2415 }
 0xd98   : > { %v2165_v55 = vsel %vm985_vm6, %v2163_v11, %v2149_v1 }
 0xd99   : > { %v2167_v0 = vpack.c.bf16 %v2165_v55, %v2164_v41 }
 0xd9b   : > { %3293 = vmatmul.msk.bf16.vlgmr.msra.gmra.mxu0 %vm5118_vm8, %v2167_v0 }
 0xd9f   : > { %v2424_v51 = vpop.xlane.xlu1 %2423 }
 0xda0   : > { %v2484_v62 = vsel %vm964_vm13, %v2416_v4, %v2424_v51  ;;  %v3678_v4 = vld [vmem:[%s5110_s5 + $0x1] ss:$0 sm:$0xff]  ;;  %s3061_s5 = scalar_lea.hbm %s5068_s18, %s3494_s22 }
 0xda1   : > { %s3064_s26 = sshll.u32 %s3061_s5, 4  ;;  %s3065_s26 = int_to_ptr.hbm [resolvable:$true] %s3064_s26 }
 0xda7   : > { %v2432_v28 = vpop.xlane.xlu1 %2431 }
 0xda8   : > { %v2486_v63 = vsel %vm967_vm14, %v2484_v62, %v2432_v28 }
 0xdaf   : > { %v2440_v50 = vpop.xlane.xlu1 %2439 }
 0xdb0   : > { %v2488_v21 = vsel %vm970_vm15, %v2486_v63, %v2440_v50 }
 0xdb1   : > { %v2443_v44 = vpop.xlane.xlu2 %2442  ;;  %v2419_v25 = vpop.xlane.xlu0 %2418 }
 0xdb6   : > { %v2208_v16 = vpop.f32.mrf.mxu2 }
 0xdb7   : > { %v2448_v13 = vpop.xlane.xlu1 %2447 }
 0xdb8   : > { %v2490_v22 = vsel %vm973_vm0, %v2488_v21, %v2448_v13 }
 0xdb9   : > { %v2451_v19 = vpop.xlane.xlu2 %2450  ;;  %v2427_v3 = vpop.xlane.xlu0 %2426 }
 0xdba   : > { %v2485_v15 = vsel %vm964_vm13, %v2419_v25, %v2427_v3  ;;  %vm5119_vm13 = vmmov %vm5118_vm8  ;;  %vm5129_vm8 = vcmask 523264  }
 0xdbe   : > { %v2210_v56 = vpop.f32.mrf.mxu2 }
 0xdbf   : > { %v2456_v46 = vpop.xlane.xlu1 %2455 }
 0xdc0   : > { %v2492_v42 = vsel %vm976_vm1, %v2490_v22, %v2456_v46 }
 0xdc1   : > { %v2459_v40 = vpop.xlane.xlu2 %2458  ;;  %v2435_v27 = vpop.xlane.xlu0 %2434 }
 0xdc2   : > { %v2487_v6 = vsel %vm967_vm14, %v2485_v15, %v2435_v27 }
 0xdc3   : > { %v2489_v37 = vsel %vm970_vm15, %v2487_v6, %v2443_v44 }
 0xdc4   : > { %v2491_v24 = vsel %vm973_vm0, %v2489_v37, %v2451_v19 }
 0xdc5   : > { %v2493_v29 = vsel %vm976_vm1, %v2491_v24, %v2459_v40 }
 0xdc6   : > { %v2534_v35 = vpop.f32.mrf.mxu2 }
 0xdc7   : > { %v2464_v48 = vpop.xlane.xlu1 %2463 }
 0xdc8   : > { %v2494_v36 = vsel %vm979_vm4, %v2492_v42, %v2464_v48 }
 0xdc9   : > { %v2472_v18 = vpop.xlane.xlu2 %2471  ;;  %v2467_v43 = vpop.xlane.xlu0 %2466 }
 0xdca   : > { %v2495_v38 = vsel %vm979_vm4, %v2493_v29, %v2467_v43  ;;  %v2496_v32 = vsel %vm982_vm5, %v2494_v36, %v2472_v18 }
 0xdce   : > { %v2536_v53 = vpop.f32.mrf.mxu2 }
 0xdcf   : > { %v2475_v2 = vpop.xlane.xlu1 %2474 }
 0xdd0   : > { %v2497_v39 = vsel %vm982_vm5, %v2495_v38, %v2475_v2  ;;  %v3679_v38 = vld [vmem:[%s5058_s8 + $0x1] ss:$0 sm:$0xff]  ;;  %vm5121_vm5 = vcmask 1040384  }
 0xdd1   : > { %v2480_v30 = vpop.xlane.xlu2 %2479  ;;  %vm5123_vm9 = vmmov %vm5121_vm5 }
 0xdd2   : > { %v2498_v31 = vsel %vm985_vm6, %v2496_v32, %v2480_v30 }
 0xdd7   : > { %v2483_v17 = vpop.xlane.xlu1 %2482 }
 0xdd8   : > { %v2499_v26 = vsel %vm985_vm6, %v2497_v39, %v2483_v17  ;;  %v3680_v17 = vld [vmem:[%s5059_s9 + $0x1] ss:$0 sm:$0xff]  ;;  %vm5122_vm6 = vmmov %vm5121_vm5 }
 0xdd9   : > { %v2501_v47 = vpack.c.bf16 %v2499_v26, %v2498_v31 }
 0xddb   : > { %3297 = vmatmul.msk.bf16.vlgmr.msrb.gmra.mxu0 %vm5119_vm13, %v2501_v47  ;;  %vm5130_vm13 = vmmov %vm5129_vm8 }
 0xe18   : > { %v2188_v59 = vpop.f32.mrf.mxu0 }
 0xe19   : > { %v2209_v34 = vadd.f32 %v2208_v16, %v2188_v59 }
 0xe20   : > { %v2190_v12 = vpop.f32.mrf.mxu0 }
 0xe21   : > { %v2211_v23 = vadd.f32 %v2210_v56, %v2190_v12 }
 0xe58   : > { %v2514_v5 = vpop.f32.mrf.mxu0 }
 0xe59   : > { %v2535_v52 = vadd.f32 %v2534_v35, %v2514_v5 }
 0xe60   : > { %v2516_v45 = vpop.f32.mrf.mxu0 }
 0xe61   : > { %v2537_v60 = vadd.f32 %v2536_v53, %v2516_v45 }
 0xe63   : > { %v3648_v49 = vpack.i.bf16 %v2537_v60, %v2535_v52 }
 0xe65   : > { %3649 = vrot.lane.b32.xlu2 %v3648_v49, %s5120_s23  ;;  %s550_s23 = scalar_lea.vmem [#allocation4], %s3131_s1  ;;  %s3050_s1 = scalar_lea.sflag [#allocation5], %s548_s28 }
 0xe66   : > { %s3062_s27 = sshll.u32 %s550_s23, 4  ;;  %s3063_s27 = int_to_ptr.vmem [resolvable:$true] %s3062_s27 }
 0xebf   : > { %v3650_v61 = vpop.permute.xlu2 %3649 }
 0xec0   : > { %v3652_v57 = vunpack.i.h.bf16 %v3650_v61  ;;  %v3651_v58 = vunpack.i.l.bf16 %v3650_v61 }
 0xec2   : > { %v2548_v33 = vsel %vm689_vm3, %v2211_v23, %v3652_v57  ;;  %v2547_v1 = vsel %vm689_vm3, %v2209_v34, %v3651_v58 }
 0xec3   : > { %v2549_v11 = vpack.c.bf16 %v2548_v33, %v2547_v1 }
 0xec5   : > { %3312 = vmatmul.msk.bf16.vlgmr.msrb.gmra.mxu1 %vm660_vm2, %v2549_v11 }
 0xf42   : > { %v2584_v41 = vpop.f32.mrf.mxu1 }
 0xf43   : > { %v2585_v55 = vadd.f32 %v3678_v4, %v2584_v41 }
 0xf45   : > { %v2589_v0 = vadd.f32 %v2585_v55, %v4574_v14 }
 0xf47   : > { %v2595_v51 = vsel %vm660_vm2, %v2589_v0, 0.0 }
 0xf48   : > { %2596 = vadd.xlane.f32.xlu1 %v2595_v51 }
 0xf4a   : > { %v2586_v28 = vpop.f32.mrf.mxu1 }
 0xf4b   : > { %v2587_v50 = vadd.f32 %v3678_v4, %v2586_v28  ;;  %v3479_v28 = vld [vmem:[%s5062_s12 + $0x58] sm:$0xff] }
 0xf4c   : > { %2749 = vmatpush.bf16.msra.mxu3 %v3479_v28 }
 0xf4d   : > { %v2590_v44 = vadd.f32 %v2587_v50, %v4576_v20  ;;  %v3478_v50 = vld [vmem:[%s5062_s12 + $0x50] sm:$0xff] }
 0xf4f   : > { %v2598_v25 = vsel %vm660_vm2, %v2590_v44, 0.0 }
 0xf50   : > { %2599 = vadd.xlane.f32.xlu1 %v2598_v25  ;;  %2750 = vmatpush.bf16.msra.mxu3 %v3478_v50  ;;  %v3476_v25 = vld [vmem:[%s5062_s12 + $0x40] sm:$0xff] }
 0xfbb   : > { %v2597_v13 = vpop.xlane.xlu1 %2596 }
 0xfbc   : > { %v2601_v19 = vmul.f32 %v2597_v13, %v4434_v8  ;;  %v3475_v13 = vld [vmem:[%s5062_s12 + $0x38] sm:$0xff] }
 0xfbe   : > { %v2603_v3 = vsub.f32 %v2589_v0, %v2601_v19  ;;  %v3474_v19 = vld [vmem:[%s5062_s12 + $0x30] sm:$0xff] }
 0xfc0   : > { %v2605_v46 = vmul.f32 %v2603_v3, %v2603_v3 }
 0xfc2   : > { %v2607_v40 = vsel %vm660_vm2, %v2605_v46, 0.0 }
 0xfc3   : > { %2608 = vadd.xlane.f32.xlu1 %v2607_v40  ;;  %v2600_v48 = vpop.xlane.xlu1 %2599 }
 0xfc4   : > { %v2602_v14 = vmul.f32 %v2600_v48, %v4434_v8 }
 0xfc6   : > { %v2604_v27 = vsub.f32 %v2590_v44, %v2602_v14  ;;  %v3477_v44 = vld [vmem:[%s5062_s12 + $0x48] sm:$0xff] }
 0xfc7   : > { %2751 = vmatpush.bf16.msra.mxu3 %v3477_v44  ;;  %v3682_v44 = vld [vmem:[%s5065_s15 + $0x1] ss:$0 sm:$0xff] }
 0xfc8   : > { %v2606_v15 = vmul.f32 %v2604_v27, %v2604_v27 }
 0xfca   : > { %v2610_v18 = vsel %vm660_vm2, %v2606_v15, 0.0 }
 0xfcb   : > { %2611 = vadd.xlane.f32.xlu0 %v2610_v18  ;;  %2752 = vmatpush.bf16.msra.mxu3 %v3476_v25 }
 0xfcf   : > { %2753 = vmatpush.bf16.msra.mxu3 %v3475_v13 }
 0xfd3   : > { %2754 = vmatpush.bf16.msra.mxu3 %v3474_v19 }
0x1036   : > { %v2609_v20 = vpop.xlane.xlu1 %2608 }
0x1037   : > { %v2613_v6 = vmul.f32 %v2609_v20, %v4434_v8 }
0x1039   : > { %v2615_v62 = vadd.f32 1e-05, %v2613_v6 }
0x103b   : > { %3728 = vrsqrt.f32 %v2615_v62  ;;  %vm2623_vm14 = vweird.f32 %v2615_v62 }
0x103e   : > { %v2612_v37 = vpop.xlane.xlu0 %2611 }
0x103f   : > { %v2614_v2 = vmul.f32 %v2612_v37, %v4434_v8  ;;  %v3491_v37 = vld [vmem:[%s5064_s14 + $0xb8] sm:$0xff] }
0x1040   : > { %2922 = vmatpush.bf16.msrb.mxu2 %v3491_v37 }
0x1041   : > { %v3729_v63 = vpop.eup %3728  ;;  %v2616_v21 = vadd.f32 1e-05, %v2614_v2  ;;  %v3490_v2 = vld [vmem:[%s5064_s14 + $0xb0] sm:$0xff] }
0x1042   : > { %v2618_v22 = vmul.f32 %v3729_v63, %v2615_v62  ;;  %vm2624_vm3 = vweird.f32 %v3729_v63 }
0x1043   : > { %3730 = vrsqrt.f32 %v2616_v21  ;;  %vm2625_vm15 = vmor %vm2623_vm14, %vm2624_vm3  ;;  %vm2633_vm1 = vweird.f32 %v2616_v21  ;;  %vm5131_vm3 = vcmask 785408  }
0x1044   : > { %v2619_v24 = vmul.f32 %v3729_v63, %v2618_v22  ;;  %2923 = vmatpush.bf16.msrb.mxu2 %v3490_v2  ;;  %v3487_v22 = vld [vmem:[%s5064_s14 + $0x98] sm:$0xff]  ;;  %vm5132_vm14 = vmmov %vm5121_vm5 }
0x1045   : > { %2904 = vmatpush.bf16.msra.mxu0 %v3487_v22 }
0x1046   : > { %v2620_v42 = vmul.f32 0.5, %v2619_v24  ;;  %v3486_v24 = vld [vmem:[%s5064_s14 + $0x90] sm:$0xff] }
0x1048   : > { %v2621_v43 = vsub.f32 1.5, %v2620_v42  ;;  %v3681_v42 = vld [vmem:[%s5063_s13 + $0x1] ss:$0 sm:$0xff] }
0x1049   : > { %v3731_v36 = vpop.eup %3730  ;;  %2905 = vmatpush.bf16.msra.mxu0 %v3486_v24 }
0x104a   : > { %v2622_v29 = vmul.f32 %v3729_v63, %v2621_v43  ;;  %v2628_v30 = vmul.f32 %v3731_v36, %v2616_v21  ;;  %vm2634_vm0 = vweird.f32 %v3731_v36  ;;  %v3488_v21 = vld [vmem:[%s5064_s14 + $0xa0] sm:$0xff]  ;;  %v3485_v43 = vld [vmem:[%s5064_s14 + $0x88] sm:$0xff] }
0x104b   : > { %vm2635_vm4 = vmor %vm2633_vm1, %vm2634_vm0 }
0x104c   : > { %v2626_v32 = vsel %vm2625_vm15, %v3729_v63, %v2622_v29  ;;  %v2629_v39 = vmul.f32 %v3731_v36, %v2628_v30  ;;  %v3489_v63 = vld [vmem:[%s5064_s14 + $0xa8] sm:$0xff]  ;;  %v3484_v30 = vld [vmem:[%s5064_s14 + $0x80] sm:$0xff]  ;;  %vm5133_vm15 = vmmov %vm5121_vm5 }
0x104d   : > { %v2637_v31 = vmul.f32 %v2626_v32, %v2603_v3  ;;  %2924 = vmatpush.bf16.msrb.mxu2 %v3489_v63  ;;  %2906 = vmatpush.bf16.msra.mxu0 %v3485_v43  ;;  %v3483_v32 = vld [vmem:[%s5064_s14 + $0x78] sm:$0xff]  ;;  %vm5134_vm0 = vmmov %vm5121_vm5 }
0x104e   : > { %v2630_v26 = vmul.f32 0.5, %v2629_v39  ;;  %vm5135_vm1 = vmmov %vm5124_vm7 }
0x104f   : > { %v2642_v47 = vmul.f32 %v3679_v38, %v2637_v31 }
0x1050   : > { %v2631_v16 = vsub.f32 1.5, %v2630_v26  ;;  %v3482_v26 = vld [vmem:[%s5064_s14 + $0x70] sm:$0xff] }
0x1051   : > { %v4883_v7 = vadd.f32 %v3680_v17, %v2642_v47  ;;  %2925 = vmatpush.bf16.msrb.mxu2 %v3488_v21  ;;  %2907 = vmatpush.bf16.msra.mxu0 %v3484_v30 }
0x1052   : > { %v2632_v59 = vmul.f32 %v3731_v36, %v2631_v16 }
0x1053   : > { %v2649_v56 = vmul.f32 %v4007_v9, %v4883_v7 }
0x1054   : > { %v2636_v12 = vsel %vm2635_vm4, %v3731_v36, %v2632_v59  ;;  %vm5136_vm4 = vmmov %vm5135_vm1 }
0x1055   : > { %v2638_v35 = vmul.f32 %v2636_v12, %v2604_v27  ;;  %v2653_v53 = vrot.slane %v2649_v56, 7  ;;  %2908 = vmatpush.bf16.msra.mxu0 %v3483_v32  ;;  %v3481_v56 = vld [vmem:[%s5064_s14 + $0x68] sm:$0xff]  ;;  %v3492_v32 = vld [vmem:[%s5066_s16] sm:$0xff] }
0x1057   : > { %v2643_v5 = vmul.f32 %v3679_v38, %v2638_v35  ;;  %v2659_v60 = vsel %vm5121_vm5, 0.0, %v2653_v53  ;;  %vm5137_vm5 = vmmov %vm5126_vm11 }
0x1058   : > { %v2674_v34 = vrot.slane %v2659_v60, 2  ;;  %v2663_v23 = vrot.slane %v2659_v60, 1 }
0x1059   : > { %v4887_v45 = vadd.f32 %v3680_v17, %v2643_v5  ;;  %2909 = vmatpush.bf16.msra.mxu0 %v3482_v26 }
0x105b   : > { %v2650_v52 = vmul.f32 %v4010_v10, %v4887_v45 }
0x105d   : > { %v2654_v49 = vrot.slane %v2650_v52, 7  ;;  %2910 = vmatpush.bf16.msra.mxu0 %v3481_v56 }
0x105f   : > { %v2655_v54 = vsel %vm5122_vm6, %v2653_v53, %v2654_v49  ;;  %v2660_v61 = vsel %vm5123_vm9, %v2654_v49, 0.0  ;;  %vm5138_vm6 = vmmov %vm5137_vm5 }
0x1060   : > { %v2675_v57 = vrot.slane %v2655_v54, 2  ;;  %v2677_v58 = vrot.slane %v2660_v61, 2  ;;  %v2664_v33 = vrot.slane %v2655_v54, 1  ;;  %v2666_v1 = vrot.slane %v2660_v61, 1  ;;  %vm5139_vm9 = vmmov %vm5129_vm8 }
0x1062   : > { %v2676_v11 = vsel %vm5124_vm7, %v2674_v34, %v2675_v57  ;;  %v2678_v4 = vsel %vm5125_vm10, %v2675_v57, %v2677_v58  ;;  %v2665_v41 = vsel %vm5126_vm11, %v2663_v23, %v2664_v33  ;;  %v2667_v55 = vsel %vm5127_vm12, %v2664_v33, %v2666_v1  ;;  %vm5140_vm7 = vmmov %vm5129_vm8 }
0x1063   : > { %v3658_v0 = vpack.i.bf16 %v2678_v4, %v2676_v11  ;;  %v3653_v51 = vpack.i.bf16 %v2667_v55, %v2665_v41  ;;  %v3480_v4 = vld [vmem:[%s5064_s14 + $0x60] sm:$0xff]  ;;  %vm5141_vm10 = vmmov %vm5140_vm7 }
0x1064   : > { %2911 = vmatpush.bf16.msra.mxu0 %v3480_v4 }
0x1065   : > { %3659 = vrot.lane.b32.xlu1 %v3658_v0, %s5111_s30  ;;  %3654 = vrot.lane.b32.xlu2 %v3653_v51, %s5128_s2 }
0x10bf   : > { %v3655_v3 = vpop.permute.xlu2 %3654 }
0x10c0   : > { %v3657_v46 = vunpack.i.h.bf16 %v3655_v3  ;;  %v3656_v40 = vunpack.i.l.bf16 %v3655_v3 }
0x10c2   : > { %v2686_v15 = vsel %vm660_vm2, %v2655_v54, %v3657_v46  ;;  %v2685_v18 = vsel %vm660_vm2, %v2659_v60, %v3656_v40 }
0x10d7   : > { %v3660_v48 = vpop.permute.xlu1 %3659 }
0x10d8   : > { %v3662_v14 = vunpack.i.h.bf16 %v3660_v48  ;;  %v3661_v27 = vunpack.i.l.bf16 %v3660_v48 }
0x10da   : > { %v2687_v20 = vsel %vm5129_vm8, %v2685_v18, %v3661_v27  ;;  %v2688_v6 = vsel %vm5130_vm13, %v2686_v15, %v3662_v14 }
0x10db   : > { %v2689_v62 = vpack.c.bf16 %v2688_v6, %v2687_v20 }
0x10dd   : > { %3352 = vmatmul.msk.bf16.vlgmr.msra.gmra.mxu3 %vm5131_vm3, %v2689_v62 }
0x1160   : > { %v2756_v36 = vpop.f32.mrf.mxu3 }
0x1161   : > { %v2757_v29 = vadd.f32 %v3681_v42, %v2756_v36 }
0x1163   : > { %v2761_v38 = vmax.f32 %v2757_v29, 0.0 }
0x1165   : > { %v2763_v39 = vmul.f32 %v4007_v9, %v2761_v38  ;;  %v3493_v38 = vld [vmem:[%s5066_s16 + $0x8] sm:$0xff] }
0x1166   : > { %3026 = vmatpush.bf16.msra.mxu1 %v3493_v38 }
0x1167   : > { %v2767_v47 = vrot.slane %v2763_v39, 7 }
0x1168   : > { %v2758_v17 = vpop.f32.mrf.mxu3 }
0x1169   : > { %v2759_v31 = vadd.f32 %v3681_v42, %v2758_v17  ;;  %v2773_v12 = vsel %vm5132_vm14, 0.0, %v2767_v47 }
0x116a   : > { %v2777_v5 = vrot.slane %v2773_v12, 1  ;;  %v2788_v53 = vrot.slane %v2773_v12, 2  ;;  %3027 = vmatpush.bf16.msra.mxu1 %v3492_v32 }
0x116b   : > { %v2762_v16 = vmax.f32 %v2759_v31, 0.0 }
0x116d   : > { %v2764_v59 = vmul.f32 %v4010_v10, %v2762_v16 }
0x116f   : > { %v2768_v35 = vrot.slane %v2764_v59, 7 }
0x1171   : > { %v2769_v52 = vsel %vm5133_vm15, %v2767_v47, %v2768_v35  ;;  %v2774_v60 = vsel %vm5134_vm0, %v2768_v35, 0.0  ;;  %vm3046_vm15 = vcmask 392448  }
0x1172   : > { %v2778_v49 = vrot.slane %v2769_v52, 1  ;;  %v2780_v54 = vrot.slane %v2774_v60, 1  ;;  %v2789_v61 = vrot.slane %v2769_v52, 2  ;;  %v2791_v34 = vrot.slane %v2774_v60, 2  ;;  %v3684_v60 = vld [vmem:[%s5112_s24 + $0x1] ss:$0 sm:$0xff] }
0x1174   : > { %v2792_v23 = vsel %vm5135_vm1, %v2789_v61, %v2791_v34  ;;  %v2790_v57 = vsel %vm5136_vm4, %v2788_v53, %v2789_v61  ;;  %v2779_v58 = vsel %vm5137_vm5, %v2777_v5, %v2778_v49  ;;  %v2781_v33 = vsel %vm5138_vm6, %v2778_v49, %v2780_v54  ;;  %v3683_v53 = vld [vmem:[%s5060_s10 + $0x1] ss:$0 sm:$0xff] }
0x1175   : > { %v2798_v1 = vpack.c.bf16 %v2792_v23, %v2790_v57  ;;  %v3663_v11 = vpack.i.bf16 %v2781_v33, %v2779_v58 }
0x1177   : > { %3426 = vmatmul.msk.bf16.vlgmr.msrb.gmra.mxu2 %vm5139_vm9, %v2798_v1  ;;  %3664 = vrot.lane.b32.xlu0 %v3663_v11, %s5111_s30  ;;  %s3762_s30 = sshra.s32 %s3065_s26, 4  ;;  %s3763_s30 = int_to_ptr.hbm [resolvable:$true] %s3762_s30 }
0x1178   : > { %p3769_p0 = scmp.lt.s32.totalorder %s3763_s30, %s5068_s18 }
0x11e9   : > { %v3665_v41 = vpop.permute.xlu0 %3664 }
0x11ea   : > { %v3667_v55 = vunpack.i.h.bf16 %v3665_v41  ;;  %v3666_v0 = vunpack.i.l.bf16 %v3665_v41 }
0x11ec   : > { %v2796_v51 = vsel %vm5140_vm7, %v2769_v52, %v3667_v55  ;;  %v2795_v28 = vsel %vm5141_vm10, %v2773_v12, %v3666_v0  ;;  %v3685_v0 = vld [vmem:[%s5067_s17] ss:$0 sm:$0xff] }
0x11ed   : > { %v2797_v50 = vpack.c.bf16 %v2796_v51, %v2795_v28 }
0x11ef   : > { %2912 = vmatmul.bf16.vlgmr.msra.gmra.mxu0 %v2797_v50 }
0x11fa   : > { %v2927_v25 = vpop.f32.mrf.mxu2 }
0x1202   : > { %v2929_v15 = vpop.f32.mrf.mxu2 }
0x126c   : > { %v2913_v13 = vpop.f32.mrf.mxu0 }
0x126d   : > { %v2914_v19 = vadd.f32 %v3682_v44, %v2913_v13 }
0x126f   : > { %v2928_v3 = vadd.f32 %v2927_v25, %v2914_v19 }
0x1271   : > { %v2932_v46 = vmul.f32 %v4007_v9, %v2928_v3 }
0x1273   : > { %v2934_v40 = vadd.f32 %v2932_v46, %v4883_v7 }
0x1274   : > { %v2915_v48 = vpop.f32.mrf.mxu0 }
0x1275   : > { %v2916_v14 = vadd.f32 %v3682_v44, %v2915_v48  ;;  %v2940_v27 = vsel %vm660_vm2, %v2934_v40, 0.0 }
0x1276   : > { %2941 = vadd.xlane.f32.xlu2 %v2940_v27 }
0x1277   : > { %v2930_v18 = vadd.f32 %v2929_v15, %v2916_v14 }
0x1279   : > { %v2933_v20 = vmul.f32 %v4010_v10, %v2930_v18 }
0x127b   : > { %v2935_v6 = vadd.f32 %v2933_v20, %v4887_v45 }
0x127d   : > { %v2943_v62 = vsel %vm660_vm2, %v2935_v6, 0.0 }
0x127e   : > { %2944 = vadd.xlane.f32.xlu0 %v2943_v62 }
0x12e9   : > { %v2942_v37 = vpop.xlane.xlu2 %2941 }
0x12ea   : > { %v2946_v2 = vmul.f32 %v2942_v37, %v4434_v8 }
0x12ec   : > { %v2948_v63 = vsub.f32 %v2934_v40, %v2946_v2 }
0x12ee   : > { %v2950_v21 = vmul.f32 %v2948_v63, %v2948_v63 }
0x12f0   : > { %v2952_v7 = vsel %vm660_vm2, %v2950_v21, 0.0 }
0x12f1   : > { %v2945_v22 = vpop.xlane.xlu0 %2944  ;;  %2953 = vadd.xlane.f32.xlu1 %v2952_v7 }
0x12f2   : > { %v2947_v24 = vmul.f32 %v2945_v22, %v4434_v8 }
0x12f4   : > { %v2949_v42 = vsub.f32 %v2935_v6, %v2947_v24 }
0x12f6   : > { %v2951_v43 = vmul.f32 %v2949_v42, %v2949_v42 }
0x12f8   : > { %v2955_v36 = vsel %vm660_vm2, %v2951_v43, 0.0 }
0x12f9   : > { %2956 = vadd.xlane.f32.xlu2 %v2955_v36 }
0x1364   : > { %v2954_v45 = vpop.xlane.xlu1 %2953 }
0x1365   : > { %v2958_v29 = vmul.f32 %v2954_v45, %v4434_v8 }
0x1367   : > { %v2960_v30 = vadd.f32 1e-05, %v2958_v29 }
0x1369   : > { %3732 = vrsqrt.f32 %v2960_v30  ;;  %vm2968_vm12 = vweird.f32 %v2960_v30 }
0x136c   : > { %v2957_v39 = vpop.xlane.xlu2 %2956 }
0x136d   : > { %v2959_v17 = vmul.f32 %v2957_v39, %v4434_v8 }
0x136f   : > { %v3733_v31 = vpop.eup %3732  ;;  %v2961_v26 = vadd.f32 1e-05, %v2959_v17 }
0x1370   : > { %v2963_v47 = vmul.f32 %v3733_v31, %v2960_v30  ;;  %vm2969_vm11 = vweird.f32 %v3733_v31 }
0x1371   : > { %3734 = vrsqrt.f32 %v2961_v26  ;;  %vm2970_vm8 = vmor %vm2968_vm12, %vm2969_vm11  ;;  %vm2978_vm3 = vweird.f32 %v2961_v26 }
0x1372   : > { %v2964_v16 = vmul.f32 %v3733_v31, %v2963_v47 }
0x1374   : > { %v2965_v59 = vmul.f32 0.5, %v2964_v16 }
0x1376   : > { %v2966_v56 = vsub.f32 1.5, %v2965_v59 }
0x1377   : > { %v3735_v12 = vpop.eup %3734 }
0x1378   : > { %v2967_v35 = vmul.f32 %v3733_v31, %v2966_v56  ;;  %v2973_v5 = vmul.f32 %v3735_v12, %v2961_v26  ;;  %vm2979_vm13 = vweird.f32 %v3735_v12 }
0x1379   : > { %vm2980_vm14 = vmor %vm2978_vm3, %vm2979_vm13 }
0x137a   : > { %v2971_v8 = vsel %vm2970_vm8, %v3733_v31, %v2967_v35  ;;  %v2974_v52 = vmul.f32 %v3735_v12, %v2973_v5 }
0x137b   : > { %v2982_v49 = vmul.f32 %v2971_v8, %v2948_v63 }
0x137c   : > { %v2975_v54 = vmul.f32 0.5, %v2974_v52 }
0x137d   : > { %v2987_v61 = vmul.f32 %v3683_v53, %v2982_v49 }
0x137e   : > { %v2976_v34 = vsub.f32 1.5, %v2975_v54 }
0x137f   : > { %v2992_v23 = vadd.f32 %v3684_v60, %v2987_v61 }
0x1380   : > { %v2977_v57 = vmul.f32 %v3735_v12, %v2976_v34 }
0x1381   : > { %v2994_v58 = vmul.f32 %v4007_v9, %v2992_v23 }
0x1382   : > { %v2981_v33 = vsel %vm2980_vm14, %v3735_v12, %v2977_v57 }
0x1383   : > { %v2983_v1 = vmul.f32 %v2981_v33, %v2949_v42  ;;  %3036 = vst.msk [vmem:[%s550_s23] sm:$0xff] %vm660_vm2, %v2994_v58 }
0x1385   : > { %v2988_v11 = vmul.f32 %v3683_v53, %v2983_v1 }
0x1387   : > { %v2993_v4 = vadd.f32 %v3684_v60, %v2988_v11 }
0x1389   : > { %v2995_v41 = vmul.f32 %v4010_v10, %v2993_v4 }
0x138b   : > { %v2996_v55 = vpack.c.bf16 %v2995_v41, %v2994_v58  ;;  %3037 = vst.msk [vmem:[%s550_s23 + $0x8] sm:$0xff] %vm660_vm2, %v2995_v41 }
0x138d   : > { %3437 = vmatmul.msk.bf16.vlgmr.msra.gmra.mxu1 %vm660_vm2, %v2996_v55 }
0x140a   : > { %v3029_v51 = vpop.f32.mrf.mxu1 }
0x140b   : > { %v3030_v28 = vadd.f32 %v3685_v0, %v3029_v51 }
0x140d   : > { %v3034_v50 = vmul.f32 %v4007_v9, %v3030_v28 }
0x140f   : > { %3040 = vrot.lane.b32.xlu2 %v3034_v50, %s5128_s2 }
0x1412   : > { %v3031_v44 = vpop.f32.mrf.mxu1 }
0x1413   : > { %v3032_v25 = vadd.f32 %v3685_v0, %v3031_v44 }
0x1415   : > { %v3035_v13 = vmul.f32 %v4010_v10, %v3032_v25 }
0x1417   : > { %3042 = vrot.lane.b32.xlu0 %v3035_v13, %s5128_s2  ;;  %s3764_s2 = scalar_lea.hbm %s3763_s30, 16 }
0x1418   : > { %p3765_p11 = scmp.ne.s32.totalorder %s3763_s30, %s3764_s2  ;;  %p3770_p1 = scmp.lt.s32.totalorder %s3768_s3, %s3764_s2 }
0x141a   : > { %p3766_p12 = pnand %p3765_p11, %p3972_p5  ;;  %p3771_p2 = por %p3770_p1, %p3769_p0 }
0x141c   : > { %p3767_p13 = pneg %p3766_p12 }
0x141e   : > { %p3772_p3 = pnand %p3771_p2, %p3767_p13 }
0x1469   : > { %v3041_v19 = vpop.permute.xlu2 %3040 }
0x146a   : > { %3047 = vst.msk [vmem:[%s550_s23] sm:$0xff] %vm3046_vm15, %v3041_v19 }
0x1489   : > { %v3043_v9 = vpop.permute.xlu0 %3042 }
0x148a   : > { %3048 = vst.msk [vmem:[%s550_s23 + $0x8] sm:$0xff] %vm3046_vm15, %v3043_v9 }
0x148b   : > { %3775 = shalt.err (!%p3772_p3)
}
0x148c   : > { %s3834_s28 = smov 128   ;;  %s3835_s23 = smov 8  }
0x148d   : > { %3495 = dma.vmem_to_hbm [thread:$0]  (%p3972_p5), %s3063_s27, 256, %s3065_s26, %s3050_s1, %s3834_s28, %s3834_s28, %s3835_s23  }
0x148e PF: > { %p3501_p4 = scmp.ge.s32.totalorder %s3812_s20, 2  ;;  %s3079_s11 = sand.u32 1, %s3800_s0  }
0x148f   : > { %s3080_s21 = scalar_lea.sflag [#allocation5], %s3079_s11 }
0x1490   : > { %p3498_p7 = pnand %p3501_p4, %p3976_p6 }
0x1492   : > { %p3499_p8 = pneg %p3498_p7 }
0x1494   : > { %3795 = dma.done.wait (%p3499_p8), %s3080_s21, 256  }
0x1495   : > { %3797 = vsyncadd (%p3499_p8), %s3080_s21, 4294967040  ;;  %s5143_s20 = sld [smem:[#allocation9_spill]]  ;;  %s5146_s0 = smov %s3804_s19 }
0x1496   : > { %s5144_s30 = sld [smem:[#allocation8_spill]] }
0x1497   : > { %s5145_s1 = sld [smem:[#allocation10_spill]] }
0x149b   : > { %p36_p9 = scmp.ge.s32.totalorder %s5143_s20, 4  }
0x149c   : > { %s5147_s19 = smov %s5144_s30 }
0x149d   :  { %38 = sbr.rel (!%p36_p9) target bundleno = 22 (0x16), region = 137 }
0x14a2   :  { %3086 = vsyncpa [#allocation5], 1 }
0x14a3   :  { %3088 = vsyncpa [#allocation5 + $0x1], 1 }

// kernel: tpu_custom_call.1
= control target key start
LH: loop header
LB: loop body
LE: loop exit
PB: predicated region body
PF: predicated region fallthrough
CT: control target
= control target key end

     0   :  { %s3814_s30 = smov [#allocation3]   ;;  %s5050_s0 = inlined_call_operand.vmem [shape: s32[2], index: 0, kind: input, shape index: {}]   ;;  %s5051_s1 = inlined_call_operand.vmem [shape: f32[2,16,32], index: 1, kind: input, shape index: {}]   ;;  %s5052_s2 = inlined_call_operand.vmem [shape: bf16[2,32,96], index: 2, kind: input, shape index: {}]   ;;  %s5053_s3 = inlined_call_operand.vmem [shape: f32[2,1,96], index: 3, kind: input, shape index: {}]   ;;  %s5054_s4 = inlined_call_operand.vmem [shape: bf16[2,32,32], index: 4, kind: input, shape index: {}]   ;;  %s5055_s5 = inlined_call_operand.vmem [shape: f32[2,1,32], index: 5, kind: input, shape index: {}]   ;;  %s5056_s6 = inlined_call_operand.vmem [shape: bf16[2,9,16], index: 6, kind: input, shape index: {}]   ;;  %s5057_s7 = inlined_call_operand.vmem [shape: bf16[2,9,16], index: 7, kind: input, shape index: {}]   ;;  %s5058_s8 = inlined_call_operand.vmem [shape: f32[2,1,32], index: 8, kind: input, shape index: {}]   ;;  %s5059_s9 = inlined_call_operand.vmem [shape: f32[2,1,32], index: 9, kind: input, shape index: {}]   ;;  %s5060_s10 = inlined_call_operand.vmem [shape: f32[2,1,32], index: 10, kind: input, shape index: {}]   ;;  %s5061_s11 = inlined_call_operand.vmem [shape: f32[2,1,32], index: 11, kind: input, shape index: {}]   ;;  %s5062_s12 = inlined_call_operand.vmem [shape: bf16[2,96,64], index: 12, kind: input, shape index: {}]   ;;  %s5063_s13 = inlined_call_operand.vmem [shape: f32[2,1,64], index: 13, kind: input, shape index: {}]   ;;  %s5064_s14 = inlined_call_operand.vmem [shape: bf16[2,192,32], index: 14, kind: input, shape index: {}]   ;;  %s5065_s15 = inlined_call_operand.vmem [shape: f32[2,1,32], index: 15, kind: input, shape index: {}]   ;;  %s5066_s16 = inlined_call_operand.vmem [shape: bf16[32,16], index: 16, kind: input, shape index: {}]   ;;  %s5067_s17 = inlined_call_operand.vmem [shape: f32[1,16], index: 17, kind: input, shape index: {}]   ;;  %s5068_s18 = inlined_call_operand.hbm [shape: f32[2,16,48], index: 18, kind: output, shape index: {}]  }
   0x1   :  { %5092 = sst [smem:[#allocation12_spill]] %s5050_s0 }
   0x2   :  { %5093 = sst [smem:[#allocation13_spill]] %s5051_s1 }
   0x3   :  { %5094 = sst [smem:[#allocation14_spill]] %s5052_s2 }
   0x4   :  { %5095 = sst [smem:[#allocation15_spill]] %s5053_s3 }
   0x5   :  { %5096 = sst [smem:[#allocation16_spill]] %s5054_s4 }
   0x6   :  { %5097 = sst [smem:[#allocation17_spill]] %s5055_s5 }
   0x7   :  { %5098 = sst [smem:[#allocation18_spill]] %s5061_s11 }
   0x8   :  { %s5099_s29 = sld [smem:[#allocation12_spill]] }
   0xe   :  { %s24_s11 = sshll.u32 %s5099_s29, 4  ;;  %s25_s11 = int_to_ptr.vmem [resolvable:$true] %s24_s11 }
   0xf   :  { %27 = dma.vmem_to_smem %s25_s11, 16, %s3814_s30, [#allocation2] }
  0x10   :  { %3792 = dma.done.wait [#allocation2], 16 }
  0x11   :  { %3793 = vsyncadd [#allocation2], 4294967280 }
  0x12   :  { %30 = sfence }
  0x13   :  { %31 = vsyncpa [#allocation5], 0 }
  0x14   :  { %33 = vsyncpa [#allocation5 + $0x1], 0  ;;  %s3934_s0 = smov 0   ;;  %s3936_s19 = smov 0  }
  0x15   :  { %s3938_s1 = smov 0   ;;  %s3940_s20 = smov 0  }
  0x16 LB: > { %5100 = sst [smem:[#allocation8_spill]] %s3808_s1  ;;  %s3955_s11 = sadd.s32 4294967295, %s3812_s20   ;;  %s3812_s20 = sphi %s3940_s20, %s5143_s20   ;;  %s3808_s1 = sphi %s3938_s1, %s5145_s1   ;;  %s3804_s19 = sphi %s3936_s19, %s5147_s19   ;;  %s3800_s0 = sphi %s3934_s0, %s5146_s0  }
  0x17   : > { %s3127_s21 = sadd.s32 4294967294, %s3812_s20   ;;  %s3959_s22 = sadd.s32 1, %s3812_s20  }
  0x18   : > { %5101 = sst [smem:[#allocation9_spill]] %s3959_s22  ;;  %s408_s2 = sadd.s32 1, %s3808_s1 }
  0x19   : > { %s405_s23 = ssub.s32 %s3812_s20, %s3959_s22  ;;  %p418_p0 = scmp.ne.s32.totalorder %s3808_s1, %s3804_s19 }
  0x1a   : > { %p406_p1 = scmp.eq.s32.totalorder %s405_s23, 0  ;;  %p419_p2 = scmp.eq.s32.totalorder %s3955_s11, 1 }
  0x1b   : > { %p424_p3 = scmp.ne.s32.totalorder %s3804_s19, %s3800_s0  ;;  %p425_p4 = scmp.eq.s32.totalorder %s3127_s21, 1 }
  0x1c   : > { %s3970_s24 = scalar_select %p406_p1, %s3808_s1, %s408_s2  }
  0x1d   : > { %p3972_p5 = por %p419_p2, %p418_p0  ;;  %p3976_p6 = por %p425_p4, %p424_p3 }
  0x1e   : > { %5102 = sst [smem:[#allocation10_spill]] %s3970_s24  ;;  %p3130_p7 = scmp.ge.s32.totalorder %s3812_s20, 1 }
  0x1f   : > { %s5104_s26 = scalar_select %p3976_p6, 1, 0 }
  0x20   : > { %p499_p8 = scmp.lt.s32.totalorder %s3812_s20, 3 }
  0x21   : > { %5105 = sst [smem:[#allocation11_spill]] %s5104_s26 }
  0x22   : > { %p500_p9 = pnand %p3130_p7, %p499_p8 }
  0x23   : > { %s5106_s29 = sld [smem:[#allocation14_spill]] (!%p500_p9)  ;;  %p551_p10 = scmp.lt.s32.totalorder (!%p500_p9), %s3955_s11, 1 }
  0x24   : > { %503 = sbr.rel (%p500_p9) target bundleno = 5262 (0x148e), region = 88  ;;  %s557_s30 = sld [smem:[#allocation3 + %s3955_s11]] (!%p500_p9) }
  0x25   : > { %s5107_s1 = sld [smem:[#allocation13_spill]] (!%p500_p9)  ;;  %s5079_s27 = smov (!%p500_p9), 96  }
  0x26   : > { %s5108_s3 = sld [smem:[#allocation15_spill]] (!%p500_p9)  ;;  %s5078_s28 = smov (!%p500_p9), 112  }
  0x27   : > { %s5076_s2 = smov (!%p500_p9), 48   ;;  %s5109_s4 = sld [smem:[#allocation16_spill]] (!%p500_p9) }
  0x28   : > { %s5110_s5 = sld [smem:[#allocation17_spill]] (!%p500_p9)  ;;  %s5113_s21 = smov (!%p500_p9), 80  }
  0x29   : > { %v3445_v0 = vld [vmem:[%s5106_s29 + $0x8] sm:$0xff]  ;;  %v558_v1 = vlaneseq  ;;  %v3444_v2 = vld [vmem:[%s5106_s29] sm:$0xff]  ;;  %s552_s23 = scalar_select %p551_p10, %s3955_s11, 1  ;;  %v3815_v8 = vmov 0.0   ;;  %vm660_vm2 = vcmask 261120   ;;  %vm689_vm3 = vcmask 130048  }
  0x2a   : > { %670 = vmatpush.bf16.msra.mxu0 %v3445_v0  ;;  %v4000_v5 = vstv %s557_s30  ;;  %v3169_v14 = vld [vmem:[%s5056_s6] sm:$0xf]  ;;  %v3446_v15 = vld [vmem:[%s5056_s6] sm:$0x10]  ;;  %v5074_v27 = vmov 4   ;;  %v3820_v28 = vmov 1  }
  0x2b   : > { %v3992_v3 = vshrl.u32 %v558_v1, 7  ;;  %s3443_s24 = sshll.u32 %s552_s23, 4  ;;  %v3170_v16 = vor.u32 %v3446_v15, %v3169_v14  ;;  %s5080_s23 = smov 80   ;;  %3560 = vset.pattern.permute.xlu0 %v5074_v27  ;;  %3557 = vset.pattern.permute.xlu2 %v3820_v28  ;;  %v3821_v29 = vmov 0   ;;  %v3822_v37 = vmov 5  }
  0x2c   : > { %s555_s22 = scalar_lea.vmem %s5107_s1, %s3443_s24  ;;  %v3669_v19 = vld [vmem:[%s5108_s3] ss:$0 sm:$0xff]  ;;  %3556 = vset.pattern.permute.xlu1 %v3821_v29  ;;  %v3823_v38 = vmov 2   ;;  %v3824_v39 = vmov 6   ;;  %v3825_v40 = vmov 3   ;;  %v3826_v41 = vmov 7  }
  0x2d   : > { %v3995_v4 = vadd.s32 8, %v3992_v3  ;;  %v635_v6 = vld [vmem:[%s555_s22] sm:$0xff]  ;;  %v636_v7 = vld [vmem:[%s555_s22 + $0x8] sm:$0xff]  ;;  %vm564_vm0 = vcmp.lt.s32.totalorder %v3992_v3, %v4000_v5  ;;  %v716_v17 = vsel %vm689_vm3, %v3170_v16, 0  ;;  %v3827_v42 = vmov 8   ;;  %s5083_s1 = smov 64  }
  0x2e   : > { %671 = vmatpush.bf16.msra.mxu0 %v3444_v2  ;;  %v4007_v9 = vsel %vm564_vm0, 1.0, %v3815_v8  ;;  %725 = vmatpush.bf16.xpose.msra.mxu2 %v716_v17  ;;  %v4068_v46 = vand.u32 127, %v558_v1  ;;  %s5077_s30 = smov 16   ;;  %s5112_s24 = sld [smem:[#allocation18_spill]] }
  0x2f   : > { %vm565_vm1 = vcmp.lt.s32.totalorder %v3995_v4, %v4000_v5  ;;  %v4013_v11 = vmul.f32 %v4007_v9, %v635_v6  ;;  %s5114_s22 = smov 96  }
  0x30   : > { %v4010_v10 = vsel %vm565_vm1, 1.0, %v3815_v8  ;;  %vm570_vm4 = vcmp.lt.s32.totalorder %v4068_v46, %v4000_v5  ;;  %v579_v51 = vsub.s32 %v4068_v46, %v3992_v3 }
  0x31   : > { %v4016_v12 = vmul.f32 %v4010_v10, %v636_v7  ;;  %v3136_v48 = vsel %vm570_vm4, 1.0, %v3815_v8 }
  0x32   : > { %v573_v49 = vmul.f32 %v3136_v48, %v4007_v9  ;;  %vm581_vm5 = vcmp.eq.s32.totalorder %v579_v51, 4294967292  ;;  %vm587_vm6 = vcmp.eq.s32.totalorder %v579_v51, 4294967293  ;;  %vm593_vm7 = vcmp.eq.s32.totalorder %v579_v51, 4294967294 }
  0x33   : > { %v639_v13 = vpack.c.bf16 %v4016_v12, %v4013_v11  ;;  %v4088_v56 = vsel %vm581_vm5, 1.0, %v3815_v8  ;;  %vm599_vm8 = vcmp.eq.s32.totalorder %v579_v51, 4294967295  ;;  %v4096_v60 = vsel %vm587_vm6, 1.0, %v3815_v8 }
  0x34   : > { %v3137_v52 = vadd.f32 -1.0, %v573_v49  ;;  %v4099_v61 = vsel %vm593_vm7, 1.0, %v3815_v8  ;;  %v4103_v0 = vsel %vm599_vm8, 1.0, %v3815_v8  ;;  %vm605_vm9 = vcmp.eq.s32.totalorder %v579_v51, 0 }
  0x35   : > { %3165 = vmatmul.msk.bf16.vlgmr.msra.gmra.mxu0 %vm660_vm2, %v639_v13  ;;  %v4110_v13 = vsel %vm605_vm9, 1.0, %v3815_v8  ;;  %vm611_vm10 = vcmp.eq.s32.totalorder %v579_v51, 1  ;;  %vm617_vm11 = vcmp.eq.s32.totalorder %v579_v51, 2  ;;  %vm623_vm12 = vcmp.eq.s32.totalorder %v579_v51, 3 }
  0x36   : > { %v4085_v55 = vmul.f32 10000.0, %v3137_v52  ;;  %vm629_vm13 = vcmp.eq.s32.totalorder %v579_v51, 4 }
  0xb2   : > { %v673_v18 = vpop.f32.mrf.mxu0 }
  0xb3   : > { %v674_v20 = vadd.f32 %v3669_v19, %v673_v18  ;;  %v4116_v18 = vsel %vm611_vm10, 1.0, %v3815_v8 }
  0xb5   : > { %v682_v23 = vmul.f32 0.25, %v674_v20 }
  0xba   : > { %v675_v21 = vpop.f32.mrf.mxu0 }
  0xbb   : > { %v676_v22 = vadd.f32 %v3669_v19, %v675_v21  ;;  %v4120_v21 = vsel %vm617_vm11, 1.0, %v3815_v8 }
  0xbd   : > { %v683_v24 = vmul.f32 0.25, %v676_v22  ;;  %v4031_v25 = vpack.c.bf16 %v676_v22, %v674_v20 }
  0xbf   : > { %1043 = vrot.lane.b32.xlu1 %v4031_v25, %s5080_s23  ;;  %687 = vrot.lane.b32.xlu0 %v4031_v25, %s5079_s27  ;;  %v684_v26 = vpack.c.bf16 %v683_v24, %v682_v23  ;;  %v4125_v24 = vsel %vm623_vm12, 1.0, %v3815_v8  ;;  %s5081_s23 = smov 32   ;;  %s5117_s27 = smov 48  }
  0xc1   : > { %3171 = vmatmul.msk.bf16.vlgmr.msra.gmra.mxu2 %vm689_vm3, %v684_v26 }
  0xc7   : > { %1041 = vrot.lane.b32.xlu0 %v684_v26, %s5078_s28  ;;  %s5115_s28 = smov 112  }
 0x131   : > { %v1044_v30 = vpop.permute.xlu1 %1043  ;;  %v688_v31 = vpop.permute.xlu0 %687 }
 0x132   : > { %v694_v32 = vsel %vm689_vm3, %v688_v31, 0  ;;  %v1049_v33 = vsel %vm689_vm3, %v1044_v30, 0  ;;  %v574_v30 = vmul.f32 %v3136_v48, %v4010_v10  ;;  %v4130_v31 = vsel %vm629_vm13, 1.0, %v3815_v8 }
 0x133   : > { %703 = vmatpush.bf16.xpose.msra.mxu1 %v694_v32  ;;  %1058 = vmatpush.bf16.xpose.msrb.mxu0 %v1049_v33 }
 0x139   : > { %v1042_v34 = vpop.permute.xlu0 %1041 }
 0x13a   : > { %3166 = vmatmul.msk.bf16.vlgmr.msra.gmra.mxu1 %vm689_vm3, %v684_v26  ;;  %3178 = vmatmul.msk.bf16.vlgmr.msrb.gmra.mxu0 %vm689_vm3, %v1042_v34 }
 0x13b   : > { %1072 = vmatpush.bf16.xpose.msrb.mxu1 %v716_v17 }
 0x144   : > { %v727_v35 = vpop.f32.mrf.mxu2 }
 0x145   : > { %783 = vperm.xlu0 %3560, %v727_v35   ;;  %747 = vperm.xlu2 %3557, %v727_v35  }
 0x146   : > { %734 = vperm.xlu1 %3556, %v727_v35  }
 0x14a   : > { %3179 = vmatmul.msk.bf16.vlgmr.msrb.gmra.mxu1 %vm689_vm3, %v1042_v34 }
 0x14c   : > { %v729_v36 = vpop.f32.mrf.mxu2 }
 0x14d   : > { %3566 = vset.pattern.permute.xlu0 %v3820_v28  ;;  %3561 = vset.pattern.permute.xlu2 %v3822_v37 }
 0x14e   : > { %3558 = vset.pattern.permute.xlu1 %v3823_v38  ;;  %795 = vperm.xlu2 %3561, %v727_v35  }
 0x14f   : > { %759 = vperm.xlu1 %3558, %v727_v35   ;;  %751 = vperm.xlu0 %3566, %v729_v36  }
 0x156   : > { %3562 = vset.pattern.permute.xlu2 %v3824_v39 }
 0x157   : > { %3559 = vset.pattern.permute.xlu1 %v3825_v40  ;;  %3571 = vset.pattern.permute.xlu0 %v3824_v39 }
 0x158   : > { %807 = vperm.xlu2 %3562, %v727_v35   ;;  %771 = vperm.xlu1 %3559, %v727_v35  }
 0x159   : > { %811 = vperm.xlu0 %3571, %v729_v36  }
 0x160   : > { %3565 = vset.pattern.permute.xlu2 %v3821_v29  ;;  %3563 = vset.pattern.permute.xlu1 %v3826_v41 }
 0x161   : > { %819 = vperm.xlu1 %3563, %v727_v35   ;;  %739 = vperm.xlu2 %3565, %v729_v36  }
 0x162   : > { %3574 = vset.pattern.permute.xlu0 %v3821_v29 }
 0x169   : > { %3564 = vset.pattern.permute.xlu1 %v3827_v42  ;;  %3567 = vset.pattern.permute.xlu2 %v3823_v38 }
 0x16a   : > { %831 = vperm.xlu1 %3564, %v727_v35   ;;  %763 = vperm.xlu2 %3567, %v729_v36  }
 0x172   : > { %3569 = vset.pattern.permute.xlu1 %v5074_v27  ;;  %3568 = vset.pattern.permute.xlu2 %v3825_v40 }
 0x173   : > { %787 = vperm.xlu1 %3569, %v729_v36   ;;  %775 = vperm.xlu2 %3568, %v729_v36  }
 0x17b   : > { %3570 = vset.pattern.permute.xlu1 %v3822_v37  ;;  %3572 = vset.pattern.permute.xlu2 %v3826_v41 }
 0x17c   : > { %799 = vperm.xlu1 %3570, %v729_v36   ;;  %823 = vperm.xlu2 %3572, %v729_v36  }
 0x184   : > { %3573 = vset.pattern.permute.xlu2 %v3827_v42  ;;  %3577 = vset.pattern.permute.xlu1 %v3825_v40 }
 0x185   : > { %835 = vperm.xlu2 %3573, %v729_v36   ;;  %v580_v36 = vsub.s32 %v4068_v46, %v3995_v4 }
 0x187   : > { %vm582_vm14 = vcmp.eq.s32.totalorder %v580_v36, 4294967292  ;;  %vm588_vm15 = vcmp.eq.s32.totalorder %v580_v36, 4294967293  ;;  %vm594_vm0 = vcmp.eq.s32.totalorder %v580_v36, 4294967294  ;;  %vm600_vm1 = vcmp.eq.s32.totalorder %v580_v36, 4294967295 }
 0x188   : > { %v4150_v46 = vsel %vm588_vm15, 1.0, %v3815_v8  ;;  %vm606_vm4 = vcmp.eq.s32.totalorder %v580_v36, 0  ;;  %vm612_vm5 = vcmp.eq.s32.totalorder %v580_v36, 1  ;;  %vm618_vm6 = vcmp.eq.s32.totalorder %v580_v36, 2 }
 0x189   : > { %vm624_vm7 = vcmp.eq.s32.totalorder %v580_v36, 3  ;;  %vm630_vm8 = vcmp.eq.s32.totalorder %v580_v36, 4 }
 0x18d   : > { %3575 = vset.pattern.permute.xlu2 %v3820_v28 }
 0x19f   : > { %v748_v50 = vpop.permute.xlu2 %747 }
 0x1a0   : > { %v754_v1 = vmul.f32 %v4096_v60, %v748_v50  ;;  %v4143_v50 = vsel %vm582_vm14, 1.0, %v3815_v8 }
 0x1a8   : > { %v796_v57 = vpop.permute.xlu2 %795 }
 0x1a9   : > { %v802_v20 = vmul.f32 %v4116_v18, %v796_v57 }
 0x1b2   : > { %v808_v6 = vpop.permute.xlu2 %807 }
 0x1b3   : > { %v814_v26 = vmul.f32 %v4120_v21, %v808_v6  ;;  %v4167_v6 = vsel %vm612_vm5, 1.0, %v3815_v8 }
 0x1b7   : > { %v705_v43 = vpop.f32.mrf.mxu1  ;;  %v784_v14 = vpop.permute.xlu0 %783 }
 0x1b8   : > { %v735_v47 = vpop.permute.xlu1 %734  ;;  %v706_v59 = vadd.f32 %v705_v43, %v4085_v55  ;;  %v790_v17 = vmul.f32 %v4110_v13, %v784_v14  ;;  %v3138_v43 = vadd.f32 -1.0, %v574_v30 }
 0x1b9   : > { %v742_v58 = vmul.f32 %v4088_v56, %v735_v47 }
 0x1ba   : > { %v4140_v49 = vmul.f32 10000.0, %v3138_v43 }
 0x1bb   : > { %v744_v63 = vadd.f32 %v742_v58, %v706_v59  ;;  %v740_v22 = vpop.permute.xlu2 %739 }
 0x1bc   : > { %v743_v57 = vmul.f32 %v4143_v50, %v740_v22  ;;  %v4172_v22 = vsel %vm618_vm6, 1.0, %v3815_v8 }
 0x1bd   : > { %v756_v3 = vadd.f32 %v754_v1, %v744_v63 }
 0x1bf   : > { %v4065_v44 = vpop.f32.mrf.mxu1 }
 0x1c0   : > { %v708_v4 = vadd.f32 %v4065_v44, %v4140_v49  ;;  %v4159_v44 = vsel %vm600_vm1, 1.0, %v3815_v8 }
 0x1c1   : > { %v760_v53 = vpop.permute.xlu1 %759  ;;  %v752_v52 = vpop.permute.xlu0 %751 }
 0x1c2   : > { %v766_v2 = vmul.f32 %v4099_v61, %v760_v53  ;;  %v745_v58 = vadd.f32 %v743_v57, %v708_v4  ;;  %v755_v59 = vmul.f32 %v4150_v46, %v752_v52  ;;  %v1060_v52 = vpop.f32.mrf.mxu0 }
 0x1c4   : > { %v768_v7 = vadd.f32 %v766_v2, %v756_v3  ;;  %v764_v47 = vpop.permute.xlu2 %763  ;;  %v757_v1 = vadd.f32 %v755_v59, %v745_v58  ;;  %v4163_v3 = vsel %vm606_vm4, 1.0, %v3815_v8  ;;  %v1061_v58 = vadd.f32 %v1060_v52, %v4085_v55 }
 0x1c7   : > { %v1074_v45 = vpop.f32.mrf.mxu1 }
 0x1c8   : > { %1118 = vperm.xlu1 %3577, %v1074_v45   ;;  %1094 = vperm.xlu2 %3575, %v1074_v45  }
 0x1c9   : > { %1081 = vperm.xlu0 %3574, %v1074_v45  }
 0x1ca   : > { %v772_v62 = vpop.permute.xlu1 %771 }
 0x1cb   : > { %v778_v5 = vmul.f32 %v4103_v0, %v772_v62  ;;  %v4156_v62 = vsel %vm594_vm0, 1.0, %v3815_v8 }
 0x1cc   : > { %v767_v2 = vmul.f32 %v4156_v62, %v764_v47 }
 0x1cd   : > { %v780_v15 = vadd.f32 %v778_v5, %v768_v7  ;;  %v776_v63 = vpop.permute.xlu2 %775 }
 0x1ce   : > { %v779_v5 = vmul.f32 %v4159_v44, %v776_v63  ;;  %v769_v14 = vadd.f32 %v767_v2, %v757_v1 }
 0x1cf   : > { %v4082_v54 = vpop.f32.mrf.mxu1  ;;  %v792_v19 = vadd.f32 %v790_v17, %v780_v15 }
 0x1d0   : > { %3578 = vset.pattern.permute.xlu1 %v5074_v27  ;;  %3576 = vset.pattern.permute.xlu2 %v3823_v38 }
 0x1d1   : > { %3579 = vset.pattern.permute.xlu0 %v3822_v37  ;;  %1130 = vperm.xlu1 %3578, %v1074_v45   ;;  %v804_v23 = vadd.f32 %v802_v20, %v792_v19 }
 0x1d2   : > { %1106 = vperm.xlu2 %3576, %v1074_v45   ;;  %1142 = vperm.xlu0 %3579, %v1074_v45  }
 0x1d3   : > { %v820_v16 = vpop.permute.xlu1 %819  ;;  %v816_v33 = vadd.f32 %v814_v26, %v804_v23  ;;  %v812_v23 = vpop.permute.xlu0 %811 }
 0x1d4   : > { %v826_v34 = vmul.f32 %v4125_v24, %v820_v16  ;;  %v781_v16 = vadd.f32 %v779_v5, %v769_v14  ;;  %v815_v30 = vmul.f32 %v4172_v22, %v812_v23 }
 0x1d6   : > { %v824_v19 = vpop.permute.xlu2 %823 }
 0x1d9   : > { %3582 = vset.pattern.permute.xlu1 %v3827_v42 }
 0x1da   : > { %3580 = vset.pattern.permute.xlu2 %v3824_v39  ;;  %3585 = vset.pattern.permute.xlu0 %v3823_v38 }
 0x1db   : > { %1178 = vperm.xlu1 %3582, %v1074_v45   ;;  %1154 = vperm.xlu2 %3580, %v1074_v45  }
 0x1dc   : > { %1110 = vperm.xlu0 %3585, %v4082_v54   ;;  %v832_v32 = vpop.permute.xlu1 %831 }
 0x1dd   : > { %v838_v35 = vmul.f32 %v4130_v31, %v832_v32  ;;  %v4176_v32 = vsel %vm624_vm7, 1.0, %v3815_v8  ;;  %vm999_vm7 = vcmask 1043456  }
 0x1df   : > { %v836_v43 = vpop.permute.xlu2 %835 }
 0x1e3   : > { %3581 = vset.pattern.permute.xlu2 %v3826_v41  ;;  %3583 = vset.pattern.permute.xlu1 %v3821_v29 }
 0x1e4   : > { %3590 = vset.pattern.permute.xlu0 %v3826_v41  ;;  %1166 = vperm.xlu2 %3581, %v1074_v45   ;;  %v828_v45 = vadd.f32 %v826_v34, %v816_v33  ;;  %v827_v34 = vmul.f32 %v4176_v32, %v824_v19 }
 0x1e5   : > { %1170 = vperm.xlu0 %3590, %v4082_v54   ;;  %v788_v53 = vpop.permute.xlu1 %787 }
 0x1e6   : > { %v4138_v48 = vadd.f32 %v838_v35, %v828_v45  ;;  %v791_v15 = vmul.f32 %v4163_v3, %v788_v53  ;;  %v4180_v35 = vsel %vm630_vm8, 1.0, %v3815_v8  ;;  %vm1000_vm8 = vcmask 1044480  }
 0x1e7   : > { %v839_v47 = vmul.f32 %v4180_v35, %v836_v43 }
 0x1e8   : > { %v842_v51 = vsel %vm689_vm3, %v4138_v48, -inf  ;;  %v793_v20 = vadd.f32 %v791_v15, %v781_v16 }
 0x1ec   : > { %3586 = vset.pattern.permute.xlu2 %v3825_v40 }
 0x1ed   : > { %1122 = vperm.xlu2 %3586, %v4082_v54   ;;  %3616 = vset.pattern.permute.xlu0 %v5074_v27 }
 0x1ee   : > { %v800_v7 = vpop.permute.xlu1 %799 }
 0x1ef   : > { %v803_v17 = vmul.f32 %v4167_v6, %v800_v7 }
 0x1f1   : > { %v805_v26 = vadd.f32 %v803_v17, %v793_v20 }
 0x1f3   : > { %v817_v33 = vadd.f32 %v815_v30, %v805_v26 }
 0x1f5   : > { %3587 = vset.pattern.permute.xlu2 %v5074_v27  ;;  %v829_v45 = vadd.f32 %v827_v34, %v817_v33 }
 0x1f6   : > { %1134 = vperm.xlu2 %3587, %v4082_v54  }
 0x1fe   : > { %3591 = vset.pattern.permute.xlu2 %v3827_v42 }
 0x1ff   : > { %1182 = vperm.xlu2 %3591, %v4082_v54  }
 0x205   : > { %843 = vmax.xlane.f32.xlu1 %v842_v51  ;;  %v4184_v51 = vadd.f32 %v839_v47, %v829_v45 }
 0x207   : > { %3612 = vset.pattern.permute.xlu2 %v3821_v29  ;;  %v845_v36 = vsel %vm689_vm3, %v4184_v51, -inf }
 0x21e   : > { %1086 = vperm.xlu1 %3583, %v4082_v54  }
 0x222   : > { %v1095_v4 = vpop.permute.xlu2 %1094 }
 0x223   : > { %v1101_v1 = vmul.f32 %v4096_v60, %v1095_v4 }
 0x226   : > { %3584 = vset.pattern.permute.xlu1 %v3820_v28 }
 0x227   : > { %1098 = vperm.xlu1 %3584, %v4082_v54  }
 0x228   : > { %846 = vmax.xlane.f32.xlu2 %v845_v36 }
 0x22c   : > { %v1107_v8 = vpop.permute.xlu2 %1106 }
 0x22d   : > { %v1113_v5 = vmul.f32 %v4099_v61, %v1107_v8 }
 0x22f   : > { %3588 = vset.pattern.permute.xlu1 %v3822_v37 }
 0x230   : > { %1146 = vperm.xlu1 %3588, %v4082_v54  }
 0x235   : > { %v1155_v63 = vpop.permute.xlu2 %1154 }
 0x236   : > { %v1161_v30 = vmul.f32 %v4120_v21, %v1155_v63 }
 0x238   : > { %3589 = vset.pattern.permute.xlu1 %v3824_v39 }
 0x239   : > { %1158 = vperm.xlu1 %3589, %v4082_v54  }
 0x23a   : > { %v1119_v53 = vpop.permute.xlu1 %1118 }
 0x23b   : > { %v1082_v57 = vpop.permute.xlu0 %1081  ;;  %v1125_v14 = vmul.f32 %v4103_v0, %v1119_v53 }
 0x23c   : > { %v1089_v59 = vmul.f32 %v4088_v56, %v1082_v57 }
 0x23e   : > { %v1091_v2 = vadd.f32 %v1089_v59, %v1061_v58  ;;  %v1167_v26 = vpop.permute.xlu2 %1166 }
 0x23f   : > { %v1173_v34 = vmul.f32 %v4125_v24, %v1167_v26 }
 0x240   : > { %v1103_v7 = vadd.f32 %v1101_v1, %v1091_v2  ;;  %v1062_v2 = vpop.f32.mrf.mxu0 }
 0x241   : > { %3614 = vset.pattern.permute.xlu1 %v3823_v38 }
 0x242   : > { %v1115_v15 = vadd.f32 %v1113_v5, %v1103_v7 }
 0x243   : > { %v1131_v16 = vpop.permute.xlu1 %1130 }
 0x244   : > { %v1127_v54 = vadd.f32 %v1125_v14, %v1115_v15  ;;  %v1137_v17 = vmul.f32 %v4110_v13, %v1131_v16  ;;  %v1143_v19 = vpop.permute.xlu0 %1142  ;;  %v1063_v14 = vadd.f32 %v1062_v2, %v4140_v49 }
 0x245   : > { %v1149_v23 = vmul.f32 %v4116_v18, %v1143_v19 }
 0x246   : > { %v1139_v20 = vadd.f32 %v1137_v17, %v1127_v54 }
 0x247   : > { %v1123_v63 = vpop.permute.xlu2 %1122 }
 0x248   : > { %v1151_v33 = vadd.f32 %v1149_v23, %v1139_v20  ;;  %v1126_v26 = vmul.f32 %v4159_v44, %v1123_v63 }
 0x24a   : > { %v1163_v43 = vadd.f32 %v1161_v30, %v1151_v33 }
 0x24c   : > { %v1175_v45 = vadd.f32 %v1173_v34, %v1163_v43 }
 0x24d   : > { %v1179_v47 = vpop.permute.xlu1 %1178 }
 0x24e   : > { %v1185_v36 = vmul.f32 %v4130_v31, %v1179_v47  ;;  %v1111_v54 = vpop.permute.xlu0 %1110 }
 0x24f   : > { %v1114_v19 = vmul.f32 %v4156_v62, %v1111_v54 }
 0x250   : > { %v1187_v4 = vadd.f32 %v1185_v36, %v1175_v45  ;;  %v1135_v5 = vpop.permute.xlu2 %1134 }
 0x251   : > { %v1138_v34 = vmul.f32 %v4163_v3, %v1135_v5 }
 0x252   : > { %v1189_v8 = vsel %vm689_vm3, %v1187_v4, -inf }
 0x253   : > { %1190 = vmax.xlane.f32.xlu0 %v1189_v8 }
 0x257   : > { %v1171_v36 = vpop.permute.xlu0 %1170 }
 0x259   : > { %v1183_v20 = vpop.permute.xlu2 %1182 }
 0x25a   : > { %v1186_v63 = vmul.f32 %v4180_v35, %v1183_v20 }
 0x278   : > { %v844_v52 = vpop.xlane.xlu1 %843 }
 0x279   : > { %v848_v53 = vsub.f32 %v4138_v48, %v844_v52 }
 0x27b   : > { %v850_v57 = vmul.f32 1.442695, %v848_v53 }
 0x27d   : > { %3686 = vpow2.f32 %v850_v57 }
 0x283   : > { %v4207_v58 = vpop.eup %3686 }
 0x284   : > { %v854_v59 = vsel %vm689_vm3, %v4207_v58, 0.0 }
 0x285   : > { %855 = vadd.xlane.f32.xlu1 %v854_v59  ;;  %v1174_v59 = vmul.f32 %v4176_v32, %v1171_v36 }
 0x290   : > { %v1087_v1 = vpop.permute.xlu1 %1086 }
 0x291   : > { %v1090_v7 = vmul.f32 %v4143_v50, %v1087_v1 }
 0x293   : > { %v1092_v16 = vadd.f32 %v1090_v7, %v1063_v14 }
 0x299   : > { %v1099_v15 = vpop.permute.xlu1 %1098 }
 0x29a   : > { %v1102_v48 = vmul.f32 %v4150_v46, %v1099_v15 }
 0x29b   : > { %v847_v43 = vpop.xlane.xlu2 %846 }
 0x29c   : > { %v1104_v17 = vadd.f32 %v1102_v48, %v1092_v16  ;;  %v849_v8 = vsub.f32 %v4184_v51, %v847_v43 }
 0x29e   : > { %v1116_v23 = vadd.f32 %v1114_v19, %v1104_v17  ;;  %v852_v2 = vmul.f32 1.442695, %v849_v8 }
 0x2a0   : > { %v1128_v33 = vadd.f32 %v1126_v26, %v1116_v23  ;;  %3688 = vpow2.f32 %v852_v2 }
 0x2a2   : > { %v1147_v30 = vpop.permute.xlu1 %1146  ;;  %v1140_v45 = vadd.f32 %v1138_v34, %v1128_v33 }
 0x2a3   : > { %v1150_v47 = vmul.f32 %v4167_v6, %v1147_v30 }
 0x2a5   : > { %v1152_v53 = vadd.f32 %v1150_v47, %v1140_v45 }
 0x2a6   : > { %v4223_v15 = vpop.eup %3688 }
 0x2a7   : > { %v857_v51 = vsel %vm689_vm3, %v4223_v15, 0.0 }
 0x2ab   : > { %v1159_v52 = vpop.permute.xlu1 %1158 }
 0x2ac   : > { %v1162_v57 = vmul.f32 %v4172_v22, %v1159_v52 }
 0x2ae   : > { %v1164_v1 = vadd.f32 %v1162_v57, %v1152_v53 }
 0x2b0   : > { %v1176_v7 = vadd.f32 %v1174_v59, %v1164_v1 }
 0x2b2   : > { %v1188_v14 = vadd.f32 %v1186_v63, %v1176_v7 }
 0x2b4   : > { %v1192_v5 = vsel %vm689_vm3, %v1188_v14, -inf }
 0x2b5   : > { %1193 = vmax.xlane.f32.xlu2 %v1192_v5 }
 0x2bd   : > { %858 = vadd.xlane.f32.xlu2 %v857_v51 }
 0x2c6   : > { %v1191_v16 = vpop.xlane.xlu0 %1190 }
 0x2c7   : > { %v1195_v48 = vsub.f32 %v1187_v4, %v1191_v16 }
 0x2c9   : > { %v1197_v54 = vmul.f32 1.442695, %v1195_v48 }
 0x2cb   : > { %3690 = vpow2.f32 %v1197_v54 }
 0x2d1   : > { %v4227_v17 = vpop.eup %3690 }
 0x2d2   : > { %v1201_v19 = vsel %vm689_vm3, %v4227_v17, 0.0 }
 0x2d3   : > { %1202 = vadd.xlane.f32.xlu0 %v1201_v19 }
 0x2f8   : > { %v856_v20 = vpop.xlane.xlu1 %855 }
 0x2f9   : > { %3692 = vrcp.f32 %v856_v20  ;;  %v871_v33 = vand.u32 2147483648, %v856_v20  ;;  %v869_v43 = vand.u32 2147483647, %v856_v20  ;;  %vm865_vm10 = vweird.f32 %v856_v20 }
 0x2fb   : > { %v872_v4 = vor.u32 1.1754944e-38, %v871_v33  ;;  %vm870_vm12 = vcmp.eq.f32.partialorder %v869_v43, 8.507059e+37 }
 0x2ff   : > { %v3693_v23 = vpop.eup %3692 }
 0x300   : > { %v861_v26 = vmul.f32 %v3693_v23, %v856_v20  ;;  %vm866_vm9 = vweird.f32 %v3693_v23 }
 0x301   : > { %vm867_vm11 = vmor %vm865_vm10, %vm866_vm9 }
 0x302   : > { %v862_v30 = vsub.f32 1.0, %v861_v26 }
 0x304   : > { %v863_v34 = vmul.f32 %v3693_v23, %v862_v30 }
 0x306   : > { %v864_v45 = vadd.f32 %v3693_v23, %v863_v34 }
 0x308   : > { %v868_v47 = vsel %vm867_vm11, %v3693_v23, %v864_v45 }
 0x309   : > { %v873_v36 = vsel %vm870_vm12, %v872_v4, %v868_v47 }
 0x30a   : > { %v4232_v8 = vmul.f32 %v4207_v58, %v873_v36 }
 0x30c   : > { %v908_v52 = vmul.f32 %v4099_v61, %v4232_v8  ;;  %v900_v53 = vmul.f32 %v4096_v60, %v4232_v8  ;;  %v892_v57 = vmul.f32 %v4088_v56, %v4232_v8  ;;  %v932_v58 = vmul.f32 %v4116_v18, %v4232_v8 }
 0x30d   : > { %v924_v63 = vmul.f32 %v4110_v13, %v4232_v8  ;;  %v916_v7 = vmul.f32 %v4103_v0, %v4232_v8  ;;  %v956_v48 = vmul.f32 %v4130_v31, %v4232_v8  ;;  %v948_v54 = vmul.f32 %v4125_v24, %v4232_v8 }
 0x30e   : > { %v910_v59 = vsel %vm689_vm3, %v908_v52, 0.0  ;;  %v902_v1 = vsel %vm689_vm3, %v900_v53, 0.0  ;;  %v894_v2 = vsel %vm689_vm3, %v892_v57, 0.0  ;;  %v934_v5 = vsel %vm689_vm3, %v932_v58, 0.0 }
 0x30f   : > { %911 = vadd.xlane.f32.xlu0 %v910_v59  ;;  %903 = vadd.xlane.f32.xlu1 %v902_v1  ;;  %v926_v51 = vsel %vm689_vm3, %v924_v63, 0.0  ;;  %v918_v16 = vsel %vm689_vm3, %v916_v7, 0.0  ;;  %v940_v19 = vmul.f32 %v4120_v21, %v4232_v8  ;;  %v958_v20 = vsel %vm689_vm3, %v956_v48, 0.0 }
 0x310   : > { %895 = vadd.xlane.f32.xlu2 %v894_v2  ;;  %v950_v23 = vsel %vm689_vm3, %v948_v54, 0.0 }
 0x311   : > { %v942_v26 = vsel %vm689_vm3, %v940_v19, 0.0 }
 0x317   : > { %935 = vadd.xlane.f32.xlu0 %v934_v5  ;;  %927 = vadd.xlane.f32.xlu1 %v926_v51 }
 0x318   : > { %919 = vadd.xlane.f32.xlu2 %v918_v16 }
 0x31f   : > { %959 = vadd.xlane.f32.xlu0 %v958_v20  ;;  %951 = vadd.xlane.f32.xlu1 %v950_v23 }
 0x320   : > { %943 = vadd.xlane.f32.xlu2 %v942_v26 }
 0x328   : > { %v1194_v30 = vpop.xlane.xlu2 %1193 }
 0x329   : > { %v1196_v33 = vsub.f32 %v1188_v14, %v1194_v30 }
 0x32b   : > { %v1199_v34 = vmul.f32 1.442695, %v1196_v33 }
 0x32d   : > { %3694 = vpow2.f32 %v1199_v34 }
 0x330   : > { %v859_v43 = vpop.xlane.xlu2 %858 }
 0x331   : > { %3696 = vrcp.f32 %v859_v43  ;;  %v886_v53 = vand.u32 2147483648, %v859_v43  ;;  %v884_v59 = vand.u32 2147483647, %v859_v43  ;;  %vm880_vm14 = vweird.f32 %v859_v43 }
 0x333   : > { %v4261_v45 = vpop.eup %3694  ;;  %v887_v14 = vor.u32 1.1754944e-38, %v886_v53  ;;  %vm885_vm0 = vcmp.eq.f32.partialorder %v884_v59, 8.507059e+37 }
 0x334   : > { %v1204_v4 = vsel %vm689_vm3, %v4261_v45, 0.0 }
 0x335   : > { %1205 = vadd.xlane.f32.xlu1 %v1204_v4 }
 0x337   : > { %v3697_v47 = vpop.eup %3696 }
 0x338   : > { %v876_v36 = vmul.f32 %v3697_v47, %v859_v43  ;;  %vm881_vm13 = vweird.f32 %v3697_v47 }
 0x339   : > { %vm882_vm15 = vmor %vm880_vm14, %vm881_vm13  ;;  %vm964_vm13 = vcmask 7168   ;;  %vm967_vm14 = vcmask 15360  }
 0x33a   : > { %v877_v52 = vsub.f32 1.0, %v876_v36 }
 0x33c   : > { %v878_v57 = vmul.f32 %v3697_v47, %v877_v52 }
 0x33e   : > { %v879_v1 = vadd.f32 %v3697_v47, %v878_v57 }
 0x340   : > { %v883_v2 = vsel %vm882_vm15, %v3697_v47, %v879_v1  ;;  %vm970_vm15 = vcmask 23552  }
 0x341   : > { %v888_v58 = vsel %vm885_vm0, %v887_v14, %v883_v2  ;;  %vm973_vm0 = vcmask 31744  }
 0x342   : > { %v4266_v63 = vmul.f32 %v4223_v15, %v888_v58 }
 0x344   : > { %v893_v7 = vmul.f32 %v4143_v50, %v4266_v63  ;;  %v909_v5 = vmul.f32 %v4156_v62, %v4266_v63  ;;  %v901_v51 = vmul.f32 %v4150_v46, %v4266_v63  ;;  %v988_v15 = vpack.c.bf16 %v4266_v63, %v4232_v8 }
 0x345   : > { %v917_v20 = vmul.f32 %v4159_v44, %v4266_v63  ;;  %v933_v23 = vmul.f32 %v4167_v6, %v4266_v63  ;;  %v925_v26 = vmul.f32 %v4163_v3, %v4266_v63  ;;  %v941_v52 = vmul.f32 %v4172_v22, %v4266_v63 }
 0x346   : > { %v1203_v16 = vpop.xlane.xlu0 %1202  ;;  %v897_v48 = vsel %vm689_vm3, %v893_v7, 0.0  ;;  %v913_v54 = vsel %vm689_vm3, %v909_v5, 0.0  ;;  %v905_v19 = vsel %vm689_vm3, %v901_v51, 0.0  ;;  %v957_v59 = vmul.f32 %v4180_v35, %v4266_v63 }
 0x347   : > { %3698 = vrcp.f32 %v1203_v16  ;;  %898 = vadd.xlane.f32.xlu0 %v897_v48  ;;  %914 = vadd.xlane.f32.xlu1 %v913_v54  ;;  %v921_v34 = vsel %vm689_vm3, %v917_v20, 0.0  ;;  %v937_v43 = vsel %vm689_vm3, %v933_v23, 0.0  ;;  %v929_v4 = vsel %vm689_vm3, %v925_v26, 0.0 }
 0x348   : > { %906 = vadd.xlane.f32.xlu2 %v905_v19  ;;  %v1218_v36 = vand.u32 2147483648, %v1203_v16  ;;  %v1216_v57 = vand.u32 2147483647, %v1203_v16  ;;  %v949_v1 = vmul.f32 %v4176_v32, %v4266_v63  ;;  %vm1212_vm4 = vweird.f32 %v1203_v16 }
 0x349   : > { %v945_v7 = vsel %vm689_vm3, %v941_v52, 0.0  ;;  %v961_v5 = vsel %vm689_vm3, %v957_v59, 0.0 }
 0x34a   : > { %v1219_v2 = vor.u32 1.1754944e-38, %v1218_v36  ;;  %vm1217_vm6 = vcmp.eq.f32.partialorder %v1216_v57, 8.507059e+37  ;;  %v953_v48 = vsel %vm689_vm3, %v949_v1, 0.0 }
 0x34d   : > { %v3699_v30 = vpop.eup %3698 }
 0x34e   : > { %v1208_v33 = vmul.f32 %v3699_v30, %v1203_v16  ;;  %vm1213_vm1 = vweird.f32 %v3699_v30 }
 0x34f   : > { %922 = vadd.xlane.f32.xlu0 %v921_v34  ;;  %938 = vadd.xlane.f32.xlu1 %v937_v43  ;;  %vm1214_vm5 = vmor %vm1212_vm4, %vm1213_vm1  ;;  %vm976_vm1 = vcmask 39936   ;;  %vm979_vm4 = vcmask 48128  }
 0x350   : > { %v1209_v47 = vsub.f32 1.0, %v1208_v33  ;;  %930 = vadd.xlane.f32.xlu2 %v929_v4 }
 0x352   : > { %v1210_v53 = vmul.f32 %v3699_v30, %v1209_v47 }
 0x354   : > { %v1211_v14 = vadd.f32 %v3699_v30, %v1210_v53 }
 0x356   : > { %v1215_v58 = vsel %vm1214_vm5, %v3699_v30, %v1211_v14  ;;  %vm982_vm5 = vcmask 56320  }
 0x357   : > { %v1220_v51 = vsel %vm1217_vm6, %v1219_v2, %v1215_v58  ;;  %946 = vadd.xlane.f32.xlu0 %v945_v7  ;;  %962 = vadd.xlane.f32.xlu1 %v961_v5  ;;  %vm985_vm6 = vcmask 64512  }
 0x358   : > { %v4298_v54 = vmul.f32 %v4227_v17, %v1220_v51  ;;  %954 = vadd.xlane.f32.xlu2 %v953_v48 }
 0x35a   : > { %v1239_v16 = vmul.f32 %v4088_v56, %v4298_v54  ;;  %v1271_v19 = vmul.f32 %v4110_v13, %v4298_v54  ;;  %v1247_v26 = vmul.f32 %v4096_v60, %v4298_v54  ;;  %v1279_v17 = vmul.f32 %v4116_v18, %v4298_v54 }
 0x35b   : > { %v1255_v34 = vmul.f32 %v4099_v61, %v4298_v54  ;;  %v1287_v43 = vmul.f32 %v4120_v21, %v4298_v54  ;;  %v1295_v36 = vmul.f32 %v4125_v24, %v4298_v54  ;;  %v1303_v53 = vmul.f32 %v4130_v31, %v4298_v54 }
 0x35c   : > { %v1241_v20 = vsel %vm689_vm3, %v1239_v16, 0.0  ;;  %v1273_v23 = vsel %vm689_vm3, %v1271_v19, 0.0  ;;  %v1249_v30 = vsel %vm689_vm3, %v1247_v26, 0.0  ;;  %v1281_v33 = vsel %vm689_vm3, %v1279_v17, 0.0  ;;  %v3174_v19 = vld [vmem:[%s5057_s7] sm:$0xf] }
 0x35d   : > { %v1257_v4 = vsel %vm689_vm3, %v1255_v34, 0.0  ;;  %v1289_v47 = vsel %vm689_vm3, %v1287_v43, 0.0  ;;  %v1297_v52 = vsel %vm689_vm3, %v1295_v36, 0.0  ;;  %v1305_v57 = vsel %vm689_vm3, %v1303_v53, 0.0 }
 0x35e   : > { %v1263_v1 = vmul.f32 %v4103_v0, %v4298_v54  ;;  %v3829_v17 = vmov 65535  }
 0x35f   : > { %1242 = vadd.xlane.f32.xlu0 %v1241_v20  ;;  %1274 = vadd.xlane.f32.xlu1 %v1273_v23  ;;  %v3447_v20 = vld [vmem:[%s5057_s7] sm:$0x10] }
 0x360   : > { %v1265_v2 = vsel %vm689_vm3, %v1263_v1, 0.0  ;;  %v3175_v23 = vor.u32 %v3447_v20, %v3174_v19 }
 0x367   : > { %1250 = vadd.xlane.f32.xlu0 %v1249_v30  ;;  %1282 = vadd.xlane.f32.xlu1 %v1281_v33  ;;  %v1001_v30 = vsel %vm999_vm7, 4294967295, %v3829_v17  ;;  %vm5091_vm7 = vcmask 72704  }
 0x368   : > { %v4337_v34 = vsel %vm1000_vm8, %v1001_v30, 0 }
 0x369   : > { %v1004_v43 = vand.u32 %v3175_v23, %v4337_v34 }
 0x36b   : > { %1013 = vmatpush.bf16.msra.mxu3 %v1004_v43  ;;  %1339 = vmatpush.bf16.msrb.mxu2 %v1004_v43 }
 0x36f   : > { %1258 = vadd.xlane.f32.xlu0 %v1257_v4  ;;  %1290 = vadd.xlane.f32.xlu1 %v1289_v47 }
 0x370   : > { %1020 = vrot.lane.b32.xlu2 %v4031_v25, %s5083_s1 }
 0x377   : > { %1298 = vadd.xlane.f32.xlu1 %v1297_v52 }
 0x37f   : > { %1306 = vadd.xlane.f32.xlu1 %v1305_v57 }
 0x382   : > { %v904_v59 = vpop.xlane.xlu1 %903  ;;  %v912_v58 = vpop.xlane.xlu0 %911 }
 0x383   : > { %v896_v7 = vpop.xlane.xlu2 %895 }
 0x384   : > { %v965_v27 = vsel %vm964_vm13, %v896_v7, %v904_v59 }
 0x38a   : > { %v928_v14 = vpop.xlane.xlu1 %927  ;;  %v936_v51 = vpop.xlane.xlu0 %935 }
 0x38b   : > { %v920_v16 = vpop.xlane.xlu2 %919 }
 0x392   : > { %v4329_v5 = vpop.xlane.xlu1 %951  ;;  %v4340_v4 = vpop.xlane.xlu0 %959 }
 0x393   : > { %v944_v36 = vpop.xlane.xlu2 %943 }
 0x399   : > { %1266 = vadd.xlane.f32.xlu2 %v1265_v2 }
 0x3a8   : > { %v1206_v48 = vpop.xlane.xlu1 %1205 }
 0x3a9   : > { %3700 = vrcp.f32 %v1206_v48  ;;  %v1233_v52 = vand.u32 2147483648, %v1206_v48  ;;  %v1231_v57 = vand.u32 2147483647, %v1206_v48  ;;  %vm1227_vm10 = vweird.f32 %v1206_v48 }
 0x3ab   : > { %v1234_v2 = vor.u32 1.1754944e-38, %v1233_v52  ;;  %vm1232_vm12 = vcmp.eq.f32.partialorder %v1231_v57, 8.507059e+37 }
 0x3af   : > { %v3701_v26 = vpop.eup %3700 }
 0x3b0   : > { %v1223_v33 = vmul.f32 %v3701_v26, %v1206_v48  ;;  %vm1228_vm9 = vweird.f32 %v3701_v26 }
 0x3b1   : > { %vm1229_vm11 = vmor %vm1227_vm10, %vm1228_vm9 }
 0x3b2   : > { %v1224_v47 = vsub.f32 1.0, %v1223_v33 }
 0x3b4   : > { %v1225_v53 = vmul.f32 %v3701_v26, %v1224_v47 }
 0x3b6   : > { %v1226_v1 = vadd.f32 %v3701_v26, %v1225_v53 }
 0x3b8   : > { %v1230_v19 = vsel %vm1229_vm11, %v3701_v26, %v1226_v1 }
 0x3b9   : > { %v1235_v20 = vsel %vm1232_vm12, %v1234_v2, %v1230_v19 }
 0x3ba   : > { %v4343_v23 = vmul.f32 %v4261_v45, %v1235_v20  ;;  %v899_v17 = vpop.xlane.xlu0 %898  ;;  %v915_v30 = vpop.xlane.xlu1 %914  ;;  %v968_v45 = vsel %vm967_vm14, %v965_v27, %v912_v58 }
 0x3bb   : > { %v907_v33 = vpop.xlane.xlu2 %906  ;;  %v971_v52 = vsel %vm970_vm15, %v968_v45, %v920_v16 }
 0x3bc   : > { %v1264_v43 = vmul.f32 %v4159_v44, %v4343_v23  ;;  %v1240_v48 = vmul.f32 %v4143_v50, %v4343_v23  ;;  %v966_v59 = vsel %vm964_vm13, %v899_v17, %v907_v33  ;;  %v1272_v57 = vmul.f32 %v4163_v3, %v4343_v23 }
 0x3bd   : > { %v1248_v1 = vmul.f32 %v4150_v46, %v4343_v23  ;;  %v974_v2 = vsel %vm973_vm0, %v971_v52, %v928_v14  ;;  %v969_v27 = vsel %vm967_vm14, %v966_v59, %v915_v30 }
 0x3be   : > { %v1268_v26 = vsel %vm689_vm3, %v1264_v43, 0.0  ;;  %v1244_v47 = vsel %vm689_vm3, %v1240_v48, 0.0  ;;  %v977_v16 = vsel %vm976_vm1, %v974_v2, %v936_v51  ;;  %v1276_v20 = vsel %vm689_vm3, %v1272_v57, 0.0 }
 0x3bf   : > { %1269 = vadd.xlane.f32.xlu0 %v1268_v26  ;;  %1245 = vadd.xlane.f32.xlu1 %v1244_v47  ;;  %v1252_v17 = vsel %vm689_vm3, %v1248_v1, 0.0  ;;  %v980_v33 = vsel %vm979_vm4, %v977_v16, %v944_v36  ;;  %v1280_v51 = vmul.f32 %v4167_v6, %v4343_v23  ;;  %v1256_v26 = vmul.f32 %v4156_v62, %v4343_v23 }
 0x3c0   : > { %v983_v14 = vsel %vm982_vm5, %v980_v33, %v4329_v5  ;;  %v1288_v1 = vmul.f32 %v4172_v22, %v4343_v23 }
 0x3c1   : > { %v986_v5 = vsel %vm985_vm6, %v983_v14, %v4340_v4  ;;  %v1296_v4 = vmul.f32 %v4176_v32, %v4343_v23 }
 0x3c2   : > { %v923_v7 = vpop.xlane.xlu0 %922  ;;  %v939_v53 = vpop.xlane.xlu1 %938 }
 0x3c3   : > { %v931_v58 = vpop.xlane.xlu2 %930  ;;  %v972_v19 = vsel %vm970_vm15, %v969_v27, %v923_v7  ;;  %v1284_v7 = vsel %vm689_vm3, %v1280_v51, 0.0  ;;  %v1292_v27 = vsel %vm689_vm3, %v1288_v1, 0.0 }
 0x3c4   : > { %v975_v43 = vsel %vm973_vm0, %v972_v19, %v931_v58  ;;  %v1300_v58 = vsel %vm689_vm3, %v1296_v4, 0.0  ;;  %v1304_v19 = vmul.f32 %v4180_v35, %v4343_v23 }
 0x3c5   : > { %v978_v48 = vsel %vm976_vm1, %v975_v43, %v939_v53  ;;  %v1260_v53 = vsel %vm689_vm3, %v1256_v26, 0.0 }
 0x3c6   : > { %v1308_v16 = vsel %vm689_vm3, %v1304_v19, 0.0 }
 0x3c7   : > { %1277 = vadd.xlane.f32.xlu0 %v1276_v20  ;;  %1253 = vadd.xlane.f32.xlu1 %v1252_v17 }
 0x3ca   : > { %v947_v30 = vpop.xlane.xlu0 %946  ;;  %v963_v45 = vpop.xlane.xlu1 %962 }
 0x3cb   : > { %v981_v47 = vsel %vm979_vm4, %v978_v48, %v947_v30  ;;  %v955_v36 = vpop.xlane.xlu2 %954 }
 0x3cc   : > { %v984_v52 = vsel %vm982_vm5, %v981_v47, %v955_v36 }
 0x3cd   : > { %v987_v59 = vsel %vm985_vm6, %v984_v52, %v963_v45 }
 0x3ce   : > { %v989_v57 = vpack.c.bf16 %v987_v59, %v986_v5 }
 0x3cf   : > { %1285 = vadd.xlane.f32.xlu0 %v1284_v7  ;;  %1261 = vadd.xlane.f32.xlu1 %v1260_v53 }
 0x3d0   : > { %3176 = vmatmul.msk.bf16.vlgmr.msra.gmra.mxu3 %vm5091_vm7, %v989_v57 }
 0x3d2   : > { %v1275_v20 = vpop.xlane.xlu1 %1274  ;;  %v1243_v33 = vpop.xlane.xlu0 %1242 }
 0x3d3   : > { %v1021_v2 = vpop.permute.xlu2 %1020 }
 0x3d4   : > { %1033 = vmatpush.bf16.msrb.mxu3 %v1021_v2 }
 0x3d7   : > { %1293 = vadd.xlane.f32.xlu0 %v1292_v27 }
 0x3da   : > { %v1283_v17 = vpop.xlane.xlu1 %1282  ;;  %v1251_v14 = vpop.xlane.xlu0 %1250 }
 0x3db   : > { %v1311_v45 = vsel %vm964_vm13, %v1243_v33, %v1251_v14 }
 0x3df   : > { %1301 = vadd.xlane.f32.xlu0 %v1300_v58 }
 0x3e0   : > { %3177 = vmatmul.msk.bf16.vlgmr.msrb.gmra.mxu3 %vm689_vm3, %v988_v15 }
 0x3e2   : > { %v1291_v43 = vpop.xlane.xlu1 %1290  ;;  %v1259_v48 = vpop.xlane.xlu0 %1258 }
 0x3e3   : > { %v1313_v59 = vsel %vm967_vm14, %v1311_v45, %v1259_v48 }
 0x3e7   : > { %1309 = vadd.xlane.f32.xlu0 %v1308_v16 }
 0x3e8   : > { %1346 = vrot.lane.b32.xlu1 %v4031_v25, %s5076_s2  ;;  %s5128_s2 = smov 32  }
 0x3ea   : > { %v1299_v30 = vpop.xlane.xlu1 %1298 }
 0x3f2   : > { %v1307_v8 = vpop.xlane.xlu1 %1306 }
 0x40c   : > { %v1267_v36 = vpop.xlane.xlu2 %1266 }
 0x40d   : > { %v1315_v25 = vsel %vm970_vm15, %v1313_v59, %v1267_v36 }
 0x40e   : > { %v1317_v53 = vsel %vm973_vm0, %v1315_v25, %v1275_v20 }
 0x40f   : > { %v1319_v1 = vsel %vm976_vm1, %v1317_v53, %v1283_v17 }
 0x410   : > { %v1321_v19 = vsel %vm979_vm4, %v1319_v1, %v1291_v43  ;;  %v1327_v43 = vpack.c.bf16 %v4343_v23, %v4298_v54  ;;  %v3448_v54 = vld [vmem:[%s5109_s4] sm:$0xff] }
 0x411   : > { %v1323_v33 = vsel %vm982_vm5, %v1321_v19, %v1299_v30  ;;  %v3670_v19 = vld [vmem:[%s5110_s5] ss:$0 sm:$0xff] }
 0x412   : > { %v1325_v17 = vsel %vm985_vm6, %v1323_v33, %v1307_v8 }
 0x432   : > { %v1270_v63 = vpop.xlane.xlu0 %1269  ;;  %v1246_v15 = vpop.xlane.xlu1 %1245 }
 0x43a   : > { %v1278_v51 = vpop.xlane.xlu0 %1277  ;;  %v1254_v26 = vpop.xlane.xlu1 %1253 }
 0x43b   : > { %v1312_v7 = vsel %vm964_vm13, %v1246_v15, %v1254_v26 }
 0x442   : > { %v1286_v47 = vpop.xlane.xlu0 %1285  ;;  %v1262_v5 = vpop.xlane.xlu1 %1261 }
 0x443   : > { %v1314_v57 = vsel %vm967_vm14, %v1312_v7, %v1262_v5 }
 0x444   : > { %v1316_v2 = vsel %vm970_vm15, %v1314_v57, %v1270_v63 }
 0x445   : > { %v1318_v58 = vsel %vm973_vm0, %v1316_v2, %v1278_v51 }
 0x446   : > { %v1320_v16 = vsel %vm976_vm1, %v1318_v58, %v1286_v47  ;;  %v3449_v47 = vld [vmem:[%s5109_s4 + $0x8] sm:$0xff] }
 0x447   : > { %1406 = vmatpush.bf16.msra.mxu0 %v3449_v47 }
 0x44a   : > { %v1294_v52 = vpop.xlane.xlu0 %1293 }
 0x44b   : > { %v1322_v14 = vsel %vm979_vm4, %v1320_v16, %v1294_v52  ;;  %1407 = vmatpush.bf16.msra.mxu0 %v3448_v54 }
 0x452   : > { %v1302_v27 = vpop.xlane.xlu0 %1301 }
 0x453   : > { %v1015_v4 = vpop.f32.mrf.mxu3  ;;  %v1324_v20 = vsel %vm982_vm5, %v1322_v14, %v1302_v27 }
 0x45a   : > { %v1310_v48 = vpop.xlane.xlu0 %1309  ;;  %v1347_v15 = vpop.permute.xlu1 %1346 }
 0x45b   : > { %v1326_v63 = vsel %vm985_vm6, %v1324_v20, %v1310_v48  ;;  %v1017_v26 = vpop.f32.mrf.mxu3  ;;  %1359 = vmatpush.bf16.msra.mxu3 %v1347_v15 }
 0x45c   : > { %v1328_v36 = vpack.c.bf16 %v1326_v63, %v1325_v17 }
 0x45e   : > { %3180 = vmatmul.msk.bf16.vlgmr.msrb.gmra.mxu2 %vm5091_vm7, %v1328_v36  ;;  %3181 = vmatmul.msk.bf16.vlgmr.msra.gmra.mxu3 %vm689_vm3, %v1327_v43 }
 0x463   : > { %v1035_v30 = vpop.f32.mrf.mxu3 }
 0x464   : > { %v1036_v51 = vadd.f32 %v1035_v30, %v1015_v4 }
 0x46b   : > { %v1037_v8 = vpop.f32.mrf.mxu3 }
 0x46c   : > { %v1038_v57 = vadd.f32 %v1037_v8, %v1017_v26  ;;  %v3832_v26 = vmov 32.0  }
 0x46d   : > { %3702 = vrcp.f32 %v3832_v26  ;;  %v3671_v26 = vld [vmem:[%s5058_s8] ss:$0 sm:$0xff] }
 0x473   : > { %v3703_v36 = vpop.eup %3702 }
 0x474   : > { %v1425_v43 = vmul.f32 32.0, %v3703_v36  ;;  %vm1429_vm8 = vweird.f32 %v3703_v36 }
 0x476   : > { %v1426_v30 = vsub.f32 1.0, %v1425_v43 }
 0x4e1   : > { %v1341_v45 = vpop.f32.mrf.mxu2  ;;  %v1361_v52 = vpop.f32.mrf.mxu3 }
 0x4e2   : > { %v1362_v5 = vadd.f32 %v1361_v52, %v1341_v45 }
 0x4e9   : > { %v1343_v59 = vpop.f32.mrf.mxu2  ;;  %v1363_v25 = vpop.f32.mrf.mxu3 }
 0x4ea   : > { %v1364_v7 = vadd.f32 %v1363_v25, %v1343_v59 }
 0x4ec   : > { %v3592_v53 = vpack.i.bf16 %v1364_v7, %v1362_v5 }
 0x4ee   : > { %3593 = vrot.lane.b32.xlu2 %v3592_v53, %s5077_s30  ;;  %s5111_s30 = smov 64  }
 0x548   : > { %v3594_v23 = vpop.permute.xlu2 %3593 }
 0x549   : > { %v3596_v1 = vunpack.i.h.bf16 %v3594_v23  ;;  %v3595_v2 = vunpack.i.l.bf16 %v3594_v23 }
 0x54b   : > { %v1375_v27 = vsel %vm689_vm3, %v1038_v57, %v3596_v1  ;;  %v1374_v4 = vsel %vm689_vm3, %v1036_v51, %v3595_v2  ;;  %v1427_v51 = vmul.f32 %v3703_v36, %v1426_v30 }
 0x54c   : > { %v1376_v58 = vpack.c.bf16 %v1375_v27, %v1374_v4 }
 0x54d   : > { %v1428_v47 = vadd.f32 %v3703_v36, %v1427_v51  ;;  %v3672_v51 = vld [vmem:[%s5059_s9] ss:$0 sm:$0xff] }
 0x54e   : > { %3190 = vmatmul.msk.bf16.vlgmr.msra.gmra.mxu0 %vm660_vm2, %v1376_v58 }
 0x54f   : > { %v4434_v8 = vsel %vm1429_vm8, %v3703_v36, %v1428_v47  ;;  %v3453_v36 = vld [vmem:[%s5062_s12 + $0x18] sm:$0xff] }
 0x5cb   : > { %v1409_v16 = vpop.f32.mrf.mxu0 }
 0x5cc   : > { %v1410_v33 = vadd.f32 %v3670_v19, %v1409_v16 }
 0x5ce   : > { %v1414_v14 = vadd.f32 %v1410_v33, %v4013_v11  ;;  %v3455_v33 = vld [vmem:[%s5062_s12 + $0x28] sm:$0xff] }
 0x5cf   : > { %1582 = vmatpush.bf16.msra.mxu1 %v3455_v33 }
 0x5d0   : > { %v1418_v20 = vsel %vm660_vm2, %v1414_v14, 0.0 }
 0x5d1   : > { %1419 = vadd.xlane.f32.xlu0 %v1418_v20  ;;  %v3454_v20 = vld [vmem:[%s5062_s12 + $0x20] sm:$0xff] }
 0x5d3   : > { %v1411_v48 = vpop.f32.mrf.mxu0  ;;  %1583 = vmatpush.bf16.msra.mxu1 %v3454_v20 }
 0x5d4   : > { %v1412_v15 = vadd.f32 %v3670_v19, %v1411_v48 }
 0x5d6   : > { %v1415_v17 = vadd.f32 %v1412_v15, %v4016_v12 }
 0x5d7   : > { %1584 = vmatpush.bf16.msra.mxu1 %v3453_v36 }
 0x5d8   : > { %v1421_v63 = vsel %vm660_vm2, %v1415_v17, 0.0 }
 0x5d9   : > { %1422 = vadd.xlane.f32.xlu0 %v1421_v63 }
 0x644   : > { %v1420_v11 = vpop.xlane.xlu0 %1419 }
 0x645   : > { %v1431_v45 = vmul.f32 %v4434_v8, %v1420_v11 }
 0x647   : > { %v1433_v52 = vsub.f32 %v1414_v14, %v1431_v45 }
 0x649   : > { %v1435_v59 = vmul.f32 %v1433_v52, %v1433_v52 }
 0x64b   : > { %v1437_v12 = vsel %vm660_vm2, %v1435_v59, 0.0  ;;  %v3452_v59 = vld [vmem:[%s5062_s12 + $0x10] sm:$0xff] }
 0x64c   : > { %1438 = vadd.xlane.f32.xlu0 %v1437_v12  ;;  %v1423_v25 = vpop.xlane.xlu0 %1422  ;;  %1585 = vmatpush.bf16.msra.mxu1 %v3452_v59 }
 0x64d   : > { %v1432_v5 = vmul.f32 %v4434_v8, %v1423_v25 }
 0x64f   : > { %v1434_v7 = vsub.f32 %v1415_v17, %v1432_v5 }
 0x651   : > { %v1436_v53 = vmul.f32 %v1434_v7, %v1434_v7 }
 0x653   : > { %v1440_v54 = vsel %vm660_vm2, %v1436_v53, 0.0  ;;  %v3451_v53 = vld [vmem:[%s5062_s12 + $0x8] sm:$0xff] }
 0x654   : > { %1441 = vadd.xlane.f32.xlu2 %v1440_v54  ;;  %1586 = vmatpush.bf16.msra.mxu1 %v3451_v53 }
 0x6bf   : > { %v1439_v23 = vpop.xlane.xlu0 %1438 }
 0x6c0   : > { %v1443_v57 = vmul.f32 %v1439_v23, %v4434_v8 }
 0x6c2   : > { %v1445_v1 = vadd.f32 1e-05, %v1443_v57 }
 0x6c4   : > { %3704 = vrsqrt.f32 %v1445_v1  ;;  %vm1453_vm10 = vweird.f32 %v1445_v1 }
 0x6c7   : > { %v1442_v2 = vpop.xlane.xlu2 %1441 }
 0x6c8   : > { %v1444_v27 = vmul.f32 %v1442_v2, %v4434_v8 }
 0x6ca   : > { %v3705_v4 = vpop.eup %3704  ;;  %v1446_v58 = vadd.f32 1e-05, %v1444_v27 }
 0x6cb   : > { %v1448_v19 = vmul.f32 %v3705_v4, %v1445_v1  ;;  %vm1454_vm9 = vweird.f32 %v3705_v4 }
 0x6cc   : > { %3706 = vrsqrt.f32 %v1446_v58  ;;  %vm1455_vm11 = vmor %vm1453_vm10, %vm1454_vm9  ;;  %vm1463_vm8 = vweird.f32 %v1446_v58  ;;  %vm5090_vm10 = vcmask 1040384  }
 0x6cd   : > { %v1449_v16 = vmul.f32 %v3705_v4, %v1448_v19 }
 0x6cf   : > { %v1450_v14 = vmul.f32 0.5, %v1449_v16 }
 0x6d1   : > { %v1451_v48 = vsub.f32 1.5, %v1450_v14 }
 0x6d2   : > { %v3707_v15 = vpop.eup %3706 }
 0x6d3   : > { %v1452_v17 = vmul.f32 %v3705_v4, %v1451_v48  ;;  %v1458_v63 = vmul.f32 %v3707_v15, %v1446_v58  ;;  %vm1464_vm12 = vweird.f32 %v3707_v15 }
 0x6d4   : > { %vm1465_vm9 = vmor %vm1463_vm8, %vm1464_vm12  ;;  %vm5088_vm12 = vcmask 1046528   ;;  %vm5087_vm8 = vcmask 523264  }
 0x6d5   : > { %v1456_v43 = vsel %vm1455_vm11, %v3705_v4, %v1452_v17  ;;  %v1459_v30 = vmul.f32 %v3707_v15, %v1458_v63  ;;  %vm5089_vm11 = vcmask 1045504  }
 0x6d6   : > { %v1467_v47 = vmul.f32 %v1456_v43, %v1433_v52 }
 0x6d7   : > { %v1460_v11 = vmul.f32 0.5, %v1459_v30 }
 0x6d8   : > { %v1472_v45 = vmul.f32 %v3671_v26, %v1467_v47 }
 0x6d9   : > { %v1461_v12 = vsub.f32 1.5, %v1460_v11 }
 0x6da   : > { %v4460_v25 = vadd.f32 %v3672_v51, %v1472_v45 }
 0x6db   : > { %v1462_v5 = vmul.f32 %v3707_v15, %v1461_v12 }
 0x6dc   : > { %v1479_v54 = vmul.f32 %v4007_v9, %v4460_v25 }
 0x6dd   : > { %v1466_v52 = vsel %vm1465_vm9, %v3707_v15, %v1462_v5  ;;  %vm5086_vm9 = vcmask 785408  }
 0x6de   : > { %v1468_v23 = vmul.f32 %v1466_v52, %v1434_v7  ;;  %v1484_v1 = vrot.slane %v1479_v54, 7 }
 0x6e0   : > { %v1473_v57 = vmul.f32 %v3671_v26, %v1468_v23  ;;  %v1490_v4 = vsel %vm5090_vm10, 0.0, %v1484_v1 }
 0x6e1   : > { %v1507_v33 = vrot.slane %v1490_v4, 2  ;;  %v1495_v7 = vrot.slane %v1490_v4, 1 }
 0x6e2   : > { %v4467_v2 = vadd.f32 %v3672_v51, %v1473_v57  ;;  %v3450_v51 = vld [vmem:[%s5062_s12] sm:$0xff] }
 0x6e3   : > { %1587 = vmatpush.bf16.msra.mxu1 %v3450_v51 }
 0x6e4   : > { %v1480_v27 = vmul.f32 %v4010_v10, %v4467_v2 }
 0x6e6   : > { %v1485_v58 = vrot.slane %v1480_v27, 7  ;;  %v3466_v27 = vld [vmem:[%s5064_s14 + $0x50] sm:$0xff] }
 0x6e8   : > { %v1486_v19 = vsel %vm5090_vm10, %v1484_v1, %v1485_v58  ;;  %v1491_v16 = vsel %vm5090_vm10, %v1485_v58, 0.0  ;;  %v3467_v1 = vld [vmem:[%s5064_s14 + $0x58] sm:$0xff]  ;;  %v3464_v58 = vld [vmem:[%s5064_s14 + $0x40] sm:$0xff] }
 0x6e9   : > { %v1508_v14 = vrot.slane %v1486_v19, 2  ;;  %v1510_v20 = vrot.slane %v1491_v16, 2  ;;  %v1496_v48 = vrot.slane %v1486_v19, 1  ;;  %v1498_v15 = vrot.slane %v1491_v16, 1  ;;  %1753 = vmatpush.bf16.msrb.mxu3 %v3467_v1  ;;  %v3462_v16 = vld [vmem:[%s5064_s14 + $0x30] sm:$0xff] }
 0x6eb   : > { %v1509_v17 = vsel %vm5089_vm11, %v1507_v33, %v1508_v14  ;;  %v1511_v63 = vsel %vm5089_vm11, %v1508_v14, %v1510_v20  ;;  %v1497_v26 = vsel %vm5088_vm12, %v1495_v7, %v1496_v48  ;;  %v1499_v36 = vsel %vm5088_vm12, %v1496_v48, %v1498_v15  ;;  %v3673_v33 = vld [vmem:[%s5063_s13] ss:$0 sm:$0xff]  ;;  %v3461_v7 = vld [vmem:[%s5064_s14 + $0x28] sm:$0xff] }
 0x6ec   : > { %v3602_v43 = vpack.i.bf16 %v1511_v63, %v1509_v17  ;;  %v3597_v30 = vpack.i.bf16 %v1499_v36, %v1497_v26  ;;  %v3460_v48 = vld [vmem:[%s5064_s14 + $0x20] sm:$0xff]  ;;  %v3459_v17 = vld [vmem:[%s5064_s14 + $0x18] sm:$0xff] }
 0x6ed   : > { %1754 = vmatpush.bf16.msrb.mxu3 %v3466_v27 }
 0x6ee   : > { %3603 = vrot.lane.b32.xlu0 %v3602_v43, %s5083_s1  ;;  %3598 = vrot.lane.b32.xlu1 %v3597_v30, %s5081_s23  ;;  %v3458_v43 = vld [vmem:[%s5064_s14 + $0x10] sm:$0xff]  ;;  %s5120_s23 = smov 16  }
 0x760   : > { %v3604_v47 = vpop.permute.xlu0 %3603  ;;  %v3599_v11 = vpop.permute.xlu1 %3598 }
 0x761   : > { %v3606_v45 = vunpack.i.h.bf16 %v3604_v47  ;;  %v3605_v59 = vunpack.i.l.bf16 %v3604_v47  ;;  %v3601_v12 = vunpack.i.h.bf16 %v3599_v11  ;;  %v3600_v5 = vunpack.i.l.bf16 %v3599_v11  ;;  %v3457_v11 = vld [vmem:[%s5064_s14 + $0x8] sm:$0xff] }
 0x763   : > { %v1519_v53 = vsel %vm660_vm2, %v1486_v19, %v3601_v12  ;;  %v1518_v52 = vsel %vm660_vm2, %v1490_v4, %v3600_v5  ;;  %v3465_v4 = vld [vmem:[%s5064_s14 + $0x48] sm:$0xff]  ;;  %v3463_v19 = vld [vmem:[%s5064_s14 + $0x38] sm:$0xff] }
 0x764   : > { %v1522_v54 = vsel %vm5087_vm8, %v1519_v53, %v3606_v45  ;;  %v1521_v23 = vsel %vm5087_vm8, %v1518_v52, %v3605_v59  ;;  %1755 = vmatpush.bf16.msrb.mxu3 %v3465_v4  ;;  %1735 = vmatpush.bf16.msra.mxu2 %v3463_v19 }
 0x765   : > { %v1523_v57 = vpack.c.bf16 %v1522_v54, %v1521_v23 }
 0x767   : > { %3215 = vmatmul.msk.bf16.vlgmr.msra.gmra.mxu1 %vm5086_vm9, %v1523_v57 }
 0x768   : > { %1756 = vmatpush.bf16.msrb.mxu3 %v3464_v58  ;;  %1736 = vmatpush.bf16.msra.mxu2 %v3462_v16 }
 0x76c   : > { %1737 = vmatpush.bf16.msra.mxu2 %v3461_v7  ;;  %v3456_v7 = vld [vmem:[%s5064_s14] sm:$0xff] }
 0x770   : > { %1738 = vmatpush.bf16.msra.mxu2 %v3460_v48 }
 0x774   : > { %1739 = vmatpush.bf16.msra.mxu2 %v3459_v17 }
 0x778   : > { %1740 = vmatpush.bf16.msra.mxu2 %v3458_v43 }
 0x77c   : > { %1741 = vmatpush.bf16.msra.mxu2 %v3457_v11 }
 0x780   : > { %1742 = vmatpush.bf16.msra.mxu2 %v3456_v7 }
 0x7e4   : > { %v1589_v14 = vpop.f32.mrf.mxu1 }
 0x7e5   : > { %v1590_v20 = vadd.f32 %v3673_v33, %v1589_v14 }
 0x7e7   : > { %v1594_v15 = vmax.f32 %v1590_v20, 0.0 }
 0x7e9   : > { %v1596_v63 = vmul.f32 %v4007_v9, %v1594_v15 }
 0x7eb   : > { %v1600_v30 = vrot.slane %v1596_v63, 7 }
 0x7ec   : > { %v1591_v26 = vpop.f32.mrf.mxu1 }
 0x7ed   : > { %v1592_v36 = vadd.f32 %v3673_v33, %v1591_v26  ;;  %v1606_v45 = vsel %vm5090_vm10, 0.0, %v1600_v30  ;;  %v3674_v26 = vld [vmem:[%s5065_s15] ss:$0 sm:$0xff] }
 0x7ee   : > { %v1610_v12 = vrot.slane %v1606_v45, 1  ;;  %v1621_v5 = vrot.slane %v1606_v45, 2 }
 0x7ef   : > { %v1595_v51 = vmax.f32 %v1592_v36, 0.0 }
 0x7f1   : > { %v1597_v47 = vmul.f32 %v4010_v10, %v1595_v51 }
 0x7f3   : > { %v1601_v59 = vrot.slane %v1597_v47, 7 }
 0x7f5   : > { %v1602_v53 = vsel %vm5090_vm10, %v1600_v30, %v1601_v59  ;;  %v1607_v52 = vsel %vm5090_vm10, %v1601_v59, 0.0 }
 0x7f6   : > { %v1613_v54 = vrot.slane %v1607_v52, 1  ;;  %v1622_v23 = vrot.slane %v1602_v53, 2  ;;  %v1624_v57 = vrot.slane %v1607_v52, 2  ;;  %v1611_v1 = vrot.slane %v1602_v53, 1 }
 0x7f8   : > { %v1625_v27 = vsel %vm5089_vm11, %v1622_v23, %v1624_v57  ;;  %v1623_v4 = vsel %vm5089_vm11, %v1621_v5, %v1622_v23  ;;  %v1612_v58 = vsel %vm5088_vm12, %v1610_v12, %v1611_v1  ;;  %v1614_v19 = vsel %vm5088_vm12, %v1611_v1, %v1613_v54 }
 0x7f9   : > { %v1631_v16 = vpack.c.bf16 %v1625_v27, %v1623_v4  ;;  %v3607_v33 = vpack.i.bf16 %v1614_v19, %v1612_v58 }
 0x7fb   : > { %3264 = vmatmul.msk.bf16.vlgmr.msrb.gmra.mxu3 %vm5087_vm8, %v1631_v16  ;;  %3608 = vrot.lane.b32.xlu1 %v3607_v33, %s5111_s30 }
 0x86d   : > { %v3609_v14 = vpop.permute.xlu1 %3608 }
 0x86e   : > { %v3611_v20 = vunpack.i.h.bf16 %v3609_v14  ;;  %v3610_v48 = vunpack.i.l.bf16 %v3609_v14  ;;  %v3471_v14 = vld [vmem:[%s5057_s7 + $0x8] sm:$0x10] }
 0x870   : > { %v1629_v15 = vsel %vm5087_vm8, %v1602_v53, %v3611_v20  ;;  %v1628_v17 = vsel %vm5087_vm8, %v1606_v45, %v3610_v48 }
 0x871   : > { %v1630_v63 = vpack.c.bf16 %v1629_v15, %v1628_v17 }
 0x873   : > { %1743 = vmatmul.bf16.vlgmr.msra.gmra.mxu2 %v1630_v63  ;;  %v3469_v63 = vld [vmem:[%s5106_s29 + $0x18] sm:$0xff] }
 0x874   : > { %1855 = vmatpush.bf16.msrb.mxu0 %v3469_v63 }
 0x87e   : > { %v1758_v36 = vpop.f32.mrf.mxu3 }
 0x886   : > { %v1760_v53 = vpop.f32.mrf.mxu3 }
 0x8f6   : > { %v1744_v43 = vpop.f32.mrf.mxu2 }
 0x8f7   : > { %v1745_v30 = vadd.f32 %v3674_v26, %v1744_v43 }
 0x8f9   : > { %v1759_v51 = vadd.f32 %v1758_v36, %v1745_v30 }
 0x8fb   : > { %v1763_v47 = vmul.f32 %v4007_v9, %v1759_v51 }
 0x8fd   : > { %v1765_v11 = vadd.f32 %v1763_v47, %v4460_v25 }
 0x8fe   : > { %v1746_v59 = vpop.f32.mrf.mxu2 }
 0x8ff   : > { %v1747_v12 = vadd.f32 %v3674_v26, %v1746_v59  ;;  %v1769_v5 = vsel %vm660_vm2, %v1765_v11, 0.0  ;;  %v3468_v26 = vld [vmem:[%s5106_s29 + $0x10] sm:$0xff] }
 0x900   : > { %1770 = vadd.xlane.f32.xlu1 %v1769_v5  ;;  %1856 = vmatpush.bf16.msrb.mxu0 %v3468_v26  ;;  %v3677_v26 = vld [vmem:[%s5108_s3 + $0x1] ss:$0 sm:$0xff]  ;;  %s3768_s3 = scalar_lea.hbm %s5068_s18, 32 }
 0x901   : > { %v1761_v45 = vadd.f32 %v1760_v53, %v1747_v12 }
 0x903   : > { %v1764_v52 = vmul.f32 %v4010_v10, %v1761_v45 }
 0x905   : > { %v1766_v54 = vadd.f32 %v1764_v52, %v4467_v2  ;;  %v3291_v2 = vld [vmem:[%s5057_s7 + $0x8] sm:$0xf] }
 0x906   : > { %v3292_v15 = vor.u32 %v3471_v14, %v3291_v2 }
 0x907   : > { %v1772_v23 = vsel %vm660_vm2, %v1766_v54, 0.0 }
 0x908   : > { %1773 = vadd.xlane.f32.xlu0 %v1772_v23  ;;  %v2177_v36 = vand.u32 %v3292_v15, %v4337_v34  ;;  %v3470_v15 = vld [vmem:[%s5056_s6 + $0x8] sm:$0x10] }
 0x90a   : > { %2186 = vmatpush.bf16.msra.mxu0 %v2177_v36 }
 0x973   : > { %v1771_v57 = vpop.xlane.xlu1 %1770 }
 0x974   : > { %v1775_v1 = vmul.f32 %v1771_v57, %v4434_v8 }
 0x976   : > { %v1777_v27 = vsub.f32 %v1765_v11, %v1775_v1  ;;  %v3675_v1 = vld [vmem:[%s5060_s10] ss:$0 sm:$0xff] }
 0x978   : > { %v1779_v4 = vmul.f32 %v1777_v27, %v1777_v27 }
 0x97a   : > { %v1781_v25 = vsel %vm660_vm2, %v1779_v4, 0.0 }
 0x97b   : > { %v1774_v58 = vpop.xlane.xlu0 %1773  ;;  %1782 = vadd.xlane.f32.xlu2 %v1781_v25 }
 0x97c   : > { %v1776_v19 = vmul.f32 %v1774_v58, %v4434_v8 }
 0x97e   : > { %v1778_v16 = vsub.f32 %v1766_v54, %v1776_v19  ;;  %v3676_v19 = vld [vmem:[%s5112_s24] ss:$0 sm:$0xff] }
 0x980   : > { %v1780_v33 = vmul.f32 %v1778_v16, %v1778_v16 }
 0x982   : > { %v1784_v7 = vsel %vm660_vm2, %v1780_v33, 0.0 }
 0x983   : > { %1785 = vadd.xlane.f32.xlu2 %v1784_v7 }
 0x9ee   : > { %v1783_v20 = vpop.xlane.xlu2 %1782 }
 0x9ef   : > { %v1787_v48 = vmul.f32 %v1783_v20, %v4434_v8 }
 0x9f1   : > { %v1789_v17 = vadd.f32 1e-05, %v1787_v48 }
 0x9f3   : > { %3708 = vrsqrt.f32 %v1789_v17  ;;  %vm1797_vm8 = vweird.f32 %v1789_v17 }
 0x9f6   : > { %v1786_v43 = vpop.xlane.xlu2 %1785 }
 0x9f7   : > { %v1788_v30 = vmul.f32 %v1786_v43, %v4434_v8 }
 0x9f9   : > { %v3709_v51 = vpop.eup %3708  ;;  %v1790_v47 = vadd.f32 1e-05, %v1788_v30 }
 0x9fa   : > { %v1792_v11 = vmul.f32 %v3709_v51, %v1789_v17  ;;  %vm1798_vm9 = vweird.f32 %v3709_v51 }
 0x9fb   : > { %3710 = vrsqrt.f32 %v1790_v47  ;;  %vm1799_vm12 = vmor %vm1797_vm8, %vm1798_vm9  ;;  %vm1807_vm10 = vweird.f32 %v1790_v47 }
 0x9fc   : > { %v1793_v59 = vmul.f32 %v3709_v51, %v1792_v11 }
 0x9fe   : > { %v1794_v12 = vmul.f32 0.5, %v1793_v59 }
 0xa00   : > { %v1795_v5 = vsub.f32 1.5, %v1794_v12 }
 0xa01   : > { %v3711_v53 = vpop.eup %3710 }
 0xa02   : > { %v1796_v45 = vmul.f32 %v3709_v51, %v1795_v5  ;;  %v1802_v52 = vmul.f32 %v3711_v53, %v1790_v47  ;;  %vm1808_vm11 = vweird.f32 %v3711_v53 }
 0xa03   : > { %vm1809_vm7 = vmor %vm1807_vm10, %vm1808_vm11 }
 0xa04   : > { %v1803_v54 = vmul.f32 %v3711_v53, %v1802_v52  ;;  %v1800_v34 = vsel %vm1799_vm12, %v3709_v51, %v1796_v45 }
 0xa05   : > { %v1811_v4 = vmul.f32 %v1800_v34, %v1777_v27  ;;  %v3286_v27 = vld [vmem:[%s5056_s6 + $0x8] sm:$0xf] }
 0xa06   : > { %v1804_v23 = vmul.f32 0.5, %v1803_v54 }
 0xa07   : > { %v1816_v33 = vmul.f32 %v3675_v1, %v1811_v4 }
 0xa08   : > { %v1805_v57 = vsub.f32 1.5, %v1804_v23  ;;  %v5116_v23 = vmov 4  }
 0xa09   : > { %v4574_v14 = vadd.f32 %v3676_v19, %v1816_v33 }
 0xa0a   : > { %v1806_v25 = vmul.f32 %v3711_v53, %v1805_v57 }
 0xa0c   : > { %v1810_v58 = vsel %vm1809_vm7, %v3711_v53, %v1806_v25 }
 0xa0d   : > { %v1812_v7 = vmul.f32 %v1810_v58, %v1778_v16  ;;  %v3287_v16 = vor.u32 %v3470_v15, %v3286_v27 }
 0xa0f   : > { %v1817_v2 = vmul.f32 %v3675_v1, %v1812_v7  ;;  %v1902_v17 = vsel %vm689_vm3, %v3287_v16, 0 }
 0xa10   : > { %1911 = vmatpush.bf16.xpose.msra.mxu3 %v1902_v17 }
 0xa11   : > { %v4576_v20 = vadd.f32 %v3676_v19, %v1817_v2 }
 0xa13   : > { %v1823_v48 = vpack.c.bf16 %v4576_v20, %v4574_v14 }
 0xa15   : > { %3278 = vmatmul.msk.bf16.vlgmr.msrb.gmra.mxu0 %vm660_vm2, %v1823_v48 }
 0xa16   : > { %2512 = vmatpush.bf16.msrb.mxu0 %v2177_v36 }
 0xa18   : > { %2245 = vmatpush.bf16.xpose.msrb.mxu3 %v1902_v17 }
 0xa92   : > { %v1858_v63 = vpop.f32.mrf.mxu0 }
 0xa93   : > { %v1859_v43 = vadd.f32 %v3677_v26, %v1858_v63 }
 0xa95   : > { %v1869_v51 = vmul.f32 0.25, %v1859_v43 }
 0xa9a   : > { %v1860_v36 = vpop.f32.mrf.mxu0 }
 0xa9b   : > { %v1861_v30 = vadd.f32 %v3677_v26, %v1860_v36 }
 0xa9d   : > { %v1870_v47 = vmul.f32 0.25, %v1861_v30  ;;  %v4591_v11 = vpack.c.bf16 %v1861_v30, %v1859_v43 }
 0xa9f   : > { %2216 = vrot.lane.b32.xlu0 %v4591_v11, %s5113_s21  ;;  %1874 = vrot.lane.b32.xlu1 %v4591_v11, %s5114_s22  ;;  %v1871_v59 = vpack.c.bf16 %v1870_v47, %v1869_v51  ;;  %s3494_s22 = sshll.u32 %s3955_s11, 4 }
 0xaa1   : > { %2214 = vrot.lane.b32.xlu2 %v1871_v59, %s5115_s28  ;;  %3288 = vmatmul.msk.bf16.vlgmr.msra.gmra.mxu3 %vm689_vm3, %v1871_v59  ;;  %s548_s28 = sand.u32 1, %s3804_s19  }
 0xaa2   : > { %s3131_s1 = sshll.u32 %s548_s28, 4 }
 0xafb   : > { %v2215_v12 = vpop.permute.xlu2 %2214 }
 0xafc   : > { %3296 = vmatmul.msk.bf16.vlgmr.msrb.gmra.mxu3 %vm689_vm3, %v2215_v12 }
 0xb11   : > { %v2217_v5 = vpop.permute.xlu0 %2216  ;;  %v1875_v53 = vpop.permute.xlu1 %1874 }
 0xb12   : > { %v2222_v45 = vsel %vm689_vm3, %v2217_v5, 0  ;;  %v1880_v52 = vsel %vm689_vm3, %v1875_v53, 0 }
 0xb13   : > { %1889 = vmatpush.bf16.xpose.msrb.mxu1 %v1880_v52 }
 0xb1a   : > { %3283 = vmatmul.msk.bf16.vlgmr.msrb.gmra.mxu1 %vm689_vm3, %v1871_v59 }
 0xb1b   : > { %2231 = vmatpush.bf16.xpose.msra.mxu1 %v2222_v45 }
 0xb24   : > { %v1913_v54 = vpop.f32.mrf.mxu3 }
 0xb25   : > { %1969 = vperm.xlu0 %3616, %v1913_v54   ;;  %1945 = vperm.xlu1 %3614, %v1913_v54  }
 0xb26   : > { %1920 = vperm.xlu2 %3612, %v1913_v54  }
 0xb2a   : > { %3295 = vmatmul.msk.bf16.vlgmr.msra.gmra.mxu1 %vm689_vm3, %v2215_v12 }
 0xb2c   : > { %v1915_v34 = vpop.f32.mrf.mxu3 }
 0xb2d   : > { %3622 = vset.pattern.permute.xlu0 %v3820_v28  ;;  %3615 = vset.pattern.permute.xlu1 %v3825_v40 }
 0xb2e   : > { %3613 = vset.pattern.permute.xlu2 %v3820_v28  ;;  %1957 = vperm.xlu1 %3615, %v1913_v54  }
 0xb2f   : > { %1933 = vperm.xlu2 %3613, %v1913_v54   ;;  %1937 = vperm.xlu0 %3622, %v1915_v34  }
 0xb36   : > { %3619 = vset.pattern.permute.xlu1 %v3826_v41 }
 0xb37   : > { %3617 = vset.pattern.permute.xlu2 %v3822_v37  ;;  %3627 = vset.pattern.permute.xlu0 %v3824_v39 }
 0xb38   : > { %2005 = vperm.xlu1 %3619, %v1913_v54   ;;  %1981 = vperm.xlu2 %3617, %v1913_v54  }
 0xb39   : > { %1997 = vperm.xlu0 %3627, %v1915_v34  }
 0xb40   : > { %3620 = vset.pattern.permute.xlu1 %v3827_v42  ;;  %3618 = vset.pattern.permute.xlu2 %v3824_v39 }
 0xb41   : > { %2017 = vperm.xlu1 %3620, %v1913_v54   ;;  %1993 = vperm.xlu2 %3618, %v1913_v54  }
 0xb42   : > { %3630 = vset.pattern.permute.xlu0 %v3821_v29 }
 0xb49   : > { %3621 = vset.pattern.permute.xlu1 %v3821_v29  ;;  %3623 = vset.pattern.permute.xlu2 %v3823_v38 }
 0xb4a   : > { %1949 = vperm.xlu2 %3623, %v1915_v34   ;;  %1925 = vperm.xlu1 %3621, %v1915_v34  }
 0xb52   : > { %3624 = vset.pattern.permute.xlu2 %v3825_v40  ;;  %3625 = vset.pattern.permute.xlu1 %v5116_v23 }
 0xb53   : > { %1961 = vperm.xlu2 %3624, %v1915_v34   ;;  %1973 = vperm.xlu1 %3625, %v1915_v34  }
 0xb5b   : > { %3628 = vset.pattern.permute.xlu2 %v3826_v41  ;;  %3626 = vset.pattern.permute.xlu1 %v3822_v37 }
 0xb5c   : > { %2009 = vperm.xlu2 %3628, %v1915_v34   ;;  %1985 = vperm.xlu1 %3626, %v1915_v34  }
 0xb64   : > { %3629 = vset.pattern.permute.xlu2 %v3827_v42  ;;  %3633 = vset.pattern.permute.xlu1 %v3825_v40 }
 0xb65   : > { %2021 = vperm.xlu2 %3629, %v1915_v34  }
 0xb6d   : > { %3631 = vset.pattern.permute.xlu2 %v3820_v28 }
 0xb7f   : > { %v2247_v57 = vpop.f32.mrf.mxu3 }
 0xb80   : > { %2291 = vperm.xlu1 %3633, %v2247_v57   ;;  %2267 = vperm.xlu2 %3631, %v2247_v57   ;;  %v1921_v1 = vpop.permute.xlu2 %1920 }
 0xb81   : > { %2254 = vperm.xlu0 %3630, %v2247_v57   ;;  %v1928_v17 = vmul.f32 %v4088_v56, %v1921_v1 }
 0xb87   : > { %v2249_v4 = vpop.f32.mrf.mxu3 }
 0xb88   : > { %3634 = vset.pattern.permute.xlu1 %v5116_v23  ;;  %3632 = vset.pattern.permute.xlu2 %v3823_v38 }
 0xb89   : > { %3635 = vset.pattern.permute.xlu0 %v3822_v37  ;;  %2303 = vperm.xlu1 %3634, %v2247_v57   ;;  %v1934_v58 = vpop.permute.xlu2 %1933 }
 0xb8a   : > { %2279 = vperm.xlu2 %3632, %v2247_v57   ;;  %2315 = vperm.xlu0 %3635, %v2247_v57  }
 0xb91   : > { %3638 = vset.pattern.permute.xlu1 %v3827_v42 }
 0xb92   : > { %3636 = vset.pattern.permute.xlu2 %v3824_v39  ;;  %3641 = vset.pattern.permute.xlu0 %v3823_v38  ;;  %v1982_v33 = vpop.permute.xlu2 %1981 }
 0xb93   : > { %2351 = vperm.xlu1 %3638, %v2247_v57   ;;  %2327 = vperm.xlu2 %3636, %v2247_v57  }
 0xb94   : > { %2283 = vperm.xlu0 %3641, %v2249_v4  }
 0xb97   : > { %v1946_v25 = vpop.permute.xlu1 %1945  ;;  %v1970_v2 = vpop.permute.xlu0 %1969 }
 0xb98   : > { %v1952_v59 = vmul.f32 %v4099_v61, %v1946_v25  ;;  %v1988_v25 = vmul.f32 %v4116_v18, %v1982_v33 }
 0xb9b   : > { %3639 = vset.pattern.permute.xlu1 %v3821_v29  ;;  %3637 = vset.pattern.permute.xlu2 %v3826_v41  ;;  %v1994_v29 = vpop.permute.xlu2 %1993 }
 0xb9c   : > { %3646 = vset.pattern.permute.xlu0 %v3826_v41  ;;  %2339 = vperm.xlu2 %3637, %v2247_v57   ;;  %v1891_v41 = vpop.f32.mrf.mxu1  ;;  %v1976_v57 = vmul.f32 %v4110_v13, %v1970_v2 }
 0xb9d   : > { %2343 = vperm.xlu0 %3646, %v2249_v4   ;;  %2259 = vperm.xlu1 %3639, %v2249_v4   ;;  %v1892_v27 = vadd.f32 %v1891_v41, %v4085_v55 }
 0xb9f   : > { %v1930_v26 = vadd.f32 %v1928_v17, %v1892_v27 }
 0xba0   : > { %v1958_v19 = vpop.permute.xlu1 %1957 }
 0xba1   : > { %v1938_v16 = vpop.permute.xlu0 %1937  ;;  %v1964_v12 = vmul.f32 %v4103_v0, %v1958_v19 }
 0xba4   : > { %3642 = vset.pattern.permute.xlu2 %v3825_v40  ;;  %v1893_v40 = vpop.f32.mrf.mxu1 }
 0xba5   : > { %3640 = vset.pattern.permute.xlu1 %v3820_v28  ;;  %2295 = vperm.xlu2 %3642, %v2249_v4   ;;  %v1950_v28 = vpop.permute.xlu2 %1949  ;;  %v1894_v15 = vadd.f32 %v1893_v40, %v4140_v49 }
 0xba6   : > { %2271 = vperm.xlu1 %3640, %v2249_v4   ;;  %3668 = vset.pattern.permute.xlu0 %v3827_v42  ;;  %v1953_v51 = vmul.f32 %v4156_v62, %v1950_v28 }
 0xbaa   : > { %v2006_v38 = vpop.permute.xlu1 %2005 }
 0xbab   : > { %v1998_v1 = vpop.permute.xlu0 %1997  ;;  %v2012_v2 = vmul.f32 %v4125_v24, %v2006_v38 }
 0xbac   : > { %v2001_v19 = vmul.f32 %v4172_v22, %v1998_v1 }
 0xbad   : > { %3643 = vset.pattern.permute.xlu2 %v5116_v23  ;;  %v1962_v43 = vpop.permute.xlu2 %1961 }
 0xbae   : > { %3644 = vset.pattern.permute.xlu1 %v3822_v37  ;;  %2307 = vperm.xlu2 %3643, %v2249_v4   ;;  %v1965_v45 = vmul.f32 %v4159_v44, %v1962_v43 }
 0xbaf   : > { %2319 = vperm.xlu1 %3644, %v2249_v4  }
 0xbb3   : > { %v2018_v7 = vpop.permute.xlu1 %2017 }
 0xbb6   : > { %3647 = vset.pattern.permute.xlu2 %v3827_v42  ;;  %v1941_v42 = vmul.f32 %v4150_v46, %v1938_v16  ;;  %v2010_v23 = vpop.permute.xlu2 %2009 }
 0xbb7   : > { %3645 = vset.pattern.permute.xlu1 %v3824_v39  ;;  %2355 = vperm.xlu2 %3647, %v2249_v4   ;;  %v1940_v39 = vmul.f32 %v4096_v60, %v1934_v58 }
 0xbb8   : > { %2331 = vperm.xlu1 %3645, %v2249_v4  }
 0xbb9   : > { %v1942_v30 = vadd.f32 %v1940_v39, %v1930_v26  ;;  %v2024_v26 = vmul.f32 %v4130_v31, %v2018_v7 }
 0xbbb   : > { %v1954_v53 = vadd.f32 %v1952_v59, %v1942_v30 }
 0xbbc   : > { %v1926_v48 = vpop.permute.xlu1 %1925 }
 0xbbd   : > { %v1929_v37 = vmul.f32 %v4143_v50, %v1926_v48  ;;  %v1966_v52 = vadd.f32 %v1964_v12, %v1954_v53 }
 0xbbf   : > { %v1931_v63 = vadd.f32 %v1929_v37, %v1894_v15  ;;  %v1978_v58 = vadd.f32 %v1976_v57, %v1966_v52  ;;  %v2000_v15 = vmul.f32 %v4120_v21, %v1994_v29  ;;  %v2013_v37 = vmul.f32 %v4176_v32, %v2010_v23  ;;  %v2022_v16 = vpop.permute.xlu2 %2021 }
 0xbc1   : > { %v1943_v36 = vadd.f32 %v1941_v42, %v1931_v63  ;;  %v1990_v48 = vadd.f32 %v1988_v25, %v1978_v58  ;;  %v2025_v42 = vmul.f32 %v4180_v35, %v2022_v16 }
 0xbc3   : > { %v1955_v5 = vadd.f32 %v1953_v51, %v1943_v36  ;;  %v2002_v17 = vadd.f32 %v2000_v15, %v1990_v48  ;;  %v2233_v51 = vpop.f32.mrf.mxu1 }
 0xbc4   : > { %v2234_v59 = vadd.f32 %v2233_v51, %v4085_v55 }
 0xbc5   : > { %v1974_v47 = vpop.permute.xlu1 %1973  ;;  %v1967_v54 = vadd.f32 %v1965_v45, %v1955_v5  ;;  %v2014_v43 = vadd.f32 %v2012_v2, %v2002_v17 }
 0xbc6   : > { %v1977_v34 = vmul.f32 %v4163_v3, %v1974_v47 }
 0xbc7   : > { %v4660_v39 = vadd.f32 %v2024_v26, %v2014_v43 }
 0xbc8   : > { %v1979_v41 = vadd.f32 %v1977_v34, %v1967_v54 }
 0xbc9   : > { %v2028_v30 = vsel %vm689_vm3, %v4660_v39, -inf }
 0xbce   : > { %v1986_v4 = vpop.permute.xlu1 %1985 }
 0xbcf   : > { %v1989_v28 = vmul.f32 %v4167_v6, %v1986_v4 }
 0xbd1   : > { %v1991_v40 = vadd.f32 %v1989_v28, %v1979_v41 }
 0xbd3   : > { %v2003_v27 = vadd.f32 %v2001_v19, %v1991_v40 }
 0xbd5   : > { %v2015_v63 = vadd.f32 %v2013_v37, %v2003_v27 }
 0xbd7   : > { %v4658_v33 = vadd.f32 %v2025_v42, %v2015_v63  ;;  %v2235_v63 = vpop.f32.mrf.mxu1 }
 0xbd8   : > { %v2236_v42 = vadd.f32 %v2235_v63, %v4140_v49 }
 0xbd9   : > { %v2031_v36 = vsel %vm689_vm3, %v4658_v33, -inf }
 0xbda   : > { %v2268_v29 = vpop.permute.xlu2 %2267 }
 0xbdb   : > { %v2274_v53 = vmul.f32 %v4096_v60, %v2268_v29 }
 0xbe0   : > { %2032 = vmax.xlane.f32.xlu2 %v2031_v36 }
 0xbe2   : > { %2029 = vmax.xlane.f32.xlu1 %v2028_v30 }
 0xbe4   : > { %v2280_v38 = vpop.permute.xlu2 %2279 }
 0xbe5   : > { %v2286_v52 = vmul.f32 %v4099_v61, %v2280_v38 }
 0xbed   : > { %v2328_v5 = vpop.permute.xlu2 %2327 }
 0xbee   : > { %v2334_v25 = vmul.f32 %v4120_v21, %v2328_v5 }
 0xbf2   : > { %v2292_v47 = vpop.permute.xlu1 %2291 }
 0xbf3   : > { %v2255_v7 = vpop.permute.xlu0 %2254  ;;  %v2298_v34 = vmul.f32 %v4103_v0, %v2292_v47 }
 0xbf4   : > { %v2262_v12 = vmul.f32 %v4088_v56, %v2255_v7 }
 0xbf6   : > { %v2264_v45 = vadd.f32 %v2262_v12, %v2234_v59  ;;  %v2340_v28 = vpop.permute.xlu2 %2339 }
 0xbf7   : > { %v2346_v40 = vmul.f32 %v4125_v24, %v2340_v28 }
 0xbf8   : > { %v2276_v54 = vadd.f32 %v2274_v53, %v2264_v45 }
 0xbfa   : > { %v2288_v23 = vadd.f32 %v2286_v52, %v2276_v54 }
 0xbfb   : > { %v2304_v57 = vpop.permute.xlu1 %2303 }
 0xbfc   : > { %v2300_v1 = vadd.f32 %v2298_v34, %v2288_v23  ;;  %v2310_v4 = vmul.f32 %v4110_v13, %v2304_v57  ;;  %v2316_v58 = vpop.permute.xlu0 %2315 }
 0xbfd   : > { %v2322_v55 = vmul.f32 %v4116_v18, %v2316_v58 }
 0xbfe   : > { %v2312_v41 = vadd.f32 %v2310_v4, %v2300_v1 }
 0xbff   : > { %v2296_v43 = vpop.permute.xlu2 %2295 }
 0xc00   : > { %v2324_v19 = vadd.f32 %v2322_v55, %v2312_v41  ;;  %v2299_v59 = vmul.f32 %v4159_v44, %v2296_v43 }
 0xc02   : > { %v2336_v48 = vadd.f32 %v2334_v25, %v2324_v19 }
 0xc04   : > { %v2348_v27 = vadd.f32 %v2346_v40, %v2336_v48 }
 0xc05   : > { %v2352_v15 = vpop.permute.xlu1 %2351 }
 0xc06   : > { %v2358_v37 = vmul.f32 %v4130_v31, %v2352_v15  ;;  %v2284_v38 = vpop.permute.xlu0 %2283 }
 0xc07   : > { %v2287_v47 = vmul.f32 %v4156_v62, %v2284_v38 }
 0xc08   : > { %v2360_v16 = vadd.f32 %v2358_v37, %v2348_v27  ;;  %v2308_v5 = vpop.permute.xlu2 %2307 }
 0xc09   : > { %v2311_v45 = vmul.f32 %v4163_v3, %v2308_v5 }
 0xc0a   : > { %v2362_v17 = vsel %vm689_vm3, %v2360_v16, -inf }
 0xc0b   : > { %2363 = vmax.xlane.f32.xlu0 %v2362_v17 }
 0xc0f   : > { %v2260_v2 = vpop.permute.xlu1 %2259  ;;  %v2344_v54 = vpop.permute.xlu0 %2343 }
 0xc10   : > { %v2263_v26 = vmul.f32 %v4143_v50, %v2260_v2  ;;  %v2347_v4 = vmul.f32 %v4176_v32, %v2344_v54 }
 0xc11   : > { %v2356_v1 = vpop.permute.xlu2 %2355 }
 0xc12   : > { %v2265_v29 = vadd.f32 %v2263_v26, %v2236_v42  ;;  %v2359_v41 = vmul.f32 %v4180_v35, %v2356_v1 }
 0xc18   : > { %v2272_v36 = vpop.permute.xlu1 %2271 }
 0xc19   : > { %v2275_v30 = vmul.f32 %v4150_v46, %v2272_v36 }
 0xc1b   : > { %v2277_v51 = vadd.f32 %v2275_v30, %v2265_v29 }
 0xc1d   : > { %v2289_v7 = vadd.f32 %v2287_v47, %v2277_v51 }
 0xc1f   : > { %v2301_v53 = vadd.f32 %v2299_v59, %v2289_v7 }
 0xc21   : > { %v2320_v12 = vpop.permute.xlu1 %2319  ;;  %v2313_v52 = vadd.f32 %v2311_v45, %v2301_v53 }
 0xc22   : > { %v2323_v49 = vmul.f32 %v4167_v6, %v2320_v12 }
 0xc24   : > { %v2325_v23 = vadd.f32 %v2323_v49, %v2313_v52 }
 0xc2a   : > { %v2332_v34 = vpop.permute.xlu1 %2331 }
 0xc2b   : > { %v2335_v57 = vmul.f32 %v4172_v22, %v2332_v34 }
 0xc2d   : > { %v2337_v58 = vadd.f32 %v2335_v57, %v2325_v23 }
 0xc2f   : > { %v2349_v55 = vadd.f32 %v2347_v4, %v2337_v58 }
 0xc31   : > { %v2361_v28 = vadd.f32 %v2359_v41, %v2349_v55 }
 0xc33   : > { %v2365_v25 = vsel %vm689_vm3, %v2361_v28, -inf }
 0xc34   : > { %2366 = vmax.xlane.f32.xlu1 %v2365_v25 }
 0xc53   : > { %v2033_v19 = vpop.xlane.xlu2 %2032 }
 0xc54   : > { %v2035_v40 = vsub.f32 %v4658_v33, %v2033_v19 }
 0xc55   : > { %v2030_v48 = vpop.xlane.xlu1 %2029 }
 0xc56   : > { %v2038_v27 = vmul.f32 1.442695, %v2035_v40  ;;  %v2034_v15 = vsub.f32 %v4660_v39, %v2030_v48 }
 0xc58   : > { %3712 = vpow2.f32 %v2038_v27  ;;  %v2036_v37 = vmul.f32 1.442695, %v2034_v15 }
 0xc5a   : > { %3714 = vpow2.f32 %v2036_v37 }
 0xc5e   : > { %v4690_v17 = vpop.eup %3712 }
 0xc5f   : > { %v2043_v2 = vsel %vm689_vm3, %v4690_v17, 0.0 }
 0xc60   : > { %v3715_v63 = vpop.eup %3714  ;;  %2044 = vadd.xlane.f32.xlu0 %v2043_v2 }
 0xc61   : > { %v2040_v26 = vsel %vm689_vm3, %v3715_v63, 0.0 }
 0xc62   : > { %2041 = vadd.xlane.f32.xlu2 %v2040_v26 }
 0xc74   : > { %2519 = vrot.lane.b32.xlu0 %v4591_v11, %s5117_s27 }
 0xc7e   : > { %v2364_v33 = vpop.xlane.xlu0 %2363 }
 0xc7f   : > { %v2368_v42 = vsub.f32 %v2360_v16, %v2364_v33 }
 0xc81   : > { %v2370_v43 = vmul.f32 1.442695, %v2368_v42 }
 0xc83   : > { %3716 = vpow2.f32 %v2370_v43 }
 0xc89   : > { %v4697_v39 = vpop.eup %3716 }
 0xc8a   : > { %v2374_v36 = vsel %vm689_vm3, %v4697_v39, 0.0 }
 0xc8b   : > { %2375 = vadd.xlane.f32.xlu1 %v2374_v36 }
 0xca7   : > { %v2367_v29 = vpop.xlane.xlu1 %2366 }
 0xca8   : > { %v2369_v30 = vsub.f32 %v2361_v28, %v2367_v29 }
 0xcaa   : > { %v2372_v38 = vmul.f32 1.442695, %v2369_v30 }
 0xcac   : > { %3718 = vpow2.f32 %v2372_v38 }
 0xcb2   : > { %v4701_v51 = vpop.eup %3718 }
 0xcb3   : > { %v2377_v47 = vsel %vm689_vm3, %v4701_v51, 0.0 }
 0xcb4   : > { %2378 = vadd.xlane.f32.xlu2 %v2377_v47 }
 0xccc   : > { %2193 = vrot.lane.b32.xlu2 %v4591_v11, %s5111_s30 }
 0xcd3   : > { %v2045_v16 = vpop.xlane.xlu0 %2044 }
 0xcd4   : > { %3720 = vrcp.f32 %v2045_v16  ;;  %v2072_v25 = vand.u32 2147483648, %v2045_v16  ;;  %vm2066_vm9 = vweird.f32 %v2045_v16  ;;  %v2070_v19 = vand.u32 2147483647, %v2045_v16 }
 0xcd5   : > { %v2042_v7 = vpop.xlane.xlu2 %2041 }
 0xcd6   : > { %3722 = vrcp.f32 %v2042_v7  ;;  %v2057_v52 = vand.u32 2147483648, %v2042_v7  ;;  %v2055_v34 = vand.u32 2147483647, %v2042_v7  ;;  %vm2051_vm10 = vweird.f32 %v2042_v7 }
 0xcd7   : > { %v2073_v15 = vor.u32 1.1754944e-38, %v2072_v25 }
 0xcd8   : > { %v2058_v57 = vor.u32 1.1754944e-38, %v2057_v52  ;;  %vm2056_vm12 = vcmp.eq.f32.partialorder %v2055_v34, 8.507059e+37 }
 0xcda   : > { %v3721_v59 = vpop.eup %3720 }
 0xcdb   : > { %v2062_v5 = vmul.f32 %v3721_v59, %v2045_v16  ;;  %vm2067_vm8 = vweird.f32 %v3721_v59 }
 0xcdc   : > { %v3723_v12 = vpop.eup %3722 }
 0xcdd   : > { %v2047_v53 = vmul.f32 %v3723_v12, %v2042_v7  ;;  %v2063_v49 = vsub.f32 1.0, %v2062_v5  ;;  %vm2052_vm7 = vweird.f32 %v3723_v12 }
 0xcde   : > { %vm2053_vm11 = vmor %vm2051_vm10, %vm2052_vm7  ;;  %vm2071_vm10 = vcmp.eq.f32.partialorder %v2070_v19, 8.507059e+37 }
 0xcdf   : > { %v2048_v45 = vsub.f32 1.0, %v2047_v53  ;;  %v2064_v1 = vmul.f32 %v3721_v59, %v2063_v49  ;;  %vm2068_vm7 = vmor %vm2066_vm9, %vm2067_vm8 }
 0xce1   : > { %v2049_v54 = vmul.f32 %v3723_v12, %v2048_v45  ;;  %v2065_v41 = vadd.f32 %v3721_v59, %v2064_v1 }
 0xce3   : > { %v2050_v23 = vadd.f32 %v3723_v12, %v2049_v54  ;;  %v2069_v27 = vsel %vm2068_vm7, %v3721_v59, %v2065_v41 }
 0xce5   : > { %v2054_v11 = vsel %vm2053_vm11, %v3723_v12, %v2050_v23 }
 0xce6   : > { %v2059_v4 = vsel %vm2056_vm12, %v2058_v57, %v2054_v11 }
 0xce7   : > { %v4707_v58 = vmul.f32 %v3715_v63, %v2059_v4  ;;  %v2074_v63 = vsel %vm2071_vm10, %v2073_v15, %v2069_v27 }
 0xce8   : > { %v4722_v33 = vmul.f32 %v4690_v17, %v2074_v63 }
 0xce9   : > { %v2094_v55 = vmul.f32 %v4099_v61, %v4707_v58  ;;  %v2078_v28 = vmul.f32 %v4088_v56, %v4707_v58  ;;  %v2142_v37 = vmul.f32 %v4130_v31, %v4707_v58  ;;  %v2102_v2 = vmul.f32 %v4103_v0, %v4707_v58 }
 0xcea   : > { %v2086_v26 = vmul.f32 %v4096_v60, %v4707_v58  ;;  %v2079_v29 = vmul.f32 %v4143_v50, %v4722_v33  ;;  %v2110_v30 = vmul.f32 %v4110_v13, %v4707_v58  ;;  %v2134_v38 = vmul.f32 %v4125_v24, %v4707_v58 }
 0xceb   : > { %v2096_v40 = vsel %vm689_vm3, %v2094_v55, 0.0  ;;  %v2080_v48 = vsel %vm689_vm3, %v2078_v28, 0.0  ;;  %v2144_v42 = vsel %vm689_vm3, %v2142_v37, 0.0  ;;  %v2104_v43 = vsel %vm689_vm3, %v2102_v2, 0.0 }
 0xcec   : > { %2097 = vadd.xlane.f32.xlu1 %v2096_v40  ;;  %2081 = vadd.xlane.f32.xlu0 %v2080_v48  ;;  %v2088_v36 = vsel %vm689_vm3, %v2086_v26, 0.0  ;;  %v2083_v17 = vsel %vm689_vm3, %v2079_v29, 0.0  ;;  %v2112_v47 = vsel %vm689_vm3, %v2110_v30, 0.0  ;;  %v2136_v16 = vsel %vm689_vm3, %v2134_v38, 0.0 }
 0xced   : > { %v2103_v59 = vmul.f32 %v4159_v44, %v4722_v33  ;;  %v2118_v12 = vmul.f32 %v4116_v18, %v4707_v58  ;;  %v2095_v5 = vmul.f32 %v4156_v62, %v4722_v33  ;;  %v2111_v34 = vmul.f32 %v4163_v3, %v4722_v33 }
 0xcee   : > { %v2126_v23 = vmul.f32 %v4120_v21, %v4707_v58  ;;  %v2119_v41 = vmul.f32 %v4167_v6, %v4722_v33  ;;  %v2087_v55 = vmul.f32 %v4150_v46, %v4722_v33  ;;  %v2127_v37 = vmul.f32 %v4172_v22, %v4722_v33 }
 0xcef   : > { %v2107_v53 = vsel %vm689_vm3, %v2103_v59, 0.0  ;;  %v2120_v45 = vsel %vm689_vm3, %v2118_v12, 0.0  ;;  %v2099_v52 = vsel %vm689_vm3, %v2095_v5, 0.0  ;;  %v2115_v1 = vsel %vm689_vm3, %v2111_v34, 0.0  ;;  %v2520_v12 = vpop.permute.xlu0 %2519 }
 0xcf0   : > { %v2128_v11 = vsel %vm689_vm3, %v2126_v23, 0.0  ;;  %v2123_v40 = vsel %vm689_vm3, %v2119_v41, 0.0  ;;  %v2091_v48 = vsel %vm689_vm3, %v2087_v55, 0.0  ;;  %v2135_v2 = vmul.f32 %v4176_v32, %v4722_v33 }
 0xcf4   : > { %2145 = vadd.xlane.f32.xlu1 %v2144_v42  ;;  %2105 = vadd.xlane.f32.xlu0 %v2104_v43  ;;  %v2131_v42 = vsel %vm689_vm3, %v2127_v37, 0.0  ;;  %v2139_v43 = vsel %vm689_vm3, %v2135_v2, 0.0 }
 0xcf5   : > { %2089 = vadd.xlane.f32.xlu2 %v2088_v36  ;;  %v2143_v36 = vmul.f32 %v4180_v35, %v4722_v33 }
 0xcf7   : > { %v2147_v30 = vsel %vm689_vm3, %v2143_v36, 0.0 }
 0xcfc   : > { %2084 = vadd.xlane.f32.xlu1 %v2083_v17  ;;  %2113 = vadd.xlane.f32.xlu0 %v2112_v47 }
 0xcfd   : > { %2137 = vadd.xlane.f32.xlu2 %v2136_v16 }
 0xcfe   : > { %v2376_v7 = vpop.xlane.xlu1 %2375 }
 0xcff   : > { %3724 = vrcp.f32 %v2376_v7  ;;  %v2391_v25 = vand.u32 2147483648, %v2376_v7  ;;  %vm2385_vm12 = vweird.f32 %v2376_v7  ;;  %v2389_v19 = vand.u32 2147483647, %v2376_v7 }
 0xd01   : > { %v2392_v15 = vor.u32 1.1754944e-38, %v2391_v25  ;;  %vm2390_vm9 = vcmp.eq.f32.partialorder %v2389_v19, 8.507059e+37 }
 0xd04   : > { %2108 = vadd.xlane.f32.xlu1 %v2107_v53  ;;  %2121 = vadd.xlane.f32.xlu0 %v2120_v45  ;;  %v2166_v53 = vpack.c.bf16 %v4722_v33, %v4707_v58 }
 0xd05   : > { %v3725_v49 = vpop.eup %3724  ;;  %2100 = vadd.xlane.f32.xlu2 %v2099_v52 }
 0xd06   : > { %v2381_v54 = vmul.f32 %v3725_v49, %v2376_v7  ;;  %vm2386_vm11 = vweird.f32 %v3725_v49 }
 0xd07   : > { %vm2387_vm8 = vmor %vm2385_vm12, %vm2386_vm11 }
 0xd08   : > { %v2382_v57 = vsub.f32 1.0, %v2381_v54 }
 0xd0a   : > { %v2383_v4 = vmul.f32 %v3725_v49, %v2382_v57 }
 0xd0c   : > { %2116 = vadd.xlane.f32.xlu1 %v2115_v1  ;;  %2129 = vadd.xlane.f32.xlu0 %v2128_v11  ;;  %v2384_v28 = vadd.f32 %v3725_v49, %v2383_v4 }
 0xd0e   : > { %v2388_v27 = vsel %vm2387_vm8, %v3725_v49, %v2384_v28  ;;  %vm5118_vm8 = vcmask 72704  }
 0xd0f   : > { %v2393_v63 = vsel %vm2390_vm9, %v2392_v15, %v2388_v27 }
 0xd10   : > { %v4762_v26 = vmul.f32 %v4697_v39, %v2393_v63 }
 0xd12   : > { %v2412_v29 = vmul.f32 %v4088_v56, %v4762_v26  ;;  %v2420_v17 = vmul.f32 %v4096_v60, %v4762_v26  ;;  %v2428_v56 = vmul.f32 %v4099_v61, %v4762_v26  ;;  %v2436_v23 = vmul.f32 %v4103_v0, %v4762_v26 }
 0xd13   : > { %v2444_v55 = vmul.f32 %v4110_v13, %v4762_v26  ;;  %v2452_v13 = vmul.f32 %v4116_v18, %v4762_v26  ;;  %v2460_v27 = vmul.f32 %v4120_v21, %v4762_v26  ;;  %v2468_v18 = vmul.f32 %v4125_v24, %v4762_v26 }
 0xd14   : > { %2124 = vadd.xlane.f32.xlu1 %v2123_v40  ;;  %2092 = vadd.xlane.f32.xlu0 %v2091_v48  ;;  %v2414_v38 = vsel %vm689_vm3, %v2412_v29, 0.0  ;;  %v2422_v47 = vsel %vm689_vm3, %v2420_v17, 0.0  ;;  %v2430_v49 = vsel %vm689_vm3, %v2428_v56, 0.0  ;;  %v2438_v33 = vsel %vm689_vm3, %v2436_v23, 0.0 }
 0xd15   : > { %v2470_v37 = vsel %vm689_vm3, %v2468_v18, 0.0  ;;  %v2476_v63 = vmul.f32 %v4130_v31, %v4762_v26 }
 0xd1c   : > { %2132 = vadd.xlane.f32.xlu1 %v2131_v42  ;;  %2140 = vadd.xlane.f32.xlu0 %v2139_v43 }
 0xd24   : > { %2148 = vadd.xlane.f32.xlu0 %v2147_v30  ;;  %2415 = vadd.xlane.f32.xlu1 %v2414_v38 }
 0xd27   : > { %v2379_v39 = vpop.xlane.xlu2 %2378 }
 0xd28   : > { %3726 = vrcp.f32 %v2379_v39  ;;  %v2406_v45 = vand.u32 2147483648, %v2379_v39  ;;  %v2404_v60 = vand.u32 2147483647, %v2379_v39  ;;  %vm2400_vm10 = vweird.f32 %v2379_v39 }
 0xd2a   : > { %v2407_v61 = vor.u32 1.1754944e-38, %v2406_v45  ;;  %vm2405_vm12 = vcmp.eq.f32.partialorder %v2404_v60, 8.507059e+37 }
 0xd2c   : > { %2423 = vadd.xlane.f32.xlu1 %v2422_v47 }
 0xd2e   : > { %v3727_v16 = vpop.eup %3726 }
 0xd2f   : > { %v2396_v7 = vmul.f32 %v3727_v16, %v2379_v39  ;;  %v2194_v59 = vpop.permute.xlu2 %2193  ;;  %vm2401_vm7 = vweird.f32 %v3727_v16 }
 0xd30   : > { %2206 = vmatpush.bf16.msrb.mxu2 %v2194_v59  ;;  %vm2402_vm11 = vmor %vm2400_vm10, %vm2401_vm7  ;;  %vm5124_vm7 = vcmask 1045504  }
 0xd31   : > { %v2397_v5 = vsub.f32 1.0, %v2396_v7  ;;  %vm5125_vm10 = vmmov %vm5124_vm7 }
 0xd33   : > { %v2398_v52 = vmul.f32 %v3727_v16, %v2397_v5  ;;  %3294 = vmatmul.msk.bf16.vlgmr.msrb.gmra.mxu2 %vm689_vm3, %v2166_v53 }
 0xd34   : > { %2532 = vmatpush.bf16.msra.mxu2 %v2520_v12  ;;  %2431 = vadd.xlane.f32.xlu1 %v2430_v49 }
 0xd35   : > { %v2399_v54 = vadd.f32 %v3727_v16, %v2398_v52 }
 0xd37   : > { %v2403_v34 = vsel %vm2402_vm11, %v3727_v16, %v2399_v54  ;;  %vm5126_vm11 = vcmask 1046528  }
 0xd38   : > { %v2408_v57 = vsel %vm2405_vm12, %v2407_v61, %v2403_v34  ;;  %vm5127_vm12 = vmmov %vm5126_vm11 }
 0xd39   : > { %v2411_v58 = vmul.f32 %v4701_v51, %v2408_v57 }
 0xd3b   : > { %v2437_v1 = vmul.f32 %v4159_v44, %v2411_v58  ;;  %v2413_v11 = vmul.f32 %v4143_v50, %v2411_v58  ;;  %v2500_v0 = vpack.c.bf16 %v2411_v58, %v4762_v26  ;;  %v2445_v51 = vmul.f32 %v4163_v3, %v2411_v58 }
 0xd3c   : > { %2439 = vadd.xlane.f32.xlu1 %v2438_v33  ;;  %v2421_v28 = vmul.f32 %v4150_v46, %v2411_v58  ;;  %v2446_v50 = vsel %vm689_vm3, %v2444_v55, 0.0  ;;  %v2453_v19 = vmul.f32 %v4167_v6, %v2411_v58  ;;  %v2429_v3 = vmul.f32 %v4156_v62, %v2411_v58 }
 0xd3d   : > { %v2441_v4 = vsel %vm689_vm3, %v2437_v1, 0.0  ;;  %v2417_v41 = vsel %vm689_vm3, %v2413_v11, 0.0  ;;  %v2449_v44 = vsel %vm689_vm3, %v2445_v51, 0.0  ;;  %v2454_v46 = vsel %vm689_vm3, %v2452_v13, 0.0 }
 0xd3e   : > { %2442 = vadd.xlane.f32.xlu2 %v2441_v4  ;;  %2418 = vadd.xlane.f32.xlu0 %v2417_v41  ;;  %v2425_v25 = vsel %vm689_vm3, %v2421_v28, 0.0  ;;  %v2457_v40 = vsel %vm689_vm3, %v2453_v19, 0.0  ;;  %v2433_v48 = vsel %vm689_vm3, %v2429_v3, 0.0  ;;  %v2461_v15 = vmul.f32 %v4172_v22, %v2411_v58 }
 0xd3f   : > { %v2462_v6 = vsel %vm689_vm3, %v2460_v27, 0.0  ;;  %v2469_v2 = vmul.f32 %v4176_v32, %v2411_v58  ;;  %v2478_v22 = vsel %vm689_vm3, %v2476_v63, 0.0  ;;  %v2477_v43 = vmul.f32 %v4180_v35, %v2411_v58 }
 0xd40   : > { %v2465_v62 = vsel %vm689_vm3, %v2461_v15, 0.0 }
 0xd41   : > { %v2473_v21 = vsel %vm689_vm3, %v2469_v2, 0.0  ;;  %v2481_v36 = vsel %vm689_vm3, %v2477_v43, 0.0 }
 0xd43   : > { %3298 = vmatmul.msk.bf16.vlgmr.msra.gmra.mxu2 %vm689_vm3, %v2500_v0 }
 0xd44   : > { %2447 = vadd.xlane.f32.xlu1 %v2446_v50 }
 0xd46   : > { %2450 = vadd.xlane.f32.xlu2 %v2449_v44  ;;  %2426 = vadd.xlane.f32.xlu0 %v2425_v25 }
 0xd4c   : > { %2455 = vadd.xlane.f32.xlu1 %v2454_v46 }
 0xd4e   : > { %2458 = vadd.xlane.f32.xlu2 %v2457_v40  ;;  %2434 = vadd.xlane.f32.xlu0 %v2433_v48 }
 0xd54   : > { %2463 = vadd.xlane.f32.xlu1 %v2462_v6 }
 0xd56   : > { %2466 = vadd.xlane.f32.xlu0 %v2465_v62  ;;  %2471 = vadd.xlane.f32.xlu2 %v2470_v37 }
 0xd5c   : > { %2474 = vadd.xlane.f32.xlu1 %v2473_v21 }
 0xd5e   : > { %2479 = vadd.xlane.f32.xlu2 %v2478_v22 }
 0xd5f   : > { %v2082_v24 = vpop.xlane.xlu0 %2081  ;;  %v2098_v42 = vpop.xlane.xlu1 %2097 }
 0xd64   : > { %2482 = vadd.xlane.f32.xlu1 %v2481_v36 }
 0xd67   : > { %v2106_v29 = vpop.xlane.xlu0 %2105  ;;  %v2146_v30 = vpop.xlane.xlu1 %2145 }
 0xd68   : > { %v2090_v39 = vpop.xlane.xlu2 %2089 }
 0xd69   : > { %v2150_v12 = vsel %vm964_vm13, %v2082_v24, %v2090_v39 }
 0xd6a   : > { %v2152_v53 = vsel %vm967_vm14, %v2150_v12, %v2098_v42 }
 0xd6b   : > { %v2154_v52 = vsel %vm970_vm15, %v2152_v53, %v2106_v29 }
 0xd6f   : > { %v2114_v38 = vpop.xlane.xlu0 %2113  ;;  %v2085_v32 = vpop.xlane.xlu1 %2084 }
 0xd70   : > { %v2138_v26 = vpop.xlane.xlu2 %2137  ;;  %v2156_v54 = vsel %vm973_vm0, %v2154_v52, %v2114_v38 }
 0xd77   : > { %v2122_v17 = vpop.xlane.xlu0 %2121  ;;  %v2109_v31 = vpop.xlane.xlu1 %2108 }
 0xd78   : > { %v2101_v35 = vpop.xlane.xlu2 %2100  ;;  %v2158_v34 = vsel %vm976_vm1, %v2156_v54, %v2122_v17  ;;  %v3472_v54 = vld [vmem:[%s5109_s4 + $0x10] sm:$0xff] }
 0xd7f   : > { %v2130_v47 = vpop.xlane.xlu0 %2129  ;;  %v2117_v16 = vpop.xlane.xlu1 %2116 }
 0xd80   : > { %v2160_v23 = vsel %vm979_vm4, %v2158_v34, %v2130_v47 }
 0xd81   : > { %v2162_v33 = vsel %vm982_vm5, %v2160_v23, %v2138_v26 }
 0xd82   : > { %v2164_v41 = vsel %vm985_vm6, %v2162_v33, %v2146_v30 }
 0xd87   : > { %v2093_v7 = vpop.xlane.xlu0 %2092  ;;  %v2125_v59 = vpop.xlane.xlu1 %2124 }
 0xd88   : > { %v2151_v56 = vsel %vm964_vm13, %v2085_v32, %v2093_v7  ;;  %v3473_v7 = vld [vmem:[%s5109_s4 + $0x18] sm:$0xff] }
 0xd89   : > { %v2153_v5 = vsel %vm967_vm14, %v2151_v56, %v2101_v35  ;;  %2581 = vmatpush.bf16.msrb.mxu1 %v3473_v7 }
 0xd8a   : > { %v2155_v45 = vsel %vm970_vm15, %v2153_v5, %v2109_v31 }
 0xd8b   : > { %v2157_v61 = vsel %vm973_vm0, %v2155_v45, %v2117_v16 }
 0xd8c   : > { %v2159_v57 = vsel %vm976_vm1, %v2157_v61, %v2125_v59 }
 0xd8d   : > { %2582 = vmatpush.bf16.msrb.mxu1 %v3472_v54 }
 0xd8f   : > { %v2141_v60 = vpop.xlane.xlu0 %2140  ;;  %v2133_v49 = vpop.xlane.xlu1 %2132 }
 0xd90   : > { %v2161_v58 = vsel %vm979_vm4, %v2159_v57, %v2133_v49 }
 0xd91   : > { %v2163_v11 = vsel %vm982_vm5, %v2161_v58, %v2141_v60 }
 0xd97   : > { %v2149_v1 = vpop.xlane.xlu0 %2148  ;;  %v2416_v4 = vpop.xlane.xlu1 %2415 }
 0xd98   : > { %v2165_v55 = vsel %vm985_vm6, %v2163_v11, %v2149_v1 }
 0xd99   : > { %v2167_v0 = vpack.c.bf16 %v2165_v55, %v2164_v41 }
 0xd9b   : > { %3293 = vmatmul.msk.bf16.vlgmr.msra.gmra.mxu0 %vm5118_vm8, %v2167_v0 }
 0xd9f   : > { %v2424_v51 = vpop.xlane.xlu1 %2423 }
 0xda0   : > { %v2484_v62 = vsel %vm964_vm13, %v2416_v4, %v2424_v51  ;;  %v3678_v4 = vld [vmem:[%s5110_s5 + $0x1] ss:$0 sm:$0xff]  ;;  %s3061_s5 = scalar_lea.hbm %s5068_s18, %s3494_s22 }
 0xda1   : > { %s3064_s26 = sshll.u32 %s3061_s5, 4  ;;  %s3065_s26 = int_to_ptr.hbm [resolvable:$true] %s3064_s26 }
 0xda7   : > { %v2432_v28 = vpop.xlane.xlu1 %2431 }
 0xda8   : > { %v2486_v63 = vsel %vm967_vm14, %v2484_v62, %v2432_v28 }
 0xdaf   : > { %v2440_v50 = vpop.xlane.xlu1 %2439 }
 0xdb0   : > { %v2488_v21 = vsel %vm970_vm15, %v2486_v63, %v2440_v50 }
 0xdb1   : > { %v2443_v44 = vpop.xlane.xlu2 %2442  ;;  %v2419_v25 = vpop.xlane.xlu0 %2418 }
 0xdb6   : > { %v2208_v16 = vpop.f32.mrf.mxu2 }
 0xdb7   : > { %v2448_v13 = vpop.xlane.xlu1 %2447 }
 0xdb8   : > { %v2490_v22 = vsel %vm973_vm0, %v2488_v21, %v2448_v13 }
 0xdb9   : > { %v2451_v19 = vpop.xlane.xlu2 %2450  ;;  %v2427_v3 = vpop.xlane.xlu0 %2426 }
 0xdba   : > { %v2485_v15 = vsel %vm964_vm13, %v2419_v25, %v2427_v3  ;;  %vm5119_vm13 = vmmov %vm5118_vm8  ;;  %vm5129_vm8 = vcmask 523264  }
 0xdbe   : > { %v2210_v56 = vpop.f32.mrf.mxu2 }
 0xdbf   : > { %v2456_v46 = vpop.xlane.xlu1 %2455 }
 0xdc0   : > { %v2492_v42 = vsel %vm976_vm1, %v2490_v22, %v2456_v46 }
 0xdc1   : > { %v2459_v40 = vpop.xlane.xlu2 %2458  ;;  %v2435_v27 = vpop.xlane.xlu0 %2434 }
 0xdc2   : > { %v2487_v6 = vsel %vm967_vm14, %v2485_v15, %v2435_v27 }
 0xdc3   : > { %v2489_v37 = vsel %vm970_vm15, %v2487_v6, %v2443_v44 }
 0xdc4   : > { %v2491_v24 = vsel %vm973_vm0, %v2489_v37, %v2451_v19 }
 0xdc5   : > { %v2493_v29 = vsel %vm976_vm1, %v2491_v24, %v2459_v40 }
 0xdc6   : > { %v2534_v35 = vpop.f32.mrf.mxu2 }
 0xdc7   : > { %v2464_v48 = vpop.xlane.xlu1 %2463 }
 0xdc8   : > { %v2494_v36 = vsel %vm979_vm4, %v2492_v42, %v2464_v48 }
 0xdc9   : > { %v2472_v18 = vpop.xlane.xlu2 %2471  ;;  %v2467_v43 = vpop.xlane.xlu0 %2466 }
 0xdca   : > { %v2495_v38 = vsel %vm979_vm4, %v2493_v29, %v2467_v43  ;;  %v2496_v32 = vsel %vm982_vm5, %v2494_v36, %v2472_v18 }
 0xdce   : > { %v2536_v53 = vpop.f32.mrf.mxu2 }
 0xdcf   : > { %v2475_v2 = vpop.xlane.xlu1 %2474 }
 0xdd0   : > { %v2497_v39 = vsel %vm982_vm5, %v2495_v38, %v2475_v2  ;;  %v3679_v38 = vld [vmem:[%s5058_s8 + $0x1] ss:$0 sm:$0xff]  ;;  %vm5121_vm5 = vcmask 1040384  }
 0xdd1   : > { %v2480_v30 = vpop.xlane.xlu2 %2479  ;;  %vm5123_vm9 = vmmov %vm5121_vm5 }
 0xdd2   : > { %v2498_v31 = vsel %vm985_vm6, %v2496_v32, %v2480_v30 }
 0xdd7   : > { %v2483_v17 = vpop.xlane.xlu1 %2482 }
 0xdd8   : > { %v2499_v26 = vsel %vm985_vm6, %v2497_v39, %v2483_v17  ;;  %v3680_v17 = vld [vmem:[%s5059_s9 + $0x1] ss:$0 sm:$0xff]  ;;  %vm5122_vm6 = vmmov %vm5121_vm5 }
 0xdd9   : > { %v2501_v47 = vpack.c.bf16 %v2499_v26, %v2498_v31 }
 0xddb   : > { %3297 = vmatmul.msk.bf16.vlgmr.msrb.gmra.mxu0 %vm5119_vm13, %v2501_v47  ;;  %vm5130_vm13 = vmmov %vm5129_vm8 }
 0xe18   : > { %v2188_v59 = vpop.f32.mrf.mxu0 }
 0xe19   : > { %v2209_v34 = vadd.f32 %v2208_v16, %v2188_v59 }
 0xe20   : > { %v2190_v12 = vpop.f32.mrf.mxu0 }
 0xe21   : > { %v2211_v23 = vadd.f32 %v2210_v56, %v2190_v12 }
 0xe58   : > { %v2514_v5 = vpop.f32.mrf.mxu0 }
 0xe59   : > { %v2535_v52 = vadd.f32 %v2534_v35, %v2514_v5 }
 0xe60   : > { %v2516_v45 = vpop.f32.mrf.mxu0 }
 0xe61   : > { %v2537_v60 = vadd.f32 %v2536_v53, %v2516_v45 }
 0xe63   : > { %v3648_v49 = vpack.i.bf16 %v2537_v60, %v2535_v52 }
 0xe65   : > { %3649 = vrot.lane.b32.xlu2 %v3648_v49, %s5120_s23  ;;  %s550_s23 = scalar_lea.vmem [#allocation4], %s3131_s1  ;;  %s3050_s1 = scalar_lea.sflag [#allocation5], %s548_s28 }
 0xe66   : > { %s3062_s27 = sshll.u32 %s550_s23, 4  ;;  %s3063_s27 = int_to_ptr.vmem [resolvable:$true] %s3062_s27 }
 0xebf   : > { %v3650_v61 = vpop.permute.xlu2 %3649 }
 0xec0   : > { %v3652_v57 = vunpack.i.h.bf16 %v3650_v61  ;;  %v3651_v58 = vunpack.i.l.bf16 %v3650_v61 }
 0xec2   : > { %v2548_v33 = vsel %vm689_vm3, %v2211_v23, %v3652_v57  ;;  %v2547_v1 = vsel %vm689_vm3, %v2209_v34, %v3651_v58 }
 0xec3   : > { %v2549_v11 = vpack.c.bf16 %v2548_v33, %v2547_v1 }
 0xec5   : > { %3312 = vmatmul.msk.bf16.vlgmr.msrb.gmra.mxu1 %vm660_vm2, %v2549_v11 }
 0xf42   : > { %v2584_v41 = vpop.f32.mrf.mxu1 }
 0xf43   : > { %v2585_v55 = vadd.f32 %v3678_v4, %v2584_v41 }
 0xf45   : > { %v2589_v0 = vadd.f32 %v2585_v55, %v4574_v14 }
 0xf47   : > { %v2595_v51 = vsel %vm660_vm2, %v2589_v0, 0.0 }
 0xf48   : > { %2596 = vadd.xlane.f32.xlu1 %v2595_v51 }
 0xf4a   : > { %v2586_v28 = vpop.f32.mrf.mxu1 }
 0xf4b   : > { %v2587_v50 = vadd.f32 %v3678_v4, %v2586_v28  ;;  %v3479_v28 = vld [vmem:[%s5062_s12 + $0x58] sm:$0xff] }
 0xf4c   : > { %2749 = vmatpush.bf16.msra.mxu3 %v3479_v28 }
 0xf4d   : > { %v2590_v44 = vadd.f32 %v2587_v50, %v4576_v20  ;;  %v3478_v50 = vld [vmem:[%s5062_s12 + $0x50] sm:$0xff] }
 0xf4f   : > { %v2598_v25 = vsel %vm660_vm2, %v2590_v44, 0.0 }
 0xf50   : > { %2599 = vadd.xlane.f32.xlu1 %v2598_v25  ;;  %2750 = vmatpush.bf16.msra.mxu3 %v3478_v50  ;;  %v3476_v25 = vld [vmem:[%s5062_s12 + $0x40] sm:$0xff] }
 0xfbb   : > { %v2597_v13 = vpop.xlane.xlu1 %2596 }
 0xfbc   : > { %v2601_v19 = vmul.f32 %v2597_v13, %v4434_v8  ;;  %v3475_v13 = vld [vmem:[%s5062_s12 + $0x38] sm:$0xff] }
 0xfbe   : > { %v2603_v3 = vsub.f32 %v2589_v0, %v2601_v19  ;;  %v3474_v19 = vld [vmem:[%s5062_s12 + $0x30] sm:$0xff] }
 0xfc0   : > { %v2605_v46 = vmul.f32 %v2603_v3, %v2603_v3 }
 0xfc2   : > { %v2607_v40 = vsel %vm660_vm2, %v2605_v46, 0.0 }
 0xfc3   : > { %2608 = vadd.xlane.f32.xlu1 %v2607_v40  ;;  %v2600_v48 = vpop.xlane.xlu1 %2599 }
 0xfc4   : > { %v2602_v14 = vmul.f32 %v2600_v48, %v4434_v8 }
 0xfc6   : > { %v2604_v27 = vsub.f32 %v2590_v44, %v2602_v14  ;;  %v3477_v44 = vld [vmem:[%s5062_s12 + $0x48] sm:$0xff] }
 0xfc7   : > { %2751 = vmatpush.bf16.msra.mxu3 %v3477_v44  ;;  %v3682_v44 = vld [vmem:[%s5065_s15 + $0x1] ss:$0 sm:$0xff] }
 0xfc8   : > { %v2606_v15 = vmul.f32 %v2604_v27, %v2604_v27 }
 0xfca   : > { %v2610_v18 = vsel %vm660_vm2, %v2606_v15, 0.0 }
 0xfcb   : > { %2611 = vadd.xlane.f32.xlu0 %v2610_v18  ;;  %2752 = vmatpush.bf16.msra.mxu3 %v3476_v25 }
 0xfcf   : > { %2753 = vmatpush.bf16.msra.mxu3 %v3475_v13 }
 0xfd3   : > { %2754 = vmatpush.bf16.msra.mxu3 %v3474_v19 }
0x1036   : > { %v2609_v20 = vpop.xlane.xlu1 %2608 }
0x1037   : > { %v2613_v6 = vmul.f32 %v2609_v20, %v4434_v8 }
0x1039   : > { %v2615_v62 = vadd.f32 1e-05, %v2613_v6 }
0x103b   : > { %3728 = vrsqrt.f32 %v2615_v62  ;;  %vm2623_vm14 = vweird.f32 %v2615_v62 }
0x103e   : > { %v2612_v37 = vpop.xlane.xlu0 %2611 }
0x103f   : > { %v2614_v2 = vmul.f32 %v2612_v37, %v4434_v8  ;;  %v3491_v37 = vld [vmem:[%s5064_s14 + $0xb8] sm:$0xff] }
0x1040   : > { %2922 = vmatpush.bf16.msrb.mxu2 %v3491_v37 }
0x1041   : > { %v3729_v63 = vpop.eup %3728  ;;  %v2616_v21 = vadd.f32 1e-05, %v2614_v2  ;;  %v3490_v2 = vld [vmem:[%s5064_s14 + $0xb0] sm:$0xff] }
0x1042   : > { %v2618_v22 = vmul.f32 %v3729_v63, %v2615_v62  ;;  %vm2624_vm3 = vweird.f32 %v3729_v63 }
0x1043   : > { %3730 = vrsqrt.f32 %v2616_v21  ;;  %vm2625_vm15 = vmor %vm2623_vm14, %vm2624_vm3  ;;  %vm2633_vm1 = vweird.f32 %v2616_v21  ;;  %vm5131_vm3 = vcmask 785408  }
0x1044   : > { %v2619_v24 = vmul.f32 %v3729_v63, %v2618_v22  ;;  %2923 = vmatpush.bf16.msrb.mxu2 %v3490_v2  ;;  %v3487_v22 = vld [vmem:[%s5064_s14 + $0x98] sm:$0xff]  ;;  %vm5132_vm14 = vmmov %vm5121_vm5 }
0x1045   : > { %2904 = vmatpush.bf16.msra.mxu0 %v3487_v22 }
0x1046   : > { %v2620_v42 = vmul.f32 0.5, %v2619_v24  ;;  %v3486_v24 = vld [vmem:[%s5064_s14 + $0x90] sm:$0xff] }
0x1048   : > { %v2621_v43 = vsub.f32 1.5, %v2620_v42  ;;  %v3681_v42 = vld [vmem:[%s5063_s13 + $0x1] ss:$0 sm:$0xff] }
0x1049   : > { %v3731_v36 = vpop.eup %3730  ;;  %2905 = vmatpush.bf16.msra.mxu0 %v3486_v24 }
0x104a   : > { %v2622_v29 = vmul.f32 %v3729_v63, %v2621_v43  ;;  %v2628_v30 = vmul.f32 %v3731_v36, %v2616_v21  ;;  %vm2634_vm0 = vweird.f32 %v3731_v36  ;;  %v3488_v21 = vld [vmem:[%s5064_s14 + $0xa0] sm:$0xff]  ;;  %v3485_v43 = vld [vmem:[%s5064_s14 + $0x88] sm:$0xff] }
0x104b   : > { %vm2635_vm4 = vmor %vm2633_vm1, %vm2634_vm0 }
0x104c   : > { %v2626_v32 = vsel %vm2625_vm15, %v3729_v63, %v2622_v29  ;;  %v2629_v39 = vmul.f32 %v3731_v36, %v2628_v30  ;;  %v3489_v63 = vld [vmem:[%s5064_s14 + $0xa8] sm:$0xff]  ;;  %v3484_v30 = vld [vmem:[%s5064_s14 + $0x80] sm:$0xff]  ;;  %vm5133_vm15 = vmmov %vm5121_vm5 }
0x104d   : > { %v2637_v31 = vmul.f32 %v2626_v32, %v2603_v3  ;;  %2924 = vmatpush.bf16.msrb.mxu2 %v3489_v63  ;;  %2906 = vmatpush.bf16.msra.mxu0 %v3485_v43  ;;  %v3483_v32 = vld [vmem:[%s5064_s14 + $0x78] sm:$0xff]  ;;  %vm5134_vm0 = vmmov %vm5121_vm5 }
0x104e   : > { %v2630_v26 = vmul.f32 0.5, %v2629_v39  ;;  %vm5135_vm1 = vmmov %vm5124_vm7 }
0x104f   : > { %v2642_v47 = vmul.f32 %v3679_v38, %v2637_v31 }
0x1050   : > { %v2631_v16 = vsub.f32 1.5, %v2630_v26  ;;  %v3482_v26 = vld [vmem:[%s5064_s14 + $0x70] sm:$0xff] }
0x1051   : > { %v4883_v7 = vadd.f32 %v3680_v17, %v2642_v47  ;;  %2925 = vmatpush.bf16.msrb.mxu2 %v3488_v21  ;;  %2907 = vmatpush.bf16.msra.mxu0 %v3484_v30 }
0x1052   : > { %v2632_v59 = vmul.f32 %v3731_v36, %v2631_v16 }
0x1053   : > { %v2649_v56 = vmul.f32 %v4007_v9, %v4883_v7 }
0x1054   : > { %v2636_v12 = vsel %vm2635_vm4, %v3731_v36, %v2632_v59  ;;  %vm5136_vm4 = vmmov %vm5135_vm1 }
0x1055   : > { %v2638_v35 = vmul.f32 %v2636_v12, %v2604_v27  ;;  %v2653_v53 = vrot.slane %v2649_v56, 7  ;;  %2908 = vmatpush.bf16.msra.mxu0 %v3483_v32  ;;  %v3481_v56 = vld [vmem:[%s5064_s14 + $0x68] sm:$0xff]  ;;  %v3492_v32 = vld [vmem:[%s5066_s16] sm:$0xff] }
0x1057   : > { %v2643_v5 = vmul.f32 %v3679_v38, %v2638_v35  ;;  %v2659_v60 = vsel %vm5121_vm5, 0.0, %v2653_v53  ;;  %vm5137_vm5 = vmmov %vm5126_vm11 }
0x1058   : > { %v2674_v34 = vrot.slane %v2659_v60, 2  ;;  %v2663_v23 = vrot.slane %v2659_v60, 1 }
0x1059   : > { %v4887_v45 = vadd.f32 %v3680_v17, %v2643_v5  ;;  %2909 = vmatpush.bf16.msra.mxu0 %v3482_v26 }
0x105b   : > { %v2650_v52 = vmul.f32 %v4010_v10, %v4887_v45 }
0x105d   : > { %v2654_v49 = vrot.slane %v2650_v52, 7  ;;  %2910 = vmatpush.bf16.msra.mxu0 %v3481_v56 }
0x105f   : > { %v2655_v54 = vsel %vm5122_vm6, %v2653_v53, %v2654_v49  ;;  %v2660_v61 = vsel %vm5123_vm9, %v2654_v49, 0.0  ;;  %vm5138_vm6 = vmmov %vm5137_vm5 }
0x1060   : > { %v2675_v57 = vrot.slane %v2655_v54, 2  ;;  %v2677_v58 = vrot.slane %v2660_v61, 2  ;;  %v2664_v33 = vrot.slane %v2655_v54, 1  ;;  %v2666_v1 = vrot.slane %v2660_v61, 1  ;;  %vm5139_vm9 = vmmov %vm5129_vm8 }
0x1062   : > { %v2676_v11 = vsel %vm5124_vm7, %v2674_v34, %v2675_v57  ;;  %v2678_v4 = vsel %vm5125_vm10, %v2675_v57, %v2677_v58  ;;  %v2665_v41 = vsel %vm5126_vm11, %v2663_v23, %v2664_v33  ;;  %v2667_v55 = vsel %vm5127_vm12, %v2664_v33, %v2666_v1  ;;  %vm5140_vm7 = vmmov %vm5129_vm8 }
0x1063   : > { %v3658_v0 = vpack.i.bf16 %v2678_v4, %v2676_v11  ;;  %v3653_v51 = vpack.i.bf16 %v2667_v55, %v2665_v41  ;;  %v3480_v4 = vld [vmem:[%s5064_s14 + $0x60] sm:$0xff]  ;;  %vm5141_vm10 = vmmov %vm5140_vm7 }
0x1064   : > { %2911 = vmatpush.bf16.msra.mxu0 %v3480_v4 }
0x1065   : > { %3659 = vrot.lane.b32.xlu1 %v3658_v0, %s5111_s30  ;;  %3654 = vrot.lane.b32.xlu2 %v3653_v51, %s5128_s2 }
0x10bf   : > { %v3655_v3 = vpop.permute.xlu2 %3654 }
0x10c0   : > { %v3657_v46 = vunpack.i.h.bf16 %v3655_v3  ;;  %v3656_v40 = vunpack.i.l.bf16 %v3655_v3 }
0x10c2   : > { %v2686_v15 = vsel %vm660_vm2, %v2655_v54, %v3657_v46  ;;  %v2685_v18 = vsel %vm660_vm2, %v2659_v60, %v3656_v40 }
0x10d7   : > { %v3660_v48 = vpop.permute.xlu1 %3659 }
0x10d8   : > { %v3662_v14 = vunpack.i.h.bf16 %v3660_v48  ;;  %v3661_v27 = vunpack.i.l.bf16 %v3660_v48 }
0x10da   : > { %v2687_v20 = vsel %vm5129_vm8, %v2685_v18, %v3661_v27  ;;  %v2688_v6 = vsel %vm5130_vm13, %v2686_v15, %v3662_v14 }
0x10db   : > { %v2689_v62 = vpack.c.bf16 %v2688_v6, %v2687_v20 }
0x10dd   : > { %3352 = vmatmul.msk.bf16.vlgmr.msra.gmra.mxu3 %vm5131_vm3, %v2689_v62 }
0x1160   : > { %v2756_v36 = vpop.f32.mrf.mxu3 }
0x1161   : > { %v2757_v29 = vadd.f32 %v3681_v42, %v2756_v36 }
0x1163   : > { %v2761_v38 = vmax.f32 %v2757_v29, 0.0 }
0x1165   : > { %v2763_v39 = vmul.f32 %v4007_v9, %v2761_v38  ;;  %v3493_v38 = vld [vmem:[%s5066_s16 + $0x8] sm:$0xff] }
0x1166   : > { %3026 = vmatpush.bf16.msra.mxu1 %v3493_v38 }
0x1167   : > { %v2767_v47 = vrot.slane %v2763_v39, 7 }
0x1168   : > { %v2758_v17 = vpop.f32.mrf.mxu3 }
0x1169   : > { %v2759_v31 = vadd.f32 %v3681_v42, %v2758_v17  ;;  %v2773_v12 = vsel %vm5132_vm14, 0.0, %v2767_v47 }
0x116a   : > { %v2777_v5 = vrot.slane %v2773_v12, 1  ;;  %v2788_v53 = vrot.slane %v2773_v12, 2  ;;  %3027 = vmatpush.bf16.msra.mxu1 %v3492_v32 }
0x116b   : > { %v2762_v16 = vmax.f32 %v2759_v31, 0.0 }
0x116d   : > { %v2764_v59 = vmul.f32 %v4010_v10, %v2762_v16 }
0x116f   : > { %v2768_v35 = vrot.slane %v2764_v59, 7 }
0x1171   : > { %v2769_v52 = vsel %vm5133_vm15, %v2767_v47, %v2768_v35  ;;  %v2774_v60 = vsel %vm5134_vm0, %v2768_v35, 0.0  ;;  %vm3046_vm15 = vcmask 392448  }
0x1172   : > { %v2778_v49 = vrot.slane %v2769_v52, 1  ;;  %v2780_v54 = vrot.slane %v2774_v60, 1  ;;  %v2789_v61 = vrot.slane %v2769_v52, 2  ;;  %v2791_v34 = vrot.slane %v2774_v60, 2  ;;  %v3684_v60 = vld [vmem:[%s5112_s24 + $0x1] ss:$0 sm:$0xff] }
0x1174   : > { %v2792_v23 = vsel %vm5135_vm1, %v2789_v61, %v2791_v34  ;;  %v2790_v57 = vsel %vm5136_vm4, %v2788_v53, %v2789_v61  ;;  %v2779_v58 = vsel %vm5137_vm5, %v2777_v5, %v2778_v49  ;;  %v2781_v33 = vsel %vm5138_vm6, %v2778_v49, %v2780_v54  ;;  %v3683_v53 = vld [vmem:[%s5060_s10 + $0x1] ss:$0 sm:$0xff] }
0x1175   : > { %v2798_v1 = vpack.c.bf16 %v2792_v23, %v2790_v57  ;;  %v3663_v11 = vpack.i.bf16 %v2781_v33, %v2779_v58 }
0x1177   : > { %3426 = vmatmul.msk.bf16.vlgmr.msrb.gmra.mxu2 %vm5139_vm9, %v2798_v1  ;;  %3664 = vrot.lane.b32.xlu0 %v3663_v11, %s5111_s30  ;;  %s3762_s30 = sshra.s32 %s3065_s26, 4  ;;  %s3763_s30 = int_to_ptr.hbm [resolvable:$true] %s3762_s30 }
0x1178   : > { %p3769_p0 = scmp.lt.s32.totalorder %s3763_s30, %s5068_s18 }
0x11e9   : > { %v3665_v41 = vpop.permute.xlu0 %3664 }
0x11ea   : > { %v3667_v55 = vunpack.i.h.bf16 %v3665_v41  ;;  %v3666_v0 = vunpack.i.l.bf16 %v3665_v41 }
0x11ec   : > { %v2796_v51 = vsel %vm5140_vm7, %v2769_v52, %v3667_v55  ;;  %v2795_v28 = vsel %vm5141_vm10, %v2773_v12, %v3666_v0  ;;  %v3685_v0 = vld [vmem:[%s5067_s17] ss:$0 sm:$0xff] }
0x11ed   : > { %v2797_v50 = vpack.c.bf16 %v2796_v51, %v2795_v28 }
0x11ef   : > { %2912 = vmatmul.bf16.vlgmr.msra.gmra.mxu0 %v2797_v50 }
0x11fa   : > { %v2927_v25 = vpop.f32.mrf.mxu2 }
0x1202   : > { %v2929_v15 = vpop.f32.mrf.mxu2 }
0x126c   : > { %v2913_v13 = vpop.f32.mrf.mxu0 }
0x126d   : > { %v2914_v19 = vadd.f32 %v3682_v44, %v2913_v13 }
0x126f   : > { %v2928_v3 = vadd.f32 %v2927_v25, %v2914_v19 }
0x1271   : > { %v2932_v46 = vmul.f32 %v4007_v9, %v2928_v3 }
0x1273   : > { %v2934_v40 = vadd.f32 %v2932_v46, %v4883_v7 }
0x1274   : > { %v2915_v48 = vpop.f32.mrf.mxu0 }
0x1275   : > { %v2916_v14 = vadd.f32 %v3682_v44, %v2915_v48  ;;  %v2940_v27 = vsel %vm660_vm2, %v2934_v40, 0.0 }
0x1276   : > { %2941 = vadd.xlane.f32.xlu2 %v2940_v27 }
0x1277   : > { %v2930_v18 = vadd.f32 %v2929_v15, %v2916_v14 }
0x1279   : > { %v2933_v20 = vmul.f32 %v4010_v10, %v2930_v18 }
0x127b   : > { %v2935_v6 = vadd.f32 %v2933_v20, %v4887_v45 }
0x127d   : > { %v2943_v62 = vsel %vm660_vm2, %v2935_v6, 0.0 }
0x127e   : > { %2944 = vadd.xlane.f32.xlu0 %v2943_v62 }
0x12e9   : > { %v2942_v37 = vpop.xlane.xlu2 %2941 }
0x12ea   : > { %v2946_v2 = vmul.f32 %v2942_v37, %v4434_v8 }
0x12ec   : > { %v2948_v63 = vsub.f32 %v2934_v40, %v2946_v2 }
0x12ee   : > { %v2950_v21 = vmul.f32 %v2948_v63, %v2948_v63 }
0x12f0   : > { %v2952_v7 = vsel %vm660_vm2, %v2950_v21, 0.0 }
0x12f1   : > { %v2945_v22 = vpop.xlane.xlu0 %2944  ;;  %2953 = vadd.xlane.f32.xlu1 %v2952_v7 }
0x12f2   : > { %v2947_v24 = vmul.f32 %v2945_v22, %v4434_v8 }
0x12f4   : > { %v2949_v42 = vsub.f32 %v2935_v6, %v2947_v24 }
0x12f6   : > { %v2951_v43 = vmul.f32 %v2949_v42, %v2949_v42 }
0x12f8   : > { %v2955_v36 = vsel %vm660_vm2, %v2951_v43, 0.0 }
0x12f9   : > { %2956 = vadd.xlane.f32.xlu2 %v2955_v36 }
0x1364   : > { %v2954_v45 = vpop.xlane.xlu1 %2953 }
0x1365   : > { %v2958_v29 = vmul.f32 %v2954_v45, %v4434_v8 }
0x1367   : > { %v2960_v30 = vadd.f32 1e-05, %v2958_v29 }
0x1369   : > { %3732 = vrsqrt.f32 %v2960_v30  ;;  %vm2968_vm12 = vweird.f32 %v2960_v30 }
0x136c   : > { %v2957_v39 = vpop.xlane.xlu2 %2956 }
0x136d   : > { %v2959_v17 = vmul.f32 %v2957_v39, %v4434_v8 }
0x136f   : > { %v3733_v31 = vpop.eup %3732  ;;  %v2961_v26 = vadd.f32 1e-05, %v2959_v17 }
0x1370   : > { %v2963_v47 = vmul.f32 %v3733_v31, %v2960_v30  ;;  %vm2969_vm11 = vweird.f32 %v3733_v31 }
0x1371   : > { %3734 = vrsqrt.f32 %v2961_v26  ;;  %vm2970_vm8 = vmor %vm2968_vm12, %vm2969_vm11  ;;  %vm2978_vm3 = vweird.f32 %v2961_v26 }
0x1372   : > { %v2964_v16 = vmul.f32 %v3733_v31, %v2963_v47 }
0x1374   : > { %v2965_v59 = vmul.f32 0.5, %v2964_v16 }
0x1376   : > { %v2966_v56 = vsub.f32 1.5, %v2965_v59 }
0x1377   : > { %v3735_v12 = vpop.eup %3734 }
0x1378   : > { %v2967_v35 = vmul.f32 %v3733_v31, %v2966_v56  ;;  %v2973_v5 = vmul.f32 %v3735_v12, %v2961_v26  ;;  %vm2979_vm13 = vweird.f32 %v3735_v12 }
0x1379   : > { %vm2980_vm14 = vmor %vm2978_vm3, %vm2979_vm13 }
0x137a   : > { %v2971_v8 = vsel %vm2970_vm8, %v3733_v31, %v2967_v35  ;;  %v2974_v52 = vmul.f32 %v3735_v12, %v2973_v5 }
0x137b   : > { %v2982_v49 = vmul.f32 %v2971_v8, %v2948_v63 }
0x137c   : > { %v2975_v54 = vmul.f32 0.5, %v2974_v52 }
0x137d   : > { %v2987_v61 = vmul.f32 %v3683_v53, %v2982_v49 }
0x137e   : > { %v2976_v34 = vsub.f32 1.5, %v2975_v54 }
0x137f   : > { %v2992_v23 = vadd.f32 %v3684_v60, %v2987_v61 }
0x1380   : > { %v2977_v57 = vmul.f32 %v3735_v12, %v2976_v34 }
0x1381   : > { %v2994_v58 = vmul.f32 %v4007_v9, %v2992_v23 }
0x1382   : > { %v2981_v33 = vsel %vm2980_vm14, %v3735_v12, %v2977_v57 }
0x1383   : > { %v2983_v1 = vmul.f32 %v2981_v33, %v2949_v42  ;;  %3036 = vst.msk [vmem:[%s550_s23] sm:$0xff] %vm660_vm2, %v2994_v58 }
0x1385   : > { %v2988_v11 = vmul.f32 %v3683_v53, %v2983_v1 }
0x1387   : > { %v2993_v4 = vadd.f32 %v3684_v60, %v2988_v11 }
0x1389   : > { %v2995_v41 = vmul.f32 %v4010_v10, %v2993_v4 }
0x138b   : > { %v2996_v55 = vpack.c.bf16 %v2995_v41, %v2994_v58  ;;  %3037 = vst.msk [vmem:[%s550_s23 + $0x8] sm:$0xff] %vm660_vm2, %v2995_v41 }
0x138d   : > { %3437 = vmatmul.msk.bf16.vlgmr.msra.gmra.mxu1 %vm660_vm2, %v2996_v55 }
0x140a   : > { %v3029_v51 = vpop.f32.mrf.mxu1 }
0x140b   : > { %v3030_v28 = vadd.f32 %v3685_v0, %v3029_v51 }
0x140d   : > { %v3034_v50 = vmul.f32 %v4007_v9, %v3030_v28 }
0x140f   : > { %3040 = vrot.lane.b32.xlu2 %v3034_v50, %s5128_s2 }
0x1412   : > { %v3031_v44 = vpop.f32.mrf.mxu1 }
0x1413   : > { %v3032_v25 = vadd.f32 %v3685_v0, %v3031_v44 }
0x1415   : > { %v3035_v13 = vmul.f32 %v4010_v10, %v3032_v25 }
0x1417   : > { %3042 = vrot.lane.b32.xlu0 %v3035_v13, %s5128_s2  ;;  %s3764_s2 = scalar_lea.hbm %s3763_s30, 16 }
0x1418   : > { %p3765_p11 = scmp.ne.s32.totalorder %s3763_s30, %s3764_s2  ;;  %p3770_p1 = scmp.lt.s32.totalorder %s3768_s3, %s3764_s2 }
0x141a   : > { %p3766_p12 = pnand %p3765_p11, %p3972_p5  ;;  %p3771_p2 = por %p3770_p1, %p3769_p0 }
0x141c   : > { %p3767_p13 = pneg %p3766_p12 }
0x141e   : > { %p3772_p3 = pnand %p3771_p2, %p3767_p13 }
0x1469   : > { %v3041_v19 = vpop.permute.xlu2 %3040 }
0x146a   : > { %3047 = vst.msk [vmem:[%s550_s23] sm:$0xff] %vm3046_vm15, %v3041_v19 }
0x1489   : > { %v3043_v9 = vpop.permute.xlu0 %3042 }
0x148a   : > { %3048 = vst.msk [vmem:[%s550_s23 + $0x8] sm:$0xff] %vm3046_vm15, %v3043_v9 }
0x148b   : > { %3775 = shalt.err (!%p3772_p3)
}
0x148c   : > { %s3834_s28 = smov 128   ;;  %s3835_s23 = smov 8  }
0x148d   : > { %3495 = dma.vmem_to_hbm [thread:$0]  (%p3972_p5), %s3063_s27, 256, %s3065_s26, %s3050_s1, %s3834_s28, %s3834_s28, %s3835_s23  }
0x148e PF: > { %p3501_p4 = scmp.ge.s32.totalorder %s3812_s20, 2  ;;  %s3079_s11 = sand.u32 1, %s3800_s0  }
0x148f   : > { %s3080_s21 = scalar_lea.sflag [#allocation5], %s3079_s11 }
0x1490   : > { %p3498_p7 = pnand %p3501_p4, %p3976_p6 }
0x1492   : > { %p3499_p8 = pneg %p3498_p7 }
0x1494   : > { %3795 = dma.done.wait (%p3499_p8), %s3080_s21, 256  }
0x1495   : > { %3797 = vsyncadd (%p3499_p8), %s3080_s21, 4294967040  ;;  %s5143_s20 = sld [smem:[#allocation9_spill]]  ;;  %s5146_s0 = smov %s3804_s19 }
0x1496   : > { %s5144_s30 = sld [smem:[#allocation8_spill]] }
0x1497   : > { %s5145_s1 = sld [smem:[#allocation10_spill]] }
0x149b   : > { %p36_p9 = scmp.ge.s32.totalorder %s5143_s20, 4  }
0x149c   : > { %s5147_s19 = smov %s5144_s30 }
0x149d   :  { %38 = sbr.rel (!%p36_p9) target bundleno = 22 (0x16), region = 137 }
0x14a2   :  { %3086 = vsyncpa [#allocation5], 1 }
0x14a3   :  { %3088 = vsyncpa [#allocation5 + $0x1], 1 }

</bundles_post_ra>
